<compile_context>
chip_gen: v7x
topology: tpu7x:2x2x1
jax: 0.10.0
libtpu: 0.0.40
codegen_flags: <defaults>
</compile_context>

<pallas_src>
import functools
import math

import jax
import jax.numpy as jnp
from jax.experimental import pallas as pl
from jax.experimental.pallas import tpu as pltpu

EXPANSION = 4            # Bottleneck_Baseline.expansion
LAYERS = (1, 1, 1)
PLANES = (64, 128, 256)
STRIDES = (1, 2, 2)
BN_EPS = 1e-5
ACT_DTYPE = jnp.bfloat16            # inter-layer activations / MXU inputs


# ----------------------------------------------------------------------------- helpers
def _round_up(x, m):
    return ((x + m - 1) // m) * m


def _pick_vmem_limit():
    # Generation-aware scoped-VMEM budget: ~3/4 of physical VMEM, capped at 96 MiB.
    # (v5e/v6e: 128 MiB physical -> 96 MiB; v7x: 64 MiB -> 48 MiB.)
    try:
        info = pltpu.get_tpu_info()
        cap = int(getattr(info, "vmem_capacity_bytes", 0) or 0)
        if cap > 0:
            return int(min(cap * 3 // 4, 96 * 1024 * 1024))
    except Exception:
        pass
    return 48 * 1024 * 1024


VMEM_LIMIT = _pick_vmem_limit()


def _cparams(*sem):
    return pltpu.CompilerParams(dimension_semantics=sem, vmem_limit_bytes=VMEM_LIMIT)


def _choose_tm(M):
    # MXU-aligned M tile: a large aligned divisor of M when M is big, otherwise a
    # single full (16-aligned) tile.  Never emits tiny 8/24-row tiles.
    if M >= 512:
        for cand in (512, 448, 384, 320, 256):
            if M % cand == 0:
                return cand
        return 256
    return max(16, _round_up(M, 16))


# ----------------------------------------------------------------------------- kernels
def _mm_bias_kernel(x_ref, w_ref, b_ref, o_ref, *, relu):
    # (tm, K)bf16 @ (K, N)bf16 on the MXU with f32 accumulation, + BN bias (+ReLU).
    y = jnp.dot(x_ref[...], w_ref[...], preferred_element_type=jnp.float32)
    y = y + b_ref[...]
    if relu:
        y = jnp.maximum(y, 0.0)
    o_ref[...] = y.astype(o_ref.dtype)


def _mm_bias_res_relu_kernel(x_ref, w_ref, b_ref, r_ref, o_ref):
    # conv(1x1) + BN bias + residual add + ReLU (bottleneck tail), fused.
    y = jnp.dot(x_ref[...], w_ref[...], preferred_element_type=jnp.float32)
    y = y + b_ref[...] + r_ref[...].astype(jnp.float32)
    o_ref[...] = jnp.maximum(y, 0.0).astype(o_ref.dtype)


def _conv_taps_kernel(x_ref, w_ref, b_ref, o_ref, acc_ref, *, kp, ww, oh, ow, relu):
    # x_ref : (1, L, Cin')  flattened padded (possibly space-to-depth'd) image, bf16.
    #         L = Hw*ww with ww a multiple of 8 so all row offsets i*ww are aligned.
    # w_ref : (kp*kp, Cin', Cout) per-tap weights with BN scale pre-folded, bf16.
    # acc_ref: (oh*ww, Cout) f32 VMEM scratch accumulator.
    # Column shift hoisted: one (possibly unaligned) window slice per j, then only
    # sublane-aligned row slices inside the i loop.
    m2 = oh * ww
    span = (kp - 1) * ww + m2
    for j in range(kp):
        col = x_ref[0, j:j + span, :]                  # one shifted window per column
        for i in range(kp):
            lhs = col[i * ww:i * ww + m2]              # aligned (ww % 8 == 0)
            contrib = jnp.dot(lhs, w_ref[i * kp + j],
                              preferred_element_type=jnp.float32)
            if i == 0 and j == 0:
                acc_ref[...] = contrib
            else:
                acc_ref[...] += contrib
    y = acc_ref[...] + b_ref[...]
    if relu:
        y = jnp.maximum(y, 0.0)
    # Drop the wrap-around junk columns in-kernel (no wrapper-side HBM slice pass).
    y = y.reshape(oh, ww, -1)[:, :ow, :]
    o_ref[0] = y.astype(o_ref.dtype)


def _maxpool_kernel(x_ref, o_ref, *, oh, ow, c):
    # x_ref: (1, Hq, 2, Wq, 2C).  The trailing 2C lanes pack the w-parity:
    #   x_ref[0, r, a, q, :c]   = xpad[2r+a, 2q,   :]
    #   x_ref[0, r, a, q, c:2c] = xpad[2r+a, 2q+1, :]
    # MaxPool2d(3, stride=2, padding=1); zero padding is exact because the input is
    # post-ReLU (non-negative).
    x0 = x_ref[0, :, 0]                                # rows 2r   -> (Hq, Wq, 2C)
    x1 = x_ref[0, :, 1]                                # rows 2r+1
    v = jnp.maximum(jnp.maximum(x0[:oh], x1[:oh]), x0[1:oh + 1])   # vertical 3-max
    m1 = jnp.maximum(v[..., :c], v[..., c:])            # cols 2q, 2q+1
    o_ref[0] = jnp.maximum(m1[:, :ow, :], v[:, 1:ow + 1, :c])       # + col 2q+2


def _avgpool_kernel(x_ref, o_ref):
    # x_ref: (N, H*W, C) -> mean over the spatial axis in f32 (AdaptiveAvgPool2d(1)).
    o_ref[...] = jnp.mean(x_ref[...].astype(jnp.float32), axis=1)


# ----------------------------------------------------------------------------- wrappers
def fused_matmul_bias(x2d, w2d, bias, *, relu, residual=None):
    """y = act((x2d @ w2d) + bias [+ residual]); bf16 inputs, f32 accumulation."""
    M, K = x2d.shape
    Nout = w2d.shape[1]
    tm = _choose_tm(M)
    m_pad = _round_up(M, tm)
    xp = x2d if m_pad == M else jnp.pad(x2d, ((0, m_pad - M), (0, 0)))
    b2 = bias.reshape(1, Nout).astype(jnp.float32)

    in_specs = [
        pl.BlockSpec((tm, K), lambda i: (i, 0)),
        pl.BlockSpec((K, Nout), lambda i: (0, 0)),
        pl.BlockSpec((1, Nout), lambda i: (0, 0)),
    ]
    args = [xp, w2d, b2]
    if residual is not None:
        rp = residual if m_pad == M else jnp.pad(residual, ((0, m_pad - M), (0, 0)))
        in_specs.append(pl.BlockSpec((tm, Nout), lambda i: (i, 0)))
        args.append(rp)
        kernel = _mm_bias_res_relu_kernel
    else:
        kernel = functools.partial(_mm_bias_kernel, relu=relu)

    out = pl.pallas_call(
        kernel,
        out_shape=jax.ShapeDtypeStruct((m_pad, Nout), ACT_DTYPE),
        grid=(m_pad // tm,),
        in_specs=in_specs,
        out_specs=pl.BlockSpec((tm, Nout), lambda i: (i, 0)),
        compiler_params=_cparams("parallel"),
    )(*args)
    return out[:M] if m_pad != M else out


def conv1_7x7_s2(x, w2d, bias):
    """conv1: Conv2d(3, 64, k=7, s=2, p=3, bias=False) + folded BN + ReLU.

    Special-cased as a single im2col matmul (K = 147) so the MXU contraction is deep."""
    N, H, W, Cin = x.shape
    OH = (H + 2 * 3 - 7) // 2 + 1
    OW = (W + 2 * 3 - 7) // 2 + 1
    xp = jnp.pad(x, ((0, 0), (3, 3), (3, 3), (0, 0)))
    cols = [xp[:, di:di + 2 * (OH - 1) + 1:2, dj:dj + 2 * (OW - 1) + 1:2, :]
            for di in range(7) for dj in range(7)]                     # (di, dj, c) order
    patches = jnp.concatenate(cols, axis=-1).reshape(N * OH * OW, 7 * 7 * Cin)
    y = fused_matmul_bias(patches, w2d, bias, relu=True)
    return y.reshape(N, OH, OW, w2d.shape[1])


def conv1x1_bn(x, w2d, bias, *, stride, relu, residual=None):
    """1x1 Conv2d(bias=False) with folded BN (+residual+ReLU).  x: NHWC bf16."""
    N, H, W, Cin = x.shape
    Cout = w2d.shape[1]
    # TODO(synk): fold the stride-2 subsample into the matmul BlockSpec; it only
    # affects the two small downsample convs (layer2.0 / layer3.0).
    xs = x if stride == 1 else x[:, ::stride, ::stride, :]
    OH, OW = xs.shape[1], xs.shape[2]
    cols = xs.reshape(N * OH * OW, Cin)
    res2d = None if residual is None else residual.reshape(N * OH * OW, Cout)
    y = fused_matmul_bias(cols, w2d, bias, relu=relu, residual=res2d)
    return y.reshape(N, OH, OW, Cout)


def conv3x3_taps(x, wt, bias, *, stride, relu):
    """3x3 Conv2d(bias=False, pad=1) + folded BN bias (+ReLU), tap-accumulation form.

    stride 1: pad spatially, flatten rows (width padded to a multiple of 8),
              accumulate 3x3 shifted matmuls in a VMEM f32 scratch.
    stride 2: the padded input is space-to-depth'd (pixel-unshuffle), turning the conv
              into a stride-1 2x2 conv over 4*Cin channels; the reordered weights were
              precomputed in init_params.
    Valid output columns are written in-kernel (no trailing XLA slice)."""
    N, H, W, Cin = x.shape
    T, cinp, Cout = wt.shape
    kp = int(round(math.sqrt(T)))
    if stride == 1:
        OH, OW = H, W
        Ww = _round_up(OW + kp - 1, 8)
        Hw = OH + kp                              # one safety row at the bottom
        xw = jnp.pad(x, ((0, 0), (1, Hw - H - 1), (1, Ww - W - 1), (0, 0)))
    else:  # stride == 2 -> space-to-depth
        OH = (H + 2 - 3) // 2 + 1
        OW = (W + 2 - 3) // 2 + 1
        Ww = _round_up(OW + kp - 1, 8)
        Hw = OH + kp
        xp = jnp.pad(x, ((0, 0), (1, 2 * Hw - H - 1), (1, 2 * Ww - W - 1), (0, 0)))
        xw = xp.reshape(N, Hw, 2, Ww, 2, Cin).transpose(0, 1, 3, 2, 4, 5)
        xw = xw.reshape(N, Hw, Ww, 4 * Cin)

    L = Hw * Ww
    M2 = OH * Ww
    xflat = xw.reshape(N, L, cinp).astype(ACT_DTYPE)
    b2 = bias.reshape(1, Cout).astype(jnp.float32)

    return pl.pallas_call(
        functools.partial(_conv_taps_kernel, kp=kp, ww=Ww, oh=OH, ow=OW, relu=relu),
        out_shape=jax.ShapeDtypeStruct((N, OH, OW, Cout), ACT_DTYPE),
        grid=(N,),
        in_specs=[
            pl.BlockSpec((1, L, cinp), lambda n: (n, 0, 0)),
            pl.BlockSpec((T, cinp, Cout), lambda n: (0, 0, 0)),
            pl.BlockSpec((1, Cout), lambda n: (0, 0)),
        ],
        out_specs=pl.BlockSpec((1, OH, OW, Cout), lambda n: (n, 0, 0, 0)),
        scratch_shapes=[pltpu.VMEM((M2, Cout), jnp.float32)],
        compiler_params=_cparams("parallel"),
    )(xflat, wt, b2)


def maxpool_3x3_s2(x):
    """MaxPool2d(kernel_size=3, stride=2, padding=1), NHWC.

    The input is post-ReLU (>= 0) so zero padding is exact.  One padded tensor is
    passed; w-parity is packed into lanes by a free reshape and h-parity is extracted
    in-kernel — no XLA strided-slice HBM copies."""
    N, H, W, C = x.shape
    OH = (H + 2 - 3) // 2 + 1
    OW = (W + 2 - 3) // 2 + 1
    Hq, Wq = OH + 1, OW + 1
    xp = jnp.pad(x, ((0, 0), (1, 2 * Hq - H - 1), (1, 2 * Wq - W - 1), (0, 0)))
    x5 = xp.reshape(N, Hq, 2, Wq, 2 * C)            # free reshape (no transpose)
    return pl.pallas_call(
        functools.partial(_maxpool_kernel, oh=OH, ow=OW, c=C),
        out_shape=jax.ShapeDtypeStruct((N, OH, OW, C), x.dtype),
        grid=(N,),
        in_specs=[pl.BlockSpec((1, Hq, 2, Wq, 2 * C), lambda n: (n, 0, 0, 0, 0))],
        out_specs=pl.BlockSpec((1, OH, OW, C), lambda n: (n, 0, 0, 0)),
        compiler_params=_cparams("parallel"),
    )(x5)


def adaptive_avgpool_flatten(x):
    """AdaptiveAvgPool2d(1) + view(N, -1), NHWC -> (N, C) in f32; single pallas_call."""
    N, H, W, C = x.shape
    x3 = x.reshape(N, H * W, C)
    return pl.pallas_call(
        _avgpool_kernel,
        out_shape=jax.ShapeDtypeStruct((N, C), jnp.float32),
        grid=(1,),
        in_specs=[pl.BlockSpec((N, H * W, C), lambda i: (0, 0, 0))],
        out_specs=pl.BlockSpec((N, C), lambda i: (0, 0)),
        compiler_params=_cparams("arbitrary"),
    )(x3)


# ----------------------------------------------------------------------------- params
def _conv_w(key, cin, cout, kh, kw):
    # kaiming_normal_(mode='fan_out', nonlinearity='relu'): std = sqrt(2 / (cout*kh*kw))
    std = math.sqrt(2.0 / (cout * kh * kw))
    return jax.random.normal(key, (kh, kw, cin, cout), jnp.float32) * std


def _fold_bn(w_hwio):
    # Inference BN with the module's __init__ state: weight=1, bias=0, mean=0, var=1.
    cout = w_hwio.shape[-1]
    gamma = jnp.ones((cout,), jnp.float32)
    beta = jnp.zeros((cout,), jnp.float32)
    mean = jnp.zeros((cout,), jnp.float32)
    var = jnp.ones((cout,), jnp.float32)
    scale = gamma / jnp.sqrt(var + BN_EPS)
    bias = beta - mean * scale
    return w_hwio * scale[None, None, None, :], bias


def _prep_taps(w_hwio, stride):
    # Tap-format weights, precomputed once (space-to-depth reorder hoisted out of the
    # forward graph for the stride-2 case).
    kh, kw, cin, cout = w_hwio.shape
    if stride == 1:
        return w_hwio.reshape(kh * kw, cin, cout).astype(ACT_DTYPE)
    kp = (kh + 1) // 2
    w6 = jnp.zeros((kp, kp, 2, 2, cin, cout), w_hwio.dtype)
    for a in range(2):
        for b in range(2):
            sub = w_hwio[a::2, b::2]
            w6 = w6.at[:sub.shape[0], :sub.shape[1], a, b].set(sub)
    return w6.reshape(kp * kp, 4 * cin, cout).astype(ACT_DTYPE)


def init_params(key):
    keys = iter(jax.random.split(key, 64))
    w1f, b1f = _fold_bn(_conv_w(next(keys), 3, 64, 7, 7))
    params = {"conv1_w": w1f.reshape(7 * 7 * 3, 64).astype(ACT_DTYPE),   # (di, dj, c) rows
              "conv1_b": b1f,
              "layers": []}
    inplanes = 64
    for planes, nblocks, stride in zip(PLANES, LAYERS, STRIDES):
        blocks = []
        for bi in range(nblocks):
            s = stride if bi == 0 else 1
            wa, ba = _fold_bn(_conv_w(next(keys), inplanes, planes, 1, 1))
            wb, bb = _fold_bn(_conv_w(next(keys), planes, planes, 3, 3))
            wc, bc = _fold_bn(_conv_w(next(keys), planes, planes * EXPANSION, 1, 1))
            blk = {"w1": wa.reshape(inplanes, planes).astype(ACT_DTYPE), "b1": ba,
                   "w2t": _prep_taps(wb, s), "b2": bb,
                   "w3": wc.reshape(planes, planes * EXPANSION).astype(ACT_DTYPE),
                   "b3": bc}
            if bi == 0 and (s != 1 or inplanes != planes * EXPANSION):
                wd, bd = _fold_bn(
                    _conv_w(next(keys), inplanes, planes * EXPANSION, 1, 1))
                blk["wd"] = wd.reshape(inplanes, planes * EXPANSION).astype(ACT_DTYPE)
                blk["bd"] = bd
            if bi == 0:
                inplanes = planes * EXPANSION
            blocks.append(blk)
        params["layers"].append(blocks)
    return params


# ----------------------------------------------------------------------------- forward
def bottleneck_block(x, blk, stride):
    out = conv1x1_bn(x, blk["w1"], blk["b1"], stride=1, relu=True)
    out = conv3x3_taps(out, blk["w2t"], blk["b2"], stride=stride, relu=True)
    if "wd" in blk:
        residual = conv1x1_bn(x, blk["wd"], blk["bd"], stride=stride, relu=False)
    else:
        residual = x
    # conv3(1x1) + BN bias + residual + ReLU fused in one Pallas matmul call.
    return conv1x1_bn(out, blk["w3"], blk["b3"], stride=1, relu=False, residual=residual)


def resnet_baseline_forward(params, x_nchw):
    x = jnp.transpose(x_nchw, (0, 2, 3, 1)).astype(ACT_DTYPE)   # NCHW -> NHWC, bf16
    x = conv1_7x7_s2(x, params["conv1_w"], params["conv1_b"])   # conv1 + bn1 + relu
    x = maxpool_3x3_s2(x)
    for li, blocks in enumerate(params["layers"]):
        for bi, blk in enumerate(blocks):
            s = STRIDES[li] if bi == 0 else 1
            x = bottleneck_block(x, blk, s)
    return adaptive_avgpool_flatten(x)   # == avgpool + view(N, -1)


if __name__ == "__main__":
    key = jax.random.PRNGKey(0)
    kx, kparam = jax.random.split(key)
    x = jax.random.normal(kx, (2, 3, 16, 16), jnp.float32)  # NCHW, like PyTorch
    params = init_params(kparam)
    fwd = jax.jit(resnet_baseline_forward)
    out = jax.block_until_ready(fwd(params, x))
    assert out.shape == (2, 256 * EXPANSION), out.shape      # (2, 1024)
    assert bool(jnp.all(jnp.isfinite(out)))
    print("KERNEL_OK")
</pallas_src>

<mosaic_0001>
module attributes {stable_mosaic.version = 11 : i64} {
  func.func @_mm_bias_kernel(%arg0: i32, %arg1: memref<128x147xbf16, #tpu.memory_space<vmem>>, %arg2: memref<147x64xbf16, #tpu.memory_space<vmem>>, %arg3: memref<1x64xf32, #tpu.memory_space<vmem>>, %arg4: memref<128x64xbf16, #tpu.memory_space<vmem>>) attributes {dimension_semantics = [#tpu.dimension_semantics<parallel>], iteration_bounds = array<i64: 1>, scalar_prefetch = 0 : i64, scratch_operands = 0 : i64, tpu.core_type = #tpu.core_type<tc>, window_params = [{transform_indices = @transform_0, window_bounds = array<i64: 128, 147>}, {pipeline_mode = #tpu.pipeline_mode<synchronous>, transform_indices = @transform_1, window_bounds = array<i64: 147, 64>}, {pipeline_mode = #tpu.pipeline_mode<synchronous>, transform_indices = @transform_2, window_bounds = array<i64: 1, 64>}, {transform_indices = @transform_3, window_bounds = array<i64: 128, 64>}]} {
    %c0 = arith.constant 0 : index
    %c0_0 = arith.constant 0 : index
    %0 = vector.load %arg1[%c0, %c0_0] : memref<128x147xbf16, #tpu.memory_space<vmem>>, vector<128x147xbf16>
    %c0_1 = arith.constant 0 : index
    %c0_2 = arith.constant 0 : index
    %1 = vector.load %arg2[%c0_1, %c0_2] : memref<147x64xbf16, #tpu.memory_space<vmem>>, vector<147x64xbf16>
    %cst = arith.constant dense<0.000000e+00> : vector<128x64xf32>
    %2 = tpu.matmul %0, %1, %cst {dimension_numbers = #tpu.dot_dimension_numbers<[1], [0], [0], [1], [0, 0, 1, 1], [], []>} : vector<128x147xbf16>, vector<147x64xbf16>, vector<128x64xf32> -> vector<128x64xf32>
    %c0_3 = arith.constant 0 : index
    %c0_4 = arith.constant 0 : index
    %3 = vector.load %arg3[%c0_3, %c0_4] : memref<1x64xf32, #tpu.memory_space<vmem>>, vector<1x64xf32>
    %4 = vector.broadcast %3 : vector<1x64xf32> to vector<128x64xf32>
    %5 = arith.addf %2, %4 : vector<128x64xf32>
    %cst_5 = arith.constant 0.000000e+00 : f32
    %6 = vector.broadcast %cst_5 : f32 to vector<128x64xf32>
    %7 = arith.maximumf %5, %6 : vector<128x64xf32>
    %8 = arith.truncf %7 : vector<128x64xf32> to vector<128x64xbf16>
    %c0_6 = arith.constant 0 : index
    %c0_7 = arith.constant 0 : index
    %9 = vector.load %arg4[%c0_6, %c0_7] : memref<128x64xbf16, #tpu.memory_space<vmem>>, vector<128x64xbf16>
    tpu.vector_store %arg4[%c0_6, %c0_7], %8 {strides = array<i32>} : memref<128x64xbf16, #tpu.memory_space<vmem>>, vector<128x64xbf16>,
    return
  }
  func.func @transform_0(%arg0: i32) -> (i32, i32) {
    %c0_i32 = arith.constant 0 : i32
    %c0_i32_0 = arith.constant 0 : i32
    return %arg0, %c0_i32 : i32, i32
  }
  func.func @transform_1(%arg0: i32) -> (i32, i32) {
    %c0_i32 = arith.constant 0 : i32
    %c0_i32_0 = arith.constant 0 : i32
    %c0_i32_1 = arith.constant 0 : i32
    return %c0_i32, %c0_i32_0 : i32, i32
  }
  func.func @transform_2(%arg0: i32) -> (i32, i32) {
    %c0_i32 = arith.constant 0 : i32
    %c0_i32_0 = arith.constant 0 : i32
    %c0_i32_1 = arith.constant 0 : i32
    return %c0_i32, %c0_i32_0 : i32, i32
  }
  func.func @transform_3(%arg0: i32) -> (i32, i32) {
    %c0_i32 = arith.constant 0 : i32
    %c0_i32_0 = arith.constant 0 : i32
    return %arg0, %c0_i32 : i32, i32
  }
}

module attributes {stable_mosaic.version = 11 : i64} {
  func.func @_maxpool_kernel(%arg0: i32, %arg1: memref<1x5x2x5x128xbf16, #tpu.memory_space<vmem>>, %arg2: memref<1x4x4x64xbf16, #tpu.memory_space<vmem>>) attributes {dimension_semantics = [#tpu.dimension_semantics<parallel>], iteration_bounds = array<i64: 2>, scalar_prefetch = 0 : i64, scratch_operands = 0 : i64, tpu.core_type = #tpu.core_type<tc>, window_params = [{transform_indices = @transform_0, window_bounds = array<i64: 1, 5, 2, 5, 128>}, {transform_indices = @transform_1, window_bounds = array<i64: 1, 4, 4, 64>}]} {
    %c0 = arith.constant 0 : index
    %c0_0 = arith.constant 0 : index
    %c0_1 = arith.constant 0 : index
    %c0_2 = arith.constant 0 : index
    %c0_3 = arith.constant 0 : index
    %0 = vector.load %arg1[%c0, %c0_0, %c0_1, %c0_2, %c0_3] : memref<1x5x2x5x128xbf16, #tpu.memory_space<vmem>>, vector<1x5x1x5x128xbf16>
    %1 = vector.shape_cast %0 : vector<1x5x1x5x128xbf16> to vector<5x5x128xbf16>
    %c0_4 = arith.constant 0 : index
    %c0_5 = arith.constant 0 : index
    %c1 = arith.constant 1 : index
    %c0_6 = arith.constant 0 : index
    %c0_7 = arith.constant 0 : index
    %2 = vector.load %arg1[%c0_4, %c0_5, %c1, %c0_6, %c0_7] : memref<1x5x2x5x128xbf16, #tpu.memory_space<vmem>>, vector<1x5x1x5x128xbf16>
    %3 = vector.shape_cast %2 : vector<1x5x1x5x128xbf16> to vector<5x5x128xbf16>
    %4 = vector.extract_strided_slice %1 {offsets = [0, 0, 0], sizes = [4, 5, 128], strides = [1, 1, 1]} : vector<5x5x128xbf16> to vector<4x5x128xbf16>
    %5 = vector.extract_strided_slice %3 {offsets = [0, 0, 0], sizes = [4, 5, 128], strides = [1, 1, 1]} : vector<5x5x128xbf16> to vector<4x5x128xbf16>
    %6 = arith.maximumf %4, %5 : vector<4x5x128xbf16>
    %7 = vector.extract_strided_slice %1 {offsets = [1, 0, 0], sizes = [4, 5, 128], strides = [1, 1, 1]} : vector<5x5x128xbf16> to vector<4x5x128xbf16>
    %8 = arith.maximumf %6, %7 : vector<4x5x128xbf16>
    %9 = vector.extract_strided_slice %8 {offsets = [0, 0, 0], sizes = [4, 5, 64], strides = [1, 1, 1]} : vector<4x5x128xbf16> to vector<4x5x64xbf16>
    %10 = vector.extract_strided_slice %8 {offsets = [0, 0, 64], sizes = [4, 5, 64], strides = [1, 1, 1]} : vector<4x5x128xbf16> to vector<4x5x64xbf16>
    %11 = arith.maximumf %9, %10 : vector<4x5x64xbf16>
    %12 = vector.extract_strided_slice %11 {offsets = [0, 0, 0], sizes = [4, 4, 64], strides = [1, 1, 1]} : vector<4x5x64xbf16> to vector<4x4x64xbf16>
    %13 = vector.extract_strided_slice %8 {offsets = [0, 1, 0], sizes = [4, 4, 64], strides = [1, 1, 1]} : vector<4x5x128xbf16> to vector<4x4x64xbf16>
    %14 = arith.maximumf %12, %13 : vector<4x4x64xbf16>
    %c0_8 = arith.constant 0 : index
    %c0_9 = arith.constant 0 : index
    %c0_10 = arith.constant 0 : index
    %c0_11 = arith.constant 0 : index
    %15 = vector.load %arg2[%c0_8, %c0_9, %c0_10, %c0_11] : memref<1x4x4x64xbf16, #tpu.memory_space<vmem>>, vector<1x4x4x64xbf16>
    %16 = vector.shape_cast %15 : vector<1x4x4x64xbf16> to vector<4x4x64xbf16>
    %17 = vector.shape_cast %14 : vector<4x4x64xbf16> to vector<1x4x4x64xbf16>
    tpu.vector_store %arg2[%c0_8, %c0_9, %c0_10, %c0_11], %17 {strides = array<i32>} : memref<1x4x4x64xbf16, #tpu.memory_space<vmem>>, vector<1x4x4x64xbf16>,
    return
  }
  func.func @transform_0(%arg0: i32) -> (i32, i32, i32, i32, i32) {
    %c0_i32 = arith.constant 0 : i32
    %c0_i32_0 = arith.constant 0 : i32
    %c0_i32_1 = arith.constant 0 : i32
    %c0_i32_2 = arith.constant 0 : i32
    %c0_i32_3 = arith.constant 0 : i32
    return %arg0, %c0_i32, %c0_i32_0, %c0_i32_1, %c0_i32_2 : i32, i32, i32, i32, i32
  }
  func.func @transform_1(%arg0: i32) -> (i32, i32, i32, i32) {
    %c0_i32 = arith.constant 0 : i32
    %c0_i32_0 = arith.constant 0 : i32
    %c0_i32_1 = arith.constant 0 : i32
    %c0_i32_2 = arith.constant 0 : i32
    return %arg0, %c0_i32, %c0_i32_0, %c0_i32_1 : i32, i32, i32, i32
  }
}

module attributes {stable_mosaic.version = 11 : i64} {
  func.func @_mm_bias_kernel(%arg0: i32, %arg1: memref<32x64xbf16, #tpu.memory_space<vmem>>, %arg2: memref<64x64xbf16, #tpu.memory_space<vmem>>, %arg3: memref<1x64xf32, #tpu.memory_space<vmem>>, %arg4: memref<32x64xbf16, #tpu.memory_space<vmem>>) attributes {dimension_semantics = [#tpu.dimension_semantics<parallel>], iteration_bounds = array<i64: 1>, scalar_prefetch = 0 : i64, scratch_operands = 0 : i64, tpu.core_type = #tpu.core_type<tc>, window_params = [{transform_indices = @transform_0, window_bounds = array<i64: 32, 64>}, {pipeline_mode = #tpu.pipeline_mode<synchronous>, transform_indices = @transform_1, window_bounds = array<i64: 64, 64>}, {pipeline_mode = #tpu.pipeline_mode<synchronous>, transform_indices = @transform_2, window_bounds = array<i64: 1, 64>}, {transform_indices = @transform_3, window_bounds = array<i64: 32, 64>}]} {
    %c0 = arith.constant 0 : index
    %c0_0 = arith.constant 0 : index
    %0 = vector.load %arg1[%c0, %c0_0] : memref<32x64xbf16, #tpu.memory_space<vmem>>, vector<32x64xbf16>
    %c0_1 = arith.constant 0 : index
    %c0_2 = arith.constant 0 : index
    %1 = vector.load %arg2[%c0_1, %c0_2] : memref<64x64xbf16, #tpu.memory_space<vmem>>, vector<64x64xbf16>
    %cst = arith.constant dense<0.000000e+00> : vector<32x64xf32>
    %2 = tpu.matmul %0, %1, %cst {dimension_numbers = #tpu.dot_dimension_numbers<[1], [0], [0], [1], [0, 0, 1, 1], [], []>} : vector<32x64xbf16>, vector<64x64xbf16>, vector<32x64xf32> -> vector<32x64xf32>
    %c0_3 = arith.constant 0 : index
    %c0_4 = arith.constant 0 : index
    %3 = vector.load %arg3[%c0_3, %c0_4] : memref<1x64xf32, #tpu.memory_space<vmem>>, vector<1x64xf32>
    %4 = vector.broadcast %3 : vector<1x64xf32> to vector<32x64xf32>
    %5 = arith.addf %2, %4 : vector<32x64xf32>
    %cst_5 = arith.constant 0.000000e+00 : f32
    %6 = vector.broadcast %cst_5 : f32 to vector<32x64xf32>
    %7 = arith.maximumf %5, %6 : vector<32x64xf32>
    %8 = arith.truncf %7 : vector<32x64xf32> to vector<32x64xbf16>
    %c0_6 = arith.constant 0 : index
    %c0_7 = arith.constant 0 : index
    %9 = vector.load %arg4[%c0_6, %c0_7] : memref<32x64xbf16, #tpu.memory_space<vmem>>, vector<32x64xbf16>
    tpu.vector_store %arg4[%c0_6, %c0_7], %8 {strides = array<i32>} : memref<32x64xbf16, #tpu.memory_space<vmem>>, vector<32x64xbf16>,
    return
  }
  func.func @transform_0(%arg0: i32) -> (i32, i32) {
    %c0_i32 = arith.constant 0 : i32
    %c0_i32_0 = arith.constant 0 : i32
    return %arg0, %c0_i32 : i32, i32
  }
  func.func @transform_1(%arg0: i32) -> (i32, i32) {
    %c0_i32 = arith.constant 0 : i32
    %c0_i32_0 = arith.constant 0 : i32
    %c0_i32_1 = arith.constant 0 : i32
    return %c0_i32, %c0_i32_0 : i32, i32
  }
  func.func @transform_2(%arg0: i32) -> (i32, i32) {
    %c0_i32 = arith.constant 0 : i32
    %c0_i32_0 = arith.constant 0 : i32
    %c0_i32_1 = arith.constant 0 : i32
    return %c0_i32, %c0_i32_0 : i32, i32
  }
  func.func @transform_3(%arg0: i32) -> (i32, i32) {
    %c0_i32 = arith.constant 0 : i32
    %c0_i32_0 = arith.constant 0 : i32
    return %arg0, %c0_i32 : i32, i32
  }
}

module attributes {stable_mosaic.version = 11 : i64} {
  func.func @_mm_bias_kernel(%arg0: i32, %arg1: memref<32x64xbf16, #tpu.memory_space<vmem>>, %arg2: memref<64x256xbf16, #tpu.memory_space<vmem>>, %arg3: memref<1x256xf32, #tpu.memory_space<vmem>>, %arg4: memref<32x256xbf16, #tpu.memory_space<vmem>>) attributes {dimension_semantics = [#tpu.dimension_semantics<parallel>], iteration_bounds = array<i64: 1>, scalar_prefetch = 0 : i64, scratch_operands = 0 : i64, tpu.core_type = #tpu.core_type<tc>, window_params = [{transform_indices = @transform_0, window_bounds = array<i64: 32, 64>}, {pipeline_mode = #tpu.pipeline_mode<synchronous>, transform_indices = @transform_1, window_bounds = array<i64: 64, 256>}, {pipeline_mode = #tpu.pipeline_mode<synchronous>, transform_indices = @transform_2, window_bounds = array<i64: 1, 256>}, {transform_indices = @transform_3, window_bounds = array<i64: 32, 256>}]} {
    %c0 = arith.constant 0 : index
    %c0_0 = arith.constant 0 : index
    %0 = vector.load %arg1[%c0, %c0_0] : memref<32x64xbf16, #tpu.memory_space<vmem>>, vector<32x64xbf16>
    %c0_1 = arith.constant 0 : index
    %c0_2 = arith.constant 0 : index
    %1 = vector.load %arg2[%c0_1, %c0_2] : memref<64x256xbf16, #tpu.memory_space<vmem>>, vector<64x256xbf16>
    %cst = arith.constant dense<0.000000e+00> : vector<32x256xf32>
    %2 = tpu.matmul %0, %1, %cst {dimension_numbers = #tpu.dot_dimension_numbers<[1], [0], [0], [1], [0, 0, 1, 1], [], []>} : vector<32x64xbf16>, vector<64x256xbf16>, vector<32x256xf32> -> vector<32x256xf32>
    %c0_3 = arith.constant 0 : index
    %c0_4 = arith.constant 0 : index
    %3 = vector.load %arg3[%c0_3, %c0_4] : memref<1x256xf32, #tpu.memory_space<vmem>>, vector<1x256xf32>
    %4 = vector.broadcast %3 : vector<1x256xf32> to vector<32x256xf32>
    %5 = arith.addf %2, %4 : vector<32x256xf32>
    %6 = arith.truncf %5 : vector<32x256xf32> to vector<32x256xbf16>
    %c0_5 = arith.constant 0 : index
    %c0_6 = arith.constant 0 : index
    %7 = vector.load %arg4[%c0_5, %c0_6] : memref<32x256xbf16, #tpu.memory_space<vmem>>, vector<32x256xbf16>
    tpu.vector_store %arg4[%c0_5, %c0_6], %6 {strides = array<i32>} : memref<32x256xbf16, #tpu.memory_space<vmem>>, vector<32x256xbf16>,
    return
  }
  func.func @transform_0(%arg0: i32) -> (i32, i32) {
    %c0_i32 = arith.constant 0 : i32
    %c0_i32_0 = arith.constant 0 : i32
    return %arg0, %c0_i32 : i32, i32
  }
  func.func @transform_1(%arg0: i32) -> (i32, i32) {
    %c0_i32 = arith.constant 0 : i32
    %c0_i32_0 = arith.constant 0 : i32
    %c0_i32_1 = arith.constant 0 : i32
    return %c0_i32, %c0_i32_0 : i32, i32
  }
  func.func @transform_2(%arg0: i32) -> (i32, i32) {
    %c0_i32 = arith.constant 0 : i32
    %c0_i32_0 = arith.constant 0 : i32
    %c0_i32_1 = arith.constant 0 : i32
    return %c0_i32, %c0_i32_0 : i32, i32
  }
  func.func @transform_3(%arg0: i32) -> (i32, i32) {
    %c0_i32 = arith.constant 0 : i32
    %c0_i32_0 = arith.constant 0 : i32
    return %arg0, %c0_i32 : i32, i32
  }
}

module attributes {stable_mosaic.version = 11 : i64} {
  func.func @_mm_bias_kernel(%arg0: i32, %arg1: memref<32x256xbf16, #tpu.memory_space<vmem>>, %arg2: memref<256x128xbf16, #tpu.memory_space<vmem>>, %arg3: memref<1x128xf32, #tpu.memory_space<vmem>>, %arg4: memref<32x128xbf16, #tpu.memory_space<vmem>>) attributes {dimension_semantics = [#tpu.dimension_semantics<parallel>], iteration_bounds = array<i64: 1>, scalar_prefetch = 0 : i64, scratch_operands = 0 : i64, tpu.core_type = #tpu.core_type<tc>, window_params = [{transform_indices = @transform_0, window_bounds = array<i64: 32, 256>}, {pipeline_mode = #tpu.pipeline_mode<synchronous>, transform_indices = @transform_1, window_bounds = array<i64: 256, 128>}, {pipeline_mode = #tpu.pipeline_mode<synchronous>, transform_indices = @transform_2, window_bounds = array<i64: 1, 128>}, {transform_indices = @transform_3, window_bounds = array<i64: 32, 128>}]} {
    %c0 = arith.constant 0 : index
    %c0_0 = arith.constant 0 : index
    %0 = vector.load %arg1[%c0, %c0_0] : memref<32x256xbf16, #tpu.memory_space<vmem>>, vector<32x256xbf16>
    %c0_1 = arith.constant 0 : index
    %c0_2 = arith.constant 0 : index
    %1 = vector.load %arg2[%c0_1, %c0_2] : memref<256x128xbf16, #tpu.memory_space<vmem>>, vector<256x128xbf16>
    %cst = arith.constant dense<0.000000e+00> : vector<32x128xf32>
    %2 = tpu.matmul %0, %1, %cst {dimension_numbers = #tpu.dot_dimension_numbers<[1], [0], [0], [1], [0, 0, 1, 1], [], []>} : vector<32x256xbf16>, vector<256x128xbf16>, vector<32x128xf32> -> vector<32x128xf32>
    %c0_3 = arith.constant 0 : index
    %c0_4 = arith.constant 0 : index
    %3 = vector.load %arg3[%c0_3, %c0_4] : memref<1x128xf32, #tpu.memory_space<vmem>>, vector<1x128xf32>
    %4 = vector.broadcast %3 : vector<1x128xf32> to vector<32x128xf32>
    %5 = arith.addf %2, %4 : vector<32x128xf32>
    %cst_5 = arith.constant 0.000000e+00 : f32
    %6 = vector.broadcast %cst_5 : f32 to vector<32x128xf32>
    %7 = arith.maximumf %5, %6 : vector<32x128xf32>
    %8 = arith.truncf %7 : vector<32x128xf32> to vector<32x128xbf16>
    %c0_6 = arith.constant 0 : index
    %c0_7 = arith.constant 0 : index
    %9 = vector.load %arg4[%c0_6, %c0_7] : memref<32x128xbf16, #tpu.memory_space<vmem>>, vector<32x128xbf16>
    tpu.vector_store %arg4[%c0_6, %c0_7], %8 {strides = array<i32>} : memref<32x128xbf16, #tpu.memory_space<vmem>>, vector<32x128xbf16>,
    return
  }
  func.func @transform_0(%arg0: i32) -> (i32, i32) {
    %c0_i32 = arith.constant 0 : i32
    %c0_i32_0 = arith.constant 0 : i32
    return %arg0, %c0_i32 : i32, i32
  }
  func.func @transform_1(%arg0: i32) -> (i32, i32) {
    %c0_i32 = arith.constant 0 : i32
    %c0_i32_0 = arith.constant 0 : i32
    %c0_i32_1 = arith.constant 0 : i32
    return %c0_i32, %c0_i32_0 : i32, i32
  }
  func.func @transform_2(%arg0: i32) -> (i32, i32) {
    %c0_i32 = arith.constant 0 : i32
    %c0_i32_0 = arith.constant 0 : i32
    %c0_i32_1 = arith.constant 0 : i32
    return %c0_i32, %c0_i32_0 : i32, i32
  }
  func.func @transform_3(%arg0: i32) -> (i32, i32) {
    %c0_i32 = arith.constant 0 : i32
    %c0_i32_0 = arith.constant 0 : i32
    return %arg0, %c0_i32 : i32, i32
  }
}

module attributes {stable_mosaic.version = 11 : i64} {
  func.func @_mm_bias_res_relu_kernel(%arg0: i32, %arg1: memref<32x64xbf16, #tpu.memory_space<vmem>>, %arg2: memref<64x256xbf16, #tpu.memory_space<vmem>>, %arg3: memref<1x256xf32, #tpu.memory_space<vmem>>, %arg4: memref<32x256xbf16, #tpu.memory_space<vmem>>, %arg5: memref<32x256xbf16, #tpu.memory_space<vmem>>) attributes {dimension_semantics = [#tpu.dimension_semantics<parallel>], iteration_bounds = array<i64: 1>, scalar_prefetch = 0 : i64, scratch_operands = 0 : i64, tpu.core_type = #tpu.core_type<tc>, window_params = [{transform_indices = @transform_0, window_bounds = array<i64: 32, 64>}, {pipeline_mode = #tpu.pipeline_mode<synchronous>, transform_indices = @transform_1, window_bounds = array<i64: 64, 256>}, {pipeline_mode = #tpu.pipeline_mode<synchronous>, transform_indices = @transform_2, window_bounds = array<i64: 1, 256>}, {transform_indices = @transform_3, window_bounds = array<i64: 32, 256>}, {transform_indices = @transform_4, window_bounds = array<i64: 32, 256>}]} {
    %c0 = arith.constant 0 : index
    %c0_0 = arith.constant 0 : index
    %0 = vector.load %arg1[%c0, %c0_0] : memref<32x64xbf16, #tpu.memory_space<vmem>>, vector<32x64xbf16>
    %c0_1 = arith.constant 0 : index
    %c0_2 = arith.constant 0 : index
    %1 = vector.load %arg2[%c0_1, %c0_2] : memref<64x256xbf16, #tpu.memory_space<vmem>>, vector<64x256xbf16>
    %cst = arith.constant dense<0.000000e+00> : vector<32x256xf32>
    %2 = tpu.matmul %0, %1, %cst {dimension_numbers = #tpu.dot_dimension_numbers<[1], [0], [0], [1], [0, 0, 1, 1], [], []>} : vector<32x64xbf16>, vector<64x256xbf16>, vector<32x256xf32> -> vector<32x256xf32>
    %c0_3 = arith.constant 0 : index
    %c0_4 = arith.constant 0 : index
    %3 = vector.load %arg3[%c0_3, %c0_4] : memref<1x256xf32, #tpu.memory_space<vmem>>, vector<1x256xf32>
    %4 = vector.broadcast %3 : vector<1x256xf32> to vector<32x256xf32>
    %5 = arith.addf %2, %4 : vector<32x256xf32>
    %c0_5 = arith.constant 0 : index
    %c0_6 = arith.constant 0 : index
    %6 = vector.load %arg4[%c0_5, %c0_6] : memref<32x256xbf16, #tpu.memory_space<vmem>>, vector<32x256xbf16>
    %7 = arith.extf %6 : vector<32x256xbf16> to vector<32x256xf32>
    %8 = arith.addf %5, %7 : vector<32x256xf32>
    %cst_7 = arith.constant 0.000000e+00 : f32
    %9 = vector.broadcast %cst_7 : f32 to vector<32x256xf32>
    %10 = arith.maximumf %8, %9 : vector<32x256xf32>
    %11 = arith.truncf %10 : vector<32x256xf32> to vector<32x256xbf16>
    %c0_8 = arith.constant 0 : index
    %c0_9 = arith.constant 0 : index
    %12 = vector.load %arg5[%c0_8, %c0_9] : memref<32x256xbf16, #tpu.memory_space<vmem>>, vector<32x256xbf16>
    tpu.vector_store %arg5[%c0_8, %c0_9], %11 {strides = array<i32>} : memref<32x256xbf16, #tpu.memory_space<vmem>>, vector<32x256xbf16>,
    return
  }
  func.func @transform_0(%arg0: i32) -> (i32, i32) {
    %c0_i32 = arith.constant 0 : i32
    %c0_i32_0 = arith.constant 0 : i32
    return %arg0, %c0_i32 : i32, i32
  }
  func.func @transform_1(%arg0: i32) -> (i32, i32) {
    %c0_i32 = arith.constant 0 : i32
    %c0_i32_0 = arith.constant 0 : i32
    %c0_i32_1 = arith.constant 0 : i32
    return %c0_i32, %c0_i32_0 : i32, i32
  }
  func.func @transform_2(%arg0: i32) -> (i32, i32) {
    %c0_i32 = arith.constant 0 : i32
    %c0_i32_0 = arith.constant 0 : i32
    %c0_i32_1 = arith.constant 0 : i32
    return %c0_i32, %c0_i32_0 : i32, i32
  }
  func.func @transform_3(%arg0: i32) -> (i32, i32) {
    %c0_i32 = arith.constant 0 : i32
    %c0_i32_0 = arith.constant 0 : i32
    return %arg0, %c0_i32 : i32, i32
  }
  func.func @transform_4(%arg0: i32) -> (i32, i32) {
    %c0_i32 = arith.constant 0 : i32
    %c0_i32_0 = arith.constant 0 : i32
    return %arg0, %c0_i32 : i32, i32
  }
}

module attributes {stable_mosaic.version = 11 : i64} {
  func.func @_conv_taps_kernel(%arg0: i32, %arg1: memref<1x56x64xbf16, #tpu.memory_space<vmem>>, %arg2: memref<9x64x64xbf16, #tpu.memory_space<vmem>>, %arg3: memref<1x64xf32, #tpu.memory_space<vmem>>, %arg4: memref<1x4x4x64xbf16, #tpu.memory_space<vmem>>, %arg5: memref<32x64xf32, #tpu.memory_space<vmem>>) attributes {dimension_semantics = [#tpu.dimension_semantics<parallel>], iteration_bounds = array<i64: 2>, scalar_prefetch = 0 : i64, scratch_operands = 1 : i64, tpu.core_type = #tpu.core_type<tc>, window_params = [{transform_indices = @transform_0, window_bounds = array<i64: 1, 56, 64>}, {pipeline_mode = #tpu.pipeline_mode<synchronous>, transform_indices = @transform_1, window_bounds = array<i64: 9, 64, 64>}, {pipeline_mode = #tpu.pipeline_mode<synchronous>, transform_indices = @transform_2, window_bounds = array<i64: 1, 64>}, {transform_indices = @transform_3, window_bounds = array<i64: 1, 4, 4, 64>}]} {
    %c0 = arith.constant 0 : index
    %c0_0 = arith.constant 0 : index
    %c0_1 = arith.constant 0 : index
    %0 = vector.load %arg1[%c0, %c0_0, %c0_1] : memref<1x56x64xbf16, #tpu.memory_space<vmem>>, vector<1x48x64xbf16>
    %1 = vector.shape_cast %0 : vector<1x48x64xbf16> to vector<48x64xbf16>
    %2 = vector.extract_strided_slice %1 {offsets = [0, 0], sizes = [32, 64], strides = [1, 1]} : vector<48x64xbf16> to vector<32x64xbf16>
    %c0_2 = arith.constant 0 : index
    %c0_3 = arith.constant 0 : index
    %c0_4 = arith.constant 0 : index
    %3 = vector.load %arg2[%c0_2, %c0_3, %c0_4] : memref<9x64x64xbf16, #tpu.memory_space<vmem>>, vector<1x64x64xbf16>
    %4 = vector.shape_cast %3 : vector<1x64x64xbf16> to vector<64x64xbf16>
    %cst = arith.constant dense<0.000000e+00> : vector<32x64xf32>
    %5 = tpu.matmul %2, %4, %cst {dimension_numbers = #tpu.dot_dimension_numbers<[1], [0], [0], [1], [0, 0, 1, 1], [], []>} : vector<32x64xbf16>, vector<64x64xbf16>, vector<32x64xf32> -> vector<32x64xf32>
    %c0_5 = arith.constant 0 : index
    %c0_6 = arith.constant 0 : index
    %6 = vector.load %arg5[%c0_5, %c0_6] : memref<32x64xf32, #tpu.memory_space<vmem>>, vector<32x64xf32>
    tpu.vector_store %arg5[%c0_5, %c0_6], %5 {strides = array<i32>} : memref<32x64xf32, #tpu.memory_space<vmem>>, vector<32x64xf32>,
    %7 = vector.extract_strided_slice %1 {offsets = [8, 0], sizes = [32, 64], strides = [1, 1]} : vector<48x64xbf16> to vector<32x64xbf16>
    %c3 = arith.constant 3 : index
    %c0_7 = arith.constant 0 : index
    %c0_8 = arith.constant 0 : index
    %8 = vector.load %arg2[%c3, %c0_7, %c0_8] : memref<9x64x64xbf16, #tpu.memory_space<vmem>>, vector<1x64x64xbf16>
    %9 = vector.shape_cast %8 : vector<1x64x64xbf16> to vector<64x64xbf16>
    %cst_9 = arith.constant dense<0.000000e+00> : vector<32x64xf32>
    %10 = tpu.matmul %7, %9, %cst_9 {dimension_numbers = #tpu.dot_dimension_numbers<[1], [0], [0], [1], [0, 0, 1, 1], [], []>} : vector<32x64xbf16>, vector<64x64xbf16>, vector<32x64xf32> -> vector<32x64xf32>
    %c0_10 = arith.constant 0 : index
    %c0_11 = arith.constant 0 : index
    %11 = vector.load %arg5[%c0_10, %c0_11] : memref<32x64xf32, #tpu.memory_space<vmem>>, vector<32x64xf32>
    %12 = arith.addf %11, %10 : vector<32x64xf32>
    %c0_12 = arith.constant 0 : index
    %c0_13 = arith.constant 0 : index
    %13 = vector.load %arg5[%c0_12, %c0_13] : memref<32x64xf32, #tpu.memory_space<vmem>>, vector<32x64xf32>
    tpu.vector_store %arg5[%c0_12, %c0_13], %12 {strides = array<i32>} : memref<32x64xf32, #tpu.memory_space<vmem>>, vector<32x64xf32>,
    %14 = vector.extract_strided_slice %1 {offsets = [16, 0], sizes = [32, 64], strides = [1, 1]} : vector<48x64xbf16> to vector<32x64xbf16>
    %c6 = arith.constant 6 : index
    %c0_14 = arith.constant 0 : index
    %c0_15 = arith.constant 0 : index
    %15 = vector.load %arg2[%c6, %c0_14, %c0_15] : memref<9x64x64xbf16, #tpu.memory_space<vmem>>, vector<1x64x64xbf16>
    %16 = vector.shape_cast %15 : vector<1x64x64xbf16> to vector<64x64xbf16>
    %cst_16 = arith.constant dense<0.000000e+00> : vector<32x64xf32>
    %17 = tpu.matmul %14, %16, %cst_16 {dimension_numbers = #tpu.dot_dimension_numbers<[1], [0], [0], [1], [0, 0, 1, 1], [], []>} : vector<32x64xbf16>, vector<64x64xbf16>, vector<32x64xf32> -> vector<32x64xf32>
    %c0_17 = arith.constant 0 : index
    %c0_18 = arith.constant 0 : index
    %18 = vector.load %arg5[%c0_17, %c0_18] : memref<32x64xf32, #tpu.memory_space<vmem>>, vector<32x64xf32>
    %19 = arith.addf %18, %17 : vector<32x64xf32>
    %c0_19 = arith.constant 0 : index
    %c0_20 = arith.constant 0 : index
    %20 = vector.load %arg5[%c0_19, %c0_20] : memref<32x64xf32, #tpu.memory_space<vmem>>, vector<32x64xf32>
    tpu.vector_store %arg5[%c0_19, %c0_20], %19 {strides = array<i32>} : memref<32x64xf32, #tpu.memory_space<vmem>>, vector<32x64xf32>,
    %c0_21 = arith.constant 0 : index
    %c1 = arith.constant 1 : index
    %c0_22 = arith.constant 0 : index
    %21 = vector.load %arg1[%c0_21, %c1, %c0_22] : memref<1x56x64xbf16, #tpu.memory_space<vmem>>, vector<1x48x64xbf16>
    %22 = vector.shape_cast %21 : vector<1x48x64xbf16> to vector<48x64xbf16>
    %23 = vector.extract_strided_slice %22 {offsets = [0, 0], sizes = [32, 64], strides = [1, 1]} : vector<48x64xbf16> to vector<32x64xbf16>
    %c1_23 = arith.constant 1 : index
    %c0_24 = arith.constant 0 : index
    %c0_25 = arith.constant 0 : index
    %24 = vector.load %arg2[%c1_23, %c0_24, %c0_25] : memref<9x64x64xbf16, #tpu.memory_space<vmem>>, vector<1x64x64xbf16>
    %25 = vector.shape_cast %24 : vector<1x64x64xbf16> to vector<64x64xbf16>
    %cst_26 = arith.constant dense<0.000000e+00> : vector<32x64xf32>
    %26 = tpu.matmul %23, %25, %cst_26 {dimension_numbers = #tpu.dot_dimension_numbers<[1], [0], [0], [1], [0, 0, 1, 1], [], []>} : vector<32x64xbf16>, vector<64x64xbf16>, vector<32x64xf32> -> vector<32x64xf32>
    %c0_27 = arith.constant 0 : index
    %c0_28 = arith.constant 0 : index
    %27 = vector.load %arg5[%c0_27, %c0_28] : memref<32x64xf32, #tpu.memory_space<vmem>>, vector<32x64xf32>
    %28 = arith.addf %27, %26 : vector<32x64xf32>
    %c0_29 = arith.constant 0 : index
    %c0_30 = arith.constant 0 : index
    %29 = vector.load %arg5[%c0_29, %c0_30] : memref<32x64xf32, #tpu.memory_space<vmem>>, vector<32x64xf32>
    tpu.vector_store %arg5[%c0_29, %c0_30], %28 {strides = array<i32>} : memref<32x64xf32, #tpu.memory_space<vmem>>, vector<32x64xf32>,
    %30 = vector.extract_strided_slice %22 {offsets = [8, 0], sizes = [32, 64], strides = [1, 1]} : vector<48x64xbf16> to vector<32x64xbf16>
    %c4 = arith.constant 4 : index
    %c0_31 = arith.constant 0 : index
    %c0_32 = arith.constant 0 : index
    %31 = vector.load %arg2[%c4, %c0_31, %c0_32] : memref<9x64x64xbf16, #tpu.memory_space<vmem>>, vector<1x64x64xbf16>
    %32 = vector.shape_cast %31 : vector<1x64x64xbf16> to vector<64x64xbf16>
    %cst_33 = arith.constant dense<0.000000e+00> : vector<32x64xf32>
    %33 = tpu.matmul %30, %32, %cst_33 {dimension_numbers = #tpu.dot_dimension_numbers<[1], [0], [0], [1], [0, 0, 1, 1], [], []>} : vector<32x64xbf16>, vector<64x64xbf16>, vector<32x64xf32> -> vector<32x64xf32>
    %c0_34 = arith.constant 0 : index
    %c0_35 = arith.constant 0 : index
    %34 = vector.load %arg5[%c0_34, %c0_35] : memref<32x64xf32, #tpu.memory_space<vmem>>, vector<32x64xf32>
    %35 = arith.addf %34, %33 : vector<32x64xf32>
    %c0_36 = arith.constant 0 : index
    %c0_37 = arith.constant 0 : index
    %36 = vector.load %arg5[%c0_36, %c0_37] : memref<32x64xf32, #tpu.memory_space<vmem>>, vector<32x64xf32>
    tpu.vector_store %arg5[%c0_36, %c0_37], %35 {strides = array<i32>} : memref<32x64xf32, #tpu.memory_space<vmem>>, vector<32x64xf32>,
    %37 = vector.extract_strided_slice %22 {offsets = [16, 0], sizes = [32, 64], strides = [1, 1]} : vector<48x64xbf16> to vector<32x64xbf16>
    %c7 = arith.constant 7 : index
    %c0_38 = arith.constant 0 : index
    %c0_39 = arith.constant 0 : index
    %38 = vector.load %arg2[%c7, %c0_38, %c0_39] : memref<9x64x64xbf16, #tpu.memory_space<vmem>>, vector<1x64x64xbf16>
    %39 = vector.shape_cast %38 : vector<1x64x64xbf16> to vector<64x64xbf16>
    %cst_40 = arith.constant dense<0.000000e+00> : vector<32x64xf32>
    %40 = tpu.matmul %37, %39, %cst_40 {dimension_numbers = #tpu.dot_dimension_numbers<[1], [0], [0], [1], [0, 0, 1, 1], [], []>} : vector<32x64xbf16>, vector<64x64xbf16>, vector<32x64xf32> -> vector<32x64xf32>
    %c0_41 = arith.constant 0 : index
    %c0_42 = arith.constant 0 : index
    %41 = vector.load %arg5[%c0_41, %c0_42] : memref<32x64xf32, #tpu.memory_space<vmem>>, vector<32x64xf32>
    %42 = arith.addf %41, %40 : vector<32x64xf32>
    %c0_43 = arith.constant 0 : index
    %c0_44 = arith.constant 0 : index
    %43 = vector.load %arg5[%c0_43, %c0_44] : memref<32x64xf32, #tpu.memory_space<vmem>>, vector<32x64xf32>
    tpu.vector_store %arg5[%c0_43, %c0_44], %42 {strides = array<i32>} : memref<32x64xf32, #tpu.memory_space<vmem>>, vector<32x64xf32>,
    %c0_45 = arith.constant 0 : index
    %c2 = arith.constant 2 : index
    %c0_46 = arith.constant 0 : index
    %44 = vector.load %arg1[%c0_45, %c2, %c0_46] : memref<1x56x64xbf16, #tpu.memory_space<vmem>>, vector<1x48x64xbf16>
    %45 = vector.shape_cast %44 : vector<1x48x64xbf16> to vector<48x64xbf16>
    %46 = vector.extract_strided_slice %45 {offsets = [0, 0], sizes = [32, 64], strides = [1, 1]} : vector<48x64xbf16> to vector<32x64xbf16>
    %c2_47 = arith.constant 2 : index
    %c0_48 = arith.constant 0 : index
    %c0_49 = arith.constant 0 : index
    %47 = vector.load %arg2[%c2_47, %c0_48, %c0_49] : memref<9x64x64xbf16, #tpu.memory_space<vmem>>, vector<1x64x64xbf16>
    %48 = vector.shape_cast %47 : vector<1x64x64xbf16> to vector<64x64xbf16>
    %cst_50 = arith.constant dense<0.000000e+00> : vector<32x64xf32>
    %49 = tpu.matmul %46, %48, %cst_50 {dimension_numbers = #tpu.dot_dimension_numbers<[1], [0], [0], [1], [0, 0, 1, 1], [], []>} : vector<32x64xbf16>, vector<64x64xbf16>, vector<32x64xf32> -> vector<32x64xf32>
    %c0_51 = arith.constant 0 : index
    %c0_52 = arith.constant 0 : index
    %50 = vector.load %arg5[%c0_51, %c0_52] : memref<32x64xf32, #tpu.memory_space<vmem>>, vector<32x64xf32>
    %51 = arith.addf %50, %49 : vector<32x64xf32>
    %c0_53 = arith.constant 0 : index
    %c0_54 = arith.constant 0 : index
    %52 = vector.load %arg5[%c0_53, %c0_54] : memref<32x64xf32, #tpu.memory_space<vmem>>, vector<32x64xf32>
    tpu.vector_store %arg5[%c0_53, %c0_54], %51 {strides = array<i32>} : memref<32x64xf32, #tpu.memory_space<vmem>>, vector<32x64xf32>,
    %53 = vector.extract_strided_slice %45 {offsets = [8, 0], sizes = [32, 64], strides = [1, 1]} : vector<48x64xbf16> to vector<32x64xbf16>
    %c5 = arith.constant 5 : index
    %c0_55 = arith.constant 0 : index
    %c0_56 = arith.constant 0 : index
    %54 = vector.load %arg2[%c5, %c0_55, %c0_56] : memref<9x64x64xbf16, #tpu.memory_space<vmem>>, vector<1x64x64xbf16>
    %55 = vector.shape_cast %54 : vector<1x64x64xbf16> to vector<64x64xbf16>
    %cst_57 = arith.constant dense<0.000000e+00> : vector<32x64xf32>
    %56 = tpu.matmul %53, %55, %cst_57 {dimension_numbers = #tpu.dot_dimension_numbers<[1], [0], [0], [1], [0, 0, 1, 1], [], []>} : vector<32x64xbf16>, vector<64x64xbf16>, vector<32x64xf32> -> vector<32x64xf32>
    %c0_58 = arith.constant 0 : index
    %c0_59 = arith.constant 0 : index
    %57 = vector.load %arg5[%c0_58, %c0_59] : memref<32x64xf32, #tpu.memory_space<vmem>>, vector<32x64xf32>
    %58 = arith.addf %57, %56 : vector<32x64xf32>
    %c0_60 = arith.constant 0 : index
    %c0_61 = arith.constant 0 : index
    %59 = vector.load %arg5[%c0_60, %c0_61] : memref<32x64xf32, #tpu.memory_space<vmem>>, vector<32x64xf32>
    tpu.vector_store %arg5[%c0_60, %c0_61], %58 {strides = array<i32>} : memref<32x64xf32, #tpu.memory_space<vmem>>, vector<32x64xf32>,
    %60 = vector.extract_strided_slice %45 {offsets = [16, 0], sizes = [32, 64], strides = [1, 1]} : vector<48x64xbf16> to vector<32x64xbf16>
    %c8 = arith.constant 8 : index
    %c0_62 = arith.constant 0 : index
    %c0_63 = arith.constant 0 : index
    %61 = vector.load %arg2[%c8, %c0_62, %c0_63] : memref<9x64x64xbf16, #tpu.memory_space<vmem>>, vector<1x64x64xbf16>
    %62 = vector.shape_cast %61 : vector<1x64x64xbf16> to vector<64x64xbf16>
    %cst_64 = arith.constant dense<0.000000e+00> : vector<32x64xf32>
    %63 = tpu.matmul %60, %62, %cst_64 {dimension_numbers = #tpu.dot_dimension_numbers<[1], [0], [0], [1], [0, 0, 1, 1], [], []>} : vector<32x64xbf16>, vector<64x64xbf16>, vector<32x64xf32> -> vector<32x64xf32>
    %c0_65 = arith.constant 0 : index
    %c0_66 = arith.constant 0 : index
    %64 = vector.load %arg5[%c0_65, %c0_66] : memref<32x64xf32, #tpu.memory_space<vmem>>, vector<32x64xf32>
    %65 = arith.addf %64, %63 : vector<32x64xf32>
    %c0_67 = arith.constant 0 : index
    %c0_68 = arith.constant 0 : index
    %66 = vector.load %arg5[%c0_67, %c0_68] : memref<32x64xf32, #tpu.memory_space<vmem>>, vector<32x64xf32>
    tpu.vector_store %arg5[%c0_67, %c0_68], %65 {strides = array<i32>} : memref<32x64xf32, #tpu.memory_space<vmem>>, vector<32x64xf32>,
    %c0_69 = arith.constant 0 : index
    %c0_70 = arith.constant 0 : index
    %67 = vector.load %arg5[%c0_69, %c0_70] : memref<32x64xf32, #tpu.memory_space<vmem>>, vector<32x64xf32>
    %c0_71 = arith.constant 0 : index
    %c0_72 = arith.constant 0 : index
    %68 = vector.load %arg3[%c0_71, %c0_72] : memref<1x64xf32, #tpu.memory_space<vmem>>, vector<1x64xf32>
    %69 = vector.broadcast %68 : vector<1x64xf32> to vector<32x64xf32>
    %70 = arith.addf %67, %69 : vector<32x64xf32>
    %cst_73 = arith.constant 0.000000e+00 : f32
    %71 = vector.broadcast %cst_73 : f32 to vector<32x64xf32>
    %72 = arith.maximumf %70, %71 : vector<32x64xf32>
    %73 = vector.shape_cast %72 : vector<32x64xf32> to vector<4x8x64xf32>
    %74 = vector.extract_strided_slice %73 {offsets = [0, 0, 0], sizes = [4, 4, 64], strides = [1, 1, 1]} : vector<4x8x64xf32> to vector<4x4x64xf32>
    %75 = arith.truncf %74 : vector<4x4x64xf32> to vector<4x4x64xbf16>
    %c0_74 = arith.constant 0 : index
    %c0_75 = arith.constant 0 : index
    %c0_76 = arith.constant 0 : index
    %c0_77 = arith.constant 0 : index
    %76 = vector.load %arg4[%c0_74, %c0_75, %c0_76, %c0_77] : memref<1x4x4x64xbf16, #tpu.memory_space<vmem>>, vector<1x4x4x64xbf16>
    %77 = vector.shape_cast %76 : vector<1x4x4x64xbf16> to vector<4x4x64xbf16>
    %78 = vector.shape_cast %75 : vector<4x4x64xbf16> to vector<1x4x4x64xbf16>
    tpu.vector_store %arg4[%c0_74, %c0_75, %c0_76, %c0_77], %78 {strides = array<i32>} : memref<1x4x4x64xbf16, #tpu.memory_space<vmem>>, vector<1x4x4x64xbf16>,
    return
  }
  func.func @transform_0(%arg0: i32) -> (i32, i32, i32) {
    %c0_i32 = arith.constant 0 : i32
    %c0_i32_0 = arith.constant 0 : i32
    %c0_i32_1 = arith.constant 0 : i32
    return %arg0, %c0_i32, %c0_i32_0 : i32, i32, i32
  }
  func.func @transform_1(%arg0: i32) -> (i32, i32, i32) {
    %c0_i32 = arith.constant 0 : i32
    %c0_i32_0 = arith.constant 0 : i32
    %c0_i32_1 = arith.constant 0 : i32
    %c0_i32_2 = arith.constant 0 : i32
    return %c0_i32, %c0_i32_0, %c0_i32_1 : i32, i32, i32
  }
  func.func @transform_2(%arg0: i32) -> (i32, i32) {
    %c0_i32 = arith.constant 0 : i32
    %c0_i32_0 = arith.constant 0 : i32
    %c0_i32_1 = arith.constant 0 : i32
    return %c0_i32, %c0_i32_0 : i32, i32
  }
  func.func @transform_3(%arg0: i32) -> (i32, i32, i32, i32) {
    %c0_i32 = arith.constant 0 : i32
    %c0_i32_0 = arith.constant 0 : i32
    %c0_i32_1 = arith.constant 0 : i32
    %c0_i32_2 = arith.constant 0 : i32
    return %arg0, %c0_i32, %c0_i32_0, %c0_i32_1 : i32, i32, i32, i32
  }
}

module attributes {stable_mosaic.version = 11 : i64} {
  func.func @_mm_bias_kernel(%arg0: i32, %arg1: memref<16x256xbf16, #tpu.memory_space<vmem>>, %arg2: memref<256x512xbf16, #tpu.memory_space<vmem>>, %arg3: memref<1x512xf32, #tpu.memory_space<vmem>>, %arg4: memref<16x512xbf16, #tpu.memory_space<vmem>>) attributes {dimension_semantics = [#tpu.dimension_semantics<parallel>], iteration_bounds = array<i64: 1>, scalar_prefetch = 0 : i64, scratch_operands = 0 : i64, tpu.core_type = #tpu.core_type<tc>, window_params = [{transform_indices = @transform_0, window_bounds = array<i64: 16, 256>}, {pipeline_mode = #tpu.pipeline_mode<synchronous>, transform_indices = @transform_1, window_bounds = array<i64: 256, 512>}, {pipeline_mode = #tpu.pipeline_mode<synchronous>, transform_indices = @transform_2, window_bounds = array<i64: 1, 512>}, {transform_indices = @transform_3, window_bounds = array<i64: 16, 512>}]} {
    %c0 = arith.constant 0 : index
    %c0_0 = arith.constant 0 : index
    %0 = vector.load %arg1[%c0, %c0_0] : memref<16x256xbf16, #tpu.memory_space<vmem>>, vector<16x256xbf16>
    %c0_1 = arith.constant 0 : index
    %c0_2 = arith.constant 0 : index
    %1 = vector.load %arg2[%c0_1, %c0_2] : memref<256x512xbf16, #tpu.memory_space<vmem>>, vector<256x512xbf16>
    %cst = arith.constant dense<0.000000e+00> : vector<16x512xf32>
    %2 = tpu.matmul %0, %1, %cst {dimension_numbers = #tpu.dot_dimension_numbers<[1], [0], [0], [1], [0, 0, 1, 1], [], []>} : vector<16x256xbf16>, vector<256x512xbf16>, vector<16x512xf32> -> vector<16x512xf32>
    %c0_3 = arith.constant 0 : index
    %c0_4 = arith.constant 0 : index
    %3 = vector.load %arg3[%c0_3, %c0_4] : memref<1x512xf32, #tpu.memory_space<vmem>>, vector<1x512xf32>
    %4 = vector.broadcast %3 : vector<1x512xf32> to vector<16x512xf32>
    %5 = arith.addf %2, %4 : vector<16x512xf32>
    %6 = arith.truncf %5 : vector<16x512xf32> to vector<16x512xbf16>
    %c0_5 = arith.constant 0 : index
    %c0_6 = arith.constant 0 : index
    %7 = vector.load %arg4[%c0_5, %c0_6] : memref<16x512xbf16, #tpu.memory_space<vmem>>, vector<16x512xbf16>
    tpu.vector_store %arg4[%c0_5, %c0_6], %6 {strides = array<i32>} : memref<16x512xbf16, #tpu.memory_space<vmem>>, vector<16x512xbf16>,
    return
  }
  func.func @transform_0(%arg0: i32) -> (i32, i32) {
    %c0_i32 = arith.constant 0 : i32
    %c0_i32_0 = arith.constant 0 : i32
    return %arg0, %c0_i32 : i32, i32
  }
  func.func @transform_1(%arg0: i32) -> (i32, i32) {
    %c0_i32 = arith.constant 0 : i32
    %c0_i32_0 = arith.constant 0 : i32
    %c0_i32_1 = arith.constant 0 : i32
    return %c0_i32, %c0_i32_0 : i32, i32
  }
  func.func @transform_2(%arg0: i32) -> (i32, i32) {
    %c0_i32 = arith.constant 0 : i32
    %c0_i32_0 = arith.constant 0 : i32
    %c0_i32_1 = arith.constant 0 : i32
    return %c0_i32, %c0_i32_0 : i32, i32
  }
  func.func @transform_3(%arg0: i32) -> (i32, i32) {
    %c0_i32 = arith.constant 0 : i32
    %c0_i32_0 = arith.constant 0 : i32
    return %arg0, %c0_i32 : i32, i32
  }
}

module attributes {stable_mosaic.version = 11 : i64} {
  func.func @_conv_taps_kernel(%arg0: i32, %arg1: memref<1x32x512xbf16, #tpu.memory_space<vmem>>, %arg2: memref<4x512x128xbf16, #tpu.memory_space<vmem>>, %arg3: memref<1x128xf32, #tpu.memory_space<vmem>>, %arg4: memref<1x2x2x128xbf16, #tpu.memory_space<vmem>>, %arg5: memref<16x128xf32, #tpu.memory_space<vmem>>) attributes {dimension_semantics = [#tpu.dimension_semantics<parallel>], iteration_bounds = array<i64: 2>, scalar_prefetch = 0 : i64, scratch_operands = 1 : i64, tpu.core_type = #tpu.core_type<tc>, window_params = [{transform_indices = @transform_0, window_bounds = array<i64: 1, 32, 512>}, {pipeline_mode = #tpu.pipeline_mode<synchronous>, transform_indices = @transform_1, window_bounds = array<i64: 4, 512, 128>}, {pipeline_mode = #tpu.pipeline_mode<synchronous>, transform_indices = @transform_2, window_bounds = array<i64: 1, 128>}, {transform_indices = @transform_3, window_bounds = array<i64: 1, 2, 2, 128>}]} {
    %c0 = arith.constant 0 : index
    %c0_0 = arith.constant 0 : index
    %c0_1 = arith.constant 0 : index
    %0 = vector.load %arg1[%c0, %c0_0, %c0_1] : memref<1x32x512xbf16, #tpu.memory_space<vmem>>, vector<1x24x512xbf16>
    %1 = vector.shape_cast %0 : vector<1x24x512xbf16> to vector<24x512xbf16>
    %2 = vector.extract_strided_slice %1 {offsets = [0, 0], sizes = [16, 512], strides = [1, 1]} : vector<24x512xbf16> to vector<16x512xbf16>
    %c0_2 = arith.constant 0 : index
    %c0_3 = arith.constant 0 : index
    %c0_4 = arith.constant 0 : index
    %3 = vector.load %arg2[%c0_2, %c0_3, %c0_4] : memref<4x512x128xbf16, #tpu.memory_space<vmem>>, vector<1x512x128xbf16>
    %4 = vector.shape_cast %3 : vector<1x512x128xbf16> to vector<512x128xbf16>
    %cst = arith.constant dense<0.000000e+00> : vector<16x128xf32>
    %5 = tpu.matmul %2, %4, %cst {dimension_numbers = #tpu.dot_dimension_numbers<[1], [0], [0], [1], [0, 0, 1, 1], [], []>} : vector<16x512xbf16>, vector<512x128xbf16>, vector<16x128xf32> -> vector<16x128xf32>
    %c0_5 = arith.constant 0 : index
    %c0_6 = arith.constant 0 : index
    %6 = vector.load %arg5[%c0_5, %c0_6] : memref<16x128xf32, #tpu.memory_space<vmem>>, vector<16x128xf32>
    tpu.vector_store %arg5[%c0_5, %c0_6], %5 {strides = array<i32>} : memref<16x128xf32, #tpu.memory_space<vmem>>, vector<16x128xf32>,
    %7 = vector.extract_strided_slice %1 {offsets = [8, 0], sizes = [16, 512], strides = [1, 1]} : vector<24x512xbf16> to vector<16x512xbf16>
    %c2 = arith.constant 2 : index
    %c0_7 = arith.constant 0 : index
    %c0_8 = arith.constant 0 : index
    %8 = vector.load %arg2[%c2, %c0_7, %c0_8] : memref<4x512x128xbf16, #tpu.memory_space<vmem>>, vector<1x512x128xbf16>
    %9 = vector.shape_cast %8 : vector<1x512x128xbf16> to vector<512x128xbf16>
    %cst_9 = arith.constant dense<0.000000e+00> : vector<16x128xf32>
    %10 = tpu.matmul %7, %9, %cst_9 {dimension_numbers = #tpu.dot_dimension_numbers<[1], [0], [0], [1], [0, 0, 1, 1], [], []>} : vector<16x512xbf16>, vector<512x128xbf16>, vector<16x128xf32> -> vector<16x128xf32>
    %c0_10 = arith.constant 0 : index
    %c0_11 = arith.constant 0 : index
    %11 = vector.load %arg5[%c0_10, %c0_11] : memref<16x128xf32, #tpu.memory_space<vmem>>, vector<16x128xf32>
    %12 = arith.addf %11, %10 : vector<16x128xf32>
    %c0_12 = arith.constant 0 : index
    %c0_13 = arith.constant 0 : index
    %13 = vector.load %arg5[%c0_12, %c0_13] : memref<16x128xf32, #tpu.memory_space<vmem>>, vector<16x128xf32>
    tpu.vector_store %arg5[%c0_12, %c0_13], %12 {strides = array<i32>} : memref<16x128xf32, #tpu.memory_space<vmem>>, vector<16x128xf32>,
    %c0_14 = arith.constant 0 : index
    %c1 = arith.constant 1 : index
    %c0_15 = arith.constant 0 : index
    %14 = vector.load %arg1[%c0_14, %c1, %c0_15] : memref<1x32x512xbf16, #tpu.memory_space<vmem>>, vector<1x24x512xbf16>
    %15 = vector.shape_cast %14 : vector<1x24x512xbf16> to vector<24x512xbf16>
    %16 = vector.extract_strided_slice %15 {offsets = [0, 0], sizes = [16, 512], strides = [1, 1]} : vector<24x512xbf16> to vector<16x512xbf16>
    %c1_16 = arith.constant 1 : index
    %c0_17 = arith.constant 0 : index
    %c0_18 = arith.constant 0 : index
    %17 = vector.load %arg2[%c1_16, %c0_17, %c0_18] : memref<4x512x128xbf16, #tpu.memory_space<vmem>>, vector<1x512x128xbf16>
    %18 = vector.shape_cast %17 : vector<1x512x128xbf16> to vector<512x128xbf16>
    %cst_19 = arith.constant dense<0.000000e+00> : vector<16x128xf32>
    %19 = tpu.matmul %16, %18, %cst_19 {dimension_numbers = #tpu.dot_dimension_numbers<[1], [0], [0], [1], [0, 0, 1, 1], [], []>} : vector<16x512xbf16>, vector<512x128xbf16>, vector<16x128xf32> -> vector<16x128xf32>
    %c0_20 = arith.constant 0 : index
    %c0_21 = arith.constant 0 : index
    %20 = vector.load %arg5[%c0_20, %c0_21] : memref<16x128xf32, #tpu.memory_space<vmem>>, vector<16x128xf32>
    %21 = arith.addf %20, %19 : vector<16x128xf32>
    %c0_22 = arith.constant 0 : index
    %c0_23 = arith.constant 0 : index
    %22 = vector.load %arg5[%c0_22, %c0_23] : memref<16x128xf32, #tpu.memory_space<vmem>>, vector<16x128xf32>
    tpu.vector_store %arg5[%c0_22, %c0_23], %21 {strides = array<i32>} : memref<16x128xf32, #tpu.memory_space<vmem>>, vector<16x128xf32>,
    %23 = vector.extract_strided_slice %15 {offsets = [8, 0], sizes = [16, 512], strides = [1, 1]} : vector<24x512xbf16> to vector<16x512xbf16>
    %c3 = arith.constant 3 : index
    %c0_24 = arith.constant 0 : index
    %c0_25 = arith.constant 0 : index
    %24 = vector.load %arg2[%c3, %c0_24, %c0_25] : memref<4x512x128xbf16, #tpu.memory_space<vmem>>, vector<1x512x128xbf16>
    %25 = vector.shape_cast %24 : vector<1x512x128xbf16> to vector<512x128xbf16>
    %cst_26 = arith.constant dense<0.000000e+00> : vector<16x128xf32>
    %26 = tpu.matmul %23, %25, %cst_26 {dimension_numbers = #tpu.dot_dimension_numbers<[1], [0], [0], [1], [0, 0, 1, 1], [], []>} : vector<16x512xbf16>, vector<512x128xbf16>, vector<16x128xf32> -> vector<16x128xf32>
    %c0_27 = arith.constant 0 : index
    %c0_28 = arith.constant 0 : index
    %27 = vector.load %arg5[%c0_27, %c0_28] : memref<16x128xf32, #tpu.memory_space<vmem>>, vector<16x128xf32>
    %28 = arith.addf %27, %26 : vector<16x128xf32>
    %c0_29 = arith.constant 0 : index
    %c0_30 = arith.constant 0 : index
    %29 = vector.load %arg5[%c0_29, %c0_30] : memref<16x128xf32, #tpu.memory_space<vmem>>, vector<16x128xf32>
    tpu.vector_store %arg5[%c0_29, %c0_30], %28 {strides = array<i32>} : memref<16x128xf32, #tpu.memory_space<vmem>>, vector<16x128xf32>,
    %c0_31 = arith.constant 0 : index
    %c0_32 = arith.constant 0 : index
    %30 = vector.load %arg5[%c0_31, %c0_32] : memref<16x128xf32, #tpu.memory_space<vmem>>, vector<16x128xf32>
    %c0_33 = arith.constant 0 : index
    %c0_34 = arith.constant 0 : index
    %31 = vector.load %arg3[%c0_33, %c0_34] : memref<1x128xf32, #tpu.memory_space<vmem>>, vector<1x128xf32>
    %32 = vector.broadcast %31 : vector<1x128xf32> to vector<16x128xf32>
    %33 = arith.addf %30, %32 : vector<16x128xf32>
    %cst_35 = arith.constant 0.000000e+00 : f32
    %34 = vector.broadcast %cst_35 : f32 to vector<16x128xf32>
    %35 = arith.maximumf %33, %34 : vector<16x128xf32>
    %36 = vector.shape_cast %35 : vector<16x128xf32> to vector<2x8x128xf32>
    %37 = vector.extract_strided_slice %36 {offsets = [0, 0, 0], sizes = [2, 2, 128], strides = [1, 1, 1]} : vector<2x8x128xf32> to vector<2x2x128xf32>
    %38 = arith.truncf %37 : vector<2x2x128xf32> to vector<2x2x128xbf16>
    %c0_36 = arith.constant 0 : index
    %c0_37 = arith.constant 0 : index
    %c0_38 = arith.constant 0 : index
    %c0_39 = arith.constant 0 : index
    %39 = vector.load %arg4[%c0_36, %c0_37, %c0_38, %c0_39] : memref<1x2x2x128xbf16, #tpu.memory_space<vmem>>, vector<1x2x2x128xbf16>
    %40 = vector.shape_cast %39 : vector<1x2x2x128xbf16> to vector<2x2x128xbf16>
    %41 = vector.shape_cast %38 : vector<2x2x128xbf16> to vector<1x2x2x128xbf16>
    tpu.vector_store %arg4[%c0_36, %c0_37, %c0_38, %c0_39], %41 {strides = array<i32>} : memref<1x2x2x128xbf16, #tpu.memory_space<vmem>>, vector<1x2x2x128xbf16>,
    return
  }
  func.func @transform_0(%arg0: i32) -> (i32, i32, i32) {
    %c0_i32 = arith.constant 0 : i32
    %c0_i32_0 = arith.constant 0 : i32
    %c0_i32_1 = arith.constant 0 : i32
    return %arg0, %c0_i32, %c0_i32_0 : i32, i32, i32
  }
  func.func @transform_1(%arg0: i32) -> (i32, i32, i32) {
    %c0_i32 = arith.constant 0 : i32
    %c0_i32_0 = arith.constant 0 : i32
    %c0_i32_1 = arith.constant 0 : i32
    %c0_i32_2 = arith.constant 0 : i32
    return %c0_i32, %c0_i32_0, %c0_i32_1 : i32, i32, i32
  }
  func.func @transform_2(%arg0: i32) -> (i32, i32) {
    %c0_i32 = arith.constant 0 : i32
    %c0_i32_0 = arith.constant 0 : i32
    %c0_i32_1 = arith.constant 0 : i32
    return %c0_i32, %c0_i32_0 : i32, i32
  }
  func.func @transform_3(%arg0: i32) -> (i32, i32, i32, i32) {
    %c0_i32 = arith.constant 0 : i32
    %c0_i32_0 = arith.constant 0 : i32
    %c0_i32_1 = arith.constant 0 : i32
    %c0_i32_2 = arith.constant 0 : i32
    return %arg0, %c0_i32, %c0_i32_0, %c0_i32_1 : i32, i32, i32, i32
  }
}

module attributes {stable_mosaic.version = 11 : i64} {
  func.func @_mm_bias_res_relu_kernel(%arg0: i32, %arg1: memref<16x128xbf16, #tpu.memory_space<vmem>>, %arg2: memref<128x512xbf16, #tpu.memory_space<vmem>>, %arg3: memref<1x512xf32, #tpu.memory_space<vmem>>, %arg4: memref<16x512xbf16, #tpu.memory_space<vmem>>, %arg5: memref<16x512xbf16, #tpu.memory_space<vmem>>) attributes {dimension_semantics = [#tpu.dimension_semantics<parallel>], iteration_bounds = array<i64: 1>, scalar_prefetch = 0 : i64, scratch_operands = 0 : i64, tpu.core_type = #tpu.core_type<tc>, window_params = [{transform_indices = @transform_0, window_bounds = array<i64: 16, 128>}, {pipeline_mode = #tpu.pipeline_mode<synchronous>, transform_indices = @transform_1, window_bounds = array<i64: 128, 512>}, {pipeline_mode = #tpu.pipeline_mode<synchronous>, transform_indices = @transform_2, window_bounds = array<i64: 1, 512>}, {transform_indices = @transform_3, window_bounds = array<i64: 16, 512>}, {transform_indices = @transform_4, window_bounds = array<i64: 16, 512>}]} {
    %c0 = arith.constant 0 : index
    %c0_0 = arith.constant 0 : index
    %0 = vector.load %arg1[%c0, %c0_0] : memref<16x128xbf16, #tpu.memory_space<vmem>>, vector<16x128xbf16>
    %c0_1 = arith.constant 0 : index
    %c0_2 = arith.constant 0 : index
    %1 = vector.load %arg2[%c0_1, %c0_2] : memref<128x512xbf16, #tpu.memory_space<vmem>>, vector<128x512xbf16>
    %cst = arith.constant dense<0.000000e+00> : vector<16x512xf32>
    %2 = tpu.matmul %0, %1, %cst {dimension_numbers = #tpu.dot_dimension_numbers<[1], [0], [0], [1], [0, 0, 1, 1], [], []>} : vector<16x128xbf16>, vector<128x512xbf16>, vector<16x512xf32> -> vector<16x512xf32>
    %c0_3 = arith.constant 0 : index
    %c0_4 = arith.constant 0 : index
    %3 = vector.load %arg3[%c0_3, %c0_4] : memref<1x512xf32, #tpu.memory_space<vmem>>, vector<1x512xf32>
    %4 = vector.broadcast %3 : vector<1x512xf32> to vector<16x512xf32>
    %5 = arith.addf %2, %4 : vector<16x512xf32>
    %c0_5 = arith.constant 0 : index
    %c0_6 = arith.constant 0 : index
    %6 = vector.load %arg4[%c0_5, %c0_6] : memref<16x512xbf16, #tpu.memory_space<vmem>>, vector<16x512xbf16>
    %7 = arith.extf %6 : vector<16x512xbf16> to vector<16x512xf32>
    %8 = arith.addf %5, %7 : vector<16x512xf32>
    %cst_7 = arith.constant 0.000000e+00 : f32
    %9 = vector.broadcast %cst_7 : f32 to vector<16x512xf32>
    %10 = arith.maximumf %8, %9 : vector<16x512xf32>
    %11 = arith.truncf %10 : vector<16x512xf32> to vector<16x512xbf16>
    %c0_8 = arith.constant 0 : index
    %c0_9 = arith.constant 0 : index
    %12 = vector.load %arg5[%c0_8, %c0_9] : memref<16x512xbf16, #tpu.memory_space<vmem>>, vector<16x512xbf16>
    tpu.vector_store %arg5[%c0_8, %c0_9], %11 {strides = array<i32>} : memref<16x512xbf16, #tpu.memory_space<vmem>>, vector<16x512xbf16>,
    return
  }
  func.func @transform_0(%arg0: i32) -> (i32, i32) {
    %c0_i32 = arith.constant 0 : i32
    %c0_i32_0 = arith.constant 0 : i32
    return %arg0, %c0_i32 : i32, i32
  }
  func.func @transform_1(%arg0: i32) -> (i32, i32) {
    %c0_i32 = arith.constant 0 : i32
    %c0_i32_0 = arith.constant 0 : i32
    %c0_i32_1 = arith.constant 0 : i32
    return %c0_i32, %c0_i32_0 : i32, i32
  }
  func.func @transform_2(%arg0: i32) -> (i32, i32) {
    %c0_i32 = arith.constant 0 : i32
    %c0_i32_0 = arith.constant 0 : i32
    %c0_i32_1 = arith.constant 0 : i32
    return %c0_i32, %c0_i32_0 : i32, i32
  }
  func.func @transform_3(%arg0: i32) -> (i32, i32) {
    %c0_i32 = arith.constant 0 : i32
    %c0_i32_0 = arith.constant 0 : i32
    return %arg0, %c0_i32 : i32, i32
  }
  func.func @transform_4(%arg0: i32) -> (i32, i32) {
    %c0_i32 = arith.constant 0 : i32
    %c0_i32_0 = arith.constant 0 : i32
    return %arg0, %c0_i32 : i32, i32
  }
}

module attributes {stable_mosaic.version = 11 : i64} {
  func.func @_mm_bias_kernel(%arg0: i32, %arg1: memref<16x512xbf16, #tpu.memory_space<vmem>>, %arg2: memref<512x256xbf16, #tpu.memory_space<vmem>>, %arg3: memref<1x256xf32, #tpu.memory_space<vmem>>, %arg4: memref<16x256xbf16, #tpu.memory_space<vmem>>) attributes {dimension_semantics = [#tpu.dimension_semantics<parallel>], iteration_bounds = array<i64: 1>, scalar_prefetch = 0 : i64, scratch_operands = 0 : i64, tpu.core_type = #tpu.core_type<tc>, window_params = [{transform_indices = @transform_0, window_bounds = array<i64: 16, 512>}, {pipeline_mode = #tpu.pipeline_mode<synchronous>, transform_indices = @transform_1, window_bounds = array<i64: 512, 256>}, {pipeline_mode = #tpu.pipeline_mode<synchronous>, transform_indices = @transform_2, window_bounds = array<i64: 1, 256>}, {transform_indices = @transform_3, window_bounds = array<i64: 16, 256>}]} {
    %c0 = arith.constant 0 : index
    %c0_0 = arith.constant 0 : index
    %0 = vector.load %arg1[%c0, %c0_0] : memref<16x512xbf16, #tpu.memory_space<vmem>>, vector<16x512xbf16>
    %c0_1 = arith.constant 0 : index
    %c0_2 = arith.constant 0 : index
    %1 = vector.load %arg2[%c0_1, %c0_2] : memref<512x256xbf16, #tpu.memory_space<vmem>>, vector<512x256xbf16>
    %cst = arith.constant dense<0.000000e+00> : vector<16x256xf32>
    %2 = tpu.matmul %0, %1, %cst {dimension_numbers = #tpu.dot_dimension_numbers<[1], [0], [0], [1], [0, 0, 1, 1], [], []>} : vector<16x512xbf16>, vector<512x256xbf16>, vector<16x256xf32> -> vector<16x256xf32>
    %c0_3 = arith.constant 0 : index
    %c0_4 = arith.constant 0 : index
    %3 = vector.load %arg3[%c0_3, %c0_4] : memref<1x256xf32, #tpu.memory_space<vmem>>, vector<1x256xf32>
    %4 = vector.broadcast %3 : vector<1x256xf32> to vector<16x256xf32>
    %5 = arith.addf %2, %4 : vector<16x256xf32>
    %cst_5 = arith.constant 0.000000e+00 : f32
    %6 = vector.broadcast %cst_5 : f32 to vector<16x256xf32>
    %7 = arith.maximumf %5, %6 : vector<16x256xf32>
    %8 = arith.truncf %7 : vector<16x256xf32> to vector<16x256xbf16>
    %c0_6 = arith.constant 0 : index
    %c0_7 = arith.constant 0 : index
    %9 = vector.load %arg4[%c0_6, %c0_7] : memref<16x256xbf16, #tpu.memory_space<vmem>>, vector<16x256xbf16>
    tpu.vector_store %arg4[%c0_6, %c0_7], %8 {strides = array<i32>} : memref<16x256xbf16, #tpu.memory_space<vmem>>, vector<16x256xbf16>,
    return
  }
  func.func @transform_0(%arg0: i32) -> (i32, i32) {
    %c0_i32 = arith.constant 0 : i32
    %c0_i32_0 = arith.constant 0 : i32
    return %arg0, %c0_i32 : i32, i32
  }
  func.func @transform_1(%arg0: i32) -> (i32, i32) {
    %c0_i32 = arith.constant 0 : i32
    %c0_i32_0 = arith.constant 0 : i32
    %c0_i32_1 = arith.constant 0 : i32
    return %c0_i32, %c0_i32_0 : i32, i32
  }
  func.func @transform_2(%arg0: i32) -> (i32, i32) {
    %c0_i32 = arith.constant 0 : i32
    %c0_i32_0 = arith.constant 0 : i32
    %c0_i32_1 = arith.constant 0 : i32
    return %c0_i32, %c0_i32_0 : i32, i32
  }
  func.func @transform_3(%arg0: i32) -> (i32, i32) {
    %c0_i32 = arith.constant 0 : i32
    %c0_i32_0 = arith.constant 0 : i32
    return %arg0, %c0_i32 : i32, i32
  }
}

module attributes {stable_mosaic.version = 11 : i64} {
  func.func @_mm_bias_kernel(%arg0: i32, %arg1: memref<16x512xbf16, #tpu.memory_space<vmem>>, %arg2: memref<512x1024xbf16, #tpu.memory_space<vmem>>, %arg3: memref<1x1024xf32, #tpu.memory_space<vmem>>, %arg4: memref<16x1024xbf16, #tpu.memory_space<vmem>>) attributes {dimension_semantics = [#tpu.dimension_semantics<parallel>], iteration_bounds = array<i64: 1>, scalar_prefetch = 0 : i64, scratch_operands = 0 : i64, tpu.core_type = #tpu.core_type<tc>, window_params = [{transform_indices = @transform_0, window_bounds = array<i64: 16, 512>}, {pipeline_mode = #tpu.pipeline_mode<synchronous>, transform_indices = @transform_1, window_bounds = array<i64: 512, 1024>}, {pipeline_mode = #tpu.pipeline_mode<synchronous>, transform_indices = @transform_2, window_bounds = array<i64: 1, 1024>}, {transform_indices = @transform_3, window_bounds = array<i64: 16, 1024>}]} {
    %c0 = arith.constant 0 : index
    %c0_0 = arith.constant 0 : index
    %0 = vector.load %arg1[%c0, %c0_0] : memref<16x512xbf16, #tpu.memory_space<vmem>>, vector<16x512xbf16>
    %c0_1 = arith.constant 0 : index
    %c0_2 = arith.constant 0 : index
    %1 = vector.load %arg2[%c0_1, %c0_2] : memref<512x1024xbf16, #tpu.memory_space<vmem>>, vector<512x1024xbf16>
    %cst = arith.constant dense<0.000000e+00> : vector<16x1024xf32>
    %2 = tpu.matmul %0, %1, %cst {dimension_numbers = #tpu.dot_dimension_numbers<[1], [0], [0], [1], [0, 0, 1, 1], [], []>} : vector<16x512xbf16>, vector<512x1024xbf16>, vector<16x1024xf32> -> vector<16x1024xf32>
    %c0_3 = arith.constant 0 : index
    %c0_4 = arith.constant 0 : index
    %3 = vector.load %arg3[%c0_3, %c0_4] : memref<1x1024xf32, #tpu.memory_space<vmem>>, vector<1x1024xf32>
    %4 = vector.broadcast %3 : vector<1x1024xf32> to vector<16x1024xf32>
    %5 = arith.addf %2, %4 : vector<16x1024xf32>
    %6 = arith.truncf %5 : vector<16x1024xf32> to vector<16x1024xbf16>
    %c0_5 = arith.constant 0 : index
    %c0_6 = arith.constant 0 : index
    %7 = vector.load %arg4[%c0_5, %c0_6] : memref<16x1024xbf16, #tpu.memory_space<vmem>>, vector<16x1024xbf16>
    tpu.vector_store %arg4[%c0_5, %c0_6], %6 {strides = array<i32>} : memref<16x1024xbf16, #tpu.memory_space<vmem>>, vector<16x1024xbf16>,
    return
  }
  func.func @transform_0(%arg0: i32) -> (i32, i32) {
    %c0_i32 = arith.constant 0 : i32
    %c0_i32_0 = arith.constant 0 : i32
    return %arg0, %c0_i32 : i32, i32
  }
  func.func @transform_1(%arg0: i32) -> (i32, i32) {
    %c0_i32 = arith.constant 0 : i32
    %c0_i32_0 = arith.constant 0 : i32
    %c0_i32_1 = arith.constant 0 : i32
    return %c0_i32, %c0_i32_0 : i32, i32
  }
  func.func @transform_2(%arg0: i32) -> (i32, i32) {
    %c0_i32 = arith.constant 0 : i32
    %c0_i32_0 = arith.constant 0 : i32
    %c0_i32_1 = arith.constant 0 : i32
    return %c0_i32, %c0_i32_0 : i32, i32
  }
  func.func @transform_3(%arg0: i32) -> (i32, i32) {
    %c0_i32 = arith.constant 0 : i32
    %c0_i32_0 = arith.constant 0 : i32
    return %arg0, %c0_i32 : i32, i32
  }
}

module attributes {stable_mosaic.version = 11 : i64} {
  func.func @_avgpool_kernel(%arg0: i32, %arg1: memref<2x1x1024xbf16, #tpu.memory_space<vmem>>, %arg2: memref<2x1024xf32, #tpu.memory_space<vmem>>) attributes {dimension_semantics = [#tpu.dimension_semantics<arbitrary>], iteration_bounds = array<i64: 1>, scalar_prefetch = 0 : i64, scratch_operands = 0 : i64, tpu.core_type = #tpu.core_type<tc>, window_params = [{pipeline_mode = #tpu.pipeline_mode<synchronous>, transform_indices = @transform_0, window_bounds = array<i64: 2, 1, 1024>}, {pipeline_mode = #tpu.pipeline_mode<synchronous>, transform_indices = @transform_1, window_bounds = array<i64: 2, 1024>}]} {
    %c0 = arith.constant 0 : index
    %c0_0 = arith.constant 0 : index
    %c0_1 = arith.constant 0 : index
    %0 = vector.load %arg1[%c0, %c0_0, %c0_1] : memref<2x1x1024xbf16, #tpu.memory_space<vmem>>, vector<2x1x1024xbf16>
    %1 = arith.extf %0 : vector<2x1x1024xbf16> to vector<2x1x1024xf32>
    %cst = arith.constant dense<0.000000e+00> : vector<2x1024xf32>
    %2 = vector.multi_reduction <add>, %1, %cst [1] : vector<2x1x1024xf32> to vector<2x1024xf32>
    %cst_2 = arith.constant 1.000000e+00 : f32
    %3 = vector.broadcast %cst_2 : f32 to vector<2x1024xf32>
    %4 = arith.divf %2, %3 : vector<2x1024xf32>
    %c0_3 = arith.constant 0 : index
    %c0_4 = arith.constant 0 : index
    %5 = vector.load %arg2[%c0_3, %c0_4] : memref<2x1024xf32, #tpu.memory_space<vmem>>, vector<2x1024xf32>
    tpu.vector_store %arg2[%c0_3, %c0_4], %4 {strides = array<i32>} : memref<2x1024xf32, #tpu.memory_space<vmem>>, vector<2x1024xf32>,
    return
  }
  func.func @transform_0(%arg0: i32) -> (i32, i32, i32) {
    %c0_i32 = arith.constant 0 : i32
    %c0_i32_0 = arith.constant 0 : i32
    %c0_i32_1 = arith.constant 0 : i32
    %c0_i32_2 = arith.constant 0 : i32
    return %c0_i32, %c0_i32_0, %c0_i32_1 : i32, i32, i32
  }
  func.func @transform_1(%arg0: i32) -> (i32, i32) {
    %c0_i32 = arith.constant 0 : i32
    %c0_i32_0 = arith.constant 0 : i32
    %c0_i32_1 = arith.constant 0 : i32
    return %c0_i32, %c0_i32_0 : i32, i32
  }
}

module attributes {stable_mosaic.version = 11 : i64} {
  func.func @_conv_taps_kernel(%arg0: i32, %arg1: memref<1x24x1024xbf16, #tpu.memory_space<vmem>>, %arg2: memref<4x1024x256xbf16, #tpu.memory_space<vmem>>, %arg3: memref<1x256xf32, #tpu.memory_space<vmem>>, %arg4: memref<1x1x1x256xbf16, #tpu.memory_space<vmem>>, %arg5: memref<8x256xf32, #tpu.memory_space<vmem>>) attributes {dimension_semantics = [#tpu.dimension_semantics<parallel>], iteration_bounds = array<i64: 2>, scalar_prefetch = 0 : i64, scratch_operands = 1 : i64, tpu.core_type = #tpu.core_type<tc>, window_params = [{transform_indices = @transform_0, window_bounds = array<i64: 1, 24, 1024>}, {pipeline_mode = #tpu.pipeline_mode<synchronous>, transform_indices = @transform_1, window_bounds = array<i64: 4, 1024, 256>}, {pipeline_mode = #tpu.pipeline_mode<synchronous>, transform_indices = @transform_2, window_bounds = array<i64: 1, 256>}, {transform_indices = @transform_3, window_bounds = array<i64: 1, 1, 1, 256>}]} {
    %c0 = arith.constant 0 : index
    %c0_0 = arith.constant 0 : index
    %c0_1 = arith.constant 0 : index
    %0 = vector.load %arg1[%c0, %c0_0, %c0_1] : memref<1x24x1024xbf16, #tpu.memory_space<vmem>>, vector<1x16x1024xbf16>
    %1 = vector.shape_cast %0 : vector<1x16x1024xbf16> to vector<16x1024xbf16>
    %2 = vector.extract_strided_slice %1 {offsets = [0, 0], sizes = [8, 1024], strides = [1, 1]} : vector<16x1024xbf16> to vector<8x1024xbf16>
    %c0_2 = arith.constant 0 : index
    %c0_3 = arith.constant 0 : index
    %c0_4 = arith.constant 0 : index
    %3 = vector.load %arg2[%c0_2, %c0_3, %c0_4] : memref<4x1024x256xbf16, #tpu.memory_space<vmem>>, vector<1x1024x256xbf16>
    %4 = vector.shape_cast %3 : vector<1x1024x256xbf16> to vector<1024x256xbf16>
    %cst = arith.constant dense<0.000000e+00> : vector<8x256xf32>
    %5 = tpu.matmul %2, %4, %cst {dimension_numbers = #tpu.dot_dimension_numbers<[1], [0], [0], [1], [0, 0, 1, 1], [], []>} : vector<8x1024xbf16>, vector<1024x256xbf16>, vector<8x256xf32> -> vector<8x256xf32>
    %c0_5 = arith.constant 0 : index
    %c0_6 = arith.constant 0 : index
    %6 = vector.load %arg5[%c0_5, %c0_6] : memref<8x256xf32, #tpu.memory_space<vmem>>, vector<8x256xf32>
    tpu.vector_store %arg5[%c0_5, %c0_6], %5 {strides = array<i32>} : memref<8x256xf32, #tpu.memory_space<vmem>>, vector<8x256xf32>,
    %7 = vector.extract_strided_slice %1 {offsets = [8, 0], sizes = [8, 1024], strides = [1, 1]} : vector<16x1024xbf16> to vector<8x1024xbf16>
    %c2 = arith.constant 2 : index
    %c0_7 = arith.constant 0 : index
    %c0_8 = arith.constant 0 : index
    %8 = vector.load %arg2[%c2, %c0_7, %c0_8] : memref<4x1024x256xbf16, #tpu.memory_space<vmem>>, vector<1x1024x256xbf16>
    %9 = vector.shape_cast %8 : vector<1x1024x256xbf16> to vector<1024x256xbf16>
    %cst_9 = arith.constant dense<0.000000e+00> : vector<8x256xf32>
    %10 = tpu.matmul %7, %9, %cst_9 {dimension_numbers = #tpu.dot_dimension_numbers<[1], [0], [0], [1], [0, 0, 1, 1], [], []>} : vector<8x1024xbf16>, vector<1024x256xbf16>, vector<8x256xf32> -> vector<8x256xf32>
    %c0_10 = arith.constant 0 : index
    %c0_11 = arith.constant 0 : index
    %11 = vector.load %arg5[%c0_10, %c0_11] : memref<8x256xf32, #tpu.memory_space<vmem>>, vector<8x256xf32>
    %12 = arith.addf %11, %10 : vector<8x256xf32>
    %c0_12 = arith.constant 0 : index
    %c0_13 = arith.constant 0 : index
    %13 = vector.load %arg5[%c0_12, %c0_13] : memref<8x256xf32, #tpu.memory_space<vmem>>, vector<8x256xf32>
    tpu.vector_store %arg5[%c0_12, %c0_13], %12 {strides = array<i32>} : memref<8x256xf32, #tpu.memory_space<vmem>>, vector<8x256xf32>,
    %c0_14 = arith.constant 0 : index
    %c1 = arith.constant 1 : index
    %c0_15 = arith.constant 0 : index
    %14 = vector.load %arg1[%c0_14, %c1, %c0_15] : memref<1x24x1024xbf16, #tpu.memory_space<vmem>>, vector<1x16x1024xbf16>
    %15 = vector.shape_cast %14 : vector<1x16x1024xbf16> to vector<16x1024xbf16>
    %16 = vector.extract_strided_slice %15 {offsets = [0, 0], sizes = [8, 1024], strides = [1, 1]} : vector<16x1024xbf16> to vector<8x1024xbf16>
    %c1_16 = arith.constant 1 : index
    %c0_17 = arith.constant 0 : index
    %c0_18 = arith.constant 0 : index
    %17 = vector.load %arg2[%c1_16, %c0_17, %c0_18] : memref<4x1024x256xbf16, #tpu.memory_space<vmem>>, vector<1x1024x256xbf16>
    %18 = vector.shape_cast %17 : vector<1x1024x256xbf16> to vector<1024x256xbf16>
    %cst_19 = arith.constant dense<0.000000e+00> : vector<8x256xf32>
    %19 = tpu.matmul %16, %18, %cst_19 {dimension_numbers = #tpu.dot_dimension_numbers<[1], [0], [0], [1], [0, 0, 1, 1], [], []>} : vector<8x1024xbf16>, vector<1024x256xbf16>, vector<8x256xf32> -> vector<8x256xf32>
    %c0_20 = arith.constant 0 : index
    %c0_21 = arith.constant 0 : index
    %20 = vector.load %arg5[%c0_20, %c0_21] : memref<8x256xf32, #tpu.memory_space<vmem>>, vector<8x256xf32>
    %21 = arith.addf %20, %19 : vector<8x256xf32>
    %c0_22 = arith.constant 0 : index
    %c0_23 = arith.constant 0 : index
    %22 = vector.load %arg5[%c0_22, %c0_23] : memref<8x256xf32, #tpu.memory_space<vmem>>, vector<8x256xf32>
    tpu.vector_store %arg5[%c0_22, %c0_23], %21 {strides = array<i32>} : memref<8x256xf32, #tpu.memory_space<vmem>>, vector<8x256xf32>,
    %23 = vector.extract_strided_slice %15 {offsets = [8, 0], sizes = [8, 1024], strides = [1, 1]} : vector<16x1024xbf16> to vector<8x1024xbf16>
    %c3 = arith.constant 3 : index
    %c0_24 = arith.constant 0 : index
    %c0_25 = arith.constant 0 : index
    %24 = vector.load %arg2[%c3, %c0_24, %c0_25] : memref<4x1024x256xbf16, #tpu.memory_space<vmem>>, vector<1x1024x256xbf16>
    %25 = vector.shape_cast %24 : vector<1x1024x256xbf16> to vector<1024x256xbf16>
    %cst_26 = arith.constant dense<0.000000e+00> : vector<8x256xf32>
    %26 = tpu.matmul %23, %25, %cst_26 {dimension_numbers = #tpu.dot_dimension_numbers<[1], [0], [0], [1], [0, 0, 1, 1], [], []>} : vector<8x1024xbf16>, vector<1024x256xbf16>, vector<8x256xf32> -> vector<8x256xf32>
    %c0_27 = arith.constant 0 : index
    %c0_28 = arith.constant 0 : index
    %27 = vector.load %arg5[%c0_27, %c0_28] : memref<8x256xf32, #tpu.memory_space<vmem>>, vector<8x256xf32>
    %28 = arith.addf %27, %26 : vector<8x256xf32>
    %c0_29 = arith.constant 0 : index
    %c0_30 = arith.constant 0 : index
    %29 = vector.load %arg5[%c0_29, %c0_30] : memref<8x256xf32, #tpu.memory_space<vmem>>, vector<8x256xf32>
    tpu.vector_store %arg5[%c0_29, %c0_30], %28 {strides = array<i32>} : memref<8x256xf32, #tpu.memory_space<vmem>>, vector<8x256xf32>,
    %c0_31 = arith.constant 0 : index
    %c0_32 = arith.constant 0 : index
    %30 = vector.load %arg5[%c0_31, %c0_32] : memref<8x256xf32, #tpu.memory_space<vmem>>, vector<8x256xf32>
    %c0_33 = arith.constant 0 : index
    %c0_34 = arith.constant 0 : index
    %31 = vector.load %arg3[%c0_33, %c0_34] : memref<1x256xf32, #tpu.memory_space<vmem>>, vector<1x256xf32>
    %32 = vector.broadcast %31 : vector<1x256xf32> to vector<8x256xf32>
    %33 = arith.addf %30, %32 : vector<8x256xf32>
    %cst_35 = arith.constant 0.000000e+00 : f32
    %34 = vector.broadcast %cst_35 : f32 to vector<8x256xf32>
    %35 = arith.maximumf %33, %34 : vector<8x256xf32>
    %36 = vector.shape_cast %35 : vector<8x256xf32> to vector<1x8x256xf32>
    %37 = vector.extract_strided_slice %36 {offsets = [0, 0, 0], sizes = [1, 1, 256], strides = [1, 1, 1]} : vector<1x8x256xf32> to vector<1x1x256xf32>
    %38 = arith.truncf %37 : vector<1x1x256xf32> to vector<1x1x256xbf16>
    %c0_36 = arith.constant 0 : index
    %c0_37 = arith.constant 0 : index
    %c0_38 = arith.constant 0 : index
    %c0_39 = arith.constant 0 : index
    %39 = vector.load %arg4[%c0_36, %c0_37, %c0_38, %c0_39] : memref<1x1x1x256xbf16, #tpu.memory_space<vmem>>, vector<1x1x1x256xbf16>
    %40 = vector.shape_cast %39 : vector<1x1x1x256xbf16> to vector<1x1x256xbf16>
    %41 = vector.shape_cast %38 : vector<1x1x256xbf16> to vector<1x1x1x256xbf16>
    tpu.vector_store %arg4[%c0_36, %c0_37, %c0_38, %c0_39], %41 {strides = array<i32>} : memref<1x1x1x256xbf16, #tpu.memory_space<vmem>>, vector<1x1x1x256xbf16>,
    return
  }
  func.func @transform_0(%arg0: i32) -> (i32, i32, i32) {
    %c0_i32 = arith.constant 0 : i32
    %c0_i32_0 = arith.constant 0 : i32
    %c0_i32_1 = arith.constant 0 : i32
    return %arg0, %c0_i32, %c0_i32_0 : i32, i32, i32
  }
  func.func @transform_1(%arg0: i32) -> (i32, i32, i32) {
    %c0_i32 = arith.constant 0 : i32
    %c0_i32_0 = arith.constant 0 : i32
    %c0_i32_1 = arith.constant 0 : i32
    %c0_i32_2 = arith.constant 0 : i32
    return %c0_i32, %c0_i32_0, %c0_i32_1 : i32, i32, i32
  }
  func.func @transform_2(%arg0: i32) -> (i32, i32) {
    %c0_i32 = arith.constant 0 : i32
    %c0_i32_0 = arith.constant 0 : i32
    %c0_i32_1 = arith.constant 0 : i32
    return %c0_i32, %c0_i32_0 : i32, i32
  }
  func.func @transform_3(%arg0: i32) -> (i32, i32, i32, i32) {
    %c0_i32 = arith.constant 0 : i32
    %c0_i32_0 = arith.constant 0 : i32
    %c0_i32_1 = arith.constant 0 : i32
    %c0_i32_2 = arith.constant 0 : i32
    return %arg0, %c0_i32, %c0_i32_0, %c0_i32_1 : i32, i32, i32, i32
  }
}

module attributes {stable_mosaic.version = 11 : i64} {
  func.func @_mm_bias_res_relu_kernel(%arg0: i32, %arg1: memref<16x256xbf16, #tpu.memory_space<vmem>>, %arg2: memref<256x1024xbf16, #tpu.memory_space<vmem>>, %arg3: memref<1x1024xf32, #tpu.memory_space<vmem>>, %arg4: memref<16x1024xbf16, #tpu.memory_space<vmem>>, %arg5: memref<16x1024xbf16, #tpu.memory_space<vmem>>) attributes {dimension_semantics = [#tpu.dimension_semantics<parallel>], iteration_bounds = array<i64: 1>, scalar_prefetch = 0 : i64, scratch_operands = 0 : i64, tpu.core_type = #tpu.core_type<tc>, window_params = [{transform_indices = @transform_0, window_bounds = array<i64: 16, 256>}, {pipeline_mode = #tpu.pipeline_mode<synchronous>, transform_indices = @transform_1, window_bounds = array<i64: 256, 1024>}, {pipeline_mode = #tpu.pipeline_mode<synchronous>, transform_indices = @transform_2, window_bounds = array<i64: 1, 1024>}, {transform_indices = @transform_3, window_bounds = array<i64: 16, 1024>}, {transform_indices = @transform_4, window_bounds = array<i64: 16, 1024>}]} {
    %c0 = arith.constant 0 : index
    %c0_0 = arith.constant 0 : index
    %0 = vector.load %arg1[%c0, %c0_0] : memref<16x256xbf16, #tpu.memory_space<vmem>>, vector<16x256xbf16>
    %c0_1 = arith.constant 0 : index
    %c0_2 = arith.constant 0 : index
    %1 = vector.load %arg2[%c0_1, %c0_2] : memref<256x1024xbf16, #tpu.memory_space<vmem>>, vector<256x1024xbf16>
    %cst = arith.constant dense<0.000000e+00> : vector<16x1024xf32>
    %2 = tpu.matmul %0, %1, %cst {dimension_numbers = #tpu.dot_dimension_numbers<[1], [0], [0], [1], [0, 0, 1, 1], [], []>} : vector<16x256xbf16>, vector<256x1024xbf16>, vector<16x1024xf32> -> vector<16x1024xf32>
    %c0_3 = arith.constant 0 : index
    %c0_4 = arith.constant 0 : index
    %3 = vector.load %arg3[%c0_3, %c0_4] : memref<1x1024xf32, #tpu.memory_space<vmem>>, vector<1x1024xf32>
    %4 = vector.broadcast %3 : vector<1x1024xf32> to vector<16x1024xf32>
    %5 = arith.addf %2, %4 : vector<16x1024xf32>
    %c0_5 = arith.constant 0 : index
    %c0_6 = arith.constant 0 : index
    %6 = vector.load %arg4[%c0_5, %c0_6] : memref<16x1024xbf16, #tpu.memory_space<vmem>>, vector<16x1024xbf16>
    %7 = arith.extf %6 : vector<16x1024xbf16> to vector<16x1024xf32>
    %8 = arith.addf %5, %7 : vector<16x1024xf32>
    %cst_7 = arith.constant 0.000000e+00 : f32
    %9 = vector.broadcast %cst_7 : f32 to vector<16x1024xf32>
    %10 = arith.maximumf %8, %9 : vector<16x1024xf32>
    %11 = arith.truncf %10 : vector<16x1024xf32> to vector<16x1024xbf16>
    %c0_8 = arith.constant 0 : index
    %c0_9 = arith.constant 0 : index
    %12 = vector.load %arg5[%c0_8, %c0_9] : memref<16x1024xbf16, #tpu.memory_space<vmem>>, vector<16x1024xbf16>
    tpu.vector_store %arg5[%c0_8, %c0_9], %11 {strides = array<i32>} : memref<16x1024xbf16, #tpu.memory_space<vmem>>, vector<16x1024xbf16>,
    return
  }
  func.func @transform_0(%arg0: i32) -> (i32, i32) {
    %c0_i32 = arith.constant 0 : i32
    %c0_i32_0 = arith.constant 0 : i32
    return %arg0, %c0_i32 : i32, i32
  }
  func.func @transform_1(%arg0: i32) -> (i32, i32) {
    %c0_i32 = arith.constant 0 : i32
    %c0_i32_0 = arith.constant 0 : i32
    %c0_i32_1 = arith.constant 0 : i32
    return %c0_i32, %c0_i32_0 : i32, i32
  }
  func.func @transform_2(%arg0: i32) -> (i32, i32) {
    %c0_i32 = arith.constant 0 : i32
    %c0_i32_0 = arith.constant 0 : i32
    %c0_i32_1 = arith.constant 0 : i32
    return %c0_i32, %c0_i32_0 : i32, i32
  }
  func.func @transform_3(%arg0: i32) -> (i32, i32) {
    %c0_i32 = arith.constant 0 : i32
    %c0_i32_0 = arith.constant 0 : i32
    return %arg0, %c0_i32 : i32, i32
  }
  func.func @transform_4(%arg0: i32) -> (i32, i32) {
    %c0_i32 = arith.constant 0 : i32
    %c0_i32_0 = arith.constant 0 : i32
    return %arg0, %c0_i32 : i32, i32
  }
}

</mosaic_0001>

<bundles_post_ra>
// kernel: resnet_baseline_forward.16
= control target key start
LH: loop header
LB: loop body
LE: loop exit
PB: predicated region body
PF: predicated region fallthrough
CT: control target
= control target key end

     0   :  { %s303_s6 = smov 0   ;;  %s324_s0 = inlined_call_operand.vmem [shape: bf16[2,5,2,5,128], index: 0, kind: input, shape index: {}]   ;;  %s325_s1 = inlined_call_operand.vmem [shape: bf16[2,4,4,64], index: 1, kind: output, shape index: {}]  }
   0x1 LB: > { %s259_s7 = sadd.s32 4294967295, %s290_s6   ;;  %p263_p0 = scmp.ge.s32.totalorder %s290_s6, 1  ;;  %s290_s6 = sphi %s303_s6, %s11_s6  }
   0x2   : > { %p87_p1 = scmp.lt.s32.totalorder %s290_s6, 3 }
   0x4   : > { %p88_p2 = pnand %p263_p0, %p87_p1 }
   0x5   : > { %p107_p3 = scmp.lt.s32.totalorder (!%p88_p2), %s259_s7, 1  ;;  %s292_s12 = smov (!%p88_p2), 64   ;;  %vm199_vm0 = vcmask (!%p88_p2), 517120  }
   0x6   : > { %91 = sbr.rel (%p88_p2) target bundleno = 147 (0x93), region = 24 }
   0xd   : > { %s327_s7 = smov (!%p107_p3, %s259_s7), 1 }
   0xe   : > { %s274_s8 = smul.u32 40, %s327_s7  ;;  %s273_s13 = sshll.u32 %s327_s7, 3 }
   0xf   : > { %s116_s16 = scalar_lea.vmem %s325_s1, %s273_s13 }
  0x10   : > { %s111_s11 = scalar_lea.vmem %s324_s0, %s274_s8 }
  0x11   : > { %v119_v0 = vld [vmem:[%s111_s11 + $0x10] sm:$0x7]  ;;  %v120_v1 = vld [vmem:[%s111_s11 + $0x18] sm:$0x7]  ;;  %v269_v2 = vld [vmem:[%s111_s11 + $0x14] sm:$0x7] }
  0x12   : > { %v129_v3 = vmax.bf16 %v269_v2, %v119_v0  ;;  %v117_v4 = vld [vmem:[%s111_s11] sm:$0x7]  ;;  %v118_v5 = vld [vmem:[%s111_s11 + $0x8] sm:$0x7]  ;;  %v267_v6 = vld [vmem:[%s111_s11 + $0x4] sm:$0x7] }
  0x13   : > { %v127_v7 = vmax.bf16 %v267_v6, %v117_v4  ;;  %v121_v8 = vld [vmem:[%s111_s11 + $0x20] sm:$0x7]  ;;  %v270_v9 = vld [vmem:[%s111_s11 + $0x1c] sm:$0x7]  ;;  %v268_v10 = vld [vmem:[%s111_s11 + $0xc] sm:$0x7] }
  0x14   : > { %v133_v11 = vmax.bf16 %v129_v3, %v120_v1  ;;  %v130_v12 = vmax.bf16 %v270_v9, %v120_v1  ;;  %v128_v13 = vmax.bf16 %v268_v10, %v118_v5 }
  0x15   : > { %v131_v14 = vmax.bf16 %v127_v7, %v118_v5 }
  0x16   : > { %143 = vrot.lane.b32.xlu1 %v133_v11, %s292_s12  ;;  %v134_v15 = vmax.bf16 %v130_v12, %v121_v8  ;;  %v132_v16 = vmax.bf16 %v128_v13, %v119_v0  ;;  %v174_v17 = vshrl.u32 %v133_v11, 16  ;;  %v177_v18 = vshll.u32 %v133_v11, 16 }
  0x17   : > { %139 = vrot.lane.b32.xlu0 %v131_v14, %s292_s12  ;;  %v156_v19 = vshrl.u32 %v131_v14, 16  ;;  %v159_v20 = vshll.u32 %v131_v14, 16 }
  0x18   : > { %v176_v21 = vrot.slane %v174_v17, 4  ;;  %v179_v22 = vrot.slane %v177_v18, 5  ;;  %v183_v23 = vshrl.u32 %v134_v15, 16  ;;  %v186_v24 = vshll.u32 %v134_v15, 16 }
  0x19   : > { %v158_v25 = vrot.slane %v156_v19, 4  ;;  %v161_v26 = vrot.slane %v159_v20, 5  ;;  %v165_v27 = vshrl.u32 %v132_v16, 16  ;;  %v168_v28 = vshll.u32 %v132_v16, 16 }
  0x1a   : > { %145 = vrot.lane.b32.xlu1 %v134_v15, %s292_s12  ;;  %v180_v29 = vor.u32 %v179_v22, %v176_v21  ;;  %v185_v30 = vrot.slane %v183_v23, 4  ;;  %v188_v31 = vrot.slane %v186_v24, 5 }
  0x1b   : > { %141 = vrot.lane.b32.xlu0 %v132_v16, %s292_s12  ;;  %v162_v32 = vor.u32 %v161_v26, %v158_v25  ;;  %v167_v33 = vrot.slane %v165_v27, 4  ;;  %v170_v34 = vrot.slane %v168_v28, 5 }
  0x1c   : > { %v181_v35 = vrot.slane %v180_v29, 4  ;;  %v189_v36 = vor.u32 %v188_v31, %v185_v30 }
  0x1d   : > { %v163_v38 = vrot.slane %v162_v32, 4  ;;  %v171_v39 = vor.u32 %v170_v34, %v167_v33 }
  0x1e   : > { %v190_v44 = vrot.slane %v189_v36, 4 }
  0x1f   : > { %v172_v47 = vrot.slane %v171_v39, 4 }
  0x88   : > { %v144_v37 = vpop.permute.xlu1 %143 }
  0x89   : > { %v153_v40 = vmax.bf16 %v144_v37, %v133_v11  ;;  %v140_v41 = vpop.permute.xlu0 %139 }
  0x8a   : > { %v151_v42 = vmax.bf16 %v140_v41, %v131_v14 }
  0x8b   : > { %v197_v43 = vmax.bf16 %v181_v35, %v153_v40 }
  0x8c   : > { %v195_v45 = vmax.bf16 %v163_v38, %v151_v42  ;;  %v146_v46 = vpop.permute.xlu1 %145 }
  0x8d   : > { %202 = vst.msk [vmem:[%s116_s16 + $0x4] sm:$0x3] %vm199_vm0, %v197_v43  ;;  %v154_v48 = vmax.bf16 %v146_v46, %v134_v15  ;;  %v142_v49 = vpop.permute.xlu0 %141 }
  0x8e   : > { %200 = vst.msk [vmem:[%s116_s16] sm:$0x3] %vm199_vm0, %v195_v45  ;;  %v152_v50 = vmax.bf16 %v142_v49, %v132_v16 }
  0x8f   : > { %v198_v51 = vmax.bf16 %v190_v44, %v154_v48 }
  0x90   : > { %v196_v52 = vmax.bf16 %v172_v47, %v152_v50 }
  0x91   : > { %203 = vst.msk [vmem:[%s116_s16 + $0x6] sm:$0x3] %vm199_vm0, %v198_v51 }
  0x92   : > { %201 = vst.msk [vmem:[%s116_s16 + $0x2] sm:$0x3] %vm199_vm0, %v196_v52 }
  0x93 PF: > { %s11_s6 = sadd.s32 1, %s290_s6  }
  0x94   : > { %p8_p4 = scmp.ge.s32.totalorder %s11_s6, 4  }
  0x96   :  { %10 = sbr.rel (!%p8_p4) target bundleno = 1 (0x1), region = 55 }

// kernel: resnet_baseline_forward.17
= control target key start
LH: loop header
LB: loop body
LE: loop exit
PB: predicated region body
PF: predicated region fallthrough
CT: control target
= control target key end

     0   :  { %vm68_vm0 = vcmask 523264   ;;  %vm144_vm1 = vcmask 519168   ;;  %s247_s1 = inlined_call_operand.vmem [shape: bf16[64,64], index: 1, kind: input, shape index: {}]   ;;  %s248_s0 = inlined_call_operand.vmem [shape: bf16[32,64], index: 0, kind: input, shape index: {}]   ;;  %s249_s2 = inlined_call_operand.vmem [shape: f32[1,64], index: 2, kind: input, shape index: {}]   ;;  %s250_s3 = inlined_call_operand.vmem [shape: bf16[32,64], index: 3, kind: output, shape index: {}]  }
   0x1   :  { %v188_v0 = vld [vmem:[%s247_s1] sm:$0xff]   ;;  %v189_v1 = vld [vmem:[%s247_s1 + $0x8] sm:$0xff]   ;;  %v190_v2 = vld [vmem:[%s247_s1 + $0x10] sm:$0xff]  }
   0x2   :  { %176 = vmatprep.subr.bf16.mxu0 %v188_v0  ;;  %v192_v3 = vld [vmem:[%s248_s0] sm:$0xff]   ;;  %v191_v4 = vld [vmem:[%s247_s1 + $0x18] sm:$0xff]   ;;  %v193_v5 = vld [vmem:[%s248_s0 + $0x8] sm:$0xff]  }
   0x3   :  { %177 = vmatpush3.bf16.msra.mxu0 %v188_v0  ;;  %184 = vmatprep.mubr.msk.bf16.mxu0 %vm68_vm0, %v192_v3  ;;  %v153_v6 = vld [vmem:[%s249_s2] ss:$0 sm:$0xff] }
   0x4   :  { %178 = vmatprep.subr.bf16.mxu0 %v189_v1 }
   0x7   :  { %179 = vmatpush3.bf16.msra.mxu0 %v189_v1 }
   0x8   :  { %180 = vmatprep.subr.bf16.mxu0 %v190_v2 }
   0xb   :  { %181 = vmatpush3.bf16.msra.mxu0 %v190_v2 }
   0xc   :  { %182 = vmatprep.subr.bf16.mxu0 %v191_v4 }
   0xf   :  { %183 = vmatpush3.bf16.msra.mxu0 %v191_v4 }
  0x12   :  { %185 = vmatmul.mubr.msk.bf16.vlgmr.msra.gmra.mrb[0].mxu0 %vm68_vm0, %v193_v5 }
  0xe5   :  { %v186_v7 = vpop.f32.mrb[0].mxu0 }
  0xe6   :  { %v118_v8 = vadd.f32 %v186_v7, %v153_v6  ;;  %v109_v9 = vpop.f32.mrb[1].mxu0 }
  0xe7   :  { %v110_v10 = vadd.f32 %v153_v6, %v109_v9  ;;  %v187_v11 = vpop.f32.mrb[2].mxu0 }
  0xe8   :  { %v126_v12 = vmax.f32 %v118_v8, 0.0  ;;  %v121_v13 = vadd.f32 %v187_v11, %v153_v6  ;;  %v112_v14 = vpop.f32.mrb[3].mxu0 }
  0xe9   :  { %v124_v15 = vmax.f32 %v110_v10, 0.0  ;;  %v113_v16 = vadd.f32 %v153_v6, %v112_v14 }
  0xea   :  { %v168_v17 = vpack.c.bf16 %v126_v12, %v126_v12  ;;  %v127_v18 = vmax.f32 %v121_v13, 0.0 }
  0xeb   :  { %v166_v19 = vpack.c.bf16 %v124_v15, %v124_v15  ;;  %v125_v20 = vmax.f32 %v113_v16, 0.0 }
  0xec   :  { %147 = vst.msk [vmem:[%s250_s3 + $0x8] sm:$0xf] %vm144_vm1, %v168_v17  ;;  %v169_v21 = vpack.c.bf16 %v127_v18, %v127_v18 }
  0xed   :  { %145 = vst.msk [vmem:[%s250_s3] sm:$0xf] %vm144_vm1, %v166_v19  ;;  %v167_v22 = vpack.c.bf16 %v125_v20, %v125_v20 }
  0xee   :  { %148 = vst.msk [vmem:[%s250_s3 + $0xc] sm:$0xf] %vm144_vm1, %v169_v21 }
  0xef   :  { %146 = vst.msk [vmem:[%s250_s3 + $0x4] sm:$0xf] %vm144_vm1, %v167_v22 }

// kernel: resnet_baseline_forward.19
= control target key start
LH: loop header
LB: loop body
LE: loop exit
PB: predicated region body
PF: predicated region fallthrough
CT: control target
= control target key end

     0   :  { %v224_v1 = vmov 0   ;;  %vm89_vm0 = vcmask 523264   ;;  %v29_v11 = vlaneseq  ;;  %s290_s1 = inlined_call_operand.vmem [shape: bf16[64,256], index: 1, kind: input, shape index: {}]   ;;  %s291_s0 = inlined_call_operand.vmem [shape: bf16[32,64], index: 0, kind: input, shape index: {}]   ;;  %s292_s2 = inlined_call_operand.vmem [shape: f32[1,256], index: 2, kind: input, shape index: {}]   ;;  %s293_s3 = inlined_call_operand.vmem [shape: bf16[32,256], index: 3, kind: output, shape index: {}]  }
   0x1   :  { %v210_v0 = vld [vmem:[%s290_s1 + $0x4] ss:$8 sps:$4 sm:$0xff]   ;;  %128 = vmatprep.mubr.bf16.mxu0 %v224_v1  ;;  %138 = vmatprep.mubr.bf16.mxu1 %v224_v1  ;;  %v212_v2 = vld [vmem:[%s290_s1] ss:$8 sps:$4 sm:$0xff]   ;;  %v213_v3 = vld [vmem:[%s290_s1 + $0x14] ss:$8 sps:$4 sm:$0xff]  }
   0x2   :  { %96 = vmatprep.subr.bf16.mxu0 %v210_v0  ;;  %201 = vmatprep.subr.bf16.mxu1 %v210_v0  ;;  %v215_v4 = vld [vmem:[%s290_s1 + $0x10] ss:$8 sps:$4 sm:$0xff]   ;;  %v216_v5 = vld [vmem:[%s290_s1 + $0x24] ss:$8 sps:$4 sm:$0xff]   ;;  %v218_v6 = vld [vmem:[%s290_s1 + $0x20] ss:$8 sps:$4 sm:$0xff]  }
   0x3   :  { %97 = vmatpush1.bf16.msra.mxu0 %v212_v2  ;;  %205 = vmatpush1.bf16.msra.mxu1 %v212_v2  ;;  %v219_v7 = vld [vmem:[%s290_s1 + $0x34] ss:$8 sps:$4 sm:$0xff]   ;;  %v221_v8 = vld [vmem:[%s290_s1 + $0x30] ss:$8 sps:$4 sm:$0xff]   ;;  %v222_v9 = vld [vmem:[%s291_s0] sm:$0xff]   ;;  %v30_v12 = vshrl.u32 %v29_v11, 7 }
   0x4   :  { %98 = vmatprep.subr.bf16.mxu0 %v213_v3  ;;  %202 = vmatprep.subr.bf16.mxu1 %v213_v3  ;;  %v223_v10 = vld [vmem:[%s291_s0 + $0x8] sm:$0xff]   ;;  %v27_v14 = vld [vmem:[%s292_s2] sm:$0x3] }
   0x5   :  { %v31_v13 = vsub.s32 0, %v30_v12  ;;  %v35_v15 = vsub.s32 1, %v30_v12 }
   0x7   :  { %99 = vmatpush1.bf16.msra.mxu0 %v215_v4  ;;  %206 = vmatpush1.bf16.msra.mxu1 %v215_v4  ;;  %v32_v16 = vrot.slane %v27_v14, %v31_v13  ;;  %v36_v17 = vrot.slane %v27_v14, %v35_v15 }
   0x8   :  { %100 = vmatprep.subr.bf16.mxu0 %v216_v5  ;;  %203 = vmatprep.subr.bf16.mxu1 %v216_v5 }
   0xb   :  { %101 = vmatpush1.bf16.msra.mxu0 %v218_v6  ;;  %207 = vmatpush1.bf16.msra.mxu1 %v218_v6 }
   0xc   :  { %102 = vmatprep.subr.bf16.mxu0 %v219_v7  ;;  %204 = vmatprep.subr.bf16.mxu1 %v219_v7 }
   0xf   :  { %103 = vmatpush1.bf16.msra.mxu0 %v221_v8  ;;  %208 = vmatpush1.bf16.msra.mxu1 %v221_v8 }
  0x12   :  { %191 = vmatmul.mubr.msk.bf16.vlgmr.msra.gmra.mrb[0].mxu0 %vm89_vm0, %v222_v9  ;;  %192 = vmatmul.mubr.msk.bf16.vlgmr.msra.gmra.mrb[0].mxu1 %vm89_vm0, %v223_v10 }
  0xe5   :  { %v130_v18 = vpop.f32.mrb[0].mxu0  ;;  %v140_v19 = vpop.f32.mrb[0].mxu1 }
  0xe6   :  { %v131_v20 = vadd.f32 %v130_v18, %v32_v16  ;;  %v141_v21 = vadd.f32 %v140_v19, %v32_v16  ;;  %v132_v22 = vpop.f32.mrb[1].mxu0  ;;  %v142_v23 = vpop.f32.mrb[1].mxu1 }
  0xe7   :  { %v133_v24 = vadd.f32 %v132_v22, %v36_v17  ;;  %v143_v25 = vadd.f32 %v142_v23, %v36_v17  ;;  %v134_v26 = vpop.f32.mrb[2].mxu0  ;;  %v144_v27 = vpop.f32.mrb[2].mxu1 }
  0xe8   :  { %v135_v28 = vadd.f32 %v134_v26, %v32_v16  ;;  %v145_v29 = vadd.f32 %v144_v27, %v32_v16  ;;  %v136_v30 = vpop.f32.mrb[3].mxu0  ;;  %v146_v31 = vpop.f32.mrb[3].mxu1 }
  0xe9   :  { %v197_v32 = vpack.c.bf16 %v133_v24, %v131_v20  ;;  %v199_v33 = vpack.c.bf16 %v143_v25, %v141_v21  ;;  %v137_v34 = vadd.f32 %v136_v30, %v36_v17  ;;  %v147_v35 = vadd.f32 %v146_v31, %v36_v17 }
  0xeb   :  { %173 = vst [vmem:[%s293_s3] sm:$0xff] %v197_v32  ;;  %175 = vst [vmem:[%s293_s3 + $0x10] sm:$0xff] %v199_v33  ;;  %v198_v36 = vpack.c.bf16 %v137_v34, %v135_v28  ;;  %v200_v37 = vpack.c.bf16 %v147_v35, %v145_v29 }
  0xed   :  { %174 = vst [vmem:[%s293_s3 + $0x8] sm:$0xff] %v198_v36  ;;  %176 = vst [vmem:[%s293_s3 + $0x18] sm:$0xff] %v200_v37 }

// kernel: resnet_baseline_forward.15
= control target key start
LH: loop header
LB: loop body
LE: loop exit
PB: predicated region body
PF: predicated region fallthrough
CT: control target
= control target key end

     0   :  { %v539_v0 = vmov 0   ;;  %vm186_vm0 = vcmask 154624   ;;  %vm211_vm1 = vcmask 1040384   ;;  %vm212_vm2 = vcmask 1041408   ;;  %s732_s1 = inlined_call_operand.vmem [shape: bf16[147,64], index: 1, kind: input, shape index: {}]   ;;  %s733_s0 = inlined_call_operand.vmem [shape: bf16[128,147], index: 0, kind: input, shape index: {}]   ;;  %s734_s2 = inlined_call_operand.vmem [shape: f32[1,64], index: 2, kind: input, shape index: {}]   ;;  %s735_s3 = inlined_call_operand.vmem [shape: bf16[128,64], index: 3, kind: output, shape index: {}]  }
   0x1   :  { %218 = vmatprep.subr.bf16.mxu0 %v539_v0  ;;  %483 = vmatprep.subr.bf16.mxu1 %v539_v0  ;;  %v505_v1 = vld [vmem:[%s732_s1] sm:$0xff]   ;;  %v506_v2 = vld [vmem:[%s732_s1 + $0x8] sm:$0xff]   ;;  %v507_v3 = vld [vmem:[%s732_s1 + $0x10] sm:$0xff]   ;;  %v540_v11 = vmov 65535   ;;  %vm395_vm3 = vcmask 519168  }
   0x2   :  { %219 = vmatpush1.bf16.msra.mxu0 %v505_v1  ;;  %493 = vmatpush1.bf16.msra.mxu1 %v505_v1  ;;  %v508_v4 = vld [vmem:[%s732_s1 + $0x18] sm:$0xff]   ;;  %v517_v5 = vld [vmem:[%s733_s0 + $0x4] ss:$8 sps:$4 sm:$0xff]   ;;  %v511_v9 = vld [vmem:[%s732_s1 + $0x30] sm:$0xff]   ;;  %v213_v12 = vsel %vm211_vm1, 4294967295, %v540_v11 }
   0x3   :  { %220 = vmatprep.subr.bf16.mxu0 %v539_v0  ;;  %484 = vmatprep.subr.bf16.mxu1 %v539_v0  ;;  %v520_v6 = vld [vmem:[%s733_s0 + $0x44] ss:$8 sps:$4 sm:$0xff]   ;;  %v512_v10 = vld [vmem:[%s732_s1 + $0x38] sm:$0xff]   ;;  %v514_v14 = vld [vmem:[%s732_s1 + $0x48] ss:$0 sps:$4 sm:$0x33]  }
   0x4   :  { %443 = vmatprep.mubr.msk.bf16.mxu0 %vm186_vm0, %v517_v5  ;;  %v509_v7 = vld [vmem:[%s732_s1 + $0x20] sm:$0xff]   ;;  %447 = vmatprep.mubr.msk.bf16.mxu1 %vm186_vm0, %v520_v6  ;;  %v510_v8 = vld [vmem:[%s732_s1 + $0x28] sm:$0xff]   ;;  %v214_v15 = vsel %vm212_vm2, %v213_v12, 0  ;;  %v521_v19 = vld [vmem:[%s733_s0 + $0x14] ss:$8 sps:$4 sm:$0xff]  }
   0x5   :  { %v513_v13 = vld [vmem:[%s732_s1 + $0x40] sm:$0xff]   ;;  %v216_v16 = vand.u32 %v514_v14, %v214_v15  ;;  %v523_v20 = vld [vmem:[%s733_s0 + $0x54] ss:$8 sps:$4 sm:$0xff]   ;;  %v525_v21 = vld [vmem:[%s733_s0 + $0x10] ss:$8 sps:$4 sm:$0xff]  }
   0x6   :  { %221 = vmatpush1.bf16.msra.mxu0 %v506_v2  ;;  %494 = vmatpush1.bf16.msra.mxu1 %v506_v2  ;;  %v515_v17 = vld [vmem:[%s733_s0] ss:$8 sps:$4 sm:$0xff]   ;;  %v526_v22 = vld [vmem:[%s733_s0 + $0x50] ss:$8 sps:$4 sm:$0xff]   ;;  %v527_v23 = vld [vmem:[%s733_s0 + $0x24] ss:$8 sps:$4 sm:$0xff]  }
   0x7   :  { %222 = vmatprep.subr.bf16.mxu0 %v539_v0  ;;  %485 = vmatprep.subr.bf16.mxu1 %v539_v0  ;;  %v518_v18 = vld [vmem:[%s733_s0 + $0x40] ss:$8 sps:$4 sm:$0xff]   ;;  %v529_v24 = vld [vmem:[%s733_s0 + $0x64] ss:$8 sps:$4 sm:$0xff]   ;;  %v533_v27 = vld [vmem:[%s733_s0 + $0x34] ss:$8 sps:$4 sm:$0xff]  }
   0x8   :  { %v531_v25 = vld [vmem:[%s733_s0 + $0x20] ss:$8 sps:$4 sm:$0xff]   ;;  %v535_v28 = vld [vmem:[%s733_s0 + $0x74] ss:$8 sps:$4 sm:$0xff]   ;;  %v537_v29 = vld [vmem:[%s733_s0 + $0x30] ss:$8 sps:$4 sm:$0xff]  }
   0x9   :  { %v532_v26 = vld [vmem:[%s733_s0 + $0x60] ss:$8 sps:$4 sm:$0xff]   ;;  %v538_v30 = vld [vmem:[%s733_s0 + $0x70] ss:$8 sps:$4 sm:$0xff]  }
   0xa   :  { %223 = vmatpush1.bf16.msra.mxu0 %v507_v3  ;;  %495 = vmatpush1.bf16.msra.mxu1 %v507_v3  ;;  %v650_v31 = vld [vmem:[%s734_s2] ss:$0 sm:$0xff] }
   0xb   :  { %224 = vmatprep.subr.bf16.mxu0 %v539_v0  ;;  %486 = vmatprep.subr.bf16.mxu1 %v539_v0 }
   0xe   :  { %225 = vmatpush1.bf16.msra.mxu0 %v508_v4  ;;  %496 = vmatpush1.bf16.msra.mxu1 %v508_v4 }
   0xf   :  { %226 = vmatprep.subr.bf16.mxu0 %v539_v0  ;;  %487 = vmatprep.subr.bf16.mxu1 %v539_v0 }
  0x12   :  { %227 = vmatpush1.bf16.msra.mxu0 %v509_v7  ;;  %497 = vmatpush1.bf16.msra.mxu1 %v509_v7 }
  0x13   :  { %228 = vmatprep.subr.bf16.mxu0 %v539_v0  ;;  %488 = vmatprep.subr.bf16.mxu1 %v539_v0 }
  0x16   :  { %229 = vmatpush1.bf16.msra.mxu0 %v510_v8  ;;  %498 = vmatpush1.bf16.msra.mxu1 %v510_v8 }
  0x17   :  { %230 = vmatprep.subr.bf16.mxu0 %v539_v0  ;;  %489 = vmatprep.subr.bf16.mxu1 %v539_v0 }
  0x1a   :  { %231 = vmatpush1.bf16.msra.mxu0 %v511_v9  ;;  %499 = vmatpush1.bf16.msra.mxu1 %v511_v9 }
  0x1b   :  { %232 = vmatprep.subr.bf16.mxu0 %v539_v0  ;;  %490 = vmatprep.subr.bf16.mxu1 %v539_v0 }
  0x1e   :  { %233 = vmatpush1.bf16.msra.mxu0 %v512_v10  ;;  %500 = vmatpush1.bf16.msra.mxu1 %v512_v10 }
  0x1f   :  { %234 = vmatprep.subr.bf16.mxu0 %v539_v0  ;;  %491 = vmatprep.subr.bf16.mxu1 %v539_v0 }
  0x22   :  { %235 = vmatpush1.bf16.msra.mxu0 %v513_v13  ;;  %501 = vmatpush1.bf16.msra.mxu1 %v513_v13 }
  0x23   :  { %236 = vmatprep.subr.bf16.mxu0 %v539_v0  ;;  %492 = vmatprep.subr.bf16.mxu1 %v539_v0 }
  0x26   :  { %237 = vmatpush1.bf16.msra.mxu0 %v216_v16  ;;  %502 = vmatpush1.bf16.msra.mxu1 %v216_v16 }
  0x29   :  { %251 = vmatmul.mubr.bf16.vlgmr.msra.gmra.mrb[0].mxu0 %v515_v17  ;;  %283 = vmatmul.mubr.bf16.vlgmr.msra.gmra.mrb[0].mxu1 %v518_v18 }
  0x2a   :  { %444 = vmatprep.mubr.msk.bf16.mxu0 %vm186_vm0, %v521_v19  ;;  %448 = vmatprep.mubr.msk.bf16.mxu1 %vm186_vm0, %v523_v20 }
  0x31   :  { %259 = vmatmul.mubr.bf16.gmra.mrb[4].mxu0 %v525_v21  ;;  %291 = vmatmul.mubr.bf16.gmra.mrb[4].mxu1 %v526_v22 }
  0x32   :  { %445 = vmatprep.mubr.msk.bf16.mxu0 %vm186_vm0, %v527_v23  ;;  %449 = vmatprep.mubr.msk.bf16.mxu1 %vm186_vm0, %v529_v24 }
  0x39   :  { %267 = vmatmul.mubr.bf16.gmra.mrb[8].mxu0 %v531_v25  ;;  %299 = vmatmul.mubr.bf16.gmra.mrb[8].mxu1 %v532_v26 }
  0x3a   :  { %446 = vmatprep.mubr.msk.bf16.mxu0 %vm186_vm0, %v533_v27  ;;  %450 = vmatprep.mubr.msk.bf16.mxu1 %vm186_vm0, %v535_v28 }
  0x41   :  { %275 = vmatmul.mubr.bf16.gmra.mrb[12].mxu0 %v537_v29  ;;  %307 = vmatmul.mubr.bf16.gmra.mrb[12].mxu1 %v538_v30 }
  0xfc   :  { %v252_v32 = vpop.f32.mrb[0].mxu0  ;;  %v284_v33 = vpop.f32.mrb[0].mxu1 }
  0xfd   :  { %v253_v34 = vadd.f32 %v650_v31, %v252_v32  ;;  %v285_v35 = vadd.f32 %v650_v31, %v284_v33  ;;  %v254_v36 = vpop.f32.mrb[1].mxu0  ;;  %v286_v37 = vpop.f32.mrb[1].mxu1 }
  0xfe   :  { %v255_v38 = vpop.f32.mrb[2].mxu0  ;;  %v287_v39 = vpop.f32.mrb[2].mxu1 }
  0xff   :  { %v315_v40 = vmax.f32 %v253_v34, 0.0  ;;  %v323_v41 = vmax.f32 %v285_v35, 0.0  ;;  %v256_v42 = vadd.f32 %v650_v31, %v255_v38  ;;  %v288_v43 = vadd.f32 %v650_v31, %v287_v39  ;;  %v257_v44 = vpop.f32.mrb[3].mxu0  ;;  %v289_v45 = vpop.f32.mrb[3].mxu1 }
 0x101   :  { %v467_v46 = vpack.c.bf16 %v315_v40, %v315_v40  ;;  %v475_v47 = vpack.c.bf16 %v323_v41, %v323_v41  ;;  %v316_v48 = vmax.f32 %v256_v42, 0.0  ;;  %v324_v49 = vmax.f32 %v288_v43, 0.0 }
 0x103   :  { %396 = vst.msk [vmem:[%s735_s3] sm:$0xf] %vm395_vm3, %v467_v46  ;;  %404 = vst.msk [vmem:[%s735_s3 + $0x20] sm:$0xf] %vm395_vm3, %v475_v47  ;;  %v468_v50 = vpack.c.bf16 %v316_v48, %v316_v48  ;;  %v476_v51 = vpack.c.bf16 %v324_v49, %v324_v49 }
 0x104   :  { %v260_v52 = vpop.f32.mrb[4].mxu0  ;;  %v292_v53 = vpop.f32.mrb[4].mxu1 }
 0x105   :  { %397 = vst.msk [vmem:[%s735_s3 + $0x4] sm:$0xf] %vm395_vm3, %v468_v50  ;;  %405 = vst.msk [vmem:[%s735_s3 + $0x24] sm:$0xf] %vm395_vm3, %v476_v51  ;;  %v261_v54 = vadd.f32 %v650_v31, %v260_v52  ;;  %v293_v55 = vadd.f32 %v650_v31, %v292_v53  ;;  %v262_v56 = vpop.f32.mrb[5].mxu0  ;;  %v294_v57 = vpop.f32.mrb[5].mxu1 }
 0x106   :  { %v263_v58 = vpop.f32.mrb[6].mxu0  ;;  %v295_v59 = vpop.f32.mrb[6].mxu1 }
 0x107   :  { %v317_v60 = vmax.f32 %v261_v54, 0.0  ;;  %v325_v61 = vmax.f32 %v293_v55, 0.0  ;;  %v264_v62 = vadd.f32 %v650_v31, %v263_v58  ;;  %v296_v63 = vadd.f32 %v650_v31, %v295_v59  ;;  %v265_v0 = vpop.f32.mrb[7].mxu0  ;;  %v297_v1 = vpop.f32.mrb[7].mxu1 }
 0x109   :  { %v469_v2 = vpack.c.bf16 %v317_v60, %v317_v60  ;;  %v477_v3 = vpack.c.bf16 %v325_v61, %v325_v61  ;;  %v318_v4 = vmax.f32 %v264_v62, 0.0  ;;  %v326_v5 = vmax.f32 %v296_v63, 0.0 }
 0x10b   :  { %398 = vst.msk [vmem:[%s735_s3 + $0x8] sm:$0xf] %vm395_vm3, %v469_v2  ;;  %406 = vst.msk [vmem:[%s735_s3 + $0x28] sm:$0xf] %vm395_vm3, %v477_v3  ;;  %v470_v6 = vpack.c.bf16 %v318_v4, %v318_v4  ;;  %v478_v7 = vpack.c.bf16 %v326_v5, %v326_v5 }
 0x10c   :  { %v268_v8 = vpop.f32.mrb[8].mxu0  ;;  %v300_v9 = vpop.f32.mrb[8].mxu1 }
 0x10d   :  { %399 = vst.msk [vmem:[%s735_s3 + $0xc] sm:$0xf] %vm395_vm3, %v470_v6  ;;  %407 = vst.msk [vmem:[%s735_s3 + $0x2c] sm:$0xf] %vm395_vm3, %v478_v7  ;;  %v269_v10 = vadd.f32 %v650_v31, %v268_v8  ;;  %v301_v11 = vadd.f32 %v650_v31, %v300_v9  ;;  %v270_v12 = vpop.f32.mrb[9].mxu0  ;;  %v302_v13 = vpop.f32.mrb[9].mxu1 }
 0x10e   :  { %v271_v14 = vpop.f32.mrb[10].mxu0  ;;  %v303_v15 = vpop.f32.mrb[10].mxu1 }
 0x10f   :  { %v319_v16 = vmax.f32 %v269_v10, 0.0  ;;  %v327_v17 = vmax.f32 %v301_v11, 0.0  ;;  %v272_v18 = vadd.f32 %v650_v31, %v271_v14  ;;  %v304_v19 = vadd.f32 %v650_v31, %v303_v15  ;;  %v273_v20 = vpop.f32.mrb[11].mxu0  ;;  %v305_v21 = vpop.f32.mrb[11].mxu1 }
 0x111   :  { %v471_v22 = vpack.c.bf16 %v319_v16, %v319_v16  ;;  %v479_v23 = vpack.c.bf16 %v327_v17, %v327_v17  ;;  %v320_v24 = vmax.f32 %v272_v18, 0.0  ;;  %v328_v25 = vmax.f32 %v304_v19, 0.0 }
 0x113   :  { %400 = vst.msk [vmem:[%s735_s3 + $0x10] sm:$0xf] %vm395_vm3, %v471_v22  ;;  %408 = vst.msk [vmem:[%s735_s3 + $0x30] sm:$0xf] %vm395_vm3, %v479_v23  ;;  %v472_v26 = vpack.c.bf16 %v320_v24, %v320_v24  ;;  %v480_v27 = vpack.c.bf16 %v328_v25, %v328_v25 }
 0x114   :  { %v276_v28 = vpop.f32.mrb[12].mxu0  ;;  %v308_v29 = vpop.f32.mrb[12].mxu1 }
 0x115   :  { %401 = vst.msk [vmem:[%s735_s3 + $0x14] sm:$0xf] %vm395_vm3, %v472_v26  ;;  %409 = vst.msk [vmem:[%s735_s3 + $0x34] sm:$0xf] %vm395_vm3, %v480_v27  ;;  %v277_v30 = vadd.f32 %v650_v31, %v276_v28  ;;  %v309_v32 = vadd.f32 %v650_v31, %v308_v29  ;;  %v278_v33 = vpop.f32.mrb[13].mxu0  ;;  %v310_v34 = vpop.f32.mrb[13].mxu1 }
 0x116   :  { %v279_v35 = vpop.f32.mrb[14].mxu0  ;;  %v311_v36 = vpop.f32.mrb[14].mxu1 }
 0x117   :  { %v321_v37 = vmax.f32 %v277_v30, 0.0  ;;  %v329_v38 = vmax.f32 %v309_v32, 0.0  ;;  %v280_v39 = vadd.f32 %v650_v31, %v279_v35  ;;  %v312_v40 = vadd.f32 %v650_v31, %v311_v36  ;;  %v281_v41 = vpop.f32.mrb[15].mxu0  ;;  %v313_v42 = vpop.f32.mrb[15].mxu1 }
 0x119   :  { %v473_v43 = vpack.c.bf16 %v321_v37, %v321_v37  ;;  %v481_v44 = vpack.c.bf16 %v329_v38, %v329_v38  ;;  %v322_v45 = vmax.f32 %v280_v39, 0.0  ;;  %v330_v46 = vmax.f32 %v312_v40, 0.0 }
 0x11b   :  { %402 = vst.msk [vmem:[%s735_s3 + $0x18] sm:$0xf] %vm395_vm3, %v473_v43  ;;  %410 = vst.msk [vmem:[%s735_s3 + $0x38] sm:$0xf] %vm395_vm3, %v481_v44  ;;  %v474_v47 = vpack.c.bf16 %v322_v45, %v322_v45  ;;  %v482_v48 = vpack.c.bf16 %v330_v46, %v330_v46 }
 0x11d   :  { %403 = vst.msk [vmem:[%s735_s3 + $0x1c] sm:$0xf] %vm395_vm3, %v474_v47  ;;  %411 = vst.msk [vmem:[%s735_s3 + $0x3c] sm:$0xf] %vm395_vm3, %v482_v48 }

// kernel: resnet_baseline_forward.20
= control target key start
LH: loop header
LB: loop body
LE: loop exit
PB: predicated region body
PF: predicated region fallthrough
CT: control target
= control target key end

     0   :  { %v255_v1 = vmov 0   ;;  %vm92_vm0 = vcmask 523264   ;;  %v32_v11 = vlaneseq  ;;  %s338_s1 = inlined_call_operand.vmem [shape: bf16[64,256], index: 1, kind: input, shape index: {}]   ;;  %s339_s0 = inlined_call_operand.vmem [shape: bf16[32,64], index: 0, kind: input, shape index: {}]   ;;  %s340_s2 = inlined_call_operand.vmem [shape: f32[1,256], index: 2, kind: input, shape index: {}]   ;;  %s341_s3 = inlined_call_operand.vmem [shape: bf16[32,256], index: 3, kind: input, shape index: {}]   ;;  %s342_s4 = inlined_call_operand.vmem [shape: bf16[32,256], index: 4, kind: output, shape index: {}]  }
   0x1   :  { %v241_v0 = vld [vmem:[%s338_s1 + $0x4] ss:$8 sps:$4 sm:$0xff]   ;;  %131 = vmatprep.mubr.bf16.mxu0 %v255_v1  ;;  %141 = vmatprep.mubr.bf16.mxu1 %v255_v1  ;;  %v243_v2 = vld [vmem:[%s338_s1] ss:$8 sps:$4 sm:$0xff]   ;;  %v244_v3 = vld [vmem:[%s338_s1 + $0x14] ss:$8 sps:$4 sm:$0xff]  }
   0x2   :  { %99 = vmatprep.subr.bf16.mxu0 %v241_v0  ;;  %232 = vmatprep.subr.bf16.mxu1 %v241_v0  ;;  %v246_v4 = vld [vmem:[%s338_s1 + $0x10] ss:$8 sps:$4 sm:$0xff]   ;;  %v247_v5 = vld [vmem:[%s338_s1 + $0x24] ss:$8 sps:$4 sm:$0xff]   ;;  %v249_v6 = vld [vmem:[%s338_s1 + $0x20] ss:$8 sps:$4 sm:$0xff]  }
   0x3   :  { %100 = vmatpush1.bf16.msra.mxu0 %v243_v2  ;;  %236 = vmatpush1.bf16.msra.mxu1 %v243_v2  ;;  %v250_v7 = vld [vmem:[%s338_s1 + $0x34] ss:$8 sps:$4 sm:$0xff]   ;;  %v252_v8 = vld [vmem:[%s338_s1 + $0x30] ss:$8 sps:$4 sm:$0xff]   ;;  %v253_v9 = vld [vmem:[%s339_s0] sm:$0xff]   ;;  %v33_v12 = vshrl.u32 %v32_v11, 7 }
   0x4   :  { %101 = vmatprep.subr.bf16.mxu0 %v244_v3  ;;  %233 = vmatprep.subr.bf16.mxu1 %v244_v3  ;;  %v254_v10 = vld [vmem:[%s339_s0 + $0x8] sm:$0xff]   ;;  %v30_v14 = vld [vmem:[%s340_s2] sm:$0x3]  ;;  %v154_v17 = vld [vmem:[%s341_s3 + $0x10] sm:$0xff] }
   0x5   :  { %v34_v13 = vsub.s32 0, %v33_v12  ;;  %v38_v15 = vsub.s32 1, %v33_v12  ;;  %v152_v16 = vld [vmem:[%s341_s3] sm:$0xff]  ;;  %v153_v20 = vld [vmem:[%s341_s3 + $0x8] sm:$0xff]  ;;  %v155_v21 = vld [vmem:[%s341_s3 + $0x18] sm:$0xff]  ;;  %v160_v23 = vunpack.c.l.bf16 %v154_v17  ;;  %v161_v27 = vunpack.c.h.bf16 %v154_v17 }
   0x6   :  { %v156_v22 = vunpack.c.l.bf16 %v152_v16  ;;  %v157_v26 = vunpack.c.h.bf16 %v152_v16  ;;  %v158_v32 = vunpack.c.l.bf16 %v153_v20  ;;  %v162_v33 = vunpack.c.l.bf16 %v155_v21 }
   0x7   :  { %102 = vmatpush1.bf16.msra.mxu0 %v246_v4  ;;  %237 = vmatpush1.bf16.msra.mxu1 %v246_v4  ;;  %v35_v18 = vrot.slane %v30_v14, %v34_v13  ;;  %v39_v19 = vrot.slane %v30_v14, %v38_v15  ;;  %v159_v38 = vunpack.c.h.bf16 %v153_v20  ;;  %v163_v39 = vunpack.c.h.bf16 %v155_v21 }
   0x8   :  { %103 = vmatprep.subr.bf16.mxu0 %v247_v5  ;;  %234 = vmatprep.subr.bf16.mxu1 %v247_v5 }
   0xb   :  { %104 = vmatpush1.bf16.msra.mxu0 %v249_v6  ;;  %238 = vmatpush1.bf16.msra.mxu1 %v249_v6 }
   0xc   :  { %105 = vmatprep.subr.bf16.mxu0 %v250_v7  ;;  %235 = vmatprep.subr.bf16.mxu1 %v250_v7 }
   0xf   :  { %106 = vmatpush1.bf16.msra.mxu0 %v252_v8  ;;  %239 = vmatpush1.bf16.msra.mxu1 %v252_v8 }
  0x12   :  { %222 = vmatmul.mubr.msk.bf16.vlgmr.msra.gmra.mrb[0].mxu0 %vm92_vm0, %v253_v9  ;;  %223 = vmatmul.mubr.msk.bf16.vlgmr.msra.gmra.mrb[0].mxu1 %vm92_vm0, %v254_v10 }
  0xe5   :  { %v133_v24 = vpop.f32.mrb[0].mxu0  ;;  %v143_v25 = vpop.f32.mrb[0].mxu1 }
  0xe6   :  { %v134_v28 = vadd.f32 %v133_v24, %v35_v18  ;;  %v144_v29 = vadd.f32 %v143_v25, %v35_v18  ;;  %v135_v30 = vpop.f32.mrb[1].mxu0  ;;  %v145_v31 = vpop.f32.mrb[1].mxu1 }
  0xe7   :  { %v136_v34 = vadd.f32 %v135_v30, %v39_v19  ;;  %v146_v35 = vadd.f32 %v145_v31, %v39_v19  ;;  %v137_v36 = vpop.f32.mrb[2].mxu0  ;;  %v147_v37 = vpop.f32.mrb[2].mxu1 }
  0xe8   :  { %v164_v40 = vadd.f32 %v156_v22, %v134_v28  ;;  %v168_v41 = vadd.f32 %v160_v23, %v144_v29  ;;  %v138_v42 = vadd.f32 %v137_v36, %v35_v18  ;;  %v148_v43 = vadd.f32 %v147_v37, %v35_v18  ;;  %v139_v44 = vpop.f32.mrb[3].mxu0  ;;  %v149_v45 = vpop.f32.mrb[3].mxu1 }
  0xe9   :  { %v165_v46 = vadd.f32 %v157_v26, %v136_v34  ;;  %v169_v47 = vadd.f32 %v161_v27, %v146_v35  ;;  %v140_v48 = vadd.f32 %v139_v44, %v39_v19  ;;  %v150_v49 = vadd.f32 %v149_v45, %v39_v19 }
  0xea   :  { %v172_v50 = vmax.f32 %v164_v40, 0.0  ;;  %v176_v51 = vmax.f32 %v168_v41, 0.0  ;;  %v166_v52 = vadd.f32 %v158_v32, %v138_v42  ;;  %v170_v53 = vadd.f32 %v162_v33, %v148_v43 }
  0xeb   :  { %v173_v54 = vmax.f32 %v165_v46, 0.0  ;;  %v177_v55 = vmax.f32 %v169_v47, 0.0  ;;  %v167_v56 = vadd.f32 %v159_v38, %v140_v48  ;;  %v171_v57 = vadd.f32 %v163_v39, %v150_v49 }
  0xec   :  { %v174_v58 = vmax.f32 %v166_v52, 0.0  ;;  %v178_v59 = vmax.f32 %v170_v53, 0.0 }
  0xed   :  { %v228_v60 = vpack.c.bf16 %v173_v54, %v172_v50  ;;  %v230_v61 = vpack.c.bf16 %v177_v55, %v176_v51  ;;  %v175_v62 = vmax.f32 %v167_v56, 0.0  ;;  %v179_v63 = vmax.f32 %v171_v57, 0.0 }
  0xef   :  { %204 = vst [vmem:[%s342_s4] sm:$0xff] %v228_v60  ;;  %206 = vst [vmem:[%s342_s4 + $0x10] sm:$0xff] %v230_v61  ;;  %v229_v0 = vpack.c.bf16 %v175_v62, %v174_v58  ;;  %v231_v1 = vpack.c.bf16 %v179_v63, %v178_v59 }
  0xf1   :  { %205 = vst [vmem:[%s342_s4 + $0x8] sm:$0xff] %v229_v0  ;;  %207 = vst [vmem:[%s342_s4 + $0x18] sm:$0xff] %v231_v1 }

// kernel: resnet_baseline_forward.21
= control target key start
LH: loop header
LB: loop body
LE: loop exit
PB: predicated region body
PF: predicated region fallthrough
CT: control target
= control target key end

     0   :  { %s446_s1 = inlined_call_operand.vmem [shape: bf16[256,128], index: 1, kind: input, shape index: {}]   ;;  %s447_s0 = inlined_call_operand.vmem [shape: bf16[32,256], index: 0, kind: input, shape index: {}]   ;;  %s448_s2 = inlined_call_operand.vmem [shape: f32[1,128], index: 2, kind: input, shape index: {}]   ;;  %s449_s3 = inlined_call_operand.vmem [shape: bf16[32,128], index: 3, kind: output, shape index: {}]  }
   0x1   :  { %v335_v0 = vld [vmem:[%s446_s1 + $0x40] sm:$0xff]   ;;  %v337_v2 = vld [vmem:[%s446_s1 + $0x48] sm:$0xff]   ;;  %v339_v4 = vld [vmem:[%s446_s1 + $0x50] sm:$0xff]  }
   0x2   :  { %v336_v1 = vld [vmem:[%s446_s1] sm:$0xff]   ;;  %291 = vmatprep.subr.bf16.mxu0 %v335_v0  ;;  %319 = vmatprep.subr.bf16.mxu1 %v335_v0  ;;  %v338_v3 = vld [vmem:[%s446_s1 + $0x8] sm:$0xff]   ;;  %v340_v5 = vld [vmem:[%s446_s1 + $0x10] sm:$0xff]  }
   0x3   :  { %292 = vmatpush3.bf16.msra.mxu0 %v336_v1  ;;  %327 = vmatpush3.bf16.msra.mxu1 %v336_v1  ;;  %v341_v6 = vld [vmem:[%s446_s1 + $0x58] sm:$0xff]   ;;  %v343_v8 = vld [vmem:[%s446_s1 + $0x60] sm:$0xff]   ;;  %v345_v10 = vld [vmem:[%s446_s1 + $0x68] sm:$0xff]  }
   0x4   :  { %293 = vmatprep.subr.bf16.mxu0 %v337_v2  ;;  %320 = vmatprep.subr.bf16.mxu1 %v337_v2  ;;  %v342_v7 = vld [vmem:[%s446_s1 + $0x18] sm:$0xff]   ;;  %v344_v9 = vld [vmem:[%s446_s1 + $0x20] sm:$0xff]   ;;  %v346_v13 = vld [vmem:[%s446_s1 + $0x28] sm:$0xff]  }
   0x5   :  { %v353_v11 = vld [vmem:[%s447_s0 + $0x4] ss:$8 sps:$4 sm:$0xff]   ;;  %v356_v12 = vld [vmem:[%s447_s0 + $0x14] ss:$8 sps:$4 sm:$0xff]   ;;  %v351_v18 = vld [vmem:[%s447_s0] ss:$8 sps:$4 sm:$0xff]  }
   0x6   :  { %v347_v14 = vld [vmem:[%s446_s1 + $0x70] sm:$0xff]   ;;  %206 = vmatprep.mubr.bf16.mxu0 %v353_v11  ;;  %214 = vmatprep.mubr.bf16.mxu1 %v356_v12  ;;  %v349_v16 = vld [vmem:[%s446_s1 + $0x78] sm:$0xff]   ;;  %v251_v22 = vld [vmem:[%s448_s2] ss:$0 sm:$0xff] }
   0x7   :  { %294 = vmatpush3.bf16.msra.mxu0 %v338_v3  ;;  %328 = vmatpush3.bf16.msra.mxu1 %v338_v3  ;;  %v348_v15 = vld [vmem:[%s446_s1 + $0x30] sm:$0xff]   ;;  %v350_v17 = vld [vmem:[%s446_s1 + $0x38] sm:$0xff]  }
   0x8   :  { %295 = vmatprep.subr.bf16.mxu0 %v339_v4  ;;  %321 = vmatprep.subr.bf16.mxu1 %v339_v4  ;;  %v354_v19 = vld [vmem:[%s447_s0 + $0x10] ss:$8 sps:$4 sm:$0xff]  }
   0xb   :  { %296 = vmatpush3.bf16.msra.mxu0 %v340_v5  ;;  %329 = vmatpush3.bf16.msra.mxu1 %v340_v5 }
   0xc   :  { %297 = vmatprep.subr.bf16.mxu0 %v341_v6  ;;  %322 = vmatprep.subr.bf16.mxu1 %v341_v6 }
   0xf   :  { %298 = vmatpush3.bf16.msra.mxu0 %v342_v7  ;;  %330 = vmatpush3.bf16.msra.mxu1 %v342_v7 }
  0x10   :  { %299 = vmatprep.subr.bf16.mxu0 %v343_v8  ;;  %323 = vmatprep.subr.bf16.mxu1 %v343_v8 }
  0x13   :  { %300 = vmatpush3.bf16.msra.mxu0 %v344_v9  ;;  %331 = vmatpush3.bf16.msra.mxu1 %v344_v9 }
  0x14   :  { %301 = vmatprep.subr.bf16.mxu0 %v345_v10  ;;  %324 = vmatprep.subr.bf16.mxu1 %v345_v10 }
  0x17   :  { %302 = vmatpush3.bf16.msra.mxu0 %v346_v13  ;;  %332 = vmatpush3.bf16.msra.mxu1 %v346_v13 }
  0x18   :  { %303 = vmatprep.subr.bf16.mxu0 %v347_v14  ;;  %325 = vmatprep.subr.bf16.mxu1 %v347_v14 }
  0x1b   :  { %304 = vmatpush3.bf16.msra.mxu0 %v348_v15  ;;  %333 = vmatpush3.bf16.msra.mxu1 %v348_v15 }
  0x1c   :  { %305 = vmatprep.subr.bf16.mxu0 %v349_v16  ;;  %326 = vmatprep.subr.bf16.mxu1 %v349_v16 }
  0x1f   :  { %306 = vmatpush3.bf16.msra.mxu0 %v350_v17  ;;  %334 = vmatpush3.bf16.msra.mxu1 %v350_v17 }
  0x22   :  { %207 = vmatmul.mubr.bf16.vlgmr.msra.gmra.mrb[0].mxu0 %v351_v18  ;;  %215 = vmatmul.mubr.bf16.vlgmr.msra.gmra.mrb[0].mxu1 %v354_v19 }
  0xf5   :  { %v307_v20 = vpop.f32.mrb[0].mxu0  ;;  %v313_v21 = vpop.f32.mrb[0].mxu1 }
  0xf6   :  { %v308_v23 = vpop.f32.mrb[1].mxu0  ;;  %v314_v24 = vpop.f32.mrb[1].mxu1 }
  0xf7   :  { %v309_v25 = vadd.f32 %v308_v23, %v307_v20  ;;  %v315_v26 = vadd.f32 %v314_v24, %v313_v21  ;;  %v310_v27 = vpop.f32.mrb[2].mxu0  ;;  %v316_v28 = vpop.f32.mrb[2].mxu1 }
  0xf8   :  { %v311_v29 = vpop.f32.mrb[3].mxu0  ;;  %v317_v30 = vpop.f32.mrb[3].mxu1 }
  0xf9   :  { %v209_v31 = vadd.f32 %v309_v25, %v251_v22  ;;  %v217_v32 = vadd.f32 %v315_v26, %v251_v22  ;;  %v312_v33 = vadd.f32 %v311_v29, %v310_v27  ;;  %v318_v34 = vadd.f32 %v317_v30, %v316_v28 }
  0xfb   :  { %v212_v35 = vadd.f32 %v312_v33, %v251_v22  ;;  %v220_v36 = vadd.f32 %v318_v34, %v251_v22  ;;  %v223_v37 = vmax.f32 %v209_v31, 0.0  ;;  %v225_v38 = vmax.f32 %v217_v32, 0.0 }
  0xfd   :  { %v224_v39 = vmax.f32 %v212_v35, 0.0  ;;  %v226_v40 = vmax.f32 %v220_v36, 0.0 }
  0xff   :  { %v283_v41 = vpack.c.bf16 %v224_v39, %v223_v37  ;;  %v288_v42 = vpack.c.bf16 %v226_v40, %v225_v38 }
 0x101   :  { %284 = vst [vmem:[%s449_s3] sm:$0xff] %v283_v41   ;;  %290 = vst [vmem:[%s449_s3 + $0x8] sm:$0xff] %v288_v42  }

// kernel: resnet_baseline_forward.18
= control target key start
LH: loop header
LB: loop body
LE: loop exit
PB: predicated region body
PF: predicated region fallthrough
CT: control target
= control target key end

     0   :  { %s1701_s12 = smov 0   ;;  %s1929_s0 = inlined_call_operand.vmem [shape: bf16[2,56,64], index: 0, kind: input, shape index: {}]   ;;  %s1930_s1 = inlined_call_operand.vmem [shape: bf16[9,64,64], index: 1, kind: input, shape index: {}]   ;;  %s1931_s2 = inlined_call_operand.vmem [shape: f32[1,64], index: 2, kind: input, shape index: {}]   ;;  %s1932_s3 = inlined_call_operand.vmem [shape: bf16[2,4,4,64], index: 3, kind: output, shape index: {}]  }
   0x1 LB: > { %s1294_s13 = sadd.s32 4294967295, %s1679_s12   ;;  %p1298_p0 = scmp.ge.s32.totalorder %s1679_s12, 1  ;;  %s1679_s12 = sphi %s1701_s12, %s13_s12  }
   0x2   : > { %p137_p1 = scmp.lt.s32.totalorder %s1679_s12, 3 }
   0x4   : > { %p138_p2 = pnand %p1298_p0, %p137_p1 }
   0x5   : > { %v1616_v0 = vld [vmem:[%s1930_s1] sm:$0xff] (!%p138_p2)   ;;  %p161_p3 = scmp.lt.s32.totalorder (!%p138_p2), %s1294_s13, 1  ;;  %v1617_v1 = vld [vmem:[%s1930_s1 + $0x8] sm:$0xff] (!%p138_p2)   ;;  %v1619_v3 = vld [vmem:[%s1930_s1 + $0x10] sm:$0xff] (!%p138_p2)   ;;  %vm220_vm0 = vcmask (!%p138_p2), 523264   ;;  %vm896_vm2 = vcmask (!%p138_p2), 1046528  }
   0x6   : > { %141 = sbr.rel (%p138_p2) target bundleno = 332 (0x14c), region = 32  ;;  %1499 = vmatprep.subr.bf16.mxu0 (!%p138_p2), %v1616_v0  ;;  %v1618_v2 = vld [vmem:[%s1930_s1 + $0x60] sm:$0xff] (!%p138_p2)   ;;  %v1620_v4 = vld [vmem:[%s1930_s1 + $0x68] sm:$0xff] (!%p138_p2)   ;;  %v1622_v5 = vld [vmem:[%s1930_s1 + $0x70] sm:$0xff] (!%p138_p2)   ;;  %vm513_vm1 = vsmask.f32 (!%p138_p2), 7424 }
   0x7   : > { %1500 = vmatpush3.bf16.msra.mxu0 (!%p138_p2), %v1616_v0  ;;  %1511 = vmatprep.subr.bf16.mxu1 (!%p138_p2), %v1618_v2  ;;  %v1621_v9 = vld [vmem:[%s1930_s1 + $0x18] sm:$0xff] (!%p138_p2)   ;;  %v1625_v14 = vld [vmem:[%s1930_s1 + $0xc0] sm:$0xff] (!%p138_p2)   ;;  %v1628_v18 = vld [vmem:[%s1930_s1 + $0xc8] sm:$0xff] (!%p138_p2)   ;;  %vm1234_vm3 = vcmask (!%p138_p2), 517120  }
   0x8   : > { %1501 = vmatprep.subr.bf16.mxu0 (!%p138_p2), %v1617_v1  ;;  %1512 = vmatpush3.bf16.msra.mxu1 (!%p138_p2), %v1618_v2  ;;  %v1626_v12 = vld [vmem:[%s1930_s1 + $0x78] sm:$0xff] (!%p138_p2)   ;;  %v1632_v17 = vld [vmem:[%s1930_s1 + $0x20] sm:$0xff] (!%p138_p2)   ;;  %v1634_v20 = vld [vmem:[%s1930_s1 + $0x28] sm:$0xff] (!%p138_p2)  }
   0x9   : > { %1513 = vmatprep.subr.bf16.mxu1 (!%p138_p2), %v1620_v4  ;;  %v1631_v21 = vld [vmem:[%s1930_s1 + $0xd0] sm:$0xff] (!%p138_p2)   ;;  %v1633_v35 = vld [vmem:[%s1930_s1 + $0xd8] sm:$0xff] (!%p138_p2)   ;;  %v1636_v44 = vld [vmem:[%s1930_s1 + $0x80] sm:$0xff] (!%p138_p2)  }
   0xa   : > { %v1635_v28 = vld [vmem:[%s1930_s1 + $0x30] sm:$0xff] (!%p138_p2)   ;;  %v1637_v36 = vld [vmem:[%s1930_s1 + $0x38] sm:$0xff] (!%p138_p2)   ;;  %v1643_v56 = vld [vmem:[%s1930_s1 + $0xe0] sm:$0xff] (!%p138_p2)  }
   0xb   : > { %1502 = vmatpush3.bf16.msra.mxu0 (!%p138_p2), %v1617_v1  ;;  %v1638_v59 = vld [vmem:[%s1930_s1 + $0x88] sm:$0xff] (!%p138_p2)  }
   0xc   : > { %1503 = vmatprep.subr.bf16.mxu0 (!%p138_p2), %v1619_v3  ;;  %1514 = vmatpush3.bf16.msra.mxu1 (!%p138_p2), %v1620_v4  ;;  %v1645_v63 = vld [vmem:[%s1930_s1 + $0xe8] sm:$0xff] (!%p138_p2)  }
   0xd   : > { %s1934_s13 = smov (!%p161_p3, %s1294_s13), 1  ;;  %1515 = vmatprep.subr.bf16.mxu1 %v1622_v5 }
   0xe   : > { %s1607_s24 = smul.u32 28, %s1934_s13  ;;  %s1444_s18 = sshll.u32 %s1934_s13, 3 }
   0xf   : > { %1504 = vmatpush3.bf16.msra.mxu0 %v1619_v3  ;;  %v1642_v3 = vld [vmem:[%s1930_s1 + $0x90] sm:$0xff]   ;;  %s170_s21 = scalar_lea.vmem %s1932_s3, %s1444_s18 }
  0x10   : > { %s1733_s29 = scalar_lea.vmem %s1929_s0, %s1607_s24  ;;  %1505 = vmatprep.subr.bf16.mxu0 %v1621_v9  ;;  %1516 = vmatpush3.bf16.msra.mxu1 %v1622_v5 }
  0x11   : > { %v172_v6 = vld [vmem:[%s1733_s29] sm:$0xf]  ;;  %v173_v7 = vld [vmem:[%s1733_s29 + $0x4] sm:$0xf]  ;;  %v174_v8 = vld [vmem:[%s1733_s29 + $0x8] sm:$0xf]  ;;  %1517 = vmatprep.subr.bf16.mxu1 %v1626_v12 }
  0x12   : > { %v1302_v10 = vcombine.low %v172_v6, %v173_v7  ;;  %v1318_v11 = vcombine.low %v173_v7, %v174_v8  ;;  %v175_v13 = vld [vmem:[%s1733_s29 + $0xc] sm:$0xf]  ;;  %v1751_v15 = vld [vmem:[%s1733_s29 + $0x10] sm:$0xf]  ;;  %v484_v22 = vld [vmem:[%s1733_s29] sm:$0xf] }
  0x13   : > { %v1303_v16 = vcombine.low %v174_v8, %v175_v13  ;;  %1506 = vmatpush3.bf16.msra.mxu0 %v1621_v9  ;;  %v1319_v19 = vcombine.low %v175_v13, %v1751_v15  ;;  %v485_v23 = vld [vmem:[%s1733_s29 + $0x4] sm:$0xf]  ;;  %v486_v24 = vld [vmem:[%s1733_s29 + $0x8] sm:$0xf]  ;;  %v487_v25 = vld [vmem:[%s1733_s29 + $0xc] sm:$0xf] }
  0x14   : > { %1507 = vmatprep.mubr.msk.bf16.mxu0 %vm220_vm0, %v1302_v10  ;;  %1519 = vmatprep.mubr.msk.bf16.mxu1 %vm220_vm0, %v1318_v11  ;;  %v1349_v26 = vcombine.low %v484_v22, %v485_v23  ;;  %v488_v27 = vld [vmem:[%s1733_s29 + $0x10] sm:$0xf]  ;;  %v1350_v29 = vcombine.low %v486_v24, %v487_v25  ;;  %v1366_v33 = vcombine.low %v485_v23, %v486_v24  ;;  %v177_v39 = vld [vmem:[%s1733_s29 + $0x14] sm:$0xf]  ;;  %v867_v4 = vld [vmem:[%s1733_s29] sm:$0xe] }
  0x15   : > { %1523 = vmatprep.subr.bf16.mxu0 %v1625_v14  ;;  %1518 = vmatpush3.bf16.msra.mxu1 %v1626_v12  ;;  %v1351_v30 = vcombine.low %v488_v27, %v488_v27  ;;  %v1777_v34 = vcombine.low %v487_v25, %v488_v27  ;;  %v489_v49 = vld [vmem:[%s1733_s29 + $0x14] sm:$0xf]  ;;  %v1334_v55 = vcombine.low %v1751_v15, %v177_v39  ;;  %v1654_v2 = vld [vmem:[%s1733_s29 + $0x18] ss:$0 sps:$4 sm:$0x11]   ;;  %v1650_v22 = vld [vmem:[%s1930_s1 + $0x40] sm:$0xff]  }
  0x16   : > { %1508 = vmatmul.mubr.msk.bf16.vlgmr.msra.gmra.mrb[0].mxu0 %vm220_vm0, %v1303_v16  ;;  %1535 = vmatprep.subr.bf16.mxu1 %v1632_v17  ;;  %v515_v31 = vshrl.u32 %v1349_v26, 16  ;;  %v517_v32 = vshll.u32 %v1349_v26, 16  ;;  %v522_v37 = vshll.u32 %v1350_v29, 16  ;;  %v526_v41 = vshrl.u32 %v1350_v29, 16  ;;  %v868_v5 = vld [vmem:[%s1733_s29 + $0x4] sm:$0xf] }
  0x17   : > { %1524 = vmatpush3.bf16.msra.mxu0 %v1625_v14  ;;  %1531 = vmatprep.mubr.msk.bf16.mxu0 %vm220_vm0, %v1303_v16  ;;  %v530_v38 = vshll.u32 %v1351_v30, 16  ;;  %v640_v46 = vshrl.u32 %v1366_v33, 16  ;;  %v642_v47 = vshll.u32 %v1366_v33, 16  ;;  %v647_v48 = vshll.u32 %v1777_v34, 16  ;;  %v869_v6 = vld [vmem:[%s1733_s29 + $0x8] sm:$0xf] }
  0x18   : > { %1525 = vmatprep.subr.bf16.mxu0 %v1628_v18  ;;  %1520 = vmatmul.mubr.msk.bf16.vlgmr.msra.gmra.mrb[0].mxu1 %vm220_vm0, %v1319_v19  ;;  %v519_v40 = vrot.slane %v517_v32, 1  ;;  %v524_v42 = vrot.slane %v522_v37, 1  ;;  %v1383_v50 = vcombine.low %v488_v27, %v489_v49  ;;  %v1368_v0 = vcombine.low %v489_v49, %v489_v49  ;;  %v1649_v7 = vld [vmem:[%s1930_s1 + $0xf0] sm:$0xff]   ;;  %v870_v8 = vld [vmem:[%s1733_s29 + $0xc] sm:$0xf]  ;;  %v1644_v11 = vld [vmem:[%s1930_s1 + $0x98] sm:$0xff]  }
  0x19   : > { %1536 = vmatpush3.bf16.msra.mxu1 %v1632_v17  ;;  %v532_v43 = vrot.slane %v530_v38, 1  ;;  %v644_v53 = vrot.slane %v642_v47, 1  ;;  %v649_v54 = vrot.slane %v647_v48, 1  ;;  %v651_v9 = vshrl.u32 %v1777_v34, 16  ;;  %v871_v16 = vld [vmem:[%s1733_s29 + $0x10] sm:$0xf] }
  0x1a   : > { %1537 = vmatprep.subr.bf16.mxu1 %v1634_v20  ;;  %v520_v45 = vor.u32 %v519_v40, %v515_v31  ;;  %v528_v52 = vor.u32 %v526_v41, %v524_v42  ;;  %v764_v58 = vshll.u32 %v1383_v50, 16  ;;  %v655_v10 = vshll.u32 %v1368_v0, 16  ;;  %v1651_v17 = vld [vmem:[%s1930_s1 + $0xf8] sm:$0xff]   ;;  %v1656_v27 = vld [vmem:[%s1930_s1 + $0xa0] sm:$0xff]   ;;  %v1652_v31 = vld [vmem:[%s1930_s1 + $0x48] sm:$0xff]  }
  0x1b   : > { %1526 = vmatpush3.bf16.msra.mxu0 %v1628_v18  ;;  %v645_v57 = vor.u32 %v644_v53, %v640_v46  ;;  %v1399_v12 = vcombine.low %v867_v4, %v868_v5  ;;  %v1400_v13 = vcombine.low %v869_v6, %v870_v8  ;;  %v768_v14 = vshrl.u32 %v1383_v50, 16  ;;  %v1658_v34 = vld [vmem:[%s1930_s1 + $0xa8] sm:$0xff]   ;;  %v1662_v37 = vld [vmem:[%s1930_s1 + $0xb0] sm:$0xff]   ;;  %v1657_v40 = vld [vmem:[%s1930_s1 + $0x58] sm:$0xff]  }
  0x1c   : > { %1527 = vmatprep.subr.bf16.mxu0 %v1631_v21  ;;  %v525_v51 = vsel %vm513_vm1, %v520_v45, %v524_v42  ;;  %v533_v60 = vsel %vm513_vm1, %v528_v52, %v532_v43  ;;  %v766_v62 = vrot.slane %v764_v58, 1  ;;  %v772_v15 = vshll.u32 %v1654_v2, 16  ;;  %v872_v38 = vld [vmem:[%s1733_s29 + $0x14] sm:$0xf]  ;;  %v1664_v43 = vld [vmem:[%s1930_s1 + $0xb8] sm:$0xff]   ;;  %v1663_v45 = vld [vmem:[%s1930_s1 + $0x100] sm:$0xff]  }
  0x1d   : > { %1538 = vmatpush3.bf16.msra.mxu1 %v1634_v20  ;;  %1543 = vmatprep.mubr.msk.bf16.mxu1 %vm220_vm0, %v525_v51  ;;  %v650_v61 = vsel %vm513_vm1, %v645_v57, %v649_v54  ;;  %v1416_v18 = vcombine.low %v868_v5, %v869_v6  ;;  %v1417_v19 = vcombine.low %v870_v8, %v871_v16  ;;  %v897_v23 = vrot.slane %v1399_v12, 1  ;;  %v1665_v49 = vld [vmem:[%s1930_s1 + $0x108] sm:$0xff]   ;;  %v1672_v53 = vld [vmem:[%s1733_s29 + $0x18] ss:$0 sps:$4 sm:$0x11]  }
  0x1e   : > { %1539 = vmatprep.subr.bf16.mxu1 %v1635_v28  ;;  %v767_v1 = vsel %vm513_vm1, %v528_v52, %v766_v62  ;;  %v653_v20 = vor.u32 %v651_v9, %v649_v54  ;;  %v898_v24 = vrot.slane %v1400_v13, 1  ;;  %v770_v25 = vor.u32 %v768_v14, %v766_v62  ;;  %v1669_v52 = vld [vmem:[%s1930_s1 + $0x110] sm:$0xff]   ;;  %v1670_v54 = vld [vmem:[%s1930_s1 + $0x118] sm:$0xff]  }
  0x1f   : > { %1528 = vmatpush3.bf16.msra.mxu0 %v1631_v21  ;;  %v657_v21 = vrot.slane %v655_v10, 1  ;;  %v774_v26 = vrot.slane %v772_v15, 1  ;;  %v1008_v29 = vrot.slane %v1417_v19, 1  ;;  %v1401_v39 = vcombine.low %v871_v16, %v871_v16 }
  0x20   : > { %1529 = vmatprep.subr.bf16.mxu0 %v1633_v35  ;;  %v899_v32 = vsel %vm896_vm2, %v897_v23, %v898_v24  ;;  %v1433_v41 = vcombine.low %v871_v16, %v872_v38  ;;  %v1418_v42 = vcombine.low %v872_v38, %v872_v38 }
  0x21   : > { %1540 = vmatpush3.bf16.msra.mxu1 %v1635_v28  ;;  %v1007_v28 = vrot.slane %v1416_v18, 1  ;;  %v658_v30 = vsel %vm513_vm1, %v653_v20, %v657_v21  ;;  %v775_v33 = vsel %vm513_vm1, %v770_v25, %v774_v26 }
  0x22   : > { %1541 = vmatprep.subr.bf16.mxu1 %v1637_v36  ;;  %v1116_v46 = vrot.slane %v1433_v41, 1  ;;  %v1010_v47 = vrot.slane %v1418_v42, 1 }
  0x23   : > { %1530 = vmatpush3.bf16.msra.mxu0 %v1633_v35  ;;  %v1009_v35 = vsel %vm896_vm2, %v1007_v28, %v1008_v29 }
  0x24   : > { %1547 = vmatprep.subr.bf16.mxu0 %v1636_v44  ;;  %v1117_v50 = vsel %vm896_vm2, %v898_v24, %v1116_v46  ;;  %v1011_v51 = vsel %vm896_vm2, %v1008_v29, %v1010_v47 }
  0x25   : > { %1542 = vmatpush3.bf16.msra.mxu1 %v1637_v36  ;;  %v1655_v36 = vld [vmem:[%s1930_s1 + $0x50] sm:$0xff]  }
  0x26   : > { %1532 = vmatmul.mubr.msk.bf16.vlgmr.msra.gmra.mrb[4].mxu0 %vm220_vm0, %v1334_v55  ;;  %1559 = vmatprep.subr.bf16.mxu1 %v1643_v56  ;;  %v1118_v55 = vrot.slane %v1672_v53, 1 }
  0x27   : > { %1548 = vmatpush3.bf16.msra.mxu0 %v1636_v44  ;;  %1555 = vmatprep.mubr.msk.bf16.mxu0 %vm220_vm0, %v650_v61  ;;  %v900_v44 = vrot.slane %v1401_v39, 1 }
  0x28   : > { %1549 = vmatprep.subr.bf16.mxu0 %v1638_v59  ;;  %1544 = vmatmul.mubr.msk.bf16.vlgmr.msra.gmra.mrb[4].mxu1 %vm220_vm0, %v533_v60 }
  0x29   : > { %1560 = vmatpush3.bf16.msra.mxu1 %v1643_v56  ;;  %1567 = vmatprep.mubr.msk.bf16.mxu1 %vm220_vm0, %v767_v1  ;;  %v901_v48 = vsel %vm896_vm2, %v898_v24, %v900_v44  ;;  %v1119_v56 = vsel %vm896_vm2, %v1116_v46, %v1118_v55 }
  0x2a   : > { %1561 = vmatprep.subr.bf16.mxu1 %v1645_v63 }
  0x2b   : > { %1550 = vmatpush3.bf16.msra.mxu0 %v1638_v59 }
  0x2c   : > { %1551 = vmatprep.subr.bf16.mxu0 %v1642_v3 }
  0x2d   : > { %1562 = vmatpush3.bf16.msra.mxu1 %v1645_v63 }
  0x2e   : > { %1563 = vmatprep.subr.bf16.mxu1 %v1649_v7 }
  0x2f   : > { %1552 = vmatpush3.bf16.msra.mxu0 %v1642_v3 }
  0x30   : > { %1553 = vmatprep.subr.bf16.mxu0 %v1644_v11 }
  0x31   : > { %1564 = vmatpush3.bf16.msra.mxu1 %v1649_v7 }
  0x32   : > { %1565 = vmatprep.subr.bf16.mxu1 %v1651_v17 }
  0x33   : > { %1554 = vmatpush3.bf16.msra.mxu0 %v1644_v11 }
  0x34   : > { %1571 = vmatprep.subr.bf16.mxu0 %v1650_v22 }
  0x35   : > { %1566 = vmatpush3.bf16.msra.mxu1 %v1651_v17 }
  0x36   : > { %1556 = vmatmul.mubr.msk.bf16.vlgmr.msra.gmra.mrb[8].mxu0 %vm220_vm0, %v658_v30  ;;  %1583 = vmatprep.subr.bf16.mxu1 %v1656_v27 }
  0x37   : > { %1572 = vmatpush3.bf16.msra.mxu0 %v1650_v22  ;;  %1579 = vmatprep.mubr.msk.bf16.mxu0 %vm220_vm0, %v899_v32 }
  0x38   : > { %1573 = vmatprep.subr.bf16.mxu0 %v1652_v31  ;;  %1568 = vmatmul.mubr.msk.bf16.vlgmr.msra.gmra.mrb[8].mxu1 %vm220_vm0, %v775_v33 }
  0x39   : > { %1584 = vmatpush3.bf16.msra.mxu1 %v1656_v27  ;;  %1591 = vmatprep.mubr.msk.bf16.mxu1 %vm220_vm0, %v1009_v35 }
  0x3a   : > { %1585 = vmatprep.subr.bf16.mxu1 %v1658_v34 }
  0x3b   : > { %1574 = vmatpush3.bf16.msra.mxu0 %v1652_v31 }
  0x3c   : > { %1575 = vmatprep.subr.bf16.mxu0 %v1655_v36 }
  0x3d   : > { %1586 = vmatpush3.bf16.msra.mxu1 %v1658_v34 }
  0x3e   : > { %1587 = vmatprep.subr.bf16.mxu1 %v1662_v37 }
  0x3f   : > { %1576 = vmatpush3.bf16.msra.mxu0 %v1655_v36 }
  0x40   : > { %1577 = vmatprep.subr.bf16.mxu0 %v1657_v40 }
  0x41   : > { %1588 = vmatpush3.bf16.msra.mxu1 %v1662_v37 }
  0x42   : > { %1589 = vmatprep.subr.bf16.mxu1 %v1664_v43 }
  0x43   : > { %1578 = vmatpush3.bf16.msra.mxu0 %v1657_v40 }
  0x44   : > { %1595 = vmatprep.subr.bf16.mxu0 %v1663_v45 }
  0x45   : > { %1590 = vmatpush3.bf16.msra.mxu1 %v1664_v43 }
  0x46   : > { %1580 = vmatmul.mubr.msk.bf16.vlgmr.msra.gmra.mrb[12].mxu0 %vm220_vm0, %v901_v48 }
  0x47   : > { %1596 = vmatpush3.bf16.msra.mxu0 %v1663_v45  ;;  %1603 = vmatprep.mubr.msk.bf16.mxu0 %vm220_vm0, %v1117_v50 }
  0x48   : > { %1597 = vmatprep.subr.bf16.mxu0 %v1665_v49  ;;  %1592 = vmatmul.mubr.msk.bf16.vlgmr.msra.gmra.mrb[12].mxu1 %vm220_vm0, %v1011_v51 }
  0x4b   : > { %1598 = vmatpush3.bf16.msra.mxu0 %v1665_v49 }
  0x4c   : > { %1599 = vmatprep.subr.bf16.mxu0 %v1669_v52 }
  0x4f   : > { %1600 = vmatpush3.bf16.msra.mxu0 %v1669_v52 }
  0x50   : > { %1601 = vmatprep.subr.bf16.mxu0 %v1670_v54 }
  0x53   : > { %1602 = vmatpush3.bf16.msra.mxu0 %v1670_v54 }
  0x56   : > { %1604 = vmatmul.mubr.msk.bf16.vlgmr.msra.gmra.mrb[16].mxu0 %vm220_vm0, %v1119_v56 }
  0xe9   : > { %v1509_v57 = vpop.f32.mrb[0].mxu0 }
  0xea   : > { %278 = vst.msk [vmem:[#allocation2 + $0x10] sm:$0xff] %vm220_vm0, %v1509_v57  ;;  %v261_v58 = vpop.f32.mrb[1].mxu0 }
  0xeb   : > { %276 = vst.msk [vmem:[#allocation2] sm:$0xff] %vm220_vm0, %v261_v58  ;;  %v1510_v59 = vpop.f32.mrb[2].mxu0  ;;  %v1521_v60 = vpop.f32.mrb[0].mxu1 }
  0xec   : > { %279 = vst.msk [vmem:[#allocation2 + $0x18] sm:$0xff] %vm220_vm0, %v1510_v59  ;;  %v264_v61 = vpop.f32.mrb[3].mxu0  ;;  %v357_v62 = vpop.f32.mrb[1].mxu1 }
  0xed   : > { %277 = vst.msk [vmem:[#allocation2 + $0x8] sm:$0xff] %vm220_vm0, %v264_v61  ;;  %v1522_v63 = vpop.f32.mrb[2].mxu1 }
  0xee   : > { %v360_v0 = vpop.f32.mrb[3].mxu1 }
  0xf1   : > { %v374_v1 = vld [vmem:[#allocation2 + $0x10] sm:$0xff] }
  0xf2   : > { %v378_v2 = vadd.f32 %v1521_v60, %v374_v1  ;;  %v372_v3 = vld [vmem:[#allocation2] sm:$0xff] }
  0xf3   : > { %v376_v4 = vadd.f32 %v372_v3, %v357_v62  ;;  %v375_v5 = vld [vmem:[#allocation2 + $0x18] sm:$0xff] }
  0xf4   : > { %382 = vst.msk [vmem:[#allocation2 + $0x10] sm:$0xff] %vm220_vm0, %v378_v2  ;;  %v379_v6 = vadd.f32 %v1522_v63, %v375_v5  ;;  %v373_v7 = vld [vmem:[#allocation2 + $0x8] sm:$0xff] }
  0xf5   : > { %380 = vst.msk [vmem:[#allocation2] sm:$0xff] %vm220_vm0, %v376_v4  ;;  %v377_v8 = vadd.f32 %v373_v7, %v360_v0 }
  0xf6   : > { %383 = vst.msk [vmem:[#allocation2 + $0x18] sm:$0xff] %vm220_vm0, %v379_v6 }
  0xf7   : > { %381 = vst.msk [vmem:[#allocation2 + $0x8] sm:$0xff] %vm220_vm0, %v377_v8 }
  0xf9   : > { %v1533_v9 = vpop.f32.mrb[4].mxu0 }
  0xfa   : > { %v457_v10 = vpop.f32.mrb[5].mxu0 }
  0xfb   : > { %v474_v11 = vld [vmem:[#allocation2 + $0x10] sm:$0xff]  ;;  %v1534_v12 = vpop.f32.mrb[6].mxu0  ;;  %v1545_v13 = vpop.f32.mrb[4].mxu1 }
  0xfc   : > { %v478_v14 = vadd.f32 %v1533_v9, %v474_v11  ;;  %v472_v15 = vld [vmem:[#allocation2] sm:$0xff]  ;;  %v460_v16 = vpop.f32.mrb[7].mxu0  ;;  %v598_v17 = vpop.f32.mrb[5].mxu1 }
  0xfd   : > { %v476_v18 = vadd.f32 %v472_v15, %v457_v10  ;;  %v475_v19 = vld [vmem:[#allocation2 + $0x18] sm:$0xff]  ;;  %v1546_v20 = vpop.f32.mrb[6].mxu1 }
  0xfe   : > { %482 = vst.msk [vmem:[#allocation2 + $0x10] sm:$0xff] %vm220_vm0, %v478_v14  ;;  %v479_v21 = vadd.f32 %v1534_v12, %v475_v19  ;;  %v473_v22 = vld [vmem:[#allocation2 + $0x8] sm:$0xff]  ;;  %v601_v23 = vpop.f32.mrb[7].mxu1 }
  0xff   : > { %480 = vst.msk [vmem:[#allocation2] sm:$0xff] %vm220_vm0, %v476_v18  ;;  %v477_v24 = vadd.f32 %v473_v22, %v460_v16 }
 0x100   : > { %483 = vst.msk [vmem:[#allocation2 + $0x18] sm:$0xff] %vm220_vm0, %v479_v21 }
 0x101   : > { %481 = vst.msk [vmem:[#allocation2 + $0x8] sm:$0xff] %vm220_vm0, %v477_v24 }
 0x105   : > { %v615_v25 = vld [vmem:[#allocation2 + $0x10] sm:$0xff] }
 0x106   : > { %v619_v26 = vadd.f32 %v1545_v13, %v615_v25  ;;  %v613_v27 = vld [vmem:[#allocation2] sm:$0xff] }
 0x107   : > { %v617_v28 = vadd.f32 %v613_v27, %v598_v17  ;;  %v616_v29 = vld [vmem:[#allocation2 + $0x18] sm:$0xff] }
 0x108   : > { %623 = vst.msk [vmem:[#allocation2 + $0x10] sm:$0xff] %vm220_vm0, %v619_v26  ;;  %v620_v30 = vadd.f32 %v1546_v20, %v616_v29  ;;  %v614_v31 = vld [vmem:[#allocation2 + $0x8] sm:$0xff]  ;;  %v1441_v29 = vld [vmem:[%s1931_s2] ss:$0 sm:$0xff] }
 0x109   : > { %621 = vst.msk [vmem:[#allocation2] sm:$0xff] %vm220_vm0, %v617_v28  ;;  %v618_v32 = vadd.f32 %v614_v31, %v601_v23  ;;  %v1557_v33 = vpop.f32.mrb[8].mxu0 }
 0x10a   : > { %624 = vst.msk [vmem:[#allocation2 + $0x18] sm:$0xff] %vm220_vm0, %v620_v30  ;;  %v723_v34 = vpop.f32.mrb[9].mxu0 }
 0x10b   : > { %622 = vst.msk [vmem:[#allocation2 + $0x8] sm:$0xff] %vm220_vm0, %v618_v32  ;;  %v1558_v35 = vpop.f32.mrb[10].mxu0  ;;  %v1569_v36 = vpop.f32.mrb[8].mxu1 }
 0x10c   : > { %v726_v37 = vpop.f32.mrb[11].mxu0  ;;  %v840_v38 = vpop.f32.mrb[9].mxu1 }
 0x10d   : > { %v1570_v39 = vpop.f32.mrb[10].mxu1 }
 0x10e   : > { %v843_v40 = vpop.f32.mrb[11].mxu1 }
 0x10f   : > { %v740_v41 = vld [vmem:[#allocation2 + $0x10] sm:$0xff] }
 0x110   : > { %v744_v42 = vadd.f32 %v1557_v33, %v740_v41  ;;  %v738_v43 = vld [vmem:[#allocation2] sm:$0xff] }
 0x111   : > { %v742_v44 = vadd.f32 %v738_v43, %v723_v34  ;;  %v741_v45 = vld [vmem:[#allocation2 + $0x18] sm:$0xff] }
 0x112   : > { %748 = vst.msk [vmem:[#allocation2 + $0x10] sm:$0xff] %vm220_vm0, %v744_v42  ;;  %v745_v46 = vadd.f32 %v1558_v35, %v741_v45  ;;  %v739_v47 = vld [vmem:[#allocation2 + $0x8] sm:$0xff] }
 0x113   : > { %746 = vst.msk [vmem:[#allocation2] sm:$0xff] %vm220_vm0, %v742_v44  ;;  %v743_v48 = vadd.f32 %v739_v47, %v726_v37 }
 0x114   : > { %749 = vst.msk [vmem:[#allocation2 + $0x18] sm:$0xff] %vm220_vm0, %v745_v46 }
 0x115   : > { %747 = vst.msk [vmem:[#allocation2 + $0x8] sm:$0xff] %vm220_vm0, %v743_v48 }
 0x119   : > { %v857_v49 = vld [vmem:[#allocation2 + $0x10] sm:$0xff]  ;;  %v1581_v50 = vpop.f32.mrb[12].mxu0 }
 0x11a   : > { %v861_v51 = vadd.f32 %v1569_v36, %v857_v49  ;;  %v855_v52 = vld [vmem:[#allocation2] sm:$0xff]  ;;  %v966_v53 = vpop.f32.mrb[13].mxu0 }
 0x11b   : > { %v859_v54 = vadd.f32 %v855_v52, %v840_v38  ;;  %v858_v55 = vld [vmem:[#allocation2 + $0x18] sm:$0xff]  ;;  %v1582_v56 = vpop.f32.mrb[14].mxu0  ;;  %v1593_v57 = vpop.f32.mrb[12].mxu1 }
 0x11c   : > { %865 = vst.msk [vmem:[#allocation2 + $0x10] sm:$0xff] %vm220_vm0, %v861_v51  ;;  %v862_v58 = vadd.f32 %v1570_v39, %v858_v55  ;;  %v856_v59 = vld [vmem:[#allocation2 + $0x8] sm:$0xff]  ;;  %v969_v60 = vpop.f32.mrb[15].mxu0  ;;  %v1076_v61 = vpop.f32.mrb[13].mxu1 }
 0x11d   : > { %863 = vst.msk [vmem:[#allocation2] sm:$0xff] %vm220_vm0, %v859_v54  ;;  %v860_v62 = vadd.f32 %v856_v59, %v843_v40  ;;  %v1594_v63 = vpop.f32.mrb[14].mxu1 }
 0x11e   : > { %866 = vst.msk [vmem:[#allocation2 + $0x18] sm:$0xff] %vm220_vm0, %v862_v58  ;;  %v1079_v0 = vpop.f32.mrb[15].mxu1 }
 0x11f   : > { %864 = vst.msk [vmem:[#allocation2 + $0x8] sm:$0xff] %vm220_vm0, %v860_v62 }
 0x123   : > { %v983_v1 = vld [vmem:[#allocation2 + $0x10] sm:$0xff] }
 0x124   : > { %v987_v2 = vadd.f32 %v1581_v50, %v983_v1  ;;  %v981_v3 = vld [vmem:[#allocation2] sm:$0xff] }
 0x125   : > { %v985_v4 = vadd.f32 %v981_v3, %v966_v53  ;;  %v984_v5 = vld [vmem:[#allocation2 + $0x18] sm:$0xff] }
 0x126   : > { %991 = vst.msk [vmem:[#allocation2 + $0x10] sm:$0xff] %vm220_vm0, %v987_v2  ;;  %v988_v6 = vadd.f32 %v1582_v56, %v984_v5  ;;  %v982_v7 = vld [vmem:[#allocation2 + $0x8] sm:$0xff] }
 0x127   : > { %989 = vst.msk [vmem:[#allocation2] sm:$0xff] %vm220_vm0, %v985_v4  ;;  %v986_v8 = vadd.f32 %v982_v7, %v969_v60 }
 0x128   : > { %992 = vst.msk [vmem:[#allocation2 + $0x18] sm:$0xff] %vm220_vm0, %v988_v6 }
 0x129   : > { %990 = vst.msk [vmem:[#allocation2 + $0x8] sm:$0xff] %vm220_vm0, %v986_v8  ;;  %v1605_v9 = vpop.f32.mrb[16].mxu0 }
 0x12a   : > { %v1184_v10 = vpop.f32.mrb[17].mxu0 }
 0x12b   : > { %v1606_v11 = vpop.f32.mrb[18].mxu0 }
 0x12c   : > { %v1187_v12 = vpop.f32.mrb[19].mxu0 }
 0x12d   : > { %v1093_v13 = vld [vmem:[#allocation2 + $0x10] sm:$0xff] }
 0x12e   : > { %v1097_v14 = vadd.f32 %v1593_v57, %v1093_v13  ;;  %v1091_v15 = vld [vmem:[#allocation2] sm:$0xff] }
 0x12f   : > { %v1095_v16 = vadd.f32 %v1091_v15, %v1076_v61  ;;  %v1094_v17 = vld [vmem:[#allocation2 + $0x18] sm:$0xff] }
 0x130   : > { %1101 = vst.msk [vmem:[#allocation2 + $0x10] sm:$0xff] %vm220_vm0, %v1097_v14  ;;  %v1098_v18 = vadd.f32 %v1594_v63, %v1094_v17  ;;  %v1092_v19 = vld [vmem:[#allocation2 + $0x8] sm:$0xff] }
 0x131   : > { %1099 = vst.msk [vmem:[#allocation2] sm:$0xff] %vm220_vm0, %v1095_v16  ;;  %v1096_v20 = vadd.f32 %v1092_v19, %v1079_v0 }
 0x132   : > { %1102 = vst.msk [vmem:[#allocation2 + $0x18] sm:$0xff] %vm220_vm0, %v1098_v18 }
 0x133   : > { %1100 = vst.msk [vmem:[#allocation2 + $0x8] sm:$0xff] %vm220_vm0, %v1096_v20 }
 0x137   : > { %v1201_v21 = vld [vmem:[#allocation2 + $0x10] sm:$0xff] }
 0x138   : > { %v1205_v22 = vadd.f32 %v1605_v9, %v1201_v21  ;;  %v1199_v23 = vld [vmem:[#allocation2] sm:$0xff] }
 0x139   : > { %v1203_v24 = vadd.f32 %v1199_v23, %v1184_v10  ;;  %v1202_v25 = vld [vmem:[#allocation2 + $0x18] sm:$0xff] }
 0x13a   : > { %1209 = vst.msk [vmem:[#allocation2 + $0x10] sm:$0xff] %vm220_vm0, %v1205_v22  ;;  %v1206_v26 = vadd.f32 %v1606_v11, %v1202_v25  ;;  %v1200_v27 = vld [vmem:[#allocation2 + $0x8] sm:$0xff] }
 0x13b   : > { %1207 = vst.msk [vmem:[#allocation2] sm:$0xff] %vm220_vm0, %v1203_v24  ;;  %v1204_v28 = vadd.f32 %v1200_v27, %v1187_v12 }
 0x13c   : > { %1210 = vst.msk [vmem:[#allocation2 + $0x18] sm:$0xff] %vm220_vm0, %v1206_v26 }
 0x13d   : > { %1208 = vst.msk [vmem:[#allocation2 + $0x8] sm:$0xff] %vm220_vm0, %v1204_v28 }
 0x141   : > { %v1213_v30 = vld [vmem:[#allocation2 + $0x10] sm:$0xff] }
 0x142   : > { %v1224_v31 = vadd.f32 %v1441_v29, %v1213_v30  ;;  %v1211_v32 = vld [vmem:[#allocation2] sm:$0xff] }
 0x143   : > { %v1222_v33 = vadd.f32 %v1441_v29, %v1211_v32  ;;  %v1214_v34 = vld [vmem:[#allocation2 + $0x18] sm:$0xff] }
 0x144   : > { %v1228_v35 = vmax.f32 %v1224_v31, 0.0  ;;  %v1225_v36 = vadd.f32 %v1441_v29, %v1214_v34  ;;  %v1212_v37 = vld [vmem:[#allocation2 + $0x8] sm:$0xff] }
 0x145   : > { %v1226_v38 = vmax.f32 %v1222_v33, 0.0  ;;  %v1223_v39 = vadd.f32 %v1441_v29, %v1212_v37 }
 0x146   : > { %v1232_v40 = vpack.c.bf16 %v1228_v35, %v1228_v35  ;;  %v1229_v41 = vmax.f32 %v1225_v36, 0.0 }
 0x147   : > { %v1230_v42 = vpack.c.bf16 %v1226_v38, %v1226_v38  ;;  %v1227_v43 = vmax.f32 %v1223_v39, 0.0 }
 0x148   : > { %1237 = vst.msk [vmem:[%s170_s21 + $0x4] sm:$0x3] %vm1234_vm3, %v1232_v40  ;;  %v1233_v44 = vpack.c.bf16 %v1229_v41, %v1229_v41 }
 0x149   : > { %1235 = vst.msk [vmem:[%s170_s21] sm:$0x3] %vm1234_vm3, %v1230_v42  ;;  %v1231_v45 = vpack.c.bf16 %v1227_v43, %v1227_v43 }
 0x14a   : > { %1238 = vst.msk [vmem:[%s170_s21 + $0x6] sm:$0x3] %vm1234_vm3, %v1233_v44 }
 0x14b   : > { %1236 = vst.msk [vmem:[%s170_s21 + $0x2] sm:$0x3] %vm1234_vm3, %v1231_v45 }
 0x14c PF: > { %s13_s12 = sadd.s32 1, %s1679_s12  }
 0x14d   : > { %p10_p4 = scmp.ge.s32.totalorder %s13_s12, 4  }
 0x14f   :  { %12 = sbr.rel (!%p10_p4) target bundleno = 1 (0x1), region = 70 }

// kernel: resnet_baseline_forward.23
= control target key start
LH: loop header
LB: loop body
LE: loop exit
PB: predicated region body
PF: predicated region fallthrough
CT: control target
= control target key end

     0   :  { %s956_s1 = inlined_call_operand.vmem [shape: bf16[256,512], index: 1, kind: input, shape index: {}]   ;;  %s957_s0 = inlined_call_operand.vmem [shape: bf16[16,256], index: 0, kind: input, shape index: {}]   ;;  %s958_s2 = inlined_call_operand.vmem [shape: f32[1,512], index: 2, kind: input, shape index: {}]   ;;  %s959_s3 = inlined_call_operand.vmem [shape: bf16[16,512], index: 3, kind: output, shape index: {}]  }
   0x1   :  { %v624_v0 = vld [vmem:[%s956_s1 + $0x4] ss:$16 sps:$4 sm:$0xff]   ;;  %v626_v1 = vld [vmem:[%s956_s1 + $0xc] ss:$16 sps:$4 sm:$0xff]   ;;  %v628_v2 = vld [vmem:[%s956_s1] ss:$16 sps:$4 sm:$0xff]  }
   0x2   :  { %432 = vmatprep.subr.bf16.mxu0 %v624_v0  ;;  %v629_v3 = vld [vmem:[%s956_s1 + $0x8] ss:$16 sps:$4 sm:$0xff]   ;;  %475 = vmatprep.subr.bf16.mxu1 %v626_v1  ;;  %v630_v4 = vld [vmem:[%s956_s1 + $0x24] ss:$16 sps:$4 sm:$0xff]   ;;  %v632_v5 = vld [vmem:[%s956_s1 + $0x2c] ss:$16 sps:$4 sm:$0xff]  }
   0x3   :  { %433 = vmatpush1.bf16.msra.mxu0 %v628_v2  ;;  %476 = vmatpush1.bf16.msra.mxu1 %v629_v3  ;;  %v634_v6 = vld [vmem:[%s956_s1 + $0x20] ss:$16 sps:$4 sm:$0xff]   ;;  %v635_v7 = vld [vmem:[%s956_s1 + $0x28] ss:$16 sps:$4 sm:$0xff]   ;;  %v636_v8 = vld [vmem:[%s956_s1 + $0x44] ss:$16 sps:$4 sm:$0xff]   ;;  %v82_v2 = vlaneseq }
   0x4   :  { %434 = vmatprep.subr.bf16.mxu0 %v630_v4  ;;  %477 = vmatprep.subr.bf16.mxu1 %v632_v5  ;;  %v638_v9 = vld [vmem:[%s956_s1 + $0x4c] ss:$16 sps:$4 sm:$0xff]   ;;  %v640_v10 = vld [vmem:[%s956_s1 + $0x40] ss:$16 sps:$4 sm:$0xff]   ;;  %v641_v11 = vld [vmem:[%s956_s1 + $0x48] ss:$16 sps:$4 sm:$0xff]  }
   0x5   :  { %v642_v12 = vld [vmem:[%s956_s1 + $0x64] ss:$16 sps:$4 sm:$0xff]   ;;  %v644_v13 = vld [vmem:[%s956_s1 + $0x6c] ss:$16 sps:$4 sm:$0xff]   ;;  %v646_v14 = vld [vmem:[%s956_s1 + $0x60] ss:$16 sps:$4 sm:$0xff]  }
   0x6   :  { %v647_v15 = vld [vmem:[%s956_s1 + $0x68] ss:$16 sps:$4 sm:$0xff]   ;;  %v648_v16 = vld [vmem:[%s956_s1 + $0x84] ss:$16 sps:$4 sm:$0xff]   ;;  %v650_v17 = vld [vmem:[%s956_s1 + $0x8c] ss:$16 sps:$4 sm:$0xff]  }
   0x7   :  { %435 = vmatpush1.bf16.msra.mxu0 %v634_v6  ;;  %478 = vmatpush1.bf16.msra.mxu1 %v635_v7  ;;  %v652_v18 = vld [vmem:[%s956_s1 + $0x80] ss:$16 sps:$4 sm:$0xff]   ;;  %v653_v19 = vld [vmem:[%s956_s1 + $0x88] ss:$16 sps:$4 sm:$0xff]   ;;  %v654_v20 = vld [vmem:[%s956_s1 + $0xa4] ss:$16 sps:$4 sm:$0xff]  }
   0x8   :  { %436 = vmatprep.subr.bf16.mxu0 %v636_v8  ;;  %479 = vmatprep.subr.bf16.mxu1 %v638_v9  ;;  %v656_v21 = vld [vmem:[%s956_s1 + $0xac] ss:$16 sps:$4 sm:$0xff]   ;;  %v658_v22 = vld [vmem:[%s956_s1 + $0xa0] ss:$16 sps:$4 sm:$0xff]   ;;  %v659_v23 = vld [vmem:[%s956_s1 + $0xa8] ss:$16 sps:$4 sm:$0xff]  }
   0x9   :  { %v660_v24 = vld [vmem:[%s956_s1 + $0xc4] ss:$16 sps:$4 sm:$0xff]   ;;  %v662_v25 = vld [vmem:[%s956_s1 + $0xcc] ss:$16 sps:$4 sm:$0xff]   ;;  %v664_v26 = vld [vmem:[%s956_s1 + $0xc0] ss:$16 sps:$4 sm:$0xff]  }
   0xa   :  { %v665_v27 = vld [vmem:[%s956_s1 + $0xc8] ss:$16 sps:$4 sm:$0xff]   ;;  %v666_v28 = vld [vmem:[%s956_s1 + $0xe4] ss:$16 sps:$4 sm:$0xff]   ;;  %v668_v29 = vld [vmem:[%s956_s1 + $0xec] ss:$16 sps:$4 sm:$0xff]  }
   0xb   :  { %437 = vmatpush1.bf16.msra.mxu0 %v640_v10  ;;  %480 = vmatpush1.bf16.msra.mxu1 %v641_v11  ;;  %v670_v30 = vld [vmem:[%s956_s1 + $0xe0] ss:$16 sps:$4 sm:$0xff]   ;;  %v671_v31 = vld [vmem:[%s956_s1 + $0xe8] ss:$16 sps:$4 sm:$0xff]   ;;  %v672_v32 = vld [vmem:[%s956_s1 + $0x104] ss:$16 sps:$4 sm:$0xff]  }
   0xc   :  { %438 = vmatprep.subr.bf16.mxu0 %v642_v12  ;;  %481 = vmatprep.subr.bf16.mxu1 %v644_v13  ;;  %v674_v33 = vld [vmem:[%s956_s1 + $0x10c] ss:$16 sps:$4 sm:$0xff]   ;;  %v676_v34 = vld [vmem:[%s956_s1 + $0x100] ss:$16 sps:$4 sm:$0xff]   ;;  %v677_v35 = vld [vmem:[%s956_s1 + $0x108] ss:$16 sps:$4 sm:$0xff]  }
   0xd   :  { %v678_v36 = vld [vmem:[%s956_s1 + $0x124] ss:$16 sps:$4 sm:$0xff]   ;;  %v680_v37 = vld [vmem:[%s956_s1 + $0x12c] ss:$16 sps:$4 sm:$0xff]   ;;  %v682_v38 = vld [vmem:[%s956_s1 + $0x120] ss:$16 sps:$4 sm:$0xff]  }
   0xe   :  { %v683_v39 = vld [vmem:[%s956_s1 + $0x128] ss:$16 sps:$4 sm:$0xff]   ;;  %v684_v40 = vld [vmem:[%s956_s1 + $0x144] ss:$16 sps:$4 sm:$0xff]   ;;  %v686_v41 = vld [vmem:[%s956_s1 + $0x14c] ss:$16 sps:$4 sm:$0xff]  }
   0xf   :  { %439 = vmatpush1.bf16.msra.mxu0 %v646_v14  ;;  %482 = vmatpush1.bf16.msra.mxu1 %v647_v15  ;;  %v688_v42 = vld [vmem:[%s956_s1 + $0x140] ss:$16 sps:$4 sm:$0xff]   ;;  %v689_v43 = vld [vmem:[%s956_s1 + $0x148] ss:$16 sps:$4 sm:$0xff]   ;;  %v690_v44 = vld [vmem:[%s956_s1 + $0x164] ss:$16 sps:$4 sm:$0xff]  }
  0x10   :  { %440 = vmatprep.subr.bf16.mxu0 %v648_v16  ;;  %483 = vmatprep.subr.bf16.mxu1 %v650_v17  ;;  %v692_v45 = vld [vmem:[%s956_s1 + $0x16c] ss:$16 sps:$4 sm:$0xff]   ;;  %v694_v47 = vld [vmem:[%s956_s1 + $0x160] ss:$16 sps:$4 sm:$0xff]   ;;  %v695_v48 = vld [vmem:[%s956_s1 + $0x168] ss:$16 sps:$4 sm:$0xff]  }
  0x11   :  { %v722_v46 = vld [vmem:[%s957_s0 + $0x4] ss:$8 sps:$4 sm:$0xff]   ;;  %v700_v51 = vld [vmem:[%s956_s1 + $0x180] ss:$16 sps:$4 sm:$0xff]   ;;  %v701_v52 = vld [vmem:[%s956_s1 + $0x188] ss:$16 sps:$4 sm:$0xff]  }
  0x12   :  { %v696_v49 = vld [vmem:[%s956_s1 + $0x184] ss:$16 sps:$4 sm:$0xff]   ;;  %v698_v50 = vld [vmem:[%s956_s1 + $0x18c] ss:$16 sps:$4 sm:$0xff]   ;;  %464 = vmatprep.mubr.bf16.mxu0 %v722_v46  ;;  %507 = vmatprep.mubr.bf16.mxu1 %v722_v46  ;;  %v706_v55 = vld [vmem:[%s956_s1 + $0x1a0] ss:$16 sps:$4 sm:$0xff]  }
  0x13   :  { %441 = vmatpush1.bf16.msra.mxu0 %v652_v18  ;;  %484 = vmatpush1.bf16.msra.mxu1 %v653_v19  ;;  %v702_v53 = vld [vmem:[%s956_s1 + $0x1a4] ss:$16 sps:$4 sm:$0xff]   ;;  %v704_v54 = vld [vmem:[%s956_s1 + $0x1ac] ss:$16 sps:$4 sm:$0xff]   ;;  %v707_v56 = vld [vmem:[%s956_s1 + $0x1a8] ss:$16 sps:$4 sm:$0xff]  }
  0x14   :  { %442 = vmatprep.subr.bf16.mxu0 %v654_v20  ;;  %485 = vmatprep.subr.bf16.mxu1 %v656_v21  ;;  %v708_v57 = vld [vmem:[%s956_s1 + $0x1c4] ss:$16 sps:$4 sm:$0xff]   ;;  %v710_v58 = vld [vmem:[%s956_s1 + $0x1cc] ss:$16 sps:$4 sm:$0xff]   ;;  %v712_v59 = vld [vmem:[%s956_s1 + $0x1c0] ss:$16 sps:$4 sm:$0xff]  }
  0x15   :  { %v713_v60 = vld [vmem:[%s956_s1 + $0x1c8] ss:$16 sps:$4 sm:$0xff]   ;;  %v714_v61 = vld [vmem:[%s956_s1 + $0x1e4] ss:$16 sps:$4 sm:$0xff]   ;;  %v716_v62 = vld [vmem:[%s956_s1 + $0x1ec] ss:$16 sps:$4 sm:$0xff]  }
  0x16   :  { %v718_v63 = vld [vmem:[%s956_s1 + $0x1e0] ss:$16 sps:$4 sm:$0xff]   ;;  %v719_v0 = vld [vmem:[%s956_s1 + $0x1e8] ss:$16 sps:$4 sm:$0xff]   ;;  %v83_v3 = vshrl.u32 %v82_v2, 7 }
  0x17   :  { %443 = vmatpush1.bf16.msra.mxu0 %v658_v22  ;;  %486 = vmatpush1.bf16.msra.mxu1 %v659_v23  ;;  %v720_v1 = vld [vmem:[%s957_s0] ss:$8 sps:$4 sm:$0xff]  }
  0x18   :  { %444 = vmatprep.subr.bf16.mxu0 %v660_v24  ;;  %487 = vmatprep.subr.bf16.mxu1 %v662_v25  ;;  %v84_v4 = vsub.s32 0, %v83_v3  ;;  %v92_v5 = vsub.s32 2, %v83_v3  ;;  %v80_v6 = vld [vmem:[%s958_s2] sm:$0xf]  ;;  %v88_v7 = vsub.s32 1, %v83_v3  ;;  %v96_v8 = vsub.s32 3, %v83_v3 }
  0x1a   :  { %v85_v9 = vrot.slane %v80_v6, %v84_v4  ;;  %v93_v10 = vrot.slane %v80_v6, %v92_v5  ;;  %v89_v11 = vrot.slane %v80_v6, %v88_v7  ;;  %v97_v12 = vrot.slane %v80_v6, %v96_v8 }
  0x1b   :  { %445 = vmatpush1.bf16.msra.mxu0 %v664_v26  ;;  %488 = vmatpush1.bf16.msra.mxu1 %v665_v27 }
  0x1c   :  { %446 = vmatprep.subr.bf16.mxu0 %v666_v28  ;;  %489 = vmatprep.subr.bf16.mxu1 %v668_v29 }
  0x1f   :  { %447 = vmatpush1.bf16.msra.mxu0 %v670_v30  ;;  %490 = vmatpush1.bf16.msra.mxu1 %v671_v31 }
  0x20   :  { %448 = vmatprep.subr.bf16.mxu0 %v672_v32  ;;  %491 = vmatprep.subr.bf16.mxu1 %v674_v33 }
  0x23   :  { %449 = vmatpush1.bf16.msra.mxu0 %v676_v34  ;;  %492 = vmatpush1.bf16.msra.mxu1 %v677_v35 }
  0x24   :  { %450 = vmatprep.subr.bf16.mxu0 %v678_v36  ;;  %493 = vmatprep.subr.bf16.mxu1 %v680_v37 }
  0x27   :  { %451 = vmatpush1.bf16.msra.mxu0 %v682_v38  ;;  %494 = vmatpush1.bf16.msra.mxu1 %v683_v39 }
  0x28   :  { %452 = vmatprep.subr.bf16.mxu0 %v684_v40  ;;  %495 = vmatprep.subr.bf16.mxu1 %v686_v41 }
  0x2b   :  { %453 = vmatpush1.bf16.msra.mxu0 %v688_v42  ;;  %496 = vmatpush1.bf16.msra.mxu1 %v689_v43 }
  0x2c   :  { %454 = vmatprep.subr.bf16.mxu0 %v690_v44  ;;  %497 = vmatprep.subr.bf16.mxu1 %v692_v45 }
  0x2f   :  { %455 = vmatpush1.bf16.msra.mxu0 %v694_v47  ;;  %498 = vmatpush1.bf16.msra.mxu1 %v695_v48 }
  0x30   :  { %456 = vmatprep.subr.bf16.mxu0 %v696_v49  ;;  %499 = vmatprep.subr.bf16.mxu1 %v698_v50 }
  0x33   :  { %457 = vmatpush1.bf16.msra.mxu0 %v700_v51  ;;  %500 = vmatpush1.bf16.msra.mxu1 %v701_v52 }
  0x34   :  { %458 = vmatprep.subr.bf16.mxu0 %v702_v53  ;;  %501 = vmatprep.subr.bf16.mxu1 %v704_v54 }
  0x37   :  { %459 = vmatpush1.bf16.msra.mxu0 %v706_v55  ;;  %502 = vmatpush1.bf16.msra.mxu1 %v707_v56 }
  0x38   :  { %460 = vmatprep.subr.bf16.mxu0 %v708_v57  ;;  %503 = vmatprep.subr.bf16.mxu1 %v710_v58 }
  0x3b   :  { %461 = vmatpush1.bf16.msra.mxu0 %v712_v59  ;;  %504 = vmatpush1.bf16.msra.mxu1 %v713_v60 }
  0x3c   :  { %462 = vmatprep.subr.bf16.mxu0 %v714_v61  ;;  %505 = vmatprep.subr.bf16.mxu1 %v716_v62 }
  0x3f   :  { %463 = vmatpush1.bf16.msra.mxu0 %v718_v63  ;;  %506 = vmatpush1.bf16.msra.mxu1 %v719_v0 }
  0x42   :  { %465 = vmatmul.mubr.bf16.vlgmr.msra.gmra.mrb[0].mxu0 %v720_v1  ;;  %508 = vmatmul.mubr.bf16.vlgmr.msra.gmra.mrb[0].mxu1 %v720_v1 }
 0x115   :  { %v466_v13 = vpop.f32.mrb[0].mxu0  ;;  %v509_v14 = vpop.f32.mrb[0].mxu1 }
 0x116   :  { %v467_v15 = vadd.f32 %v466_v13, %v85_v9  ;;  %v510_v16 = vadd.f32 %v509_v14, %v93_v10  ;;  %v468_v17 = vpop.f32.mrb[1].mxu0  ;;  %v511_v18 = vpop.f32.mrb[1].mxu1 }
 0x117   :  { %v469_v19 = vadd.f32 %v468_v17, %v89_v11  ;;  %v512_v20 = vadd.f32 %v511_v18, %v97_v12  ;;  %v470_v21 = vpop.f32.mrb[2].mxu0  ;;  %v513_v22 = vpop.f32.mrb[2].mxu1 }
 0x118   :  { %v471_v23 = vadd.f32 %v470_v21, %v85_v9  ;;  %v514_v24 = vadd.f32 %v513_v22, %v93_v10  ;;  %v472_v25 = vpop.f32.mrb[3].mxu0  ;;  %v515_v26 = vpop.f32.mrb[3].mxu1 }
 0x119   :  { %v620_v27 = vpack.c.bf16 %v469_v19, %v467_v15  ;;  %v621_v28 = vpack.c.bf16 %v512_v20, %v510_v16  ;;  %v473_v29 = vadd.f32 %v472_v25, %v89_v11  ;;  %v516_v30 = vadd.f32 %v515_v26, %v97_v12 }
 0x11b   :  { %542 = vst [vmem:[%s959_s3] sm:$0xff] %v620_v27  ;;  %543 = vst [vmem:[%s959_s3 + $0x8] sm:$0xff] %v621_v28  ;;  %v622_v31 = vpack.c.bf16 %v473_v29, %v471_v23  ;;  %v623_v32 = vpack.c.bf16 %v516_v30, %v514_v24 }
 0x11d   :  { %544 = vst [vmem:[%s959_s3 + $0x10] sm:$0xff] %v622_v31  ;;  %545 = vst [vmem:[%s959_s3 + $0x18] sm:$0xff] %v623_v32 }

// kernel: resnet_baseline_forward.24
= control target key start
LH: loop header
LB: loop body
LE: loop exit
PB: predicated region body
PF: predicated region fallthrough
CT: control target
= control target key end

     0   :  { %v477_v1 = vmov 0   ;;  %v54_v34 = vlaneseq  ;;  %s629_s1 = inlined_call_operand.vmem [shape: bf16[128,512], index: 1, kind: input, shape index: {}]   ;;  %s630_s0 = inlined_call_operand.vmem [shape: bf16[16,128], index: 0, kind: input, shape index: {}]   ;;  %s631_s2 = inlined_call_operand.vmem [shape: f32[1,512], index: 2, kind: input, shape index: {}]   ;;  %s632_s3 = inlined_call_operand.vmem [shape: bf16[16,512], index: 3, kind: input, shape index: {}]   ;;  %s633_s4 = inlined_call_operand.vmem [shape: bf16[16,512], index: 4, kind: output, shape index: {}]  }
   0x1   :  { %v428_v0 = vld [vmem:[%s629_s1 + $0x4] ss:$16 sps:$4 sm:$0xff]   ;;  %272 = vmatprep.mubr.bf16.mxu0 %v477_v1  ;;  %315 = vmatprep.mubr.bf16.mxu1 %v477_v1  ;;  %v430_v2 = vld [vmem:[%s629_s1 + $0xc] ss:$16 sps:$4 sm:$0xff]   ;;  %v432_v3 = vld [vmem:[%s629_s1] ss:$16 sps:$4 sm:$0xff]  }
   0x2   :  { %240 = vmatprep.subr.bf16.mxu0 %v428_v0  ;;  %v433_v4 = vld [vmem:[%s629_s1 + $0x8] ss:$16 sps:$4 sm:$0xff]   ;;  %283 = vmatprep.subr.bf16.mxu1 %v430_v2  ;;  %v434_v5 = vld [vmem:[%s629_s1 + $0x24] ss:$16 sps:$4 sm:$0xff]   ;;  %v436_v6 = vld [vmem:[%s629_s1 + $0x2c] ss:$16 sps:$4 sm:$0xff]  }
   0x3   :  { %241 = vmatpush1.bf16.msra.mxu0 %v432_v3  ;;  %284 = vmatpush1.bf16.msra.mxu1 %v433_v4  ;;  %v438_v7 = vld [vmem:[%s629_s1 + $0x20] ss:$16 sps:$4 sm:$0xff]   ;;  %v439_v8 = vld [vmem:[%s629_s1 + $0x28] ss:$16 sps:$4 sm:$0xff]   ;;  %v440_v9 = vld [vmem:[%s629_s1 + $0x44] ss:$16 sps:$4 sm:$0xff]  }
   0x4   :  { %242 = vmatprep.subr.bf16.mxu0 %v434_v5  ;;  %285 = vmatprep.subr.bf16.mxu1 %v436_v6  ;;  %v442_v10 = vld [vmem:[%s629_s1 + $0x4c] ss:$16 sps:$4 sm:$0xff]   ;;  %v444_v11 = vld [vmem:[%s629_s1 + $0x40] ss:$16 sps:$4 sm:$0xff]   ;;  %v445_v12 = vld [vmem:[%s629_s1 + $0x48] ss:$16 sps:$4 sm:$0xff]  }
   0x5   :  { %v446_v13 = vld [vmem:[%s629_s1 + $0x64] ss:$16 sps:$4 sm:$0xff]   ;;  %v448_v14 = vld [vmem:[%s629_s1 + $0x6c] ss:$16 sps:$4 sm:$0xff]   ;;  %v450_v15 = vld [vmem:[%s629_s1 + $0x60] ss:$16 sps:$4 sm:$0xff]  }
   0x6   :  { %v451_v16 = vld [vmem:[%s629_s1 + $0x68] ss:$16 sps:$4 sm:$0xff]   ;;  %v452_v17 = vld [vmem:[%s629_s1 + $0x84] ss:$16 sps:$4 sm:$0xff]   ;;  %v454_v18 = vld [vmem:[%s629_s1 + $0x8c] ss:$16 sps:$4 sm:$0xff]  }
   0x7   :  { %243 = vmatpush1.bf16.msra.mxu0 %v438_v7  ;;  %286 = vmatpush1.bf16.msra.mxu1 %v439_v8  ;;  %v456_v19 = vld [vmem:[%s629_s1 + $0x80] ss:$16 sps:$4 sm:$0xff]   ;;  %v457_v20 = vld [vmem:[%s629_s1 + $0x88] ss:$16 sps:$4 sm:$0xff]   ;;  %v458_v21 = vld [vmem:[%s629_s1 + $0xa4] ss:$16 sps:$4 sm:$0xff]  }
   0x8   :  { %244 = vmatprep.subr.bf16.mxu0 %v440_v9  ;;  %287 = vmatprep.subr.bf16.mxu1 %v442_v10  ;;  %v460_v22 = vld [vmem:[%s629_s1 + $0xac] ss:$16 sps:$4 sm:$0xff]   ;;  %v462_v23 = vld [vmem:[%s629_s1 + $0xa0] ss:$16 sps:$4 sm:$0xff]   ;;  %v463_v24 = vld [vmem:[%s629_s1 + $0xa8] ss:$16 sps:$4 sm:$0xff]  }
   0x9   :  { %v464_v25 = vld [vmem:[%s629_s1 + $0xc4] ss:$16 sps:$4 sm:$0xff]   ;;  %v466_v26 = vld [vmem:[%s629_s1 + $0xcc] ss:$16 sps:$4 sm:$0xff]   ;;  %v468_v27 = vld [vmem:[%s629_s1 + $0xc0] ss:$16 sps:$4 sm:$0xff]  }
   0xa   :  { %v469_v28 = vld [vmem:[%s629_s1 + $0xc8] ss:$16 sps:$4 sm:$0xff]   ;;  %v470_v29 = vld [vmem:[%s629_s1 + $0xe4] ss:$16 sps:$4 sm:$0xff]   ;;  %v472_v30 = vld [vmem:[%s629_s1 + $0xec] ss:$16 sps:$4 sm:$0xff]  }
   0xb   :  { %245 = vmatpush1.bf16.msra.mxu0 %v444_v11  ;;  %288 = vmatpush1.bf16.msra.mxu1 %v445_v12  ;;  %v474_v31 = vld [vmem:[%s629_s1 + $0xe0] ss:$16 sps:$4 sm:$0xff]   ;;  %v475_v32 = vld [vmem:[%s629_s1 + $0xe8] ss:$16 sps:$4 sm:$0xff]   ;;  %v55_v35 = vshrl.u32 %v54_v34, 7 }
   0xc   :  { %246 = vmatprep.subr.bf16.mxu0 %v446_v13  ;;  %289 = vmatprep.subr.bf16.mxu1 %v448_v14  ;;  %v476_v33 = vld [vmem:[%s630_s0] sm:$0xff]   ;;  %v327_v42 = vld [vmem:[%s632_s3 + $0x8] sm:$0xff]  ;;  %v328_v47 = vld [vmem:[%s632_s3 + $0x10] sm:$0xff] }
   0xd   :  { %v56_v36 = vsub.s32 0, %v55_v35  ;;  %v64_v37 = vsub.s32 2, %v55_v35  ;;  %v52_v38 = vld [vmem:[%s631_s2] sm:$0xf]  ;;  %v60_v39 = vsub.s32 1, %v55_v35  ;;  %v68_v40 = vsub.s32 3, %v55_v35 }
   0xe   :  { %v326_v41 = vld [vmem:[%s632_s3] sm:$0xff]  ;;  %v329_v48 = vld [vmem:[%s632_s3 + $0x18] sm:$0xff]  ;;  %v332_v50 = vunpack.c.l.bf16 %v327_v42  ;;  %v333_v54 = vunpack.c.h.bf16 %v327_v42  ;;  %v334_v59 = vunpack.c.l.bf16 %v328_v47  ;;  %v335_v1 = vunpack.c.h.bf16 %v328_v47 }
   0xf   :  { %247 = vmatpush1.bf16.msra.mxu0 %v450_v15  ;;  %290 = vmatpush1.bf16.msra.mxu1 %v451_v16  ;;  %v57_v43 = vrot.slane %v52_v38, %v56_v36  ;;  %v65_v44 = vrot.slane %v52_v38, %v64_v37  ;;  %v61_v45 = vrot.slane %v52_v38, %v60_v39  ;;  %v330_v49 = vunpack.c.l.bf16 %v326_v41 }
  0x10   :  { %248 = vmatprep.subr.bf16.mxu0 %v452_v17  ;;  %291 = vmatprep.subr.bf16.mxu1 %v454_v18  ;;  %v69_v46 = vrot.slane %v52_v38, %v68_v40  ;;  %v331_v53 = vunpack.c.h.bf16 %v326_v41  ;;  %v336_v60 = vunpack.c.l.bf16 %v329_v48  ;;  %v337_v2 = vunpack.c.h.bf16 %v329_v48 }
  0x13   :  { %249 = vmatpush1.bf16.msra.mxu0 %v456_v19  ;;  %292 = vmatpush1.bf16.msra.mxu1 %v457_v20 }
  0x14   :  { %250 = vmatprep.subr.bf16.mxu0 %v458_v21  ;;  %293 = vmatprep.subr.bf16.mxu1 %v460_v22 }
  0x17   :  { %251 = vmatpush1.bf16.msra.mxu0 %v462_v23  ;;  %294 = vmatpush1.bf16.msra.mxu1 %v463_v24 }
  0x18   :  { %252 = vmatprep.subr.bf16.mxu0 %v464_v25  ;;  %295 = vmatprep.subr.bf16.mxu1 %v466_v26 }
  0x1b   :  { %253 = vmatpush1.bf16.msra.mxu0 %v468_v27  ;;  %296 = vmatpush1.bf16.msra.mxu1 %v469_v28 }
  0x1c   :  { %254 = vmatprep.subr.bf16.mxu0 %v470_v29  ;;  %297 = vmatprep.subr.bf16.mxu1 %v472_v30 }
  0x1f   :  { %255 = vmatpush1.bf16.msra.mxu0 %v474_v31  ;;  %298 = vmatpush1.bf16.msra.mxu1 %v475_v32 }
  0x22   :  { %273 = vmatmul.mubr.bf16.vlgmr.msra.gmra.mrb[0].mxu0 %v476_v33  ;;  %316 = vmatmul.mubr.bf16.vlgmr.msra.gmra.mrb[0].mxu1 %v476_v33 }
  0xf5   :  { %v274_v51 = vpop.f32.mrb[0].mxu0  ;;  %v317_v52 = vpop.f32.mrb[0].mxu1 }
  0xf6   :  { %v275_v55 = vadd.f32 %v274_v51, %v57_v43  ;;  %v318_v56 = vadd.f32 %v317_v52, %v65_v44  ;;  %v276_v57 = vpop.f32.mrb[1].mxu0  ;;  %v319_v58 = vpop.f32.mrb[1].mxu1 }
  0xf7   :  { %v277_v61 = vadd.f32 %v276_v57, %v61_v45  ;;  %v320_v62 = vadd.f32 %v319_v58, %v69_v46  ;;  %v278_v63 = vpop.f32.mrb[2].mxu0  ;;  %v321_v0 = vpop.f32.mrb[2].mxu1 }
  0xf8   :  { %v338_v3 = vadd.f32 %v330_v49, %v275_v55  ;;  %v340_v4 = vadd.f32 %v332_v50, %v318_v56  ;;  %v279_v5 = vadd.f32 %v278_v63, %v57_v43  ;;  %v322_v6 = vadd.f32 %v321_v0, %v65_v44  ;;  %v280_v7 = vpop.f32.mrb[3].mxu0  ;;  %v323_v8 = vpop.f32.mrb[3].mxu1 }
  0xf9   :  { %v339_v9 = vadd.f32 %v331_v53, %v277_v61  ;;  %v341_v10 = vadd.f32 %v333_v54, %v320_v62  ;;  %v281_v11 = vadd.f32 %v280_v7, %v61_v45  ;;  %v324_v12 = vadd.f32 %v323_v8, %v69_v46 }
  0xfa   :  { %v346_v13 = vmax.f32 %v338_v3, 0.0  ;;  %v348_v14 = vmax.f32 %v340_v4, 0.0  ;;  %v342_v15 = vadd.f32 %v334_v59, %v279_v5  ;;  %v344_v16 = vadd.f32 %v336_v60, %v322_v6 }
  0xfb   :  { %v347_v17 = vmax.f32 %v339_v9, 0.0  ;;  %v349_v18 = vmax.f32 %v341_v10, 0.0  ;;  %v343_v19 = vadd.f32 %v335_v1, %v281_v11  ;;  %v345_v20 = vadd.f32 %v337_v2, %v324_v12 }
  0xfc   :  { %v350_v21 = vmax.f32 %v342_v15, 0.0  ;;  %v352_v22 = vmax.f32 %v344_v16, 0.0 }
  0xfd   :  { %v423_v23 = vpack.c.bf16 %v347_v17, %v346_v13  ;;  %v424_v24 = vpack.c.bf16 %v349_v18, %v348_v14  ;;  %v351_v25 = vmax.f32 %v343_v19, 0.0  ;;  %v353_v26 = vmax.f32 %v345_v20, 0.0 }
  0xff   :  { %378 = vst [vmem:[%s633_s4] sm:$0xff] %v423_v23  ;;  %379 = vst [vmem:[%s633_s4 + $0x8] sm:$0xff] %v424_v24  ;;  %v425_v27 = vpack.c.bf16 %v351_v25, %v350_v21  ;;  %v426_v28 = vpack.c.bf16 %v353_v26, %v352_v22 }
 0x101   :  { %380 = vst [vmem:[%s633_s4 + $0x10] sm:$0xff] %v425_v27  ;;  %381 = vst [vmem:[%s633_s4 + $0x18] sm:$0xff] %v426_v28 }

// kernel: resnet_baseline_forward.22
= control target key start
LH: loop header
LB: loop body
LE: loop exit
PB: predicated region body
PF: predicated region fallthrough
CT: control target
= control target key end

     0   :  { %s2520_s12 = smov 0   ;;  %s3018_s0 = inlined_call_operand.vmem [shape: bf16[2,32,512], index: 0, kind: input, shape index: {}]   ;;  %s3019_s1 = inlined_call_operand.vmem [shape: bf16[4,512,128], index: 1, kind: input, shape index: {}]   ;;  %s3020_s2 = inlined_call_operand.vmem [shape: f32[1,128], index: 2, kind: input, shape index: {}]   ;;  %s3021_s3 = inlined_call_operand.vmem [shape: bf16[2,2,2,128], index: 3, kind: output, shape index: {}]  }
   0x1 LB: > { %s1808_s13 = sadd.s32 4294967295, %s2498_s12   ;;  %p1812_p0 = scmp.ge.s32.totalorder %s2498_s12, 1  ;;  %s2498_s12 = sphi %s2520_s12, %s13_s12  }
   0x2   : > { %p137_p1 = scmp.lt.s32.totalorder %s2498_s12, 3 }
   0x4   : > { %p138_p2 = pnand %p1812_p0, %p137_p1 }
   0x5   : > { %v2348_v0 = vld [vmem:[%s3019_s1 + $0x40] sm:$0xff] (!%p138_p2)   ;;  %v2352_v4 = vld [vmem:[%s3019_s1 + $0x48] sm:$0xff] (!%p138_p2)   ;;  %v2356_v8 = vld [vmem:[%s3019_s1 + $0x50] sm:$0xff] (!%p138_p2)   ;;  %p160_p3 = scmp.lt.s32.totalorder (!%p138_p2), %s1808_s13, 1  ;;  %vm994_vm0 = vsmask.f32 (!%p138_p2), 7424 }
   0x6   : > { %141 = sbr.rel (%p138_p2) target bundleno = 364 (0x16c), region = 32  ;;  %v2349_v1 = vld [vmem:[%s3019_s1 + $0xc0] sm:$0xff] (!%p138_p2)   ;;  %2164 = vmatprep.subr.bf16.mxu0 (!%p138_p2), %v2348_v0  ;;  %v2353_v5 = vld [vmem:[%s3019_s1 + $0xc8] sm:$0xff] (!%p138_p2)   ;;  %v2357_v9 = vld [vmem:[%s3019_s1 + $0xd0] sm:$0xff] (!%p138_p2)  }
   0x7   : > { %v2350_v2 = vld [vmem:[%s3019_s1] sm:$0xff] (!%p138_p2)   ;;  %2186 = vmatprep.subr.bf16.mxu1 (!%p138_p2), %v2349_v1  ;;  %v2354_v6 = vld [vmem:[%s3019_s1 + $0x8] sm:$0xff] (!%p138_p2)   ;;  %v2358_v10 = vld [vmem:[%s3019_s1 + $0x10] sm:$0xff] (!%p138_p2)  }
   0x8   : > { %v2351_v3 = vld [vmem:[%s3019_s1 + $0x80] sm:$0xff] (!%p138_p2)   ;;  %2165 = vmatpush3.bf16.msra.mxu0 (!%p138_p2), %v2350_v2  ;;  %v2355_v7 = vld [vmem:[%s3019_s1 + $0x88] sm:$0xff] (!%p138_p2)   ;;  %v2359_v11 = vld [vmem:[%s3019_s1 + $0x90] sm:$0xff] (!%p138_p2)  }
   0x9   : > { %2187 = vmatpush3.bf16.msra.mxu1 (!%p138_p2), %v2351_v3  ;;  %2166 = vmatprep.subr.bf16.mxu0 (!%p138_p2), %v2352_v4  ;;  %v2360_v12 = vld [vmem:[%s3019_s1 + $0x58] sm:$0xff] (!%p138_p2)   ;;  %v2364_v16 = vld [vmem:[%s3019_s1 + $0x60] sm:$0xff] (!%p138_p2)   ;;  %v2368_v20 = vld [vmem:[%s3019_s1 + $0x68] sm:$0xff] (!%p138_p2)  }
   0xa   : > { %2188 = vmatprep.subr.bf16.mxu1 (!%p138_p2), %v2353_v5  ;;  %v2361_v13 = vld [vmem:[%s3019_s1 + $0xd8] sm:$0xff] (!%p138_p2)   ;;  %v2365_v17 = vld [vmem:[%s3019_s1 + $0xe0] sm:$0xff] (!%p138_p2)   ;;  %v2369_v21 = vld [vmem:[%s3019_s1 + $0xe8] sm:$0xff] (!%p138_p2)  }
   0xb   : > { %v2362_v14 = vld [vmem:[%s3019_s1 + $0x18] sm:$0xff] (!%p138_p2)   ;;  %v2366_v18 = vld [vmem:[%s3019_s1 + $0x20] sm:$0xff] (!%p138_p2)   ;;  %v2370_v22 = vld [vmem:[%s3019_s1 + $0x28] sm:$0xff] (!%p138_p2)  }
   0xc   : > { %2167 = vmatpush3.bf16.msra.mxu0 (!%p138_p2), %v2354_v6  ;;  %v2363_v15 = vld [vmem:[%s3019_s1 + $0x98] sm:$0xff] (!%p138_p2)   ;;  %v2367_v19 = vld [vmem:[%s3019_s1 + $0xa0] sm:$0xff] (!%p138_p2)   ;;  %v2371_v23 = vld [vmem:[%s3019_s1 + $0xa8] sm:$0xff] (!%p138_p2)  }
   0xd   : > { %2189 = vmatpush3.bf16.msra.mxu1 %v2355_v7  ;;  %2168 = vmatprep.subr.bf16.mxu0 %v2356_v8  ;;  %s3023_s13 = smov (!%p160_p3, %s1808_s13), 1  ;;  %v2372_v24 = vld [vmem:[%s3019_s1 + $0x70] sm:$0xff]   ;;  %v2376_v28 = vld [vmem:[%s3019_s1 + $0x78] sm:$0xff]   ;;  %v2384_v40 = vld [vmem:[%s3019_s1 + $0x240] sm:$0xff]  }
   0xe   : > { %2190 = vmatprep.subr.bf16.mxu1 %v2357_v9  ;;  %v2373_v25 = vld [vmem:[%s3019_s1 + $0xf0] sm:$0xff]   ;;  %s2163_s18 = sshll.u32 %s3023_s13, 6  ;;  %v2377_v29 = vld [vmem:[%s3019_s1 + $0xf8] sm:$0xff]   ;;  %v2385_v41 = vld [vmem:[%s3019_s1 + $0x2c0] sm:$0xff]   ;;  %s1815_s6 = sshll.u32 %s3023_s13, 1 }
   0xf   : > { %v2374_v26 = vld [vmem:[%s3019_s1 + $0x30] sm:$0xff]   ;;  %s2628_s27 = scalar_lea.vmem %s3018_s0, %s2163_s18  ;;  %v2378_v30 = vld [vmem:[%s3019_s1 + $0x38] sm:$0xff]   ;;  %v2386_v42 = vld [vmem:[%s3019_s1 + $0x200] sm:$0xff]   ;;  %s168_s9 = scalar_lea.vmem %s3021_s3, %s1815_s6 }
  0x10   : > { %2169 = vmatpush3.bf16.msra.mxu0 %v2358_v10  ;;  %v2375_v27 = vld [vmem:[%s3019_s1 + $0xb0] sm:$0xff]   ;;  %v2379_v31 = vld [vmem:[%s3019_s1 + $0xb8] sm:$0xff]   ;;  %v170_v32 = vld [vmem:[%s2628_s27] sm:$0xff] }
  0x11   : > { %2191 = vmatpush3.bf16.msra.mxu1 %v2359_v11  ;;  %2170 = vmatprep.subr.bf16.mxu0 %v2360_v12  ;;  %v2638_v33 = vld [vmem:[%s2628_s27 + $0x10] sm:$0xff]  ;;  %v171_v34 = vld [vmem:[%s2628_s27 + $0x8] sm:$0xff]  ;;  %v2648_v37 = vld [vmem:[%s2628_s27 + $0x18] sm:$0xff] }
  0x12   : > { %2192 = vmatprep.subr.bf16.mxu1 %v2361_v13  ;;  %v2642_v35 = vcombine.low %v170_v32, %v2638_v33  ;;  %v2645_v36 = vcombine.high %v170_v32, %v2638_v33  ;;  %v2651_v38 = vcombine.low %v171_v34, %v2648_v37  ;;  %v2654_v39 = vcombine.high %v171_v34, %v2648_v37  ;;  %v2387_v43 = vld [vmem:[%s3019_s1 + $0x280] sm:$0xff]   ;;  %v2388_v44 = vld [vmem:[%s3019_s1 + $0x248] sm:$0xff]   ;;  %v2392_v48 = vld [vmem:[%s3019_s1 + $0x250] sm:$0xff]  }
  0x13   : > { %v2389_v45 = vld [vmem:[%s3019_s1 + $0x2c8] sm:$0xff]   ;;  %v2393_v49 = vld [vmem:[%s3019_s1 + $0x2d0] sm:$0xff]   ;;  %v2396_v52 = vld [vmem:[%s3019_s1 + $0x258] sm:$0xff]  }
  0x14   : > { %2171 = vmatpush3.bf16.msra.mxu0 %v2362_v14  ;;  %484 = vmatprep.mubr.bf16.mxu0 %v2645_v36  ;;  %v2390_v46 = vld [vmem:[%s3019_s1 + $0x208] sm:$0xff]   ;;  %v2394_v50 = vld [vmem:[%s3019_s1 + $0x210] sm:$0xff]   ;;  %v2397_v53 = vld [vmem:[%s3019_s1 + $0x2d8] sm:$0xff]   ;;  %v1010_v3 = vshll.u32 %v2645_v36, 16  ;;  %v1034_v5 = vshll.u32 %v2654_v39, 16  ;;  %v1008_v9 = vshrl.u32 %v2645_v36, 16 }
  0x15   : > { %2193 = vmatpush3.bf16.msra.mxu1 %v2363_v15  ;;  %2172 = vmatprep.subr.bf16.mxu0 %v2364_v16  ;;  %v2391_v47 = vld [vmem:[%s3019_s1 + $0x288] sm:$0xff]   ;;  %v2395_v51 = vld [vmem:[%s3019_s1 + $0x290] sm:$0xff]   ;;  %v2398_v54 = vld [vmem:[%s3019_s1 + $0x218] sm:$0xff]   ;;  %v1032_v14 = vshrl.u32 %v2654_v39, 16 }
  0x16   : > { %2194 = vmatprep.subr.bf16.mxu1 %v2365_v17  ;;  %525 = vmatprep.mubr.bf16.mxu1 %v2654_v39  ;;  %v2399_v55 = vld [vmem:[%s3019_s1 + $0x298] sm:$0xff]   ;;  %v2400_v56 = vld [vmem:[%s3019_s1 + $0x260] sm:$0xff]   ;;  %v2404_v60 = vld [vmem:[%s3019_s1 + $0x268] sm:$0xff]   ;;  %v1012_v13 = vrot.slane %v1010_v3, 1  ;;  %v1036_v15 = vrot.slane %v1034_v5, 1 }
  0x17   : > { %v2401_v57 = vld [vmem:[%s3019_s1 + $0x2e0] sm:$0xff]   ;;  %v2405_v61 = vld [vmem:[%s3019_s1 + $0x2e8] sm:$0xff]   ;;  %v2408_v0 = vld [vmem:[%s3019_s1 + $0x270] sm:$0xff]  }
  0x18   : > { %2173 = vmatpush3.bf16.msra.mxu0 %v2366_v18  ;;  %v2402_v58 = vld [vmem:[%s3019_s1 + $0x220] sm:$0xff]   ;;  %v2406_v62 = vld [vmem:[%s3019_s1 + $0x228] sm:$0xff]   ;;  %v2409_v1 = vld [vmem:[%s3019_s1 + $0x2f0] sm:$0xff]  }
  0x19   : > { %2195 = vmatpush3.bf16.msra.mxu1 %v2367_v19  ;;  %2174 = vmatprep.subr.bf16.mxu0 %v2368_v20  ;;  %v2403_v59 = vld [vmem:[%s3019_s1 + $0x2a0] sm:$0xff]   ;;  %v2407_v63 = vld [vmem:[%s3019_s1 + $0x2a8] sm:$0xff]   ;;  %v2410_v2 = vld [vmem:[%s3019_s1 + $0x230] sm:$0xff]  }
  0x1a   : > { %2196 = vmatprep.subr.bf16.mxu1 %v2369_v21  ;;  %v2411_v4 = vld [vmem:[%s3019_s1 + $0x2b0] sm:$0xff]   ;;  %v2412_v6 = vld [vmem:[%s3019_s1 + $0x278] sm:$0xff]   ;;  %v2760_v11 = vld [vmem:[%s2628_s27 + $0x20] sm:$0xff] }
  0x1b   : > { %v2413_v7 = vld [vmem:[%s3019_s1 + $0x2f8] sm:$0xff]   ;;  %v2763_v12 = vld [vmem:[%s2628_s27 + $0x28] sm:$0xff]  ;;  %v2768_v16 = vcombine.low %v2638_v33, %v2760_v11  ;;  %v2772_v17 = vcombine.high %v2638_v33, %v2760_v11  ;;  %v2420_v20 = vld [vmem:[%s3019_s1 + $0x140] sm:$0xff]  }
  0x1c   : > { %2175 = vmatpush3.bf16.msra.mxu0 %v2370_v22  ;;  %v2414_v8 = vld [vmem:[%s3019_s1 + $0x238] sm:$0xff]   ;;  %v2776_v18 = vcombine.low %v2648_v37, %v2763_v12  ;;  %v2780_v19 = vcombine.high %v2648_v37, %v2763_v12  ;;  %v2421_v21 = vld [vmem:[%s3019_s1 + $0x1c0] sm:$0xff]   ;;  %v2021_v22 = vcombine.high %v2760_v11, %v2760_v11  ;;  %v2426_v33 = vld [vmem:[%s3019_s1 + $0x108] sm:$0xff]  }
  0x1d   : > { %2197 = vmatpush3.bf16.msra.mxu1 %v2371_v23  ;;  %2176 = vmatprep.subr.bf16.mxu0 %v2372_v24  ;;  %v2415_v10 = vld [vmem:[%s3019_s1 + $0x2b8] sm:$0xff]   ;;  %v2023_v23 = vcombine.high %v2763_v12, %v2763_v12  ;;  %v2422_v24 = vld [vmem:[%s3019_s1 + $0x100] sm:$0xff]   ;;  %v2427_v36 = vld [vmem:[%s3019_s1 + $0x188] sm:$0xff]  }
  0x1e   : > { %2198 = vmatprep.subr.bf16.mxu1 %v2373_v25  ;;  %v2423_v25 = vld [vmem:[%s3019_s1 + $0x180] sm:$0xff]   ;;  %v2428_v39 = vld [vmem:[%s3019_s1 + $0x150] sm:$0xff]  }
  0x1f   : > { %v2447_v3 = vld [vmem:[%s3019_s1 + $0x1b0] sm:$0xff]  }
  0x20   : > { %2177 = vmatpush3.bf16.msra.mxu0 %v2374_v26  ;;  %v1013_v26 = vor.u32 %v1012_v13, %v1008_v9 }
  0x21   : > { %2199 = vmatpush3.bf16.msra.mxu1 %v2375_v27  ;;  %2178 = vmatprep.subr.bf16.mxu0 %v2376_v28  ;;  %v1015_v27 = vshll.u32 %v2021_v22, 16  ;;  %v2424_v28 = vld [vmem:[%s3019_s1 + $0x148] sm:$0xff]  }
  0x22   : > { %2200 = vmatprep.subr.bf16.mxu1 %v2377_v29  ;;  %v1037_v29 = vor.u32 %v1036_v15, %v1032_v14  ;;  %v2457_v15 = vld [vmem:[%s3019_s1 + $0x3c0] sm:$0xff]   ;;  %v2460_v22 = vld [vmem:[%s3019_s1 + $0x348] sm:$0xff]  }
  0x23   : > { %v1017_v32 = vrot.slane %v1015_v27, 1  ;;  %v2465_v27 = vld [vmem:[%s3019_s1 + $0x3d0] sm:$0xff]  }
  0x24   : > { %2179 = vmatpush3.bf16.msra.mxu0 %v2378_v30  ;;  %v1039_v30 = vshll.u32 %v2023_v23, 16  ;;  %v2461_v23 = vld [vmem:[%s3019_s1 + $0x3c8] sm:$0xff]  }
  0x25   : > { %2201 = vmatpush3.bf16.msra.mxu1 %v2379_v31  ;;  %2208 = vmatprep.subr.bf16.mxu0 %v2384_v40  ;;  %v2425_v31 = vld [vmem:[%s3019_s1 + $0x1c8] sm:$0xff]   ;;  %v1018_v37 = vsel %vm994_vm0, %v1013_v26, %v1017_v32  ;;  %v2464_v26 = vld [vmem:[%s3019_s1 + $0x350] sm:$0xff]   ;;  %v2470_v32 = vld [vmem:[%s3019_s1 + $0x318] sm:$0xff]  }
  0x26   : > { %2230 = vmatprep.subr.bf16.mxu1 %v2385_v41  ;;  %v1041_v34 = vrot.slane %v1039_v30, 1  ;;  %v2429_v41 = vld [vmem:[%s3019_s1 + $0x1d0] sm:$0xff]   ;;  %v2468_v30 = vld [vmem:[%s3019_s1 + $0x358] sm:$0xff]  }
  0x27   : > { %485 = vmatmul.mubr.bf16.vlgmr.msra.gmra.mrb[0].mxu0 %v2642_v35 }
  0x28   : > { %526 = vmatmul.mubr.bf16.vlgmr.msra.gmra.mrb[0].mxu1 %v2651_v38  ;;  %2209 = vmatpush3.bf16.msra.mxu0 %v2386_v42  ;;  %v1042_v40 = vsel %vm994_vm0, %v1037_v29, %v1041_v34  ;;  %v2430_v42 = vld [vmem:[%s3019_s1 + $0x110] sm:$0xff]   ;;  %v2472_v34 = vld [vmem:[%s3019_s1 + $0x360] sm:$0xff]  }
  0x29   : > { %2231 = vmatpush3.bf16.msra.mxu1 %v2387_v43  ;;  %2210 = vmatprep.subr.bf16.mxu0 %v2388_v44  ;;  %v2431_v43 = vld [vmem:[%s3019_s1 + $0x190] sm:$0xff]   ;;  %v2432_v44 = vld [vmem:[%s3019_s1 + $0x158] sm:$0xff]  }
  0x2a   : > { %2232 = vmatprep.subr.bf16.mxu1 %v2389_v45  ;;  %839 = vmatprep.mubr.bf16.mxu0 %v2772_v17  ;;  %v2433_v45 = vld [vmem:[%s3019_s1 + $0x1d8] sm:$0xff]   ;;  %v2467_v29 = vld [vmem:[%s3019_s1 + $0x390] sm:$0xff]  }
  0x2b   : > { %880 = vmatprep.mubr.bf16.mxu1 %v2780_v19 }
  0x2c   : > { %2211 = vmatpush3.bf16.msra.mxu0 %v2390_v46  ;;  %v2434_v46 = vld [vmem:[%s3019_s1 + $0x118] sm:$0xff]  }
  0x2d   : > { %2233 = vmatpush3.bf16.msra.mxu1 %v2391_v47  ;;  %2212 = vmatprep.subr.bf16.mxu0 %v2392_v48  ;;  %v2435_v47 = vld [vmem:[%s3019_s1 + $0x198] sm:$0xff]   ;;  %v2436_v48 = vld [vmem:[%s3019_s1 + $0x160] sm:$0xff]  }
  0x2e   : > { %2234 = vmatprep.subr.bf16.mxu1 %v2393_v49  ;;  %v2437_v49 = vld [vmem:[%s3019_s1 + $0x1e0] sm:$0xff]  }
  0x30   : > { %2213 = vmatpush3.bf16.msra.mxu0 %v2394_v50  ;;  %v2438_v50 = vld [vmem:[%s3019_s1 + $0x120] sm:$0xff]  }
  0x31   : > { %2235 = vmatpush3.bf16.msra.mxu1 %v2395_v51  ;;  %2214 = vmatprep.subr.bf16.mxu0 %v2396_v52  ;;  %v998_v51 = vshll.u32 %v2642_v35, 16  ;;  %v2439_v52 = vld [vmem:[%s3019_s1 + $0x1a0] sm:$0xff]  }
  0x32   : > { %2236 = vmatprep.subr.bf16.mxu1 %v2397_v53  ;;  %v1022_v53 = vshll.u32 %v2651_v38, 16 }
  0x34   : > { %2215 = vmatpush3.bf16.msra.mxu0 %v2398_v54  ;;  %v2440_v54 = vld [vmem:[%s3019_s1 + $0x168] sm:$0xff]  }
  0x35   : > { %2237 = vmatpush3.bf16.msra.mxu1 %v2399_v55  ;;  %2216 = vmatprep.subr.bf16.mxu0 %v2400_v56  ;;  %v2020_v55 = vcombine.low %v2760_v11, %v2760_v11  ;;  %v996_v56 = vshrl.u32 %v2642_v35, 16  ;;  %v2443_v35 = vld [vmem:[%s3019_s1 + $0x1a8] sm:$0xff]   ;;  %v2451_v11 = vld [vmem:[%s3019_s1 + $0x1b8] sm:$0xff]  }
  0x36   : > { %2238 = vmatprep.subr.bf16.mxu1 %v2401_v57  ;;  %v2441_v57 = vld [vmem:[%s3019_s1 + $0x1e8] sm:$0xff]  }
  0x38   : > { %2217 = vmatpush3.bf16.msra.mxu0 %v2402_v58  ;;  %v2022_v58 = vcombine.low %v2763_v12, %v2763_v12  ;;  %v2456_v12 = vld [vmem:[%s3019_s1 + $0x340] sm:$0xff]  }
  0x39   : > { %2239 = vmatpush3.bf16.msra.mxu1 %v2403_v59  ;;  %2218 = vmatprep.subr.bf16.mxu0 %v2404_v60  ;;  %v1020_v59 = vshrl.u32 %v2651_v38, 16  ;;  %v2442_v60 = vld [vmem:[%s3019_s1 + $0x128] sm:$0xff]   ;;  %v2445_v38 = vld [vmem:[%s3019_s1 + $0x1f0] sm:$0xff]  }
  0x3a   : > { %2240 = vmatprep.subr.bf16.mxu1 %v2405_v61  ;;  %v1000_v61 = vrot.slane %v998_v51, 1  ;;  %v2483_v51 = vld [vmem:[%s3019_s1 + $0x3b0] sm:$0xff]  }
  0x3c   : > { %2219 = vmatpush3.bf16.msra.mxu0 %v2406_v62  ;;  %v1024_v62 = vrot.slane %v1022_v53, 1  ;;  %v2484_v53 = vld [vmem:[%s3019_s1 + $0x378] sm:$0xff]  }
  0x3d   : > { %2241 = vmatpush3.bf16.msra.mxu1 %v2407_v63  ;;  %2220 = vmatprep.subr.bf16.mxu0 %v2408_v0  ;;  %v2444_v63 = vld [vmem:[%s3019_s1 + $0x170] sm:$0xff]   ;;  %v1003_v0 = vshll.u32 %v2020_v55, 16  ;;  %v1407_v55 = vshrl.u32 %v2768_v16, 16 }
  0x3e   : > { %2242 = vmatprep.subr.bf16.mxu1 %v2409_v1  ;;  %v1027_v1 = vshll.u32 %v2022_v58, 16  ;;  %v2487_v58 = vld [vmem:[%s3019_s1 + $0x3b8] sm:$0xff]  }
  0x3f   : > { %v1005_v5 = vrot.slane %v1003_v0, 1 }
  0x40   : > { %2221 = vmatpush3.bf16.msra.mxu0 %v2410_v2  ;;  %v2446_v2 = vld [vmem:[%s3019_s1 + $0x130] sm:$0xff]   ;;  %v1029_v9 = vrot.slane %v1027_v1, 1 }
  0x41   : > { %2243 = vmatpush3.bf16.msra.mxu1 %v2411_v4  ;;  %2222 = vmatprep.subr.bf16.mxu0 %v2412_v6  ;;  %v2448_v4 = vld [vmem:[%s3019_s1 + $0x178] sm:$0xff]  }
  0x42   : > { %2244 = vmatprep.subr.bf16.mxu1 %v2413_v7  ;;  %v2449_v6 = vld [vmem:[%s3019_s1 + $0x1f8] sm:$0xff]   ;;  %v1001_v7 = vor.u32 %v1000_v61, %v996_v56 }
  0x43   : > { %v2486_v56 = vld [vmem:[%s3019_s1 + $0x338] sm:$0xff]  }
  0x44   : > { %2223 = vmatpush3.bf16.msra.mxu0 %v2414_v8  ;;  %v1025_v8 = vor.u32 %v1024_v62, %v1020_v59  ;;  %v1006_v13 = vsel %vm994_vm0, %v1001_v7, %v1005_v5  ;;  %v902_v61 = vld [vmem:[%s2628_s27 + $0x38] sm:$0x11] }
  0x45   : > { %2245 = vmatpush3.bf16.msra.mxu1 %v2415_v10  ;;  %2252 = vmatprep.subr.bf16.mxu0 %v2420_v20  ;;  %v2450_v10 = vld [vmem:[%s3019_s1 + $0x138] sm:$0xff]   ;;  %v2458_v20 = vld [vmem:[%s3019_s1 + $0x300] sm:$0xff]  }
  0x46   : > { %2274 = vmatprep.subr.bf16.mxu1 %v2421_v21  ;;  %v1030_v14 = vsel %vm994_vm0, %v1025_v8, %v1029_v9  ;;  %v2459_v21 = vld [vmem:[%s3019_s1 + $0x380] sm:$0xff]  }
  0x47   : > { %840 = vmatmul.mubr.bf16.vlgmr.msra.gmra.mrb[4].mxu0 %v2768_v16 }
  0x48   : > { %881 = vmatmul.mubr.bf16.vlgmr.msra.gmra.mrb[4].mxu1 %v2776_v18  ;;  %2253 = vmatpush3.bf16.msra.mxu0 %v2422_v24  ;;  %v2462_v24 = vld [vmem:[%s3019_s1 + $0x308] sm:$0xff]  }
  0x49   : > { %2275 = vmatpush3.bf16.msra.mxu1 %v2423_v25  ;;  %2254 = vmatprep.subr.bf16.mxu0 %v2424_v28  ;;  %v2463_v25 = vld [vmem:[%s3019_s1 + $0x388] sm:$0xff]   ;;  %v2466_v28 = vld [vmem:[%s3019_s1 + $0x310] sm:$0xff]  }
  0x4a   : > { %2276 = vmatprep.subr.bf16.mxu1 %v2425_v31  ;;  %1271 = vmatprep.mubr.bf16.mxu0 %v1018_v37  ;;  %v2469_v31 = vld [vmem:[%s3019_s1 + $0x3d8] sm:$0xff]   ;;  %v2474_v37 = vld [vmem:[%s3019_s1 + $0x320] sm:$0xff]  }
  0x4b   : > { %1312 = vmatprep.mubr.bf16.mxu1 %v1042_v40  ;;  %v2476_v40 = vld [vmem:[%s3019_s1 + $0x368] sm:$0xff]  }
  0x4c   : > { %2255 = vmatpush3.bf16.msra.mxu0 %v2426_v33  ;;  %v2471_v33 = vld [vmem:[%s3019_s1 + $0x398] sm:$0xff]  }
  0x4d   : > { %2277 = vmatpush3.bf16.msra.mxu1 %v2427_v36  ;;  %2256 = vmatprep.subr.bf16.mxu0 %v2428_v39  ;;  %v2473_v36 = vld [vmem:[%s3019_s1 + $0x3e0] sm:$0xff]  }
  0x4e   : > { %2278 = vmatprep.subr.bf16.mxu1 %v2429_v41  ;;  %v2475_v39 = vld [vmem:[%s3019_s1 + $0x3a0] sm:$0xff]   ;;  %v2477_v41 = vld [vmem:[%s3019_s1 + $0x3e8] sm:$0xff]  }
  0x50   : > { %2257 = vmatpush3.bf16.msra.mxu0 %v2430_v42  ;;  %v1421_v42 = vshll.u32 %v2772_v17, 16 }
  0x51   : > { %2279 = vmatpush3.bf16.msra.mxu1 %v2431_v43  ;;  %2258 = vmatprep.subr.bf16.mxu0 %v2432_v44  ;;  %v2478_v43 = vld [vmem:[%s3019_s1 + $0x328] sm:$0xff]  }
  0x52   : > { %2280 = vmatprep.subr.bf16.mxu1 %v2433_v45  ;;  %v2479_v44 = vld [vmem:[%s3019_s1 + $0x3a8] sm:$0xff]   ;;  %v1419_v45 = vshrl.u32 %v2772_v17, 16  ;;  %v1445_v17 = vshll.u32 %v2780_v19, 16 }
  0x54   : > { %2259 = vmatpush3.bf16.msra.mxu0 %v2434_v46  ;;  %v2480_v46 = vld [vmem:[%s3019_s1 + $0x370] sm:$0xff]  }
  0x55   : > { %2281 = vmatpush3.bf16.msra.mxu1 %v2435_v47  ;;  %2260 = vmatprep.subr.bf16.mxu0 %v2436_v48  ;;  %v1443_v47 = vshrl.u32 %v2780_v19, 16  ;;  %v2481_v48 = vld [vmem:[%s3019_s1 + $0x3f0] sm:$0xff]   ;;  %v2485_v19 = vld [vmem:[%s3019_s1 + $0x3f8] sm:$0xff]  }
  0x56   : > { %2282 = vmatprep.subr.bf16.mxu1 %v2437_v49  ;;  %v1423_v49 = vrot.slane %v1421_v42, 1 }
  0x58   : > { %2261 = vmatpush3.bf16.msra.mxu0 %v2438_v50  ;;  %v2482_v50 = vld [vmem:[%s3019_s1 + $0x330] sm:$0xff]  }
  0x59   : > { %2283 = vmatpush3.bf16.msra.mxu1 %v2439_v52  ;;  %2262 = vmatprep.subr.bf16.mxu0 %v2440_v54  ;;  %v1409_v52 = vshll.u32 %v2768_v16, 16  ;;  %v1433_v54 = vshll.u32 %v2776_v18, 16 }
  0x5a   : > { %2284 = vmatprep.subr.bf16.mxu1 %v2441_v57  ;;  %v1447_v57 = vrot.slane %v1445_v17, 1 }
  0x5b   : > { %v1411_v59 = vrot.slane %v1409_v52, 1  ;;  %v1435_v62 = vrot.slane %v1433_v54, 1 }
  0x5c   : > { %2263 = vmatpush3.bf16.msra.mxu0 %v2442_v60  ;;  %v901_v60 = vld [vmem:[%s2628_s27 + $0x30] sm:$0x11]  ;;  %v1448_v1 = vor.u32 %v1447_v57, %v1443_v47 }
  0x5d   : > { %2285 = vmatpush3.bf16.msra.mxu1 %v2443_v35  ;;  %2264 = vmatprep.subr.bf16.mxu0 %v2444_v63  ;;  %v1431_v35 = vshrl.u32 %v2776_v18, 16  ;;  %v2125_v16 = vcombine.high %v901_v60, %v901_v60  ;;  %v2127_v63 = vcombine.high %v902_v61, %v902_v61  ;;  %v2124_v0 = vcombine.low %v901_v60, %v901_v60 }
  0x5e   : > { %2286 = vmatprep.subr.bf16.mxu1 %v2445_v38  ;;  %v1424_v38 = vor.u32 %v1423_v49, %v1419_v45  ;;  %v1412_v5 = vor.u32 %v1411_v59, %v1407_v55 }
  0x5f   : > { %v1436_v7 = vor.u32 %v1435_v62, %v1431_v35 }
  0x60   : > { %2265 = vmatpush3.bf16.msra.mxu0 %v2446_v2  ;;  %v2126_v2 = vcombine.low %v902_v61, %v902_v61 }
  0x61   : > { %2287 = vmatpush3.bf16.msra.mxu1 %v2447_v3  ;;  %2266 = vmatprep.subr.bf16.mxu0 %v2448_v4  ;;  %v1426_v3 = vshll.u32 %v2125_v16, 16  ;;  %v1450_v4 = vshll.u32 %v2127_v63, 16 }
  0x62   : > { %2288 = vmatprep.subr.bf16.mxu1 %v2449_v6  ;;  %v1414_v6 = vshll.u32 %v2124_v0, 16  ;;  %v1438_v8 = vshll.u32 %v2126_v2, 16 }
  0x63   : > { %v1428_v9 = vrot.slane %v1426_v3, 1 }
  0x64   : > { %2267 = vmatpush3.bf16.msra.mxu0 %v2450_v10  ;;  %v1452_v10 = vrot.slane %v1450_v4, 1 }
  0x65   : > { %2289 = vmatpush3.bf16.msra.mxu1 %v2451_v11  ;;  %2296 = vmatprep.subr.bf16.mxu0 %v2456_v12  ;;  %v1416_v11 = vrot.slane %v1414_v6, 1  ;;  %v1440_v12 = vrot.slane %v1438_v8, 1  ;;  %v1429_v18 = vsel %vm994_vm0, %v1424_v38, %v1428_v9 }
  0x66   : > { %2318 = vmatprep.subr.bf16.mxu1 %v2457_v15 }
  0x67   : > { %1272 = vmatmul.mubr.bf16.vlgmr.msra.gmra.mrb[8].mxu0 %v1006_v13  ;;  %v1453_v13 = vsel %vm994_vm0, %v1448_v1, %v1452_v10  ;;  %v1441_v15 = vsel %vm994_vm0, %v1436_v7, %v1440_v12  ;;  %v2160_v12 = vld [vmem:[%s3020_s2] ss:$0 sm:$0xff] }
  0x68   : > { %1313 = vmatmul.mubr.bf16.vlgmr.msra.gmra.mrb[8].mxu1 %v1030_v14  ;;  %2297 = vmatpush3.bf16.msra.mxu0 %v2458_v20  ;;  %v1417_v14 = vsel %vm994_vm0, %v1412_v5, %v1416_v11 }
  0x69   : > { %2319 = vmatpush3.bf16.msra.mxu1 %v2459_v21  ;;  %2298 = vmatprep.subr.bf16.mxu0 %v2460_v22 }
  0x6a   : > { %2320 = vmatprep.subr.bf16.mxu1 %v2461_v23  ;;  %1682 = vmatprep.mubr.bf16.mxu0 %v1429_v18 }
  0x6b   : > { %1723 = vmatprep.mubr.bf16.mxu1 %v1453_v13 }
  0x6c   : > { %2299 = vmatpush3.bf16.msra.mxu0 %v2462_v24 }
  0x6d   : > { %2321 = vmatpush3.bf16.msra.mxu1 %v2463_v25  ;;  %2300 = vmatprep.subr.bf16.mxu0 %v2464_v26 }
  0x6e   : > { %2322 = vmatprep.subr.bf16.mxu1 %v2465_v27 }
  0x70   : > { %2301 = vmatpush3.bf16.msra.mxu0 %v2466_v28 }
  0x71   : > { %2323 = vmatpush3.bf16.msra.mxu1 %v2467_v29  ;;  %2302 = vmatprep.subr.bf16.mxu0 %v2468_v30 }
  0x72   : > { %2324 = vmatprep.subr.bf16.mxu1 %v2469_v31 }
  0x74   : > { %2303 = vmatpush3.bf16.msra.mxu0 %v2470_v32 }
  0x75   : > { %2325 = vmatpush3.bf16.msra.mxu1 %v2471_v33  ;;  %2304 = vmatprep.subr.bf16.mxu0 %v2472_v34 }
  0x76   : > { %2326 = vmatprep.subr.bf16.mxu1 %v2473_v36 }
  0x78   : > { %2305 = vmatpush3.bf16.msra.mxu0 %v2474_v37 }
  0x79   : > { %2327 = vmatpush3.bf16.msra.mxu1 %v2475_v39  ;;  %2306 = vmatprep.subr.bf16.mxu0 %v2476_v40 }
  0x7a   : > { %2328 = vmatprep.subr.bf16.mxu1 %v2477_v41 }
  0x7c   : > { %2307 = vmatpush3.bf16.msra.mxu0 %v2478_v43 }
  0x7d   : > { %2329 = vmatpush3.bf16.msra.mxu1 %v2479_v44  ;;  %2308 = vmatprep.subr.bf16.mxu0 %v2480_v46 }
  0x7e   : > { %2330 = vmatprep.subr.bf16.mxu1 %v2481_v48 }
  0x80   : > { %2309 = vmatpush3.bf16.msra.mxu0 %v2482_v50 }
  0x81   : > { %2331 = vmatpush3.bf16.msra.mxu1 %v2483_v51  ;;  %2310 = vmatprep.subr.bf16.mxu0 %v2484_v53 }
  0x82   : > { %2332 = vmatprep.subr.bf16.mxu1 %v2485_v19 }
  0x84   : > { %2311 = vmatpush3.bf16.msra.mxu0 %v2486_v56 }
  0x85   : > { %2333 = vmatpush3.bf16.msra.mxu1 %v2487_v58 }
  0x87   : > { %1683 = vmatmul.mubr.bf16.vlgmr.msra.gmra.mrb[12].mxu0 %v1417_v14 }
  0x88   : > { %1724 = vmatmul.mubr.bf16.vlgmr.msra.gmra.mrb[12].mxu1 %v1441_v15 }
  0xfa   : > { %v2180_v20 = vpop.f32.mrb[0].mxu0 }
  0xfb   : > { %v2202_v21 = vpop.f32.mrb[0].mxu1  ;;  %v2181_v22 = vpop.f32.mrb[1].mxu0 }
  0xfc   : > { %v2182_v23 = vadd.f32 %v2181_v22, %v2180_v20  ;;  %v2203_v24 = vpop.f32.mrb[1].mxu1  ;;  %v2183_v25 = vpop.f32.mrb[2].mxu0 }
  0xfd   : > { %v2204_v26 = vadd.f32 %v2203_v24, %v2202_v21  ;;  %v2205_v27 = vpop.f32.mrb[2].mxu1  ;;  %v2184_v28 = vpop.f32.mrb[3].mxu0 }
  0xfe   : > { %v2185_v29 = vadd.f32 %v2184_v28, %v2183_v25  ;;  %v2206_v30 = vpop.f32.mrb[3].mxu1 }
  0xff   : > { %v528_v31 = vadd.f32 %v2204_v26, %v2182_v23  ;;  %v2207_v32 = vadd.f32 %v2206_v30, %v2205_v27 }
 0x101   : > { %v531_v33 = vadd.f32 %v2207_v32, %v2185_v29 }
 0x11a   : > { %v2224_v34 = vpop.f32.mrb[4].mxu0 }
 0x11b   : > { %v2246_v36 = vpop.f32.mrb[4].mxu1  ;;  %v2225_v37 = vpop.f32.mrb[5].mxu0 }
 0x11c   : > { %v2226_v39 = vadd.f32 %v2225_v37, %v2224_v34  ;;  %v2247_v40 = vpop.f32.mrb[5].mxu1  ;;  %v2227_v41 = vpop.f32.mrb[6].mxu0 }
 0x11d   : > { %v2248_v42 = vadd.f32 %v2247_v40, %v2246_v36  ;;  %v2249_v43 = vpop.f32.mrb[6].mxu1  ;;  %v2228_v44 = vpop.f32.mrb[7].mxu0 }
 0x11e   : > { %v2229_v45 = vadd.f32 %v2228_v44, %v2227_v41  ;;  %v2250_v46 = vpop.f32.mrb[7].mxu1 }
 0x11f   : > { %v883_v47 = vadd.f32 %v2248_v42, %v2226_v39  ;;  %v2251_v48 = vadd.f32 %v2250_v46, %v2249_v43 }
 0x121   : > { %v891_v49 = vadd.f32 %v883_v47, %v528_v31  ;;  %v886_v50 = vadd.f32 %v2251_v48, %v2229_v45 }
 0x123   : > { %v892_v17 = vadd.f32 %v886_v50, %v531_v33 }
 0x13a   : > { %v2268_v51 = vpop.f32.mrb[8].mxu0 }
 0x13b   : > { %v2290_v52 = vpop.f32.mrb[8].mxu1  ;;  %v2269_v53 = vpop.f32.mrb[9].mxu0 }
 0x13c   : > { %v2291_v54 = vpop.f32.mrb[9].mxu1  ;;  %v2270_v19 = vadd.f32 %v2269_v53, %v2268_v51  ;;  %v2271_v56 = vpop.f32.mrb[10].mxu0 }
 0x13d   : > { %v2292_v55 = vadd.f32 %v2291_v54, %v2290_v52  ;;  %v2293_v57 = vpop.f32.mrb[10].mxu1  ;;  %v2272_v58 = vpop.f32.mrb[11].mxu0 }
 0x13e   : > { %v2294_v59 = vpop.f32.mrb[11].mxu1  ;;  %v2273_v61 = vadd.f32 %v2272_v58, %v2271_v56 }
 0x13f   : > { %v1315_v60 = vadd.f32 %v2292_v55, %v2270_v19  ;;  %v2295_v35 = vadd.f32 %v2294_v59, %v2293_v57 }
 0x141   : > { %v1323_v62 = vadd.f32 %v1315_v60, %v891_v49  ;;  %v1318_v16 = vadd.f32 %v2295_v35, %v2273_v61 }
 0x143   : > { %v1324_v63 = vadd.f32 %v1318_v16, %v892_v17 }
 0x15a   : > { %v2312_v0 = vpop.f32.mrb[12].mxu0 }
 0x15b   : > { %v2334_v38 = vpop.f32.mrb[12].mxu1  ;;  %v2313_v1 = vpop.f32.mrb[13].mxu0 }
 0x15c   : > { %v2335_v2 = vpop.f32.mrb[13].mxu1  ;;  %v2314_v3 = vadd.f32 %v2313_v1, %v2312_v0  ;;  %v2315_v5 = vpop.f32.mrb[14].mxu0 }
 0x15d   : > { %v2336_v4 = vadd.f32 %v2335_v2, %v2334_v38  ;;  %v2337_v6 = vpop.f32.mrb[14].mxu1  ;;  %v2316_v7 = vpop.f32.mrb[15].mxu0 }
 0x15e   : > { %v2338_v8 = vpop.f32.mrb[15].mxu1  ;;  %v2317_v10 = vadd.f32 %v2316_v7, %v2315_v5 }
 0x15f   : > { %v1726_v9 = vadd.f32 %v2336_v4, %v2314_v3  ;;  %v2339_v11 = vadd.f32 %v2338_v8, %v2337_v6 }
 0x161   : > { %v1734_v18 = vadd.f32 %v1726_v9, %v1323_v62  ;;  %v1729_v13 = vadd.f32 %v2339_v11, %v2317_v10 }
 0x163   : > { %v1747_v14 = vadd.f32 %v2160_v12, %v1734_v18  ;;  %v1735_v15 = vadd.f32 %v1729_v13, %v1324_v63 }
 0x165   : > { %v1749_v20 = vmax.f32 %v1747_v14, 0.0  ;;  %v1748_v21 = vadd.f32 %v2160_v12, %v1735_v15 }
 0x167   : > { %v1751_v22 = vpack.c.bf16 %v1749_v20, %v1749_v20  ;;  %v1750_v23 = vmax.f32 %v1748_v21, 0.0 }
 0x169   : > { %1753 = vst [vmem:[%s168_s9] sm:$0x1] %v1751_v22  ;;  %v1752_v24 = vpack.c.bf16 %v1750_v23, %v1750_v23 }
 0x16b   : > { %1754 = vst [vmem:[%s168_s9 + $0x1] sm:$0x1] %v1752_v24 }
 0x16c PF: > { %s13_s12 = sadd.s32 1, %s2498_s12  }
 0x16d   : > { %p10_p4 = scmp.ge.s32.totalorder %s13_s12, 4  }
 0x16f   :  { %12 = sbr.rel (!%p10_p4) target bundleno = 1 (0x1), region = 65 }

// kernel: resnet_baseline_forward.25
= control target key start
LH: loop header
LB: loop body
LE: loop exit
PB: predicated region body
PF: predicated region fallthrough
CT: control target
= control target key end

     0   :  { %s957_s1 = inlined_call_operand.vmem [shape: bf16[512,256], index: 1, kind: input, shape index: {}]   ;;  %s958_s0 = inlined_call_operand.vmem [shape: bf16[16,512], index: 0, kind: input, shape index: {}]   ;;  %s959_s2 = inlined_call_operand.vmem [shape: f32[1,256], index: 2, kind: input, shape index: {}]   ;;  %s960_s3 = inlined_call_operand.vmem [shape: bf16[16,256], index: 3, kind: output, shape index: {}]  }
   0x1   :  { %v622_v0 = vld [vmem:[%s957_s1 + $0x4] ss:$8 sps:$4 sm:$0xff]   ;;  %v626_v2 = vld [vmem:[%s957_s1] ss:$8 sps:$4 sm:$0xff]   ;;  %v628_v4 = vld [vmem:[%s957_s1 + $0x14] ss:$8 sps:$4 sm:$0xff]  }
   0x2   :  { %v624_v1 = vld [vmem:[%s957_s1 + $0x104] ss:$8 sps:$4 sm:$0xff]   ;;  %434 = vmatprep.subr.bf16.mxu1 %v622_v0  ;;  %v627_v3 = vld [vmem:[%s957_s1 + $0x100] ss:$8 sps:$4 sm:$0xff]   ;;  %v630_v5 = vld [vmem:[%s957_s1 + $0x114] ss:$8 sps:$4 sm:$0xff]  }
   0x3   :  { %477 = vmatprep.subr.bf16.mxu0 %v624_v1  ;;  %435 = vmatpush1.bf16.msra.mxu1 %v626_v2  ;;  %v632_v6 = vld [vmem:[%s957_s1 + $0x10] ss:$8 sps:$4 sm:$0xff]   ;;  %v634_v8 = vld [vmem:[%s957_s1 + $0x24] ss:$8 sps:$4 sm:$0xff]   ;;  %v638_v10 = vld [vmem:[%s957_s1 + $0x20] ss:$8 sps:$4 sm:$0xff]  }
   0x4   :  { %478 = vmatpush1.bf16.msra.mxu0 %v627_v3  ;;  %436 = vmatprep.subr.bf16.mxu1 %v628_v4  ;;  %v633_v7 = vld [vmem:[%s957_s1 + $0x110] ss:$8 sps:$4 sm:$0xff]   ;;  %v636_v9 = vld [vmem:[%s957_s1 + $0x124] ss:$8 sps:$4 sm:$0xff]   ;;  %v639_v11 = vld [vmem:[%s957_s1 + $0x120] ss:$8 sps:$4 sm:$0xff]   ;;  %v84_v4 = vlaneseq }
   0x5   :  { %479 = vmatprep.subr.bf16.mxu0 %v630_v5  ;;  %v640_v12 = vld [vmem:[%s957_s1 + $0x34] ss:$8 sps:$4 sm:$0xff]   ;;  %v644_v14 = vld [vmem:[%s957_s1 + $0x30] ss:$8 sps:$4 sm:$0xff]   ;;  %v646_v16 = vld [vmem:[%s957_s1 + $0x44] ss:$8 sps:$4 sm:$0xff]  }
   0x6   :  { %v642_v13 = vld [vmem:[%s957_s1 + $0x134] ss:$8 sps:$4 sm:$0xff]   ;;  %v645_v15 = vld [vmem:[%s957_s1 + $0x130] ss:$8 sps:$4 sm:$0xff]   ;;  %v648_v17 = vld [vmem:[%s957_s1 + $0x144] ss:$8 sps:$4 sm:$0xff]  }
   0x7   :  { %437 = vmatpush1.bf16.msra.mxu1 %v632_v6  ;;  %v650_v18 = vld [vmem:[%s957_s1 + $0x40] ss:$8 sps:$4 sm:$0xff]   ;;  %v652_v20 = vld [vmem:[%s957_s1 + $0x54] ss:$8 sps:$4 sm:$0xff]   ;;  %v656_v22 = vld [vmem:[%s957_s1 + $0x50] ss:$8 sps:$4 sm:$0xff]  }
   0x8   :  { %480 = vmatpush1.bf16.msra.mxu0 %v633_v7  ;;  %438 = vmatprep.subr.bf16.mxu1 %v634_v8  ;;  %v651_v19 = vld [vmem:[%s957_s1 + $0x140] ss:$8 sps:$4 sm:$0xff]   ;;  %v654_v21 = vld [vmem:[%s957_s1 + $0x154] ss:$8 sps:$4 sm:$0xff]   ;;  %v657_v23 = vld [vmem:[%s957_s1 + $0x150] ss:$8 sps:$4 sm:$0xff]  }
   0x9   :  { %481 = vmatprep.subr.bf16.mxu0 %v636_v9  ;;  %v658_v24 = vld [vmem:[%s957_s1 + $0x64] ss:$8 sps:$4 sm:$0xff]   ;;  %v662_v26 = vld [vmem:[%s957_s1 + $0x60] ss:$8 sps:$4 sm:$0xff]   ;;  %v664_v28 = vld [vmem:[%s957_s1 + $0x74] ss:$8 sps:$4 sm:$0xff]  }
   0xa   :  { %v660_v25 = vld [vmem:[%s957_s1 + $0x164] ss:$8 sps:$4 sm:$0xff]   ;;  %v663_v27 = vld [vmem:[%s957_s1 + $0x160] ss:$8 sps:$4 sm:$0xff]   ;;  %v666_v29 = vld [vmem:[%s957_s1 + $0x174] ss:$8 sps:$4 sm:$0xff]  }
   0xb   :  { %439 = vmatpush1.bf16.msra.mxu1 %v638_v10  ;;  %v668_v30 = vld [vmem:[%s957_s1 + $0x70] ss:$8 sps:$4 sm:$0xff]   ;;  %v670_v32 = vld [vmem:[%s957_s1 + $0x84] ss:$8 sps:$4 sm:$0xff]   ;;  %v674_v34 = vld [vmem:[%s957_s1 + $0x80] ss:$8 sps:$4 sm:$0xff]  }
   0xc   :  { %482 = vmatpush1.bf16.msra.mxu0 %v639_v11  ;;  %440 = vmatprep.subr.bf16.mxu1 %v640_v12  ;;  %v669_v31 = vld [vmem:[%s957_s1 + $0x170] ss:$8 sps:$4 sm:$0xff]   ;;  %v672_v33 = vld [vmem:[%s957_s1 + $0x184] ss:$8 sps:$4 sm:$0xff]   ;;  %v675_v35 = vld [vmem:[%s957_s1 + $0x180] ss:$8 sps:$4 sm:$0xff]  }
   0xd   :  { %483 = vmatprep.subr.bf16.mxu0 %v642_v13  ;;  %v676_v36 = vld [vmem:[%s957_s1 + $0x94] ss:$8 sps:$4 sm:$0xff]   ;;  %v680_v38 = vld [vmem:[%s957_s1 + $0x90] ss:$8 sps:$4 sm:$0xff]   ;;  %v682_v40 = vld [vmem:[%s957_s1 + $0xa4] ss:$8 sps:$4 sm:$0xff]  }
   0xe   :  { %v678_v37 = vld [vmem:[%s957_s1 + $0x194] ss:$8 sps:$4 sm:$0xff]   ;;  %v681_v39 = vld [vmem:[%s957_s1 + $0x190] ss:$8 sps:$4 sm:$0xff]   ;;  %v684_v41 = vld [vmem:[%s957_s1 + $0x1a4] ss:$8 sps:$4 sm:$0xff]  }
   0xf   :  { %441 = vmatpush1.bf16.msra.mxu1 %v644_v14  ;;  %v686_v42 = vld [vmem:[%s957_s1 + $0xa0] ss:$8 sps:$4 sm:$0xff]   ;;  %v688_v44 = vld [vmem:[%s957_s1 + $0xb4] ss:$8 sps:$4 sm:$0xff]   ;;  %v692_v46 = vld [vmem:[%s957_s1 + $0xb0] ss:$8 sps:$4 sm:$0xff]  }
  0x10   :  { %484 = vmatpush1.bf16.msra.mxu0 %v645_v15  ;;  %442 = vmatprep.subr.bf16.mxu1 %v646_v16  ;;  %v687_v43 = vld [vmem:[%s957_s1 + $0x1a0] ss:$8 sps:$4 sm:$0xff]   ;;  %v690_v45 = vld [vmem:[%s957_s1 + $0x1b4] ss:$8 sps:$4 sm:$0xff]   ;;  %v693_v48 = vld [vmem:[%s957_s1 + $0x1b0] ss:$8 sps:$4 sm:$0xff]  }
  0x11   :  { %485 = vmatprep.subr.bf16.mxu0 %v648_v17  ;;  %v720_v47 = vld [vmem:[%s958_s0 + $0x4] ss:$16 sps:$4 sm:$0xff]   ;;  %v723_v51 = vld [vmem:[%s958_s0 + $0xc] ss:$16 sps:$4 sm:$0xff]   ;;  %v698_v52 = vld [vmem:[%s957_s1 + $0xc0] ss:$8 sps:$4 sm:$0xff]  }
  0x12   :  { %v694_v49 = vld [vmem:[%s957_s1 + $0xc4] ss:$8 sps:$4 sm:$0xff]   ;;  %466 = vmatprep.mubr.bf16.mxu1 %v720_v47  ;;  %509 = vmatprep.mubr.bf16.mxu0 %v723_v51  ;;  %v699_v53 = vld [vmem:[%s957_s1 + $0x1c0] ss:$8 sps:$4 sm:$0xff]   ;;  %v700_v54 = vld [vmem:[%s957_s1 + $0xd4] ss:$8 sps:$4 sm:$0xff]  }
  0x13   :  { %443 = vmatpush1.bf16.msra.mxu1 %v650_v18  ;;  %v696_v50 = vld [vmem:[%s957_s1 + $0x1c4] ss:$8 sps:$4 sm:$0xff]   ;;  %v702_v55 = vld [vmem:[%s957_s1 + $0x1d4] ss:$8 sps:$4 sm:$0xff]   ;;  %v704_v56 = vld [vmem:[%s957_s1 + $0xd0] ss:$8 sps:$4 sm:$0xff]  }
  0x14   :  { %486 = vmatpush1.bf16.msra.mxu0 %v651_v19  ;;  %444 = vmatprep.subr.bf16.mxu1 %v652_v20  ;;  %v705_v57 = vld [vmem:[%s957_s1 + $0x1d0] ss:$8 sps:$4 sm:$0xff]   ;;  %v706_v58 = vld [vmem:[%s957_s1 + $0xe4] ss:$8 sps:$4 sm:$0xff]   ;;  %v710_v60 = vld [vmem:[%s957_s1 + $0xe0] ss:$8 sps:$4 sm:$0xff]  }
  0x15   :  { %487 = vmatprep.subr.bf16.mxu0 %v654_v21  ;;  %v708_v59 = vld [vmem:[%s957_s1 + $0x1e4] ss:$8 sps:$4 sm:$0xff]   ;;  %v711_v61 = vld [vmem:[%s957_s1 + $0x1e0] ss:$8 sps:$4 sm:$0xff]   ;;  %v712_v62 = vld [vmem:[%s957_s1 + $0xf4] ss:$8 sps:$4 sm:$0xff]  }
  0x16   :  { %v714_v63 = vld [vmem:[%s957_s1 + $0x1f4] ss:$8 sps:$4 sm:$0xff]   ;;  %v716_v0 = vld [vmem:[%s957_s1 + $0xf0] ss:$8 sps:$4 sm:$0xff]   ;;  %v85_v5 = vshrl.u32 %v84_v4, 7 }
  0x17   :  { %445 = vmatpush1.bf16.msra.mxu1 %v656_v22  ;;  %v717_v1 = vld [vmem:[%s957_s1 + $0x1f0] ss:$8 sps:$4 sm:$0xff]   ;;  %v82_v7 = vld [vmem:[%s959_s2] sm:$0x3] }
  0x18   :  { %488 = vmatpush1.bf16.msra.mxu0 %v657_v23  ;;  %446 = vmatprep.subr.bf16.mxu1 %v658_v24  ;;  %v718_v2 = vld [vmem:[%s958_s0] ss:$16 sps:$4 sm:$0xff]   ;;  %v721_v3 = vld [vmem:[%s958_s0 + $0x8] ss:$16 sps:$4 sm:$0xff]   ;;  %v86_v6 = vsub.s32 0, %v85_v5  ;;  %v90_v8 = vsub.s32 1, %v85_v5 }
  0x19   :  { %489 = vmatprep.subr.bf16.mxu0 %v660_v25 }
  0x1a   :  { %v87_v9 = vrot.slane %v82_v7, %v86_v6  ;;  %v91_v10 = vrot.slane %v82_v7, %v90_v8 }
  0x1b   :  { %447 = vmatpush1.bf16.msra.mxu1 %v662_v26 }
  0x1c   :  { %490 = vmatpush1.bf16.msra.mxu0 %v663_v27  ;;  %448 = vmatprep.subr.bf16.mxu1 %v664_v28 }
  0x1d   :  { %491 = vmatprep.subr.bf16.mxu0 %v666_v29 }
  0x1f   :  { %449 = vmatpush1.bf16.msra.mxu1 %v668_v30 }
  0x20   :  { %492 = vmatpush1.bf16.msra.mxu0 %v669_v31  ;;  %450 = vmatprep.subr.bf16.mxu1 %v670_v32 }
  0x21   :  { %493 = vmatprep.subr.bf16.mxu0 %v672_v33 }
  0x23   :  { %451 = vmatpush1.bf16.msra.mxu1 %v674_v34 }
  0x24   :  { %494 = vmatpush1.bf16.msra.mxu0 %v675_v35  ;;  %452 = vmatprep.subr.bf16.mxu1 %v676_v36 }
  0x25   :  { %495 = vmatprep.subr.bf16.mxu0 %v678_v37 }
  0x27   :  { %453 = vmatpush1.bf16.msra.mxu1 %v680_v38 }
  0x28   :  { %496 = vmatpush1.bf16.msra.mxu0 %v681_v39  ;;  %454 = vmatprep.subr.bf16.mxu1 %v682_v40 }
  0x29   :  { %497 = vmatprep.subr.bf16.mxu0 %v684_v41 }
  0x2b   :  { %455 = vmatpush1.bf16.msra.mxu1 %v686_v42 }
  0x2c   :  { %498 = vmatpush1.bf16.msra.mxu0 %v687_v43  ;;  %456 = vmatprep.subr.bf16.mxu1 %v688_v44 }
  0x2d   :  { %499 = vmatprep.subr.bf16.mxu0 %v690_v45 }
  0x2f   :  { %457 = vmatpush1.bf16.msra.mxu1 %v692_v46 }
  0x30   :  { %500 = vmatpush1.bf16.msra.mxu0 %v693_v48  ;;  %458 = vmatprep.subr.bf16.mxu1 %v694_v49 }
  0x31   :  { %501 = vmatprep.subr.bf16.mxu0 %v696_v50 }
  0x33   :  { %459 = vmatpush1.bf16.msra.mxu1 %v698_v52 }
  0x34   :  { %502 = vmatpush1.bf16.msra.mxu0 %v699_v53  ;;  %460 = vmatprep.subr.bf16.mxu1 %v700_v54 }
  0x35   :  { %503 = vmatprep.subr.bf16.mxu0 %v702_v55 }
  0x37   :  { %461 = vmatpush1.bf16.msra.mxu1 %v704_v56 }
  0x38   :  { %504 = vmatpush1.bf16.msra.mxu0 %v705_v57  ;;  %462 = vmatprep.subr.bf16.mxu1 %v706_v58 }
  0x39   :  { %505 = vmatprep.subr.bf16.mxu0 %v708_v59 }
  0x3b   :  { %463 = vmatpush1.bf16.msra.mxu1 %v710_v60 }
  0x3c   :  { %506 = vmatpush1.bf16.msra.mxu0 %v711_v61  ;;  %464 = vmatprep.subr.bf16.mxu1 %v712_v62 }
  0x3d   :  { %507 = vmatprep.subr.bf16.mxu0 %v714_v63 }
  0x3f   :  { %465 = vmatpush1.bf16.msra.mxu1 %v716_v0 }
  0x40   :  { %508 = vmatpush1.bf16.msra.mxu0 %v717_v1 }
  0x42   :  { %467 = vmatmul.mubr.bf16.vlgmr.msra.gmra.mrb[0].mxu1 %v718_v2 }
  0x43   :  { %510 = vmatmul.mubr.bf16.vlgmr.msra.gmra.mrb[0].mxu0 %v721_v3 }
 0x115   :  { %v468_v11 = vpop.f32.mrb[0].mxu1 }
 0x116   :  { %v511_v12 = vpop.f32.mrb[0].mxu0  ;;  %v469_v13 = vadd.f32 %v468_v11, %v87_v9  ;;  %v470_v14 = vpop.f32.mrb[1].mxu1 }
 0x117   :  { %v513_v15 = vpop.f32.mrb[1].mxu0  ;;  %v471_v16 = vadd.f32 %v470_v14, %v91_v10  ;;  %v472_v17 = vpop.f32.mrb[2].mxu1 }
 0x118   :  { %v515_v18 = vpop.f32.mrb[2].mxu0  ;;  %v512_v19 = vadd.f32 %v511_v12, %v469_v13  ;;  %v473_v20 = vadd.f32 %v472_v17, %v87_v9  ;;  %v474_v21 = vpop.f32.mrb[3].mxu1 }
 0x119   :  { %v517_v22 = vpop.f32.mrb[3].mxu0  ;;  %v514_v23 = vadd.f32 %v513_v15, %v471_v16  ;;  %v475_v24 = vadd.f32 %v474_v21, %v91_v10 }
 0x11a   :  { %v520_v25 = vmax.f32 %v512_v19, 0.0  ;;  %v516_v26 = vadd.f32 %v515_v18, %v473_v20 }
 0x11b   :  { %v521_v27 = vmax.f32 %v514_v23, 0.0  ;;  %v518_v28 = vadd.f32 %v517_v22, %v475_v24 }
 0x11c   :  { %v522_v29 = vmax.f32 %v516_v26, 0.0 }
 0x11d   :  { %v612_v30 = vpack.c.bf16 %v521_v27, %v520_v25  ;;  %v523_v31 = vmax.f32 %v518_v28, 0.0 }
 0x11f   :  { %536 = vst [vmem:[%s960_s3] sm:$0xff] %v612_v30  ;;  %v613_v32 = vpack.c.bf16 %v523_v31, %v522_v29 }
 0x121   :  { %537 = vst [vmem:[%s960_s3 + $0x8] sm:$0xff] %v613_v32 }

// kernel: resnet_baseline_forward.29
= control target key start
LH: loop header
LB: loop body
LE: loop exit
PB: predicated region body
PF: predicated region fallthrough
CT: control target
= control target key end

     0   :  { %s115_s0 = inlined_call_operand.vmem [shape: bf16[2,1,1024], index: 0, kind: input, shape index: {}]   ;;  %s116_s1 = inlined_call_operand.hbm [shape: f32[2,1024], index: 1, kind: output, shape index: {}]  }
   0x1   :  { %v9_v0 = vld [vmem:[%s115_s0] sm:$0xff]  ;;  %v10_v1 = vld [vmem:[%s115_s0 + $0x8] sm:$0xff] }
   0x2   :  { %v11_v2 = vunpack.c.l.bf16 %v9_v0  ;;  %v13_v3 = vunpack.c.l.bf16 %v10_v1  ;;  %v12_v4 = vunpack.c.h.bf16 %v9_v0  ;;  %v14_v5 = vunpack.c.h.bf16 %v10_v1 }
   0x3   :  { %6 = vsyncpa [#allocation3], 0  ;;  %vm28_vm0 = vcmask 1041409   ;;  %vm30_vm1 = vcmask 1043459   ;;  %vm32_vm2 = vcmask 1045509   ;;  %s86_s10 = smov [#allocation2]  }
   0x4   :  { %v27_v6 = vrot.slane %v13_v3, 7  ;;  %v38_v7 = vrot.slane %v14_v5, 7  ;;  %s53_s11 = sshll.u32 %s86_s10, 4  ;;  %vm34_vm3 = vcmask 1047559   ;;  %s54_s11 = int_to_ptr.vmem [resolvable:$true] %s53_s11 }
   0x5   :  { %s62_s0 = scalar_lea.vmem %s54_s11, 256  ;;  %p67_p1 = scmp.lt.s32.totalorder %s54_s11, %s54_s11 }
   0x6   :  { %v29_v8 = vsel %vm28_vm0, %v27_v6, %v11_v2  ;;  %v39_v9 = vsel %vm28_vm0, %v38_v7, %v12_v4  ;;  %p63_p0 = scmp.ne.s32.totalorder %s54_s11, %s62_s0  ;;  %p68_p2 = scmp.lt.s32.totalorder %s62_s0, %s62_s0 }
   0x7   :  { %v31_v10 = vsel %vm30_vm1, %v27_v6, %v29_v8  ;;  %v40_v11 = vsel %vm30_vm1, %v38_v7, %v39_v9 }
   0x8   :  { %v33_v12 = vsel %vm32_vm2, %v27_v6, %v31_v10  ;;  %v41_v13 = vsel %vm32_vm2, %v38_v7, %v40_v11  ;;  %p69_p3 = por %p68_p2, %p67_p1 }
   0x9   :  { %v35_v14 = vsel %vm34_vm3, %v27_v6, %v33_v12  ;;  %v42_v15 = vsel %vm34_vm3, %v38_v7, %v41_v13 }
   0xa   :  { %45 = vst [vmem:[#allocation2] sm:$0xff] %v35_v14  ;;  %46 = vst [vmem:[#allocation2 + $0x8] sm:$0xff] %v42_v15  ;;  %p70_p4 = pnand %p69_p3, %p63_p0 }
   0xc   :  { %73 = shalt.err (!%p70_p4)
}
   0xd   :  { %s74_s14 = scalar_lea.hbm %s116_s1, 256 }
   0xe   :  { %p75_p5 = scmp.ne.s32.totalorder %s116_s1, %s74_s14  ;;  %p78_p6 = scmp.lt.u32.totalorder %s74_s14, %s116_s1 }
  0x10   :  { %p80_p7 = pnand %p78_p6, %p75_p5 }
  0x12   :  { %83 = shalt.err (!%p80_p7)
}
  0x13   :  { %56 = dma.vmem_to_hbm [thread:$0]  %s54_s11, 256, %s116_s1, [#allocation3]  }
  0x14   :  { %84 = dma.done.wait [#allocation3], 256  }
  0x15   :  { %85 = vsyncadd [#allocation3], 4294967040 }
  0x16   :  { %60 = vsyncpa [#allocation3], 1 }

// kernel: resnet_baseline_forward.27
= control target key start
LH: loop header
LB: loop body
LE: loop exit
PB: predicated region body
PF: predicated region fallthrough
CT: control target
= control target key end

     0   :  { %s3185_s1 = inlined_call_operand.vmem [shape: bf16[512,1024], index: 1, kind: input, shape index: {}]   ;;  %s3186_s0 = inlined_call_operand.vmem [shape: bf16[16,512], index: 0, kind: input, shape index: {}]   ;;  %s3187_s2 = inlined_call_operand.vmem [shape: f32[1,1024], index: 2, kind: input, shape index: {}]   ;;  %s3188_s3 = inlined_call_operand.vmem [shape: bf16[16,1024], index: 3, kind: output, shape index: {}]  }
   0x1   :  { %v18_v0 = vld [vmem:[%s3185_s1] sm:$0xff]  ;;  %v19_v2 = vld [vmem:[%s3185_s1 + $0x8] sm:$0xff] }
   0x2   :  { %v22_v1 = vld [vmem:[%s3185_s1 + $0x20] sm:$0xff]  ;;  %v23_v4 = vld [vmem:[%s3185_s1 + $0x28] sm:$0xff] }
   0x3   :  { %v2025_v3 = vcombine.high %v18_v0, %v22_v1  ;;  %v2024_v5 = vcombine.low %v18_v0, %v22_v1  ;;  %v26_v6 = vld [vmem:[%s3185_s1 + $0x40] sm:$0xff]  ;;  %v2027_v8 = vcombine.high %v19_v2, %v23_v4  ;;  %v2026_v9 = vcombine.low %v19_v2, %v23_v4  ;;  %v27_v11 = vld [vmem:[%s3185_s1 + $0x48] sm:$0xff] }
   0x4   :  { %v30_v7 = vld [vmem:[%s3185_s1 + $0x60] sm:$0xff]  ;;  %v31_v12 = vld [vmem:[%s3185_s1 + $0x68] sm:$0xff] }
   0x5   :  { %v2033_v10 = vcombine.high %v26_v6, %v30_v7  ;;  %v34_v13 = vld [vmem:[%s3185_s1 + $0x80] sm:$0xff]  ;;  %1616 = vmatprep.subr.bf16.mxu0 %v2025_v3  ;;  %v2035_v14 = vcombine.high %v27_v11, %v31_v12  ;;  %v35_v16 = vld [vmem:[%s3185_s1 + $0x88] sm:$0xff]  ;;  %1702 = vmatprep.subr.bf16.mxu1 %v2027_v8  ;;  %v2032_v18 = vcombine.low %v26_v6, %v30_v7 }
   0x6   :  { %v38_v15 = vld [vmem:[%s3185_s1 + $0xa0] sm:$0xff]  ;;  %v39_v17 = vld [vmem:[%s3185_s1 + $0xa8] sm:$0xff]  ;;  %1617 = vmatpush1.bf16.msra.mxu0 %v2024_v5  ;;  %1703 = vmatpush1.bf16.msra.mxu1 %v2026_v9  ;;  %v2034_v19 = vcombine.low %v27_v11, %v31_v12 }
   0x7   :  { %1618 = vmatprep.subr.bf16.mxu0 %v2033_v10  ;;  %v2041_v20 = vcombine.high %v34_v13, %v38_v15  ;;  %1704 = vmatprep.subr.bf16.mxu1 %v2035_v14  ;;  %v2043_v21 = vcombine.high %v35_v16, %v39_v17  ;;  %v42_v22 = vld [vmem:[%s3185_s1 + $0xc0] sm:$0xff]  ;;  %v43_v24 = vld [vmem:[%s3185_s1 + $0xc8] sm:$0xff]  ;;  %v2040_v26 = vcombine.low %v34_v13, %v38_v15 }
   0x8   :  { %v46_v23 = vld [vmem:[%s3185_s1 + $0xe0] sm:$0xff]  ;;  %v47_v25 = vld [vmem:[%s3185_s1 + $0xe8] sm:$0xff]  ;;  %v2042_v27 = vcombine.low %v35_v16, %v39_v17 }
   0x9   :  { %v2049_v28 = vcombine.high %v42_v22, %v46_v23  ;;  %v2051_v29 = vcombine.high %v43_v24, %v47_v25  ;;  %v50_v30 = vld [vmem:[%s3185_s1 + $0x100] sm:$0xff]  ;;  %v51_v32 = vld [vmem:[%s3185_s1 + $0x108] sm:$0xff]  ;;  %v2048_v34 = vcombine.low %v42_v22, %v46_v23  ;;  %v2050_v35 = vcombine.low %v43_v24, %v47_v25 }
   0xa   :  { %1619 = vmatpush1.bf16.msra.mxu0 %v2032_v18  ;;  %1705 = vmatpush1.bf16.msra.mxu1 %v2034_v19  ;;  %v54_v31 = vld [vmem:[%s3185_s1 + $0x120] sm:$0xff]  ;;  %v55_v33 = vld [vmem:[%s3185_s1 + $0x128] sm:$0xff] }
   0xb   :  { %1620 = vmatprep.subr.bf16.mxu0 %v2041_v20  ;;  %1706 = vmatprep.subr.bf16.mxu1 %v2043_v21  ;;  %v2057_v36 = vcombine.high %v50_v30, %v54_v31  ;;  %v2059_v37 = vcombine.high %v51_v32, %v55_v33  ;;  %v58_v38 = vld [vmem:[%s3185_s1 + $0x140] sm:$0xff]  ;;  %v59_v40 = vld [vmem:[%s3185_s1 + $0x148] sm:$0xff]  ;;  %v2056_v42 = vcombine.low %v50_v30, %v54_v31 }
   0xc   :  { %v62_v39 = vld [vmem:[%s3185_s1 + $0x160] sm:$0xff]  ;;  %v63_v41 = vld [vmem:[%s3185_s1 + $0x168] sm:$0xff]  ;;  %v2058_v43 = vcombine.low %v51_v32, %v55_v33 }
   0xd   :  { %v2065_v44 = vcombine.high %v58_v38, %v62_v39  ;;  %v2067_v45 = vcombine.high %v59_v40, %v63_v41  ;;  %v66_v46 = vld [vmem:[%s3185_s1 + $0x180] sm:$0xff]  ;;  %v67_v48 = vld [vmem:[%s3185_s1 + $0x188] sm:$0xff]  ;;  %v2064_v50 = vcombine.low %v58_v38, %v62_v39  ;;  %v2066_v51 = vcombine.low %v59_v40, %v63_v41 }
   0xe   :  { %1621 = vmatpush1.bf16.msra.mxu0 %v2040_v26  ;;  %1707 = vmatpush1.bf16.msra.mxu1 %v2042_v27  ;;  %v70_v47 = vld [vmem:[%s3185_s1 + $0x1a0] sm:$0xff]  ;;  %v71_v49 = vld [vmem:[%s3185_s1 + $0x1a8] sm:$0xff] }
   0xf   :  { %1622 = vmatprep.subr.bf16.mxu0 %v2049_v28  ;;  %1708 = vmatprep.subr.bf16.mxu1 %v2051_v29  ;;  %v2073_v52 = vcombine.high %v66_v46, %v70_v47  ;;  %v2075_v53 = vcombine.high %v67_v48, %v71_v49  ;;  %v74_v54 = vld [vmem:[%s3185_s1 + $0x1c0] sm:$0xff]  ;;  %v75_v57 = vld [vmem:[%s3185_s1 + $0x1c8] sm:$0xff]  ;;  %v2072_v59 = vcombine.low %v66_v46, %v70_v47 }
  0x10   :  { %v78_v55 = vld [vmem:[%s3185_s1 + $0x1e0] sm:$0xff]  ;;  %v79_v58 = vld [vmem:[%s3185_s1 + $0x1e8] sm:$0xff]  ;;  %v2074_v60 = vcombine.low %v67_v48, %v71_v49 }
  0x11   :  { %v2447_v56 = vld [vmem:[%s3186_s0 + $0x4] ss:$16 sps:$4 sm:$0xff]   ;;  %v2081_v61 = vcombine.high %v74_v54, %v78_v55  ;;  %v2083_v62 = vcombine.high %v75_v57, %v79_v58  ;;  %v83_v1 = vld [vmem:[%s3185_s1 + $0x208] sm:$0xff]  ;;  %v2080_v3 = vcombine.low %v74_v54, %v78_v55  ;;  %v2082_v4 = vcombine.low %v75_v57, %v79_v58 }
  0x12   :  { %1623 = vmatpush1.bf16.msra.mxu0 %v2048_v34  ;;  %1709 = vmatpush1.bf16.msra.mxu1 %v2050_v35  ;;  %v82_v63 = vld [vmem:[%s3185_s1 + $0x200] sm:$0xff]  ;;  %v87_v2 = vld [vmem:[%s3185_s1 + $0x228] sm:$0xff] }
  0x13   :  { %1624 = vmatprep.subr.bf16.mxu0 %v2057_v36  ;;  %1710 = vmatprep.subr.bf16.mxu1 %v2059_v37  ;;  %v86_v0 = vld [vmem:[%s3185_s1 + $0x220] sm:$0xff]  ;;  %v2091_v6 = vcombine.high %v83_v1, %v87_v2  ;;  %v91_v9 = vld [vmem:[%s3185_s1 + $0x248] sm:$0xff]  ;;  %v2090_v12 = vcombine.low %v83_v1, %v87_v2 }
  0x14   :  { %1648 = vmatprep.mubr.bf16.mxu0 %v2447_v56  ;;  %1734 = vmatprep.mubr.bf16.mxu1 %v2447_v56  ;;  %v2089_v5 = vcombine.high %v82_v63, %v86_v0  ;;  %v90_v7 = vld [vmem:[%s3185_s1 + $0x240] sm:$0xff]  ;;  %v95_v10 = vld [vmem:[%s3185_s1 + $0x268] sm:$0xff]  ;;  %v2088_v11 = vcombine.low %v82_v63, %v86_v0 }
  0x15   :  { %v94_v8 = vld [vmem:[%s3185_s1 + $0x260] sm:$0xff]  ;;  %v2099_v14 = vcombine.high %v91_v9, %v95_v10  ;;  %v99_v17 = vld [vmem:[%s3185_s1 + $0x288] sm:$0xff]  ;;  %v2098_v20 = vcombine.low %v91_v9, %v95_v10 }
  0x16   :  { %1625 = vmatpush1.bf16.msra.mxu0 %v2056_v42  ;;  %1711 = vmatpush1.bf16.msra.mxu1 %v2058_v43  ;;  %v2097_v13 = vcombine.high %v90_v7, %v94_v8  ;;  %v98_v15 = vld [vmem:[%s3185_s1 + $0x280] sm:$0xff]  ;;  %v103_v18 = vld [vmem:[%s3185_s1 + $0x2a8] sm:$0xff]  ;;  %v2096_v19 = vcombine.low %v90_v7, %v94_v8 }
  0x17   :  { %1626 = vmatprep.subr.bf16.mxu0 %v2065_v44  ;;  %1712 = vmatprep.subr.bf16.mxu1 %v2067_v45  ;;  %v102_v16 = vld [vmem:[%s3185_s1 + $0x2a0] sm:$0xff]  ;;  %v2107_v22 = vcombine.high %v99_v17, %v103_v18  ;;  %v107_v25 = vld [vmem:[%s3185_s1 + $0x2c8] sm:$0xff]  ;;  %v2106_v28 = vcombine.low %v99_v17, %v103_v18 }
  0x18   :  { %v2105_v21 = vcombine.high %v98_v15, %v102_v16  ;;  %v106_v23 = vld [vmem:[%s3185_s1 + $0x2c0] sm:$0xff]  ;;  %v111_v26 = vld [vmem:[%s3185_s1 + $0x2e8] sm:$0xff]  ;;  %v2104_v27 = vcombine.low %v98_v15, %v102_v16 }
  0x19   :  { %v110_v24 = vld [vmem:[%s3185_s1 + $0x2e0] sm:$0xff]  ;;  %v2115_v30 = vcombine.high %v107_v25, %v111_v26  ;;  %v115_v33 = vld [vmem:[%s3185_s1 + $0x308] sm:$0xff]  ;;  %v2114_v36 = vcombine.low %v107_v25, %v111_v26 }
  0x1a   :  { %1627 = vmatpush1.bf16.msra.mxu0 %v2064_v50  ;;  %1713 = vmatpush1.bf16.msra.mxu1 %v2066_v51  ;;  %v2113_v29 = vcombine.high %v106_v23, %v110_v24  ;;  %v114_v31 = vld [vmem:[%s3185_s1 + $0x300] sm:$0xff]  ;;  %v119_v34 = vld [vmem:[%s3185_s1 + $0x328] sm:$0xff]  ;;  %v2112_v35 = vcombine.low %v106_v23, %v110_v24 }
  0x1b   :  { %1628 = vmatprep.subr.bf16.mxu0 %v2073_v52  ;;  %1714 = vmatprep.subr.bf16.mxu1 %v2075_v53  ;;  %v118_v32 = vld [vmem:[%s3185_s1 + $0x320] sm:$0xff]  ;;  %v2123_v38 = vcombine.high %v115_v33, %v119_v34  ;;  %v123_v41 = vld [vmem:[%s3185_s1 + $0x348] sm:$0xff]  ;;  %v2122_v44 = vcombine.low %v115_v33, %v119_v34 }
  0x1c   :  { %v2121_v37 = vcombine.high %v114_v31, %v118_v32  ;;  %v122_v39 = vld [vmem:[%s3185_s1 + $0x340] sm:$0xff]  ;;  %v127_v42 = vld [vmem:[%s3185_s1 + $0x368] sm:$0xff]  ;;  %v2120_v43 = vcombine.low %v114_v31, %v118_v32 }
  0x1d   :  { %v126_v40 = vld [vmem:[%s3185_s1 + $0x360] sm:$0xff]  ;;  %v2131_v46 = vcombine.high %v123_v41, %v127_v42  ;;  %v131_v49 = vld [vmem:[%s3185_s1 + $0x388] sm:$0xff]  ;;  %v2130_v52 = vcombine.low %v123_v41, %v127_v42 }
  0x1e   :  { %1629 = vmatpush1.bf16.msra.mxu0 %v2072_v59  ;;  %1715 = vmatpush1.bf16.msra.mxu1 %v2074_v60  ;;  %v2129_v45 = vcombine.high %v122_v39, %v126_v40  ;;  %v130_v47 = vld [vmem:[%s3185_s1 + $0x380] sm:$0xff]  ;;  %v135_v50 = vld [vmem:[%s3185_s1 + $0x3a8] sm:$0xff]  ;;  %v2128_v51 = vcombine.low %v122_v39, %v126_v40 }
  0x1f   :  { %1630 = vmatprep.subr.bf16.mxu0 %v2081_v61  ;;  %1716 = vmatprep.subr.bf16.mxu1 %v2083_v62  ;;  %v134_v48 = vld [vmem:[%s3185_s1 + $0x3a0] sm:$0xff]  ;;  %v2139_v54 = vcombine.high %v131_v49, %v135_v50  ;;  %v139_v58 = vld [vmem:[%s3185_s1 + $0x3c8] sm:$0xff]  ;;  %v2138_v61 = vcombine.low %v131_v49, %v135_v50 }
  0x20   :  { %v2137_v53 = vcombine.high %v130_v47, %v134_v48  ;;  %v138_v55 = vld [vmem:[%s3185_s1 + $0x3c0] sm:$0xff]  ;;  %v143_v59 = vld [vmem:[%s3185_s1 + $0x3e8] sm:$0xff]  ;;  %v2136_v60 = vcombine.low %v130_v47, %v134_v48 }
  0x21   :  { %v142_v57 = vld [vmem:[%s3185_s1 + $0x3e0] sm:$0xff]  ;;  %v2147_v63 = vcombine.high %v139_v58, %v143_v59  ;;  %v147_v2 = vld [vmem:[%s3185_s1 + $0x408] sm:$0xff] }
  0x22   :  { %1631 = vmatpush1.bf16.msra.mxu0 %v2080_v3  ;;  %1717 = vmatpush1.bf16.msra.mxu1 %v2082_v4  ;;  %v2145_v62 = vcombine.high %v138_v55, %v142_v57  ;;  %v146_v0 = vld [vmem:[%s3185_s1 + $0x400] sm:$0xff]  ;;  %v151_v3 = vld [vmem:[%s3185_s1 + $0x428] sm:$0xff]  ;;  %v2144_v4 = vcombine.low %v138_v55, %v142_v57 }
  0x23   :  { %1632 = vmatprep.subr.bf16.mxu0 %v2089_v5  ;;  %1718 = vmatprep.subr.bf16.mxu1 %v2091_v6  ;;  %v150_v1 = vld [vmem:[%s3185_s1 + $0x420] sm:$0xff]  ;;  %v2146_v5 = vcombine.low %v139_v58, %v143_v59  ;;  %v2155_v7 = vcombine.high %v147_v2, %v151_v3 }
  0x24   :  { %v2153_v6 = vcombine.high %v146_v0, %v150_v1  ;;  %v154_v8 = vld [vmem:[%s3185_s1 + $0x440] sm:$0xff] }
  0x25   :  { %v158_v9 = vld [vmem:[%s3185_s1 + $0x460] sm:$0xff] }
  0x26   :  { %1633 = vmatpush1.bf16.msra.mxu0 %v2088_v11  ;;  %1719 = vmatpush1.bf16.msra.mxu1 %v2090_v12  ;;  %v2574_v10 = vld [vmem:[%s3186_s0] ss:$16 sps:$4 sm:$0xff]   ;;  %v155_v11 = vld [vmem:[%s3185_s1 + $0x448] sm:$0xff]  ;;  %v2161_v15 = vcombine.high %v154_v8, %v158_v9 }
  0x27   :  { %1634 = vmatprep.subr.bf16.mxu0 %v2097_v13  ;;  %1720 = vmatprep.subr.bf16.mxu1 %v2099_v14  ;;  %v159_v12 = vld [vmem:[%s3185_s1 + $0x468] sm:$0xff]  ;;  %v2152_v13 = vcombine.low %v146_v0, %v150_v1  ;;  %v2154_v14 = vcombine.low %v147_v2, %v151_v3  ;;  %v162_v17 = vld [vmem:[%s3185_s1 + $0x480] sm:$0xff] }
  0x28   :  { %v2163_v16 = vcombine.high %v155_v11, %v159_v12  ;;  %v166_v18 = vld [vmem:[%s3185_s1 + $0x4a0] sm:$0xff]  ;;  %v2162_v23 = vcombine.low %v155_v11, %v159_v12 }
  0x29   :  { %v2169_v24 = vcombine.high %v162_v17, %v166_v18  ;;  %v170_v26 = vld [vmem:[%s3185_s1 + $0x4c0] sm:$0xff] }
  0x2a   :  { %1635 = vmatpush1.bf16.msra.mxu0 %v2096_v19  ;;  %1721 = vmatpush1.bf16.msra.mxu1 %v2098_v20  ;;  %v2591_v19 = vld [vmem:[%s3186_s0 + $0xc] ss:$16 sps:$4 sm:$0xff]   ;;  %v178_v34 = vld [vmem:[%s3185_s1 + $0x500] sm:$0xff] }
  0x2b   :  { %1636 = vmatprep.subr.bf16.mxu0 %v2105_v21  ;;  %1722 = vmatprep.subr.bf16.mxu1 %v2107_v22  ;;  %v163_v20 = vld [vmem:[%s3185_s1 + $0x488] sm:$0xff]  ;;  %v2160_v22 = vcombine.low %v154_v8, %v158_v9  ;;  %v186_v42 = vld [vmem:[%s3185_s1 + $0x540] sm:$0xff] }
  0x2c   :  { %v167_v21 = vld [vmem:[%s3185_s1 + $0x4a8] sm:$0xff]  ;;  %v194_v50 = vld [vmem:[%s3185_s1 + $0x580] sm:$0xff] }
  0x2d   :  { %v2171_v25 = vcombine.high %v163_v20, %v167_v21  ;;  %v2170_v31 = vcombine.low %v163_v20, %v167_v21  ;;  %v202_v59 = vld [vmem:[%s3185_s1 + $0x5c0] sm:$0xff] }
  0x2e   :  { %1637 = vmatpush1.bf16.msra.mxu0 %v2104_v27  ;;  %1723 = vmatpush1.bf16.msra.mxu1 %v2106_v28  ;;  %v174_v27 = vld [vmem:[%s3185_s1 + $0x4e0] sm:$0xff]  ;;  %v171_v28 = vld [vmem:[%s3185_s1 + $0x4c8] sm:$0xff] }
  0x2f   :  { %1638 = vmatprep.subr.bf16.mxu0 %v2113_v29  ;;  %1724 = vmatprep.subr.bf16.mxu1 %v2115_v30  ;;  %v175_v29 = vld [vmem:[%s3185_s1 + $0x4e8] sm:$0xff]  ;;  %v2168_v30 = vcombine.low %v162_v17, %v166_v18  ;;  %v2177_v32 = vcombine.high %v170_v26, %v174_v27  ;;  %v210_v3 = vld [vmem:[%s3185_s1 + $0x600] sm:$0xff] }
  0x30   :  { %v2179_v33 = vcombine.high %v171_v28, %v175_v29  ;;  %v2178_v39 = vcombine.low %v171_v28, %v175_v29  ;;  %v218_v12 = vld [vmem:[%s3185_s1 + $0x640] sm:$0xff] }
  0x31   :  { %v226_v21 = vld [vmem:[%s3185_s1 + $0x680] sm:$0xff] }
  0x32   :  { %1639 = vmatpush1.bf16.msra.mxu0 %v2112_v35  ;;  %1725 = vmatpush1.bf16.msra.mxu1 %v2114_v36  ;;  %v182_v35 = vld [vmem:[%s3185_s1 + $0x520] sm:$0xff]  ;;  %v179_v36 = vld [vmem:[%s3185_s1 + $0x508] sm:$0xff] }
  0x33   :  { %1640 = vmatprep.subr.bf16.mxu0 %v2121_v37  ;;  %1726 = vmatprep.subr.bf16.mxu1 %v2123_v38  ;;  %v183_v37 = vld [vmem:[%s3185_s1 + $0x528] sm:$0xff]  ;;  %v2176_v38 = vcombine.low %v170_v26, %v174_v27  ;;  %v2185_v40 = vcombine.high %v178_v34, %v182_v35  ;;  %v234_v29 = vld [vmem:[%s3185_s1 + $0x6c0] sm:$0xff] }
  0x34   :  { %v2187_v41 = vcombine.high %v179_v36, %v183_v37  ;;  %v2186_v47 = vcombine.low %v179_v36, %v183_v37  ;;  %v242_v37 = vld [vmem:[%s3185_s1 + $0x700] sm:$0xff] }
  0x36   :  { %1641 = vmatpush1.bf16.msra.mxu0 %v2120_v43  ;;  %1727 = vmatpush1.bf16.msra.mxu1 %v2122_v44  ;;  %v190_v43 = vld [vmem:[%s3185_s1 + $0x560] sm:$0xff]  ;;  %v187_v44 = vld [vmem:[%s3185_s1 + $0x548] sm:$0xff] }
  0x37   :  { %1642 = vmatprep.subr.bf16.mxu0 %v2129_v45  ;;  %1728 = vmatprep.subr.bf16.mxu1 %v2131_v46  ;;  %v191_v45 = vld [vmem:[%s3185_s1 + $0x568] sm:$0xff]  ;;  %v2184_v46 = vcombine.low %v178_v34, %v182_v35  ;;  %v2193_v48 = vcombine.high %v186_v42, %v190_v43 }
  0x38   :  { %v2195_v49 = vcombine.high %v187_v44, %v191_v45  ;;  %v2194_v55 = vcombine.low %v187_v44, %v191_v45  ;;  %v250_v45 = vld [vmem:[%s3185_s1 + $0x740] sm:$0xff] }
  0x3a   :  { %1643 = vmatpush1.bf16.msra.mxu0 %v2128_v51  ;;  %1729 = vmatpush1.bf16.msra.mxu1 %v2130_v52  ;;  %v198_v51 = vld [vmem:[%s3185_s1 + $0x5a0] sm:$0xff]  ;;  %v195_v52 = vld [vmem:[%s3185_s1 + $0x588] sm:$0xff] }
  0x3b   :  { %1644 = vmatprep.subr.bf16.mxu0 %v2137_v53  ;;  %1730 = vmatprep.subr.bf16.mxu1 %v2139_v54  ;;  %v199_v53 = vld [vmem:[%s3185_s1 + $0x5a8] sm:$0xff]  ;;  %v2192_v54 = vcombine.low %v186_v42, %v190_v43  ;;  %v2201_v57 = vcombine.high %v194_v50, %v198_v51 }
  0x3c   :  { %v2203_v58 = vcombine.high %v195_v52, %v199_v53  ;;  %v2202_v0 = vcombine.low %v195_v52, %v199_v53  ;;  %v258_v53 = vld [vmem:[%s3185_s1 + $0x780] sm:$0xff] }
  0x3e   :  { %1645 = vmatpush1.bf16.msra.mxu0 %v2136_v60  ;;  %1731 = vmatpush1.bf16.msra.mxu1 %v2138_v61  ;;  %v206_v60 = vld [vmem:[%s3185_s1 + $0x5e0] sm:$0xff]  ;;  %v203_v61 = vld [vmem:[%s3185_s1 + $0x5c8] sm:$0xff] }
  0x3f   :  { %1646 = vmatprep.subr.bf16.mxu0 %v2145_v62  ;;  %1732 = vmatprep.subr.bf16.mxu1 %v2147_v63  ;;  %v207_v62 = vld [vmem:[%s3185_s1 + $0x5e8] sm:$0xff]  ;;  %v2200_v63 = vcombine.low %v194_v50, %v198_v51  ;;  %v2209_v1 = vcombine.high %v202_v59, %v206_v60 }
  0x40   :  { %v2211_v2 = vcombine.high %v203_v61, %v207_v62  ;;  %v2210_v8 = vcombine.low %v203_v61, %v207_v62  ;;  %v266_v62 = vld [vmem:[%s3185_s1 + $0x7c0] sm:$0xff] }
  0x42   :  { %1647 = vmatpush1.bf16.msra.mxu0 %v2144_v4  ;;  %1733 = vmatpush1.bf16.msra.mxu1 %v2146_v5  ;;  %v214_v4 = vld [vmem:[%s3185_s1 + $0x620] sm:$0xff]  ;;  %v211_v5 = vld [vmem:[%s3185_s1 + $0x608] sm:$0xff] }
  0x43   :  { %1659 = vmatprep.subr.bf16.mxu0 %v2153_v6  ;;  %1745 = vmatprep.subr.bf16.mxu1 %v2155_v7  ;;  %v215_v6 = vld [vmem:[%s3185_s1 + $0x628] sm:$0xff]  ;;  %v2208_v7 = vcombine.low %v202_v59, %v206_v60  ;;  %v2217_v9 = vcombine.high %v210_v3, %v214_v4 }
  0x44   :  { %v2219_v11 = vcombine.high %v211_v5, %v215_v6  ;;  %v2218_v17 = vcombine.low %v211_v5, %v215_v6  ;;  %v20_v6 = vld [vmem:[%s3185_s1 + $0x10] sm:$0xff] }
  0x45   :  { %1649 = vmatmul.mubr.bf16.vlgmr.msra.gmra.mrb[0].mxu0 %v2574_v10  ;;  %1735 = vmatmul.mubr.bf16.vlgmr.msra.gmra.mrb[0].mxu1 %v2574_v10 }
  0x46   :  { %1660 = vmatpush1.bf16.msra.mxu0 %v2152_v13  ;;  %1746 = vmatpush1.bf16.msra.mxu1 %v2154_v14  ;;  %v222_v13 = vld [vmem:[%s3185_s1 + $0x660] sm:$0xff]  ;;  %v219_v14 = vld [vmem:[%s3185_s1 + $0x648] sm:$0xff] }
  0x47   :  { %1661 = vmatprep.subr.bf16.mxu0 %v2161_v15  ;;  %1747 = vmatprep.subr.bf16.mxu1 %v2163_v16  ;;  %v223_v15 = vld [vmem:[%s3185_s1 + $0x668] sm:$0xff]  ;;  %v2216_v16 = vcombine.low %v210_v3, %v214_v4  ;;  %v2225_v18 = vcombine.high %v218_v12, %v222_v13 }
  0x48   :  { %1691 = vmatprep.mubr.bf16.mxu0 %v2591_v19  ;;  %1777 = vmatprep.mubr.bf16.mxu1 %v2591_v19  ;;  %v2227_v20 = vcombine.high %v219_v14, %v223_v15  ;;  %v2226_v26 = vcombine.low %v219_v14, %v223_v15  ;;  %v28_v15 = vld [vmem:[%s3185_s1 + $0x50] sm:$0xff] }
  0x4a   :  { %1662 = vmatpush1.bf16.msra.mxu0 %v2160_v22  ;;  %1748 = vmatpush1.bf16.msra.mxu1 %v2162_v23  ;;  %v230_v22 = vld [vmem:[%s3185_s1 + $0x6a0] sm:$0xff]  ;;  %v227_v23 = vld [vmem:[%s3185_s1 + $0x688] sm:$0xff] }
  0x4b   :  { %1663 = vmatprep.subr.bf16.mxu0 %v2169_v24  ;;  %1749 = vmatprep.subr.bf16.mxu1 %v2171_v25  ;;  %v231_v24 = vld [vmem:[%s3185_s1 + $0x6a8] sm:$0xff]  ;;  %v2224_v25 = vcombine.low %v218_v12, %v222_v13  ;;  %v2233_v27 = vcombine.high %v226_v21, %v230_v22 }
  0x4c   :  { %v2235_v28 = vcombine.high %v227_v23, %v231_v24  ;;  %v2234_v34 = vcombine.low %v227_v23, %v231_v24 }
  0x4e   :  { %1664 = vmatpush1.bf16.msra.mxu0 %v2168_v30  ;;  %1750 = vmatpush1.bf16.msra.mxu1 %v2170_v31  ;;  %v238_v30 = vld [vmem:[%s3185_s1 + $0x6e0] sm:$0xff]  ;;  %v235_v31 = vld [vmem:[%s3185_s1 + $0x6c8] sm:$0xff] }
  0x4f   :  { %1665 = vmatprep.subr.bf16.mxu0 %v2177_v32  ;;  %1751 = vmatprep.subr.bf16.mxu1 %v2179_v33  ;;  %v239_v32 = vld [vmem:[%s3185_s1 + $0x6e8] sm:$0xff]  ;;  %v2232_v33 = vcombine.low %v226_v21, %v230_v22  ;;  %v2241_v35 = vcombine.high %v234_v29, %v238_v30 }
  0x50   :  { %v2243_v36 = vcombine.high %v235_v31, %v239_v32  ;;  %v2242_v42 = vcombine.low %v235_v31, %v239_v32 }
  0x52   :  { %1666 = vmatpush1.bf16.msra.mxu0 %v2176_v38  ;;  %1752 = vmatpush1.bf16.msra.mxu1 %v2178_v39  ;;  %v246_v38 = vld [vmem:[%s3185_s1 + $0x720] sm:$0xff]  ;;  %v243_v39 = vld [vmem:[%s3185_s1 + $0x708] sm:$0xff] }
  0x53   :  { %1667 = vmatprep.subr.bf16.mxu0 %v2185_v40  ;;  %1753 = vmatprep.subr.bf16.mxu1 %v2187_v41  ;;  %v247_v40 = vld [vmem:[%s3185_s1 + $0x728] sm:$0xff]  ;;  %v2240_v41 = vcombine.low %v234_v29, %v238_v30  ;;  %v2249_v43 = vcombine.high %v242_v37, %v246_v38 }
  0x54   :  { %v2251_v44 = vcombine.high %v243_v39, %v247_v40  ;;  %v2250_v50 = vcombine.low %v243_v39, %v247_v40 }
  0x56   :  { %1668 = vmatpush1.bf16.msra.mxu0 %v2184_v46  ;;  %1754 = vmatpush1.bf16.msra.mxu1 %v2186_v47  ;;  %v254_v46 = vld [vmem:[%s3185_s1 + $0x760] sm:$0xff]  ;;  %v251_v47 = vld [vmem:[%s3185_s1 + $0x748] sm:$0xff] }
  0x57   :  { %1669 = vmatprep.subr.bf16.mxu0 %v2193_v48  ;;  %1755 = vmatprep.subr.bf16.mxu1 %v2195_v49  ;;  %v255_v48 = vld [vmem:[%s3185_s1 + $0x768] sm:$0xff]  ;;  %v2248_v49 = vcombine.low %v242_v37, %v246_v38  ;;  %v2257_v51 = vcombine.high %v250_v45, %v254_v46 }
  0x58   :  { %v2259_v52 = vcombine.high %v251_v47, %v255_v48  ;;  %v2258_v59 = vcombine.low %v251_v47, %v255_v48  ;;  %v60_v48 = vld [vmem:[%s3185_s1 + $0x150] sm:$0xff] }
  0x5a   :  { %1670 = vmatpush1.bf16.msra.mxu0 %v2192_v54  ;;  %1756 = vmatpush1.bf16.msra.mxu1 %v2194_v55  ;;  %v262_v54 = vld [vmem:[%s3185_s1 + $0x7a0] sm:$0xff]  ;;  %v259_v55 = vld [vmem:[%s3185_s1 + $0x788] sm:$0xff] }
  0x5b   :  { %1671 = vmatprep.subr.bf16.mxu0 %v2201_v57  ;;  %1757 = vmatprep.subr.bf16.mxu1 %v2203_v58  ;;  %v263_v57 = vld [vmem:[%s3185_s1 + $0x7a8] sm:$0xff]  ;;  %v2256_v58 = vcombine.low %v250_v45, %v254_v46  ;;  %v2265_v60 = vcombine.high %v258_v53, %v262_v54 }
  0x5c   :  { %v2267_v61 = vcombine.high %v259_v55, %v263_v57  ;;  %v2266_v3 = vcombine.low %v259_v55, %v263_v57  ;;  %v68_v57 = vld [vmem:[%s3185_s1 + $0x190] sm:$0xff] }
  0x5e   :  { %1672 = vmatpush1.bf16.msra.mxu0 %v2200_v63  ;;  %1758 = vmatpush1.bf16.msra.mxu1 %v2202_v0  ;;  %v270_v63 = vld [vmem:[%s3185_s1 + $0x7e0] sm:$0xff]  ;;  %v267_v0 = vld [vmem:[%s3185_s1 + $0x7c8] sm:$0xff] }
  0x5f   :  { %1673 = vmatprep.subr.bf16.mxu0 %v2209_v1  ;;  %1759 = vmatprep.subr.bf16.mxu1 %v2211_v2  ;;  %v271_v1 = vld [vmem:[%s3185_s1 + $0x7e8] sm:$0xff]  ;;  %v2264_v2 = vcombine.low %v258_v53, %v262_v54  ;;  %v2273_v4 = vcombine.high %v266_v62, %v270_v63 }
  0x60   :  { %v2275_v5 = vcombine.high %v267_v0, %v271_v1  ;;  %v2274_v12 = vcombine.low %v267_v0, %v271_v1  ;;  %v76_v1 = vld [vmem:[%s3185_s1 + $0x1d0] sm:$0xff] }
  0x62   :  { %1674 = vmatpush1.bf16.msra.mxu0 %v2208_v7  ;;  %1760 = vmatpush1.bf16.msra.mxu1 %v2210_v8  ;;  %v24_v7 = vld [vmem:[%s3185_s1 + $0x30] sm:$0xff]  ;;  %v21_v8 = vld [vmem:[%s3185_s1 + $0x18] sm:$0xff] }
  0x63   :  { %1675 = vmatprep.subr.bf16.mxu0 %v2217_v9  ;;  %1761 = vmatprep.subr.bf16.mxu1 %v2219_v11  ;;  %v25_v9 = vld [vmem:[%s3185_s1 + $0x38] sm:$0xff]  ;;  %v2272_v11 = vcombine.low %v266_v62, %v270_v63  ;;  %v2029_v13 = vcombine.high %v20_v6, %v24_v7  ;;  %v2028_v21 = vcombine.low %v20_v6, %v24_v7 }
  0x64   :  { %v2031_v14 = vcombine.high %v21_v8, %v25_v9  ;;  %v2030_v22 = vcombine.low %v21_v8, %v25_v9  ;;  %v84_v9 = vld [vmem:[%s3185_s1 + $0x210] sm:$0xff] }
  0x66   :  { %1676 = vmatpush1.bf16.msra.mxu0 %v2216_v16  ;;  %1762 = vmatpush1.bf16.msra.mxu1 %v2218_v17  ;;  %v32_v16 = vld [vmem:[%s3185_s1 + $0x70] sm:$0xff]  ;;  %v2780_v17 = vld [vmem:[%s3186_s0 + $0x8] ss:$16 sps:$4 sm:$0xff]  }
  0x67   :  { %1677 = vmatprep.subr.bf16.mxu0 %v2225_v18  ;;  %1763 = vmatprep.subr.bf16.mxu1 %v2227_v20  ;;  %v29_v18 = vld [vmem:[%s3185_s1 + $0x58] sm:$0xff]  ;;  %v2037_v23 = vcombine.high %v28_v15, %v32_v16  ;;  %v2036_v29 = vcombine.low %v28_v15, %v32_v16 }
  0x68   :  { %v33_v20 = vld [vmem:[%s3185_s1 + $0x78] sm:$0xff] }
  0x69   :  { %v2039_v24 = vcombine.high %v29_v18, %v33_v20  ;;  %v2038_v30 = vcombine.low %v29_v18, %v33_v20  ;;  %v92_v20 = vld [vmem:[%s3185_s1 + $0x250] sm:$0xff] }
  0x6a   :  { %1678 = vmatpush1.bf16.msra.mxu0 %v2224_v25  ;;  %1764 = vmatpush1.bf16.msra.mxu1 %v2226_v26  ;;  %v36_v25 = vld [vmem:[%s3185_s1 + $0x90] sm:$0xff] }
  0x6b   :  { %1679 = vmatprep.subr.bf16.mxu0 %v2233_v27  ;;  %1765 = vmatprep.subr.bf16.mxu1 %v2235_v28  ;;  %v40_v26 = vld [vmem:[%s3185_s1 + $0xb0] sm:$0xff]  ;;  %v37_v27 = vld [vmem:[%s3185_s1 + $0x98] sm:$0xff] }
  0x6c   :  { %v41_v28 = vld [vmem:[%s3185_s1 + $0xb8] sm:$0xff]  ;;  %v2045_v31 = vcombine.high %v36_v25, %v40_v26  ;;  %v2044_v37 = vcombine.low %v36_v25, %v40_v26 }
  0x6d   :  { %v2047_v32 = vcombine.high %v37_v27, %v41_v28  ;;  %v2046_v38 = vcombine.low %v37_v27, %v41_v28  ;;  %v100_v28 = vld [vmem:[%s3185_s1 + $0x290] sm:$0xff] }
  0x6e   :  { %1680 = vmatpush1.bf16.msra.mxu0 %v2232_v33  ;;  %1766 = vmatpush1.bf16.msra.mxu1 %v2234_v34  ;;  %v44_v33 = vld [vmem:[%s3185_s1 + $0xd0] sm:$0xff] }
  0x6f   :  { %1681 = vmatprep.subr.bf16.mxu0 %v2241_v35  ;;  %1767 = vmatprep.subr.bf16.mxu1 %v2243_v36  ;;  %v48_v34 = vld [vmem:[%s3185_s1 + $0xf0] sm:$0xff]  ;;  %v45_v35 = vld [vmem:[%s3185_s1 + $0xd8] sm:$0xff] }
  0x70   :  { %v49_v36 = vld [vmem:[%s3185_s1 + $0xf8] sm:$0xff]  ;;  %v2053_v39 = vcombine.high %v44_v33, %v48_v34 }
  0x71   :  { %v2055_v40 = vcombine.high %v45_v35, %v49_v36  ;;  %v2054_v45 = vcombine.low %v45_v35, %v49_v36  ;;  %v108_v36 = vld [vmem:[%s3185_s1 + $0x2d0] sm:$0xff] }
  0x72   :  { %1682 = vmatpush1.bf16.msra.mxu0 %v2240_v41  ;;  %1768 = vmatpush1.bf16.msra.mxu1 %v2242_v42  ;;  %v52_v41 = vld [vmem:[%s3185_s1 + $0x110] sm:$0xff] }
  0x73   :  { %1683 = vmatprep.subr.bf16.mxu0 %v2249_v43  ;;  %1769 = vmatprep.subr.bf16.mxu1 %v2251_v44  ;;  %v56_v42 = vld [vmem:[%s3185_s1 + $0x130] sm:$0xff]  ;;  %v57_v43 = vld [vmem:[%s3185_s1 + $0x138] sm:$0xff]  ;;  %v2052_v44 = vcombine.low %v44_v33, %v48_v34 }
  0x74   :  { %v2061_v46 = vcombine.high %v52_v41, %v56_v42 }
  0x76   :  { %1684 = vmatpush1.bf16.msra.mxu0 %v2248_v49  ;;  %1770 = vmatpush1.bf16.msra.mxu1 %v2250_v50  ;;  %v64_v49 = vld [vmem:[%s3185_s1 + $0x170] sm:$0xff]  ;;  %v61_v50 = vld [vmem:[%s3185_s1 + $0x158] sm:$0xff] }
  0x77   :  { %1685 = vmatprep.subr.bf16.mxu0 %v2257_v51  ;;  %1771 = vmatprep.subr.bf16.mxu1 %v2259_v52  ;;  %v65_v51 = vld [vmem:[%s3185_s1 + $0x178] sm:$0xff]  ;;  %v2060_v52 = vcombine.low %v52_v41, %v56_v42  ;;  %v2069_v54 = vcombine.high %v60_v48, %v64_v49 }
  0x78   :  { %v2071_v55 = vcombine.high %v61_v50, %v65_v51  ;;  %v2070_v62 = vcombine.low %v61_v50, %v65_v51  ;;  %v124_v51 = vld [vmem:[%s3185_s1 + $0x350] sm:$0xff] }
  0x7a   :  { %1686 = vmatpush1.bf16.msra.mxu0 %v2256_v58  ;;  %1772 = vmatpush1.bf16.msra.mxu1 %v2258_v59  ;;  %v72_v58 = vld [vmem:[%s3185_s1 + $0x1b0] sm:$0xff]  ;;  %v69_v59 = vld [vmem:[%s3185_s1 + $0x198] sm:$0xff] }
  0x7b   :  { %1687 = vmatprep.subr.bf16.mxu0 %v2265_v60  ;;  %1773 = vmatprep.subr.bf16.mxu1 %v2267_v61  ;;  %v73_v60 = vld [vmem:[%s3185_s1 + $0x1b8] sm:$0xff]  ;;  %v2068_v61 = vcombine.low %v60_v48, %v64_v49  ;;  %v2077_v63 = vcombine.high %v68_v57, %v72_v58 }
  0x7c   :  { %v2079_v0 = vcombine.high %v69_v59, %v73_v60  ;;  %v2078_v6 = vcombine.low %v69_v59, %v73_v60  ;;  %v132_v60 = vld [vmem:[%s3185_s1 + $0x390] sm:$0xff] }
  0x7e   :  { %1688 = vmatpush1.bf16.msra.mxu0 %v2264_v2  ;;  %1774 = vmatpush1.bf16.msra.mxu1 %v2266_v3  ;;  %v80_v2 = vld [vmem:[%s3185_s1 + $0x1f0] sm:$0xff]  ;;  %v77_v3 = vld [vmem:[%s3185_s1 + $0x1d8] sm:$0xff] }
  0x7f   :  { %1689 = vmatprep.subr.bf16.mxu0 %v2273_v4  ;;  %1775 = vmatprep.subr.bf16.mxu1 %v2275_v5  ;;  %v81_v4 = vld [vmem:[%s3185_s1 + $0x1f8] sm:$0xff]  ;;  %v2076_v5 = vcombine.low %v68_v57, %v72_v58  ;;  %v2085_v7 = vcombine.high %v76_v1, %v80_v2 }
  0x80   :  { %v2087_v8 = vcombine.high %v77_v3, %v81_v4  ;;  %v2086_v15 = vcombine.low %v77_v3, %v81_v4  ;;  %v140_v4 = vld [vmem:[%s3185_s1 + $0x3d0] sm:$0xff] }
  0x82   :  { %1690 = vmatpush1.bf16.msra.mxu0 %v2272_v11  ;;  %1776 = vmatpush1.bf16.msra.mxu1 %v2274_v12  ;;  %v88_v11 = vld [vmem:[%s3185_s1 + $0x230] sm:$0xff]  ;;  %v85_v12 = vld [vmem:[%s3185_s1 + $0x218] sm:$0xff] }
  0x83   :  { %1788 = vmatprep.subr.bf16.mxu0 %v2029_v13  ;;  %1874 = vmatprep.subr.bf16.mxu1 %v2031_v14  ;;  %v89_v13 = vld [vmem:[%s3185_s1 + $0x238] sm:$0xff]  ;;  %v2084_v14 = vcombine.low %v76_v1, %v80_v2  ;;  %v2093_v16 = vcombine.high %v84_v9, %v88_v11 }
  0x84   :  { %v2095_v18 = vcombine.high %v85_v12, %v89_v13  ;;  %v2094_v25 = vcombine.low %v85_v12, %v89_v13  ;;  %v148_v13 = vld [vmem:[%s3185_s1 + $0x410] sm:$0xff] }
  0x85   :  { %1692 = vmatmul.mubr.bf16.vlgmr.msra.gmra.mrb[0].mxu0 %v2780_v17  ;;  %1778 = vmatmul.mubr.bf16.vlgmr.msra.gmra.mrb[0].mxu1 %v2780_v17 }
  0x86   :  { %1789 = vmatpush1.bf16.msra.mxu0 %v2028_v21  ;;  %1875 = vmatpush1.bf16.msra.mxu1 %v2030_v22  ;;  %v96_v21 = vld [vmem:[%s3185_s1 + $0x270] sm:$0xff]  ;;  %v93_v22 = vld [vmem:[%s3185_s1 + $0x258] sm:$0xff] }
  0x87   :  { %1790 = vmatprep.subr.bf16.mxu0 %v2037_v23  ;;  %1876 = vmatprep.subr.bf16.mxu1 %v2039_v24  ;;  %v97_v23 = vld [vmem:[%s3185_s1 + $0x278] sm:$0xff]  ;;  %v2092_v24 = vcombine.low %v84_v9, %v88_v11  ;;  %v2101_v26 = vcombine.high %v92_v20, %v96_v21 }
  0x88   :  { %1820 = vmatprep.mubr.bf16.mxu0 %v2447_v56  ;;  %1906 = vmatprep.mubr.bf16.mxu1 %v2447_v56  ;;  %v53_v56 = vld [vmem:[%s3185_s1 + $0x118] sm:$0xff]  ;;  %v2103_v27 = vcombine.high %v93_v22, %v97_v23  ;;  %v2102_v33 = vcombine.low %v93_v22, %v97_v23  ;;  %v156_v23 = vld [vmem:[%s3185_s1 + $0x450] sm:$0xff] }
  0x89   :  { %v2063_v47 = vcombine.high %v53_v56, %v57_v43  ;;  %v2062_v53 = vcombine.low %v53_v56, %v57_v43  ;;  %v116_v43 = vld [vmem:[%s3185_s1 + $0x310] sm:$0xff] }
  0x8a   :  { %1791 = vmatpush1.bf16.msra.mxu0 %v2036_v29  ;;  %1877 = vmatpush1.bf16.msra.mxu1 %v2038_v30  ;;  %v104_v29 = vld [vmem:[%s3185_s1 + $0x2b0] sm:$0xff]  ;;  %v101_v30 = vld [vmem:[%s3185_s1 + $0x298] sm:$0xff] }
  0x8b   :  { %1792 = vmatprep.subr.bf16.mxu0 %v2045_v31  ;;  %1878 = vmatprep.subr.bf16.mxu1 %v2047_v32  ;;  %v105_v31 = vld [vmem:[%s3185_s1 + $0x2b8] sm:$0xff]  ;;  %v2100_v32 = vcombine.low %v92_v20, %v96_v21  ;;  %v2109_v34 = vcombine.high %v100_v28, %v104_v29 }
  0x8c   :  { %v2111_v35 = vcombine.high %v101_v30, %v105_v31  ;;  %v2110_v41 = vcombine.low %v101_v30, %v105_v31  ;;  %v164_v31 = vld [vmem:[%s3185_s1 + $0x490] sm:$0xff] }
  0x8e   :  { %1793 = vmatpush1.bf16.msra.mxu0 %v2044_v37  ;;  %1879 = vmatpush1.bf16.msra.mxu1 %v2046_v38  ;;  %v112_v37 = vld [vmem:[%s3185_s1 + $0x2f0] sm:$0xff]  ;;  %v109_v38 = vld [vmem:[%s3185_s1 + $0x2d8] sm:$0xff] }
  0x8f   :  { %1794 = vmatprep.subr.bf16.mxu0 %v2053_v39  ;;  %1880 = vmatprep.subr.bf16.mxu1 %v2055_v40  ;;  %v113_v39 = vld [vmem:[%s3185_s1 + $0x2f8] sm:$0xff]  ;;  %v2108_v40 = vcombine.low %v100_v28, %v104_v29  ;;  %v2117_v42 = vcombine.high %v108_v36, %v112_v37 }
  0x90   :  { %v2119_v56 = vcombine.high %v109_v38, %v113_v39  ;;  %v2118_v48 = vcombine.low %v109_v38, %v113_v39  ;;  %v172_v39 = vld [vmem:[%s3185_s1 + $0x4d0] sm:$0xff] }
  0x92   :  { %1795 = vmatpush1.bf16.msra.mxu0 %v2052_v44  ;;  %1881 = vmatpush1.bf16.msra.mxu1 %v2054_v45  ;;  %v120_v44 = vld [vmem:[%s3185_s1 + $0x330] sm:$0xff]  ;;  %v117_v45 = vld [vmem:[%s3185_s1 + $0x318] sm:$0xff] }
  0x93   :  { %1796 = vmatprep.subr.bf16.mxu0 %v2061_v46  ;;  %1882 = vmatprep.subr.bf16.mxu1 %v2063_v47  ;;  %v121_v46 = vld [vmem:[%s3185_s1 + $0x338] sm:$0xff]  ;;  %v2116_v47 = vcombine.low %v108_v36, %v112_v37  ;;  %v2125_v49 = vcombine.high %v116_v43, %v120_v44 }
  0x94   :  { %v2127_v50 = vcombine.high %v117_v45, %v121_v46  ;;  %v2126_v57 = vcombine.low %v117_v45, %v121_v46  ;;  %v180_v45 = vld [vmem:[%s3185_s1 + $0x510] sm:$0xff] }
  0x95   :  { %v184_v46 = vld [vmem:[%s3185_s1 + $0x530] sm:$0xff] }
  0x96   :  { %1797 = vmatpush1.bf16.msra.mxu0 %v2060_v52  ;;  %1883 = vmatpush1.bf16.msra.mxu1 %v2062_v53  ;;  %v128_v52 = vld [vmem:[%s3185_s1 + $0x370] sm:$0xff]  ;;  %v125_v53 = vld [vmem:[%s3185_s1 + $0x358] sm:$0xff] }
  0x97   :  { %1798 = vmatprep.subr.bf16.mxu0 %v2069_v54  ;;  %1884 = vmatprep.subr.bf16.mxu1 %v2071_v55  ;;  %v129_v54 = vld [vmem:[%s3185_s1 + $0x378] sm:$0xff]  ;;  %v2124_v55 = vcombine.low %v116_v43, %v120_v44  ;;  %v2133_v58 = vcombine.high %v124_v51, %v128_v52 }
  0x98   :  { %v2135_v59 = vcombine.high %v125_v53, %v129_v54  ;;  %v2134_v1 = vcombine.low %v125_v53, %v129_v54  ;;  %v192_v53 = vld [vmem:[%s3185_s1 + $0x570] sm:$0xff]  ;;  %v189_v54 = vld [vmem:[%s3185_s1 + $0x558] sm:$0xff] }
  0x9a   :  { %1799 = vmatpush1.bf16.msra.mxu0 %v2068_v61  ;;  %1885 = vmatpush1.bf16.msra.mxu1 %v2070_v62  ;;  %v136_v61 = vld [vmem:[%s3185_s1 + $0x3b0] sm:$0xff]  ;;  %v133_v62 = vld [vmem:[%s3185_s1 + $0x398] sm:$0xff] }
  0x9b   :  { %1800 = vmatprep.subr.bf16.mxu0 %v2077_v63  ;;  %1886 = vmatprep.subr.bf16.mxu1 %v2079_v0  ;;  %v137_v63 = vld [vmem:[%s3185_s1 + $0x3b8] sm:$0xff]  ;;  %v2132_v0 = vcombine.low %v124_v51, %v128_v52  ;;  %v2141_v2 = vcombine.high %v132_v60, %v136_v61  ;;  %v188_v52 = vld [vmem:[%s3185_s1 + $0x550] sm:$0xff] }
  0x9c   :  { %v2143_v3 = vcombine.high %v133_v62, %v137_v63  ;;  %v2142_v9 = vcombine.low %v133_v62, %v137_v63  ;;  %v200_v62 = vld [vmem:[%s3185_s1 + $0x5b0] sm:$0xff]  ;;  %v197_v63 = vld [vmem:[%s3185_s1 + $0x598] sm:$0xff] }
  0x9e   :  { %1801 = vmatpush1.bf16.msra.mxu0 %v2076_v5  ;;  %1887 = vmatpush1.bf16.msra.mxu1 %v2078_v6  ;;  %v144_v5 = vld [vmem:[%s3185_s1 + $0x3f0] sm:$0xff]  ;;  %v141_v6 = vld [vmem:[%s3185_s1 + $0x3d8] sm:$0xff] }
  0x9f   :  { %1802 = vmatprep.subr.bf16.mxu0 %v2085_v7  ;;  %1888 = vmatprep.subr.bf16.mxu1 %v2087_v8  ;;  %v145_v7 = vld [vmem:[%s3185_s1 + $0x3f8] sm:$0xff]  ;;  %v2140_v8 = vcombine.low %v132_v60, %v136_v61  ;;  %v2149_v11 = vcombine.high %v140_v4, %v144_v5  ;;  %v196_v61 = vld [vmem:[%s3185_s1 + $0x590] sm:$0xff] }
  0xa0   :  { %v2151_v12 = vcombine.high %v141_v6, %v145_v7  ;;  %v2150_v20 = vcombine.low %v141_v6, %v145_v7  ;;  %v208_v6 = vld [vmem:[%s3185_s1 + $0x5f0] sm:$0xff]  ;;  %v205_v7 = vld [vmem:[%s3185_s1 + $0x5d8] sm:$0xff] }
  0xa2   :  { %1803 = vmatpush1.bf16.msra.mxu0 %v2084_v14  ;;  %1889 = vmatpush1.bf16.msra.mxu1 %v2086_v15  ;;  %v152_v14 = vld [vmem:[%s3185_s1 + $0x430] sm:$0xff]  ;;  %v149_v15 = vld [vmem:[%s3185_s1 + $0x418] sm:$0xff] }
  0xa3   :  { %1804 = vmatprep.subr.bf16.mxu0 %v2093_v16  ;;  %1890 = vmatprep.subr.bf16.mxu1 %v2095_v18  ;;  %v153_v16 = vld [vmem:[%s3185_s1 + $0x438] sm:$0xff]  ;;  %v2148_v18 = vcombine.low %v140_v4, %v144_v5  ;;  %v2157_v21 = vcombine.high %v148_v13, %v152_v14  ;;  %v204_v5 = vld [vmem:[%s3185_s1 + $0x5d0] sm:$0xff] }
  0xa4   :  { %v2159_v22 = vcombine.high %v149_v15, %v153_v16  ;;  %v2158_v28 = vcombine.low %v149_v15, %v153_v16  ;;  %v216_v15 = vld [vmem:[%s3185_s1 + $0x630] sm:$0xff]  ;;  %v213_v16 = vld [vmem:[%s3185_s1 + $0x618] sm:$0xff] }
  0xa6   :  { %1805 = vmatpush1.bf16.msra.mxu0 %v2092_v24  ;;  %1891 = vmatpush1.bf16.msra.mxu1 %v2094_v25  ;;  %v160_v24 = vld [vmem:[%s3185_s1 + $0x470] sm:$0xff]  ;;  %v157_v25 = vld [vmem:[%s3185_s1 + $0x458] sm:$0xff] }
  0xa7   :  { %1806 = vmatprep.subr.bf16.mxu0 %v2101_v26  ;;  %1892 = vmatprep.subr.bf16.mxu1 %v2103_v27  ;;  %v161_v26 = vld [vmem:[%s3185_s1 + $0x478] sm:$0xff]  ;;  %v2156_v27 = vcombine.low %v148_v13, %v152_v14  ;;  %v2165_v29 = vcombine.high %v156_v23, %v160_v24  ;;  %v212_v14 = vld [vmem:[%s3185_s1 + $0x610] sm:$0xff] }
  0xa8   :  { %v2167_v30 = vcombine.high %v157_v25, %v161_v26  ;;  %v2166_v36 = vcombine.low %v157_v25, %v161_v26  ;;  %v224_v25 = vld [vmem:[%s3185_s1 + $0x670] sm:$0xff]  ;;  %v221_v26 = vld [vmem:[%s3185_s1 + $0x658] sm:$0xff] }
  0xaa   :  { %1807 = vmatpush1.bf16.msra.mxu0 %v2100_v32  ;;  %1893 = vmatpush1.bf16.msra.mxu1 %v2102_v33  ;;  %v168_v32 = vld [vmem:[%s3185_s1 + $0x4b0] sm:$0xff]  ;;  %v165_v33 = vld [vmem:[%s3185_s1 + $0x498] sm:$0xff] }
  0xab   :  { %1808 = vmatprep.subr.bf16.mxu0 %v2109_v34  ;;  %1894 = vmatprep.subr.bf16.mxu1 %v2111_v35  ;;  %v169_v34 = vld [vmem:[%s3185_s1 + $0x4b8] sm:$0xff]  ;;  %v2164_v35 = vcombine.low %v156_v23, %v160_v24  ;;  %v2173_v37 = vcombine.high %v164_v31, %v168_v32  ;;  %v220_v24 = vld [vmem:[%s3185_s1 + $0x650] sm:$0xff] }
  0xac   :  { %v2175_v38 = vcombine.high %v165_v33, %v169_v34 }
  0xae   :  { %1809 = vmatpush1.bf16.msra.mxu0 %v2108_v40  ;;  %1895 = vmatpush1.bf16.msra.mxu1 %v2110_v41  ;;  %v176_v40 = vld [vmem:[%s3185_s1 + $0x4f0] sm:$0xff]  ;;  %v177_v41 = vld [vmem:[%s3185_s1 + $0x4f8] sm:$0xff] }
  0xaf   :  { %1810 = vmatprep.subr.bf16.mxu0 %v2117_v42  ;;  %1896 = vmatprep.subr.bf16.mxu1 %v2119_v56  ;;  %v2172_v42 = vcombine.low %v164_v31, %v168_v32  ;;  %v2174_v56 = vcombine.low %v165_v33, %v169_v34  ;;  %v2181_v43 = vcombine.high %v172_v39, %v176_v40  ;;  %v228_v32 = vld [vmem:[%s3185_s1 + $0x690] sm:$0xff]  ;;  %v229_v34 = vld [vmem:[%s3185_s1 + $0x698] sm:$0xff] }
  0xb0   :  { %v232_v33 = vld [vmem:[%s3185_s1 + $0x6b0] sm:$0xff] }
  0xb2   :  { %1811 = vmatpush1.bf16.msra.mxu0 %v2116_v47  ;;  %1897 = vmatpush1.bf16.msra.mxu1 %v2118_v48  ;;  %v185_v47 = vld [vmem:[%s3185_s1 + $0x538] sm:$0xff]  ;;  %v2180_v48 = vcombine.low %v172_v39, %v176_v40  ;;  %v236_v40 = vld [vmem:[%s3185_s1 + $0x6d0] sm:$0xff] }
  0xb3   :  { %1812 = vmatprep.subr.bf16.mxu0 %v2125_v49  ;;  %1898 = vmatprep.subr.bf16.mxu1 %v2127_v50  ;;  %v2189_v50 = vcombine.high %v180_v45, %v184_v46 }
  0xb6   :  { %1813 = vmatpush1.bf16.msra.mxu0 %v2124_v55  ;;  %1899 = vmatpush1.bf16.msra.mxu1 %v2126_v57  ;;  %v193_v55 = vld [vmem:[%s3185_s1 + $0x578] sm:$0xff]  ;;  %v2188_v57 = vcombine.low %v180_v45, %v184_v46  ;;  %v244_v46 = vld [vmem:[%s3185_s1 + $0x710] sm:$0xff] }
  0xb7   :  { %1814 = vmatprep.subr.bf16.mxu0 %v2133_v58  ;;  %1900 = vmatprep.subr.bf16.mxu1 %v2135_v59  ;;  %v2197_v59 = vcombine.high %v188_v52, %v192_v53  ;;  %v2199_v60 = vcombine.high %v189_v54, %v193_v55 }
  0xba   :  { %1815 = vmatpush1.bf16.msra.mxu0 %v2132_v0  ;;  %1901 = vmatpush1.bf16.msra.mxu1 %v2134_v1  ;;  %v201_v0 = vld [vmem:[%s3185_s1 + $0x5b8] sm:$0xff]  ;;  %v2196_v1 = vcombine.low %v188_v52, %v192_v53  ;;  %v252_v53 = vld [vmem:[%s3185_s1 + $0x750] sm:$0xff] }
  0xbb   :  { %1816 = vmatprep.subr.bf16.mxu0 %v2141_v2  ;;  %1902 = vmatprep.subr.bf16.mxu1 %v2143_v3  ;;  %v2198_v2 = vcombine.low %v189_v54, %v193_v55  ;;  %v2205_v3 = vcombine.high %v196_v61, %v200_v62  ;;  %v2207_v4 = vcombine.high %v197_v63, %v201_v0  ;;  %v256_v54 = vld [vmem:[%s3185_s1 + $0x770] sm:$0xff]  ;;  %v253_v55 = vld [vmem:[%s3185_s1 + $0x758] sm:$0xff] }
  0xbe   :  { %1817 = vmatpush1.bf16.msra.mxu0 %v2140_v8  ;;  %1903 = vmatpush1.bf16.msra.mxu1 %v2142_v9  ;;  %v209_v8 = vld [vmem:[%s3185_s1 + $0x5f8] sm:$0xff]  ;;  %v2204_v9 = vcombine.low %v196_v61, %v200_v62  ;;  %v260_v62 = vld [vmem:[%s3185_s1 + $0x790] sm:$0xff] }
  0xbf   :  { %1818 = vmatprep.subr.bf16.mxu0 %v2149_v11  ;;  %1904 = vmatprep.subr.bf16.mxu1 %v2151_v12  ;;  %v2206_v11 = vcombine.low %v197_v63, %v201_v0  ;;  %v2213_v12 = vcombine.high %v204_v5, %v208_v6  ;;  %v2215_v13 = vcombine.high %v205_v7, %v209_v8  ;;  %v264_v63 = vld [vmem:[%s3185_s1 + $0x7b0] sm:$0xff]  ;;  %v261_v0 = vld [vmem:[%s3185_s1 + $0x798] sm:$0xff] }
  0xc2   :  { %1819 = vmatpush1.bf16.msra.mxu0 %v2148_v18  ;;  %1905 = vmatpush1.bf16.msra.mxu1 %v2150_v20  ;;  %v217_v18 = vld [vmem:[%s3185_s1 + $0x638] sm:$0xff]  ;;  %v2212_v20 = vcombine.low %v204_v5, %v208_v6  ;;  %v268_v6 = vld [vmem:[%s3185_s1 + $0x7d0] sm:$0xff] }
  0xc3   :  { %1831 = vmatprep.subr.bf16.mxu0 %v2157_v21  ;;  %1917 = vmatprep.subr.bf16.mxu1 %v2159_v22  ;;  %v2214_v21 = vcombine.low %v205_v7, %v209_v8  ;;  %v2221_v22 = vcombine.high %v212_v14, %v216_v15  ;;  %v2223_v23 = vcombine.high %v213_v16, %v217_v18  ;;  %v272_v7 = vld [vmem:[%s3185_s1 + $0x7f0] sm:$0xff]  ;;  %v269_v8 = vld [vmem:[%s3185_s1 + $0x7d8] sm:$0xff] }
  0xc5   :  { %1821 = vmatmul.mubr.bf16.vlgmr.msra.gmra.mrb[4].mxu0 %v2574_v10  ;;  %1907 = vmatmul.mubr.bf16.vlgmr.msra.gmra.mrb[4].mxu1 %v2574_v10  ;;  %v173_v10 = vld [vmem:[%s3185_s1 + $0x4d8] sm:$0xff] }
  0xc6   :  { %1832 = vmatpush1.bf16.msra.mxu0 %v2156_v27  ;;  %1918 = vmatpush1.bf16.msra.mxu1 %v2158_v28  ;;  %v2183_v44 = vcombine.high %v173_v10, %v177_v41  ;;  %v2182_v49 = vcombine.low %v173_v10, %v177_v41  ;;  %v225_v27 = vld [vmem:[%s3185_s1 + $0x678] sm:$0xff]  ;;  %v2220_v28 = vcombine.low %v212_v14, %v216_v15  ;;  %v240_v10 = vld [vmem:[%s3185_s1 + $0x6f0] sm:$0xff] }
  0xc7   :  { %1833 = vmatprep.subr.bf16.mxu0 %v2165_v29  ;;  %1919 = vmatprep.subr.bf16.mxu1 %v2167_v30  ;;  %v2222_v29 = vcombine.low %v213_v16, %v217_v18  ;;  %v2229_v30 = vcombine.high %v220_v24, %v224_v25  ;;  %v2231_v31 = vcombine.high %v221_v26, %v225_v27  ;;  %v237_v41 = vld [vmem:[%s3185_s1 + $0x6d8] sm:$0xff]  ;;  %v276_v18 = vlaneseq }
  0xc8   :  { %1863 = vmatprep.mubr.bf16.mxu0 %v2591_v19  ;;  %1949 = vmatprep.mubr.bf16.mxu1 %v2591_v19  ;;  %v181_v19 = vld [vmem:[%s3185_s1 + $0x518] sm:$0xff]  ;;  %v2276_v15 = vcombine.low %v268_v6, %v272_v7 }
  0xc9   :  { %v2191_v51 = vcombine.high %v181_v19, %v185_v47  ;;  %v2190_v58 = vcombine.low %v181_v19, %v185_v47  ;;  %v248_v19 = vld [vmem:[%s3185_s1 + $0x730] sm:$0xff]  ;;  %v245_v47 = vld [vmem:[%s3185_s1 + $0x718] sm:$0xff] }
  0xca   :  { %1834 = vmatpush1.bf16.msra.mxu0 %v2164_v35  ;;  %1920 = vmatpush1.bf16.msra.mxu1 %v2166_v36  ;;  %v233_v35 = vld [vmem:[%s3185_s1 + $0x6b8] sm:$0xff]  ;;  %v2228_v36 = vcombine.low %v220_v24, %v224_v25 }
  0xcb   :  { %1835 = vmatprep.subr.bf16.mxu0 %v2173_v37  ;;  %1921 = vmatprep.subr.bf16.mxu1 %v2175_v38  ;;  %v2230_v37 = vcombine.low %v221_v26, %v225_v27  ;;  %v2237_v38 = vcombine.high %v228_v32, %v232_v33  ;;  %v2239_v39 = vcombine.high %v229_v34, %v233_v35 }
  0xce   :  { %1836 = vmatpush1.bf16.msra.mxu0 %v2172_v42  ;;  %1922 = vmatpush1.bf16.msra.mxu1 %v2174_v56  ;;  %v241_v42 = vld [vmem:[%s3185_s1 + $0x6f8] sm:$0xff]  ;;  %v2236_v56 = vcombine.low %v228_v32, %v232_v33 }
  0xcf   :  { %1837 = vmatprep.subr.bf16.mxu0 %v2181_v43  ;;  %1923 = vmatprep.subr.bf16.mxu1 %v2183_v44  ;;  %v2238_v43 = vcombine.low %v229_v34, %v233_v35  ;;  %v2245_v44 = vcombine.high %v236_v40, %v240_v10  ;;  %v2247_v45 = vcombine.high %v237_v41, %v241_v42 }
  0xd2   :  { %1838 = vmatpush1.bf16.msra.mxu0 %v2180_v48  ;;  %1924 = vmatpush1.bf16.msra.mxu1 %v2182_v49  ;;  %v249_v48 = vld [vmem:[%s3185_s1 + $0x738] sm:$0xff]  ;;  %v2244_v49 = vcombine.low %v236_v40, %v240_v10 }
  0xd3   :  { %1839 = vmatprep.subr.bf16.mxu0 %v2189_v50  ;;  %1925 = vmatprep.subr.bf16.mxu1 %v2191_v51  ;;  %v2246_v50 = vcombine.low %v237_v41, %v241_v42  ;;  %v2253_v51 = vcombine.high %v244_v46, %v248_v19  ;;  %v2255_v52 = vcombine.high %v245_v47, %v249_v48 }
  0xd6   :  { %1840 = vmatpush1.bf16.msra.mxu0 %v2188_v57  ;;  %1926 = vmatpush1.bf16.msra.mxu1 %v2190_v58  ;;  %v257_v57 = vld [vmem:[%s3185_s1 + $0x778] sm:$0xff]  ;;  %v2252_v58 = vcombine.low %v244_v46, %v248_v19 }
  0xd7   :  { %1841 = vmatprep.subr.bf16.mxu0 %v2197_v59  ;;  %1927 = vmatprep.subr.bf16.mxu1 %v2199_v60  ;;  %v2254_v59 = vcombine.low %v245_v47, %v249_v48  ;;  %v2261_v60 = vcombine.high %v252_v53, %v256_v54  ;;  %v2263_v61 = vcombine.high %v253_v55, %v257_v57 }
  0xda   :  { %1842 = vmatpush1.bf16.msra.mxu0 %v2196_v1  ;;  %1928 = vmatpush1.bf16.msra.mxu1 %v2198_v2  ;;  %v265_v1 = vld [vmem:[%s3185_s1 + $0x7b8] sm:$0xff]  ;;  %v2260_v2 = vcombine.low %v252_v53, %v256_v54 }
  0xdb   :  { %1843 = vmatprep.subr.bf16.mxu0 %v2205_v3  ;;  %1929 = vmatprep.subr.bf16.mxu1 %v2207_v4  ;;  %v2262_v3 = vcombine.low %v253_v55, %v257_v57  ;;  %v2269_v4 = vcombine.high %v260_v62, %v264_v63  ;;  %v2271_v5 = vcombine.high %v261_v0, %v265_v1 }
  0xde   :  { %1844 = vmatpush1.bf16.msra.mxu0 %v2204_v9  ;;  %1930 = vmatpush1.bf16.msra.mxu1 %v2206_v11  ;;  %v273_v9 = vld [vmem:[%s3185_s1 + $0x7f8] sm:$0xff]  ;;  %v2268_v11 = vcombine.low %v260_v62, %v264_v63 }
  0xdf   :  { %1845 = vmatprep.subr.bf16.mxu0 %v2213_v12  ;;  %1931 = vmatprep.subr.bf16.mxu1 %v2215_v13  ;;  %v2270_v12 = vcombine.low %v261_v0, %v265_v1  ;;  %v2277_v13 = vcombine.high %v268_v6, %v272_v7  ;;  %v2279_v14 = vcombine.high %v269_v8, %v273_v9 }
  0xe0   :  { %v2278_v16 = vcombine.low %v269_v8, %v273_v9 }
  0xe2   :  { %1846 = vmatpush1.bf16.msra.mxu0 %v2212_v20  ;;  %1932 = vmatpush1.bf16.msra.mxu1 %v2214_v21  ;;  %v277_v20 = vshrl.u32 %v276_v18, 7 }
  0xe3   :  { %1847 = vmatprep.subr.bf16.mxu0 %v2221_v22  ;;  %1933 = vmatprep.subr.bf16.mxu1 %v2223_v23  ;;  %v274_v22 = vld [vmem:[%s3187_s2] sm:$0xff] }
  0xe4   :  { %v278_v21 = vsub.s32 0, %v277_v20  ;;  %v286_v23 = vsub.s32 2, %v277_v20  ;;  %v282_v24 = vsub.s32 1, %v277_v20  ;;  %v290_v25 = vsub.s32 3, %v277_v20 }
  0xe5   :  { %v294_v19 = vsub.s32 4, %v277_v20  ;;  %v302_v47 = vsub.s32 6, %v277_v20  ;;  %v298_v48 = vsub.s32 5, %v277_v20 }
  0xe6   :  { %1848 = vmatpush1.bf16.msra.mxu0 %v2220_v28  ;;  %1934 = vmatpush1.bf16.msra.mxu1 %v2222_v29  ;;  %v279_v26 = vrot.slane %v274_v22, %v278_v21  ;;  %v287_v27 = vrot.slane %v274_v22, %v286_v23  ;;  %v283_v28 = vrot.slane %v274_v22, %v282_v24 }
  0xe7   :  { %1849 = vmatprep.subr.bf16.mxu0 %v2229_v30  ;;  %1935 = vmatprep.subr.bf16.mxu1 %v2231_v31  ;;  %v291_v29 = vrot.slane %v274_v22, %v290_v25 }
  0xea   :  { %1850 = vmatpush1.bf16.msra.mxu0 %v2228_v36  ;;  %1936 = vmatpush1.bf16.msra.mxu1 %v2230_v37 }
  0xeb   :  { %1851 = vmatprep.subr.bf16.mxu0 %v2237_v38  ;;  %1937 = vmatprep.subr.bf16.mxu1 %v2239_v39 }
  0xee   :  { %1852 = vmatpush1.bf16.msra.mxu0 %v2236_v56  ;;  %1938 = vmatpush1.bf16.msra.mxu1 %v2238_v43 }
  0xef   :  { %1853 = vmatprep.subr.bf16.mxu0 %v2245_v44  ;;  %1939 = vmatprep.subr.bf16.mxu1 %v2247_v45 }
  0xf2   :  { %1854 = vmatpush1.bf16.msra.mxu0 %v2244_v49  ;;  %1940 = vmatpush1.bf16.msra.mxu1 %v2246_v50  ;;  %v306_v49 = vsub.s32 7, %v277_v20  ;;  %v295_v50 = vrot.slane %v274_v22, %v294_v19 }
  0xf3   :  { %1855 = vmatprep.subr.bf16.mxu0 %v2253_v51  ;;  %1941 = vmatprep.subr.bf16.mxu1 %v2255_v52  ;;  %v303_v51 = vrot.slane %v274_v22, %v302_v47  ;;  %v299_v52 = vrot.slane %v274_v22, %v298_v48 }
  0xf4   :  { %v307_v53 = vrot.slane %v274_v22, %v306_v49 }
  0xf6   :  { %1856 = vmatpush1.bf16.msra.mxu0 %v2252_v58  ;;  %1942 = vmatpush1.bf16.msra.mxu1 %v2254_v59 }
  0xf7   :  { %1857 = vmatprep.subr.bf16.mxu0 %v2261_v60  ;;  %1943 = vmatprep.subr.bf16.mxu1 %v2263_v61 }
  0xfa   :  { %1858 = vmatpush1.bf16.msra.mxu0 %v2260_v2  ;;  %1944 = vmatpush1.bf16.msra.mxu1 %v2262_v3 }
  0xfb   :  { %1859 = vmatprep.subr.bf16.mxu0 %v2269_v4  ;;  %1945 = vmatprep.subr.bf16.mxu1 %v2271_v5 }
  0xfe   :  { %1860 = vmatpush1.bf16.msra.mxu0 %v2268_v11  ;;  %1946 = vmatpush1.bf16.msra.mxu1 %v2270_v12 }
  0xff   :  { %1861 = vmatprep.subr.bf16.mxu0 %v2277_v13  ;;  %1947 = vmatprep.subr.bf16.mxu1 %v2279_v14 }
 0x102   :  { %1862 = vmatpush1.bf16.msra.mxu0 %v2276_v15  ;;  %1948 = vmatpush1.bf16.msra.mxu1 %v2278_v16 }
 0x105   :  { %1864 = vmatmul.mubr.bf16.vlgmr.msra.gmra.mrb[4].mxu0 %v2780_v17  ;;  %1950 = vmatmul.mubr.bf16.vlgmr.msra.gmra.mrb[4].mxu1 %v2780_v17 }
 0x158   :  { %v1693_v30 = vpop.f32.mrb[0].mxu0  ;;  %v1779_v32 = vpop.f32.mrb[0].mxu1 }
 0x159   :  { %v2296_v31 = vadd.f32 %v1693_v30, %v279_v26  ;;  %v1695_v33 = vpop.f32.mrb[1].mxu0  ;;  %v2300_v34 = vadd.f32 %v1779_v32, %v287_v27  ;;  %v1781_v35 = vpop.f32.mrb[1].mxu1 }
 0x15a   :  { %v2297_v17 = vadd.f32 %v1695_v33, %v283_v28  ;;  %v1697_v36 = vpop.f32.mrb[2].mxu0  ;;  %v2301_v37 = vadd.f32 %v1781_v35, %v291_v29  ;;  %v1783_v39 = vpop.f32.mrb[2].mxu1 }
 0x15b   :  { %v2298_v38 = vadd.f32 %v1697_v36, %v279_v26  ;;  %v1699_v40 = vpop.f32.mrb[3].mxu0  ;;  %v2302_v41 = vadd.f32 %v1783_v39, %v287_v27  ;;  %v1785_v56 = vpop.f32.mrb[3].mxu1 }
 0x15c   :  { %v2288_v10 = vpack.c.bf16 %v2297_v17, %v2296_v31  ;;  %v2299_v42 = vadd.f32 %v1699_v40, %v283_v28  ;;  %v2289_v43 = vpack.c.bf16 %v2301_v37, %v2300_v34  ;;  %v2303_v44 = vadd.f32 %v1785_v56, %v291_v29 }
 0x15e   :  { %2008 = vst [vmem:[%s3188_s3] sm:$0xff] %v2288_v10  ;;  %v2292_v45 = vpack.c.bf16 %v2299_v42, %v2298_v38  ;;  %2009 = vst [vmem:[%s3188_s3 + $0x8] sm:$0xff] %v2289_v43  ;;  %v2293_v46 = vpack.c.bf16 %v2303_v44, %v2302_v41 }
 0x160   :  { %2012 = vst [vmem:[%s3188_s3 + $0x20] sm:$0xff] %v2292_v45  ;;  %2013 = vst [vmem:[%s3188_s3 + $0x28] sm:$0xff] %v2293_v46 }
 0x1d8   :  { %v1865_v54 = vpop.f32.mrb[4].mxu0  ;;  %v1951_v57 = vpop.f32.mrb[4].mxu1 }
 0x1d9   :  { %v2304_v55 = vadd.f32 %v1865_v54, %v295_v50  ;;  %v1867_v58 = vpop.f32.mrb[5].mxu0  ;;  %v2308_v59 = vadd.f32 %v1951_v57, %v303_v51  ;;  %v1953_v61 = vpop.f32.mrb[5].mxu1 }
 0x1da   :  { %v2305_v60 = vadd.f32 %v1867_v58, %v299_v52  ;;  %v1869_v62 = vpop.f32.mrb[6].mxu0  ;;  %v2309_v63 = vadd.f32 %v1953_v61, %v307_v53  ;;  %v1955_v1 = vpop.f32.mrb[6].mxu1 }
 0x1db   :  { %v2306_v0 = vadd.f32 %v1869_v62, %v295_v50  ;;  %v1871_v2 = vpop.f32.mrb[7].mxu0  ;;  %v2310_v4 = vadd.f32 %v1955_v1, %v303_v51  ;;  %v1957_v6 = vpop.f32.mrb[7].mxu1 }
 0x1dc   :  { %v2290_v3 = vpack.c.bf16 %v2305_v60, %v2304_v55  ;;  %v2307_v5 = vadd.f32 %v1871_v2, %v299_v52  ;;  %v2291_v7 = vpack.c.bf16 %v2309_v63, %v2308_v59  ;;  %v2311_v8 = vadd.f32 %v1957_v6, %v307_v53 }
 0x1de   :  { %2010 = vst [vmem:[%s3188_s3 + $0x10] sm:$0xff] %v2290_v3  ;;  %v2294_v9 = vpack.c.bf16 %v2307_v5, %v2306_v0  ;;  %2011 = vst [vmem:[%s3188_s3 + $0x18] sm:$0xff] %v2291_v7  ;;  %v2295_v11 = vpack.c.bf16 %v2311_v8, %v2310_v4 }
 0x1e0   :  { %2014 = vst [vmem:[%s3188_s3 + $0x30] sm:$0xff] %v2294_v9  ;;  %2015 = vst [vmem:[%s3188_s3 + $0x38] sm:$0xff] %v2295_v11 }

// kernel: resnet_baseline_forward.28
= control target key start
LH: loop header
LB: loop body
LE: loop exit
PB: predicated region body
PF: predicated region fallthrough
CT: control target
= control target key end

     0   :  { %s1774_s1 = inlined_call_operand.vmem [shape: bf16[256,1024], index: 1, kind: input, shape index: {}]   ;;  %s1775_s0 = inlined_call_operand.vmem [shape: bf16[16,256], index: 0, kind: input, shape index: {}]   ;;  %s1776_s2 = inlined_call_operand.vmem [shape: f32[1,1024], index: 2, kind: input, shape index: {}]   ;;  %s1777_s3 = inlined_call_operand.vmem [shape: bf16[16,1024], index: 3, kind: input, shape index: {}]   ;;  %s1778_s4 = inlined_call_operand.vmem [shape: bf16[16,1024], index: 4, kind: output, shape index: {}]  }
   0x1   :  { %v19_v0 = vld [vmem:[%s1774_s1] sm:$0xff]  ;;  %v20_v2 = vld [vmem:[%s1774_s1 + $0x8] sm:$0xff] }
   0x2   :  { %v23_v1 = vld [vmem:[%s1774_s1 + $0x20] sm:$0xff]  ;;  %v24_v4 = vld [vmem:[%s1774_s1 + $0x28] sm:$0xff] }
   0x3   :  { %v1130_v3 = vcombine.high %v19_v0, %v23_v1  ;;  %v1129_v5 = vcombine.low %v19_v0, %v23_v1  ;;  %v27_v6 = vld [vmem:[%s1774_s1 + $0x40] sm:$0xff]  ;;  %v1132_v8 = vcombine.high %v20_v2, %v24_v4  ;;  %v1131_v9 = vcombine.low %v20_v2, %v24_v4  ;;  %v28_v11 = vld [vmem:[%s1774_s1 + $0x48] sm:$0xff] }
   0x4   :  { %v31_v7 = vld [vmem:[%s1774_s1 + $0x60] sm:$0xff]  ;;  %v32_v12 = vld [vmem:[%s1774_s1 + $0x68] sm:$0xff] }
   0x5   :  { %v1138_v10 = vcombine.high %v27_v6, %v31_v7  ;;  %v35_v13 = vld [vmem:[%s1774_s1 + $0x80] sm:$0xff]  ;;  %839 = vmatprep.subr.bf16.mxu0 %v1130_v3  ;;  %v1140_v14 = vcombine.high %v28_v11, %v32_v12  ;;  %v36_v16 = vld [vmem:[%s1774_s1 + $0x88] sm:$0xff]  ;;  %882 = vmatprep.subr.bf16.mxu1 %v1132_v8  ;;  %v1137_v18 = vcombine.low %v27_v6, %v31_v7 }
   0x6   :  { %v39_v15 = vld [vmem:[%s1774_s1 + $0xa0] sm:$0xff]  ;;  %v40_v17 = vld [vmem:[%s1774_s1 + $0xa8] sm:$0xff]  ;;  %840 = vmatpush1.bf16.msra.mxu0 %v1129_v5  ;;  %883 = vmatpush1.bf16.msra.mxu1 %v1131_v9  ;;  %v1139_v19 = vcombine.low %v28_v11, %v32_v12 }
   0x7   :  { %841 = vmatprep.subr.bf16.mxu0 %v1138_v10  ;;  %v1146_v20 = vcombine.high %v35_v13, %v39_v15  ;;  %884 = vmatprep.subr.bf16.mxu1 %v1140_v14  ;;  %v1148_v21 = vcombine.high %v36_v16, %v40_v17  ;;  %v43_v22 = vld [vmem:[%s1774_s1 + $0xc0] sm:$0xff]  ;;  %v44_v24 = vld [vmem:[%s1774_s1 + $0xc8] sm:$0xff]  ;;  %v1145_v26 = vcombine.low %v35_v13, %v39_v15 }
   0x8   :  { %v47_v23 = vld [vmem:[%s1774_s1 + $0xe0] sm:$0xff]  ;;  %v48_v25 = vld [vmem:[%s1774_s1 + $0xe8] sm:$0xff]  ;;  %v1147_v27 = vcombine.low %v36_v16, %v40_v17 }
   0x9   :  { %v1154_v28 = vcombine.high %v43_v22, %v47_v23  ;;  %v1156_v29 = vcombine.high %v44_v24, %v48_v25  ;;  %v51_v30 = vld [vmem:[%s1774_s1 + $0x100] sm:$0xff]  ;;  %v52_v32 = vld [vmem:[%s1774_s1 + $0x108] sm:$0xff]  ;;  %v1153_v34 = vcombine.low %v43_v22, %v47_v23  ;;  %v1155_v35 = vcombine.low %v44_v24, %v48_v25 }
   0xa   :  { %842 = vmatpush1.bf16.msra.mxu0 %v1137_v18  ;;  %885 = vmatpush1.bf16.msra.mxu1 %v1139_v19  ;;  %v55_v31 = vld [vmem:[%s1774_s1 + $0x120] sm:$0xff]  ;;  %v56_v33 = vld [vmem:[%s1774_s1 + $0x128] sm:$0xff] }
   0xb   :  { %843 = vmatprep.subr.bf16.mxu0 %v1146_v20  ;;  %886 = vmatprep.subr.bf16.mxu1 %v1148_v21  ;;  %v1162_v36 = vcombine.high %v51_v30, %v55_v31  ;;  %v1164_v37 = vcombine.high %v52_v32, %v56_v33  ;;  %v59_v38 = vld [vmem:[%s1774_s1 + $0x140] sm:$0xff]  ;;  %v60_v40 = vld [vmem:[%s1774_s1 + $0x148] sm:$0xff]  ;;  %v1161_v42 = vcombine.low %v51_v30, %v55_v31 }
   0xc   :  { %v63_v39 = vld [vmem:[%s1774_s1 + $0x160] sm:$0xff]  ;;  %v64_v41 = vld [vmem:[%s1774_s1 + $0x168] sm:$0xff]  ;;  %v1163_v43 = vcombine.low %v52_v32, %v56_v33 }
   0xd   :  { %v1170_v44 = vcombine.high %v59_v38, %v63_v39  ;;  %v1172_v45 = vcombine.high %v60_v40, %v64_v41  ;;  %v67_v46 = vld [vmem:[%s1774_s1 + $0x180] sm:$0xff]  ;;  %v68_v48 = vld [vmem:[%s1774_s1 + $0x188] sm:$0xff]  ;;  %v1169_v50 = vcombine.low %v59_v38, %v63_v39  ;;  %v1171_v51 = vcombine.low %v60_v40, %v64_v41 }
   0xe   :  { %844 = vmatpush1.bf16.msra.mxu0 %v1145_v26  ;;  %887 = vmatpush1.bf16.msra.mxu1 %v1147_v27  ;;  %v71_v47 = vld [vmem:[%s1774_s1 + $0x1a0] sm:$0xff]  ;;  %v72_v49 = vld [vmem:[%s1774_s1 + $0x1a8] sm:$0xff] }
   0xf   :  { %845 = vmatprep.subr.bf16.mxu0 %v1154_v28  ;;  %888 = vmatprep.subr.bf16.mxu1 %v1156_v29  ;;  %v1178_v52 = vcombine.high %v67_v46, %v71_v47  ;;  %v1180_v53 = vcombine.high %v68_v48, %v72_v49  ;;  %v75_v54 = vld [vmem:[%s1774_s1 + $0x1c0] sm:$0xff]  ;;  %v76_v57 = vld [vmem:[%s1774_s1 + $0x1c8] sm:$0xff]  ;;  %v1177_v59 = vcombine.low %v67_v46, %v71_v47 }
  0x10   :  { %v79_v55 = vld [vmem:[%s1774_s1 + $0x1e0] sm:$0xff]  ;;  %v80_v58 = vld [vmem:[%s1774_s1 + $0x1e8] sm:$0xff]  ;;  %v1179_v60 = vcombine.low %v68_v48, %v72_v49 }
  0x11   :  { %v1394_v56 = vld [vmem:[%s1775_s0 + $0x4] ss:$8 sps:$4 sm:$0xff]   ;;  %v1186_v61 = vcombine.high %v75_v54, %v79_v55  ;;  %v1188_v62 = vcombine.high %v76_v57, %v80_v58  ;;  %v1185_v3 = vcombine.low %v75_v54, %v79_v55  ;;  %v1187_v4 = vcombine.low %v76_v57, %v80_v58 }
  0x12   :  { %846 = vmatpush1.bf16.msra.mxu0 %v1153_v34  ;;  %889 = vmatpush1.bf16.msra.mxu1 %v1155_v35  ;;  %v83_v63 = vld [vmem:[%s1774_s1 + $0x200] sm:$0xff]  ;;  %v84_v1 = vld [vmem:[%s1774_s1 + $0x208] sm:$0xff] }
  0x13   :  { %847 = vmatprep.subr.bf16.mxu0 %v1162_v36  ;;  %890 = vmatprep.subr.bf16.mxu1 %v1164_v37  ;;  %v87_v0 = vld [vmem:[%s1774_s1 + $0x220] sm:$0xff]  ;;  %v88_v2 = vld [vmem:[%s1774_s1 + $0x228] sm:$0xff] }
  0x14   :  { %871 = vmatprep.mubr.bf16.mxu0 %v1394_v56  ;;  %914 = vmatprep.mubr.bf16.mxu1 %v1394_v56  ;;  %v1194_v5 = vcombine.high %v83_v63, %v87_v0  ;;  %v1196_v6 = vcombine.high %v84_v1, %v88_v2  ;;  %v91_v7 = vld [vmem:[%s1774_s1 + $0x240] sm:$0xff]  ;;  %v92_v9 = vld [vmem:[%s1774_s1 + $0x248] sm:$0xff]  ;;  %v1193_v11 = vcombine.low %v83_v63, %v87_v0  ;;  %v21_v0 = vld [vmem:[%s1774_s1 + $0x10] sm:$0xff] }
  0x15   :  { %v95_v8 = vld [vmem:[%s1774_s1 + $0x260] sm:$0xff]  ;;  %v96_v10 = vld [vmem:[%s1774_s1 + $0x268] sm:$0xff]  ;;  %v1195_v12 = vcombine.low %v84_v1, %v88_v2  ;;  %v25_v1 = vld [vmem:[%s1774_s1 + $0x30] sm:$0xff] }
  0x16   :  { %848 = vmatpush1.bf16.msra.mxu0 %v1161_v42  ;;  %891 = vmatpush1.bf16.msra.mxu1 %v1163_v43  ;;  %v1202_v13 = vcombine.high %v91_v7, %v95_v8  ;;  %v1204_v14 = vcombine.high %v92_v9, %v96_v10  ;;  %v99_v15 = vld [vmem:[%s1774_s1 + $0x280] sm:$0xff]  ;;  %v100_v17 = vld [vmem:[%s1774_s1 + $0x288] sm:$0xff]  ;;  %v1201_v19 = vcombine.low %v91_v7, %v95_v8  ;;  %v22_v2 = vld [vmem:[%s1774_s1 + $0x18] sm:$0xff] }
  0x17   :  { %849 = vmatprep.subr.bf16.mxu0 %v1170_v44  ;;  %892 = vmatprep.subr.bf16.mxu1 %v1172_v45  ;;  %v103_v16 = vld [vmem:[%s1774_s1 + $0x2a0] sm:$0xff]  ;;  %v104_v18 = vld [vmem:[%s1774_s1 + $0x2a8] sm:$0xff]  ;;  %v1203_v20 = vcombine.low %v92_v9, %v96_v10  ;;  %v29_v8 = vld [vmem:[%s1774_s1 + $0x50] sm:$0xff] }
  0x18   :  { %v1210_v21 = vcombine.high %v99_v15, %v103_v16  ;;  %v1212_v22 = vcombine.high %v100_v17, %v104_v18  ;;  %v107_v23 = vld [vmem:[%s1774_s1 + $0x2c0] sm:$0xff]  ;;  %v108_v25 = vld [vmem:[%s1774_s1 + $0x2c8] sm:$0xff]  ;;  %v1209_v27 = vcombine.low %v99_v15, %v103_v16  ;;  %v1211_v28 = vcombine.low %v100_v17, %v104_v18  ;;  %v33_v9 = vld [vmem:[%s1774_s1 + $0x70] sm:$0xff] }
  0x19   :  { %v111_v24 = vld [vmem:[%s1774_s1 + $0x2e0] sm:$0xff]  ;;  %v112_v26 = vld [vmem:[%s1774_s1 + $0x2e8] sm:$0xff]  ;;  %v1142_v15 = vcombine.high %v29_v8, %v33_v9  ;;  %v37_v17 = vld [vmem:[%s1774_s1 + $0x90] sm:$0xff] }
  0x1a   :  { %850 = vmatpush1.bf16.msra.mxu0 %v1169_v50  ;;  %893 = vmatpush1.bf16.msra.mxu1 %v1171_v51  ;;  %v1218_v29 = vcombine.high %v107_v23, %v111_v24  ;;  %v1220_v30 = vcombine.high %v108_v25, %v112_v26  ;;  %v115_v31 = vld [vmem:[%s1774_s1 + $0x300] sm:$0xff]  ;;  %v116_v33 = vld [vmem:[%s1774_s1 + $0x308] sm:$0xff]  ;;  %v1217_v35 = vcombine.low %v107_v23, %v111_v24  ;;  %v41_v18 = vld [vmem:[%s1774_s1 + $0xb0] sm:$0xff] }
  0x1b   :  { %851 = vmatprep.subr.bf16.mxu0 %v1178_v52  ;;  %894 = vmatprep.subr.bf16.mxu1 %v1180_v53  ;;  %v119_v32 = vld [vmem:[%s1774_s1 + $0x320] sm:$0xff]  ;;  %v120_v34 = vld [vmem:[%s1774_s1 + $0x328] sm:$0xff]  ;;  %v1219_v36 = vcombine.low %v108_v25, %v112_v26  ;;  %v1150_v23 = vcombine.high %v37_v17, %v41_v18  ;;  %v45_v25 = vld [vmem:[%s1774_s1 + $0xd0] sm:$0xff] }
  0x1c   :  { %v1226_v37 = vcombine.high %v115_v31, %v119_v32  ;;  %v1228_v38 = vcombine.high %v116_v33, %v120_v34  ;;  %v123_v39 = vld [vmem:[%s1774_s1 + $0x340] sm:$0xff]  ;;  %v124_v41 = vld [vmem:[%s1774_s1 + $0x348] sm:$0xff]  ;;  %v1225_v43 = vcombine.low %v115_v31, %v119_v32  ;;  %v1227_v44 = vcombine.low %v116_v33, %v120_v34  ;;  %v49_v26 = vld [vmem:[%s1774_s1 + $0xf0] sm:$0xff] }
  0x1d   :  { %v127_v40 = vld [vmem:[%s1774_s1 + $0x360] sm:$0xff]  ;;  %v128_v42 = vld [vmem:[%s1774_s1 + $0x368] sm:$0xff]  ;;  %v1158_v31 = vcombine.high %v45_v25, %v49_v26  ;;  %v53_v33 = vld [vmem:[%s1774_s1 + $0x110] sm:$0xff] }
  0x1e   :  { %852 = vmatpush1.bf16.msra.mxu0 %v1177_v59  ;;  %895 = vmatpush1.bf16.msra.mxu1 %v1179_v60  ;;  %v1234_v45 = vcombine.high %v123_v39, %v127_v40  ;;  %v1236_v46 = vcombine.high %v124_v41, %v128_v42  ;;  %v131_v47 = vld [vmem:[%s1774_s1 + $0x380] sm:$0xff]  ;;  %v132_v49 = vld [vmem:[%s1774_s1 + $0x388] sm:$0xff]  ;;  %v1233_v51 = vcombine.low %v123_v39, %v127_v40  ;;  %v57_v34 = vld [vmem:[%s1774_s1 + $0x130] sm:$0xff] }
  0x1f   :  { %853 = vmatprep.subr.bf16.mxu0 %v1186_v61  ;;  %896 = vmatprep.subr.bf16.mxu1 %v1188_v62  ;;  %v135_v48 = vld [vmem:[%s1774_s1 + $0x3a0] sm:$0xff]  ;;  %v136_v50 = vld [vmem:[%s1774_s1 + $0x3a8] sm:$0xff]  ;;  %v1235_v52 = vcombine.low %v124_v41, %v128_v42  ;;  %v61_v40 = vld [vmem:[%s1774_s1 + $0x150] sm:$0xff] }
  0x20   :  { %v1242_v53 = vcombine.high %v131_v47, %v135_v48  ;;  %v1244_v54 = vcombine.high %v132_v49, %v136_v50  ;;  %v139_v55 = vld [vmem:[%s1774_s1 + $0x3c0] sm:$0xff]  ;;  %v140_v58 = vld [vmem:[%s1774_s1 + $0x3c8] sm:$0xff]  ;;  %v1241_v60 = vcombine.low %v131_v47, %v135_v48  ;;  %v1243_v61 = vcombine.low %v132_v49, %v136_v50  ;;  %v65_v41 = vld [vmem:[%s1774_s1 + $0x170] sm:$0xff] }
  0x21   :  { %v143_v57 = vld [vmem:[%s1774_s1 + $0x3e0] sm:$0xff]  ;;  %v144_v59 = vld [vmem:[%s1774_s1 + $0x3e8] sm:$0xff]  ;;  %v62_v42 = vld [vmem:[%s1774_s1 + $0x158] sm:$0xff] }
  0x22   :  { %854 = vmatpush1.bf16.msra.mxu0 %v1185_v3  ;;  %897 = vmatpush1.bf16.msra.mxu1 %v1187_v4  ;;  %v1250_v62 = vcombine.high %v139_v55, %v143_v57  ;;  %v1252_v63 = vcombine.high %v140_v58, %v144_v59  ;;  %v26_v3 = vld [vmem:[%s1774_s1 + $0x38] sm:$0xff]  ;;  %v1249_v4 = vcombine.low %v139_v55, %v143_v57  ;;  %v1521_v10 = vld [vmem:[%s1775_s0] ss:$8 sps:$4 sm:$0xff]   ;;  %v69_v48 = vld [vmem:[%s1774_s1 + $0x190] sm:$0xff] }
  0x23   :  { %855 = vmatprep.subr.bf16.mxu0 %v1194_v5  ;;  %898 = vmatprep.subr.bf16.mxu1 %v1196_v6  ;;  %v1251_v5 = vcombine.low %v140_v58, %v144_v59  ;;  %v1134_v6 = vcombine.high %v21_v0, %v25_v1  ;;  %v1136_v7 = vcombine.high %v22_v2, %v26_v3  ;;  %v73_v49 = vld [vmem:[%s1774_s1 + $0x1b0] sm:$0xff]  ;;  %v70_v50 = vld [vmem:[%s1774_s1 + $0x198] sm:$0xff] }
  0x24   :  { %v77_v57 = vld [vmem:[%s1774_s1 + $0x1d0] sm:$0xff]  ;;  %v78_v59 = vld [vmem:[%s1774_s1 + $0x1d8] sm:$0xff] }
  0x25   :  { %v81_v58 = vld [vmem:[%s1774_s1 + $0x1f0] sm:$0xff] }
  0x26   :  { %856 = vmatpush1.bf16.msra.mxu0 %v1193_v11  ;;  %899 = vmatpush1.bf16.msra.mxu1 %v1195_v12  ;;  %v30_v11 = vld [vmem:[%s1774_s1 + $0x58] sm:$0xff] }
  0x27   :  { %857 = vmatprep.subr.bf16.mxu0 %v1202_v13  ;;  %900 = vmatprep.subr.bf16.mxu1 %v1204_v14  ;;  %v34_v12 = vld [vmem:[%s1774_s1 + $0x78] sm:$0xff]  ;;  %v1133_v13 = vcombine.low %v21_v0, %v25_v1  ;;  %v1135_v14 = vcombine.low %v22_v2, %v26_v3  ;;  %v85_v1 = vld [vmem:[%s1774_s1 + $0x210] sm:$0xff] }
  0x28   :  { %v1144_v16 = vcombine.high %v30_v11, %v34_v12  ;;  %v89_v2 = vld [vmem:[%s1774_s1 + $0x230] sm:$0xff]  ;;  %v86_v3 = vld [vmem:[%s1774_s1 + $0x218] sm:$0xff] }
  0x2a   :  { %858 = vmatpush1.bf16.msra.mxu0 %v1201_v19  ;;  %901 = vmatpush1.bf16.msra.mxu1 %v1203_v20  ;;  %v38_v19 = vld [vmem:[%s1774_s1 + $0x98] sm:$0xff] }
  0x2b   :  { %859 = vmatprep.subr.bf16.mxu0 %v1210_v21  ;;  %902 = vmatprep.subr.bf16.mxu1 %v1212_v22  ;;  %v42_v20 = vld [vmem:[%s1774_s1 + $0xb8] sm:$0xff]  ;;  %v1141_v21 = vcombine.low %v29_v8, %v33_v9  ;;  %v1143_v22 = vcombine.low %v30_v11, %v34_v12  ;;  %v93_v9 = vld [vmem:[%s1774_s1 + $0x250] sm:$0xff] }
  0x2c   :  { %v1152_v24 = vcombine.high %v38_v19, %v42_v20  ;;  %v97_v11 = vld [vmem:[%s1774_s1 + $0x270] sm:$0xff]  ;;  %v94_v12 = vld [vmem:[%s1774_s1 + $0x258] sm:$0xff] }
  0x2e   :  { %860 = vmatpush1.bf16.msra.mxu0 %v1209_v27  ;;  %903 = vmatpush1.bf16.msra.mxu1 %v1211_v28  ;;  %v46_v27 = vld [vmem:[%s1774_s1 + $0xd8] sm:$0xff] }
  0x2f   :  { %861 = vmatprep.subr.bf16.mxu0 %v1218_v29  ;;  %904 = vmatprep.subr.bf16.mxu1 %v1220_v30  ;;  %v50_v28 = vld [vmem:[%s1774_s1 + $0xf8] sm:$0xff]  ;;  %v1149_v29 = vcombine.low %v37_v17, %v41_v18  ;;  %v1151_v30 = vcombine.low %v38_v19, %v42_v20  ;;  %v101_v18 = vld [vmem:[%s1774_s1 + $0x290] sm:$0xff] }
  0x30   :  { %v1160_v32 = vcombine.high %v46_v27, %v50_v28  ;;  %v105_v19 = vld [vmem:[%s1774_s1 + $0x2b0] sm:$0xff]  ;;  %v102_v20 = vld [vmem:[%s1774_s1 + $0x298] sm:$0xff] }
  0x32   :  { %862 = vmatpush1.bf16.msra.mxu0 %v1217_v35  ;;  %905 = vmatpush1.bf16.msra.mxu1 %v1219_v36  ;;  %v58_v35 = vld [vmem:[%s1774_s1 + $0x138] sm:$0xff]  ;;  %v1157_v36 = vcombine.low %v45_v25, %v49_v26  ;;  %v109_v26 = vld [vmem:[%s1774_s1 + $0x2d0] sm:$0xff] }
  0x33   :  { %863 = vmatprep.subr.bf16.mxu0 %v1226_v37  ;;  %906 = vmatprep.subr.bf16.mxu1 %v1228_v38  ;;  %v1159_v37 = vcombine.low %v46_v27, %v50_v28  ;;  %v1166_v38 = vcombine.high %v53_v33, %v57_v34  ;;  %v113_v27 = vld [vmem:[%s1774_s1 + $0x2f0] sm:$0xff]  ;;  %v110_v28 = vld [vmem:[%s1774_s1 + $0x2d8] sm:$0xff] }
  0x36   :  { %864 = vmatpush1.bf16.msra.mxu0 %v1225_v43  ;;  %907 = vmatpush1.bf16.msra.mxu1 %v1227_v44  ;;  %v66_v43 = vld [vmem:[%s1774_s1 + $0x178] sm:$0xff]  ;;  %v1165_v44 = vcombine.low %v53_v33, %v57_v34  ;;  %v117_v34 = vld [vmem:[%s1774_s1 + $0x310] sm:$0xff] }
  0x37   :  { %865 = vmatprep.subr.bf16.mxu0 %v1234_v45  ;;  %908 = vmatprep.subr.bf16.mxu1 %v1236_v46  ;;  %v1174_v46 = vcombine.high %v61_v40, %v65_v41  ;;  %v1176_v47 = vcombine.high %v62_v42, %v66_v43 }
  0x3a   :  { %866 = vmatpush1.bf16.msra.mxu0 %v1233_v51  ;;  %909 = vmatpush1.bf16.msra.mxu1 %v1235_v52  ;;  %v74_v51 = vld [vmem:[%s1774_s1 + $0x1b8] sm:$0xff]  ;;  %v1173_v52 = vcombine.low %v61_v40, %v65_v41  ;;  %v125_v41 = vld [vmem:[%s1774_s1 + $0x350] sm:$0xff] }
  0x3b   :  { %867 = vmatprep.subr.bf16.mxu0 %v1242_v53  ;;  %910 = vmatprep.subr.bf16.mxu1 %v1244_v54  ;;  %v1175_v53 = vcombine.low %v62_v42, %v66_v43  ;;  %v1182_v54 = vcombine.high %v69_v48, %v73_v49  ;;  %v1184_v55 = vcombine.high %v70_v50, %v74_v51  ;;  %v129_v42 = vld [vmem:[%s1774_s1 + $0x370] sm:$0xff]  ;;  %v126_v43 = vld [vmem:[%s1774_s1 + $0x358] sm:$0xff] }
  0x3e   :  { %868 = vmatpush1.bf16.msra.mxu0 %v1241_v60  ;;  %911 = vmatpush1.bf16.msra.mxu1 %v1243_v61  ;;  %v82_v60 = vld [vmem:[%s1774_s1 + $0x1f8] sm:$0xff]  ;;  %v1181_v61 = vcombine.low %v69_v48, %v73_v49  ;;  %v133_v49 = vld [vmem:[%s1774_s1 + $0x390] sm:$0xff] }
  0x3f   :  { %869 = vmatprep.subr.bf16.mxu0 %v1250_v62  ;;  %912 = vmatprep.subr.bf16.mxu1 %v1252_v63  ;;  %v1183_v62 = vcombine.low %v70_v50, %v74_v51  ;;  %v1190_v63 = vcombine.high %v77_v57, %v81_v58  ;;  %v1192_v0 = vcombine.high %v78_v59, %v82_v60  ;;  %v137_v50 = vld [vmem:[%s1774_s1 + $0x3b0] sm:$0xff]  ;;  %v134_v51 = vld [vmem:[%s1774_s1 + $0x398] sm:$0xff] }
  0x42   :  { %870 = vmatpush1.bf16.msra.mxu0 %v1249_v4  ;;  %913 = vmatpush1.bf16.msra.mxu1 %v1251_v5  ;;  %v90_v4 = vld [vmem:[%s1774_s1 + $0x238] sm:$0xff]  ;;  %v1189_v5 = vcombine.low %v77_v57, %v81_v58  ;;  %v141_v58 = vld [vmem:[%s1774_s1 + $0x3d0] sm:$0xff] }
  0x43   :  { %925 = vmatprep.subr.bf16.mxu0 %v1134_v6  ;;  %968 = vmatprep.subr.bf16.mxu1 %v1136_v7  ;;  %v1191_v6 = vcombine.low %v78_v59, %v82_v60  ;;  %v1198_v7 = vcombine.high %v85_v1, %v89_v2  ;;  %v1200_v8 = vcombine.high %v86_v3, %v90_v4  ;;  %v145_v59 = vld [vmem:[%s1774_s1 + $0x3f0] sm:$0xff]  ;;  %v142_v60 = vld [vmem:[%s1774_s1 + $0x3d8] sm:$0xff] }
  0x45   :  { %872 = vmatmul.mubr.bf16.vlgmr.msra.gmra.mrb[0].mxu0 %v1521_v10  ;;  %915 = vmatmul.mubr.bf16.vlgmr.msra.gmra.mrb[0].mxu1 %v1521_v10 }
  0x46   :  { %926 = vmatpush1.bf16.msra.mxu0 %v1133_v13  ;;  %969 = vmatpush1.bf16.msra.mxu1 %v1135_v14  ;;  %v98_v13 = vld [vmem:[%s1774_s1 + $0x278] sm:$0xff]  ;;  %v1197_v14 = vcombine.low %v85_v1, %v89_v2  ;;  %v1253_v2 = vcombine.low %v141_v58, %v145_v59 }
  0x47   :  { %927 = vmatprep.subr.bf16.mxu0 %v1142_v15  ;;  %970 = vmatprep.subr.bf16.mxu1 %v1144_v16  ;;  %v1199_v15 = vcombine.low %v86_v3, %v90_v4  ;;  %v1206_v16 = vcombine.high %v93_v9, %v97_v11  ;;  %v1208_v17 = vcombine.high %v94_v12, %v98_v13  ;;  %v149_v4 = vlaneseq }
  0x48   :  { %957 = vmatprep.mubr.bf16.mxu0 %v1394_v56  ;;  %1000 = vmatprep.mubr.bf16.mxu1 %v1394_v56  ;;  %v54_v56 = vld [vmem:[%s1774_s1 + $0x118] sm:$0xff] }
  0x49   :  { %v1168_v39 = vcombine.high %v54_v56, %v58_v35  ;;  %v1167_v45 = vcombine.low %v54_v56, %v58_v35  ;;  %v121_v56 = vld [vmem:[%s1774_s1 + $0x330] sm:$0xff]  ;;  %v118_v35 = vld [vmem:[%s1774_s1 + $0x318] sm:$0xff] }
  0x4a   :  { %928 = vmatpush1.bf16.msra.mxu0 %v1141_v21  ;;  %971 = vmatpush1.bf16.msra.mxu1 %v1143_v22  ;;  %v106_v21 = vld [vmem:[%s1774_s1 + $0x2b8] sm:$0xff]  ;;  %v1205_v22 = vcombine.low %v93_v9, %v97_v11 }
  0x4b   :  { %929 = vmatprep.subr.bf16.mxu0 %v1150_v23  ;;  %972 = vmatprep.subr.bf16.mxu1 %v1152_v24  ;;  %v1207_v23 = vcombine.low %v94_v12, %v98_v13  ;;  %v1214_v24 = vcombine.high %v101_v18, %v105_v19  ;;  %v1216_v25 = vcombine.high %v102_v20, %v106_v21  ;;  %v1012_v13 = vld [vmem:[%s1777_s3 + $0x8] sm:$0xff] }
  0x4e   :  { %930 = vmatpush1.bf16.msra.mxu0 %v1149_v29  ;;  %973 = vmatpush1.bf16.msra.mxu1 %v1151_v30  ;;  %v114_v29 = vld [vmem:[%s1774_s1 + $0x2f8] sm:$0xff]  ;;  %v1213_v30 = vcombine.low %v101_v18, %v105_v19  ;;  %v1016_v19 = vld [vmem:[%s1777_s3 + $0x28] sm:$0xff] }
  0x4f   :  { %931 = vmatprep.subr.bf16.mxu0 %v1158_v31  ;;  %974 = vmatprep.subr.bf16.mxu1 %v1160_v32  ;;  %v1215_v31 = vcombine.low %v102_v20, %v106_v21  ;;  %v1222_v32 = vcombine.high %v109_v26, %v113_v27  ;;  %v1224_v33 = vcombine.high %v110_v28, %v114_v29  ;;  %v1021_v21 = vunpack.c.l.bf16 %v1012_v13 }
  0x52   :  { %932 = vmatpush1.bf16.msra.mxu0 %v1157_v36  ;;  %975 = vmatpush1.bf16.msra.mxu1 %v1159_v37  ;;  %v122_v36 = vld [vmem:[%s1774_s1 + $0x338] sm:$0xff]  ;;  %v1221_v37 = vcombine.low %v109_v26, %v113_v27  ;;  %v1022_v26 = vunpack.c.h.bf16 %v1012_v13 }
  0x53   :  { %933 = vmatprep.subr.bf16.mxu0 %v1166_v38  ;;  %976 = vmatprep.subr.bf16.mxu1 %v1168_v39  ;;  %v1223_v38 = vcombine.low %v110_v28, %v114_v29  ;;  %v1230_v39 = vcombine.high %v117_v34, %v121_v56  ;;  %v1232_v40 = vcombine.high %v118_v35, %v122_v36 }
  0x56   :  { %934 = vmatpush1.bf16.msra.mxu0 %v1165_v44  ;;  %977 = vmatpush1.bf16.msra.mxu1 %v1167_v45  ;;  %v130_v44 = vld [vmem:[%s1774_s1 + $0x378] sm:$0xff]  ;;  %v1229_v45 = vcombine.low %v117_v34, %v121_v56 }
  0x57   :  { %935 = vmatprep.subr.bf16.mxu0 %v1174_v46  ;;  %978 = vmatprep.subr.bf16.mxu1 %v1176_v47  ;;  %v1231_v46 = vcombine.low %v118_v35, %v122_v36  ;;  %v1238_v47 = vcombine.high %v125_v41, %v129_v42  ;;  %v1240_v48 = vcombine.high %v126_v43, %v130_v44 }
  0x5a   :  { %936 = vmatpush1.bf16.msra.mxu0 %v1173_v52  ;;  %979 = vmatpush1.bf16.msra.mxu1 %v1175_v53  ;;  %v138_v52 = vld [vmem:[%s1774_s1 + $0x3b8] sm:$0xff]  ;;  %v1237_v53 = vcombine.low %v125_v41, %v129_v42 }
  0x5b   :  { %937 = vmatprep.subr.bf16.mxu0 %v1182_v54  ;;  %980 = vmatprep.subr.bf16.mxu1 %v1184_v55  ;;  %v1239_v54 = vcombine.low %v126_v43, %v130_v44  ;;  %v1246_v55 = vcombine.high %v133_v49, %v137_v50  ;;  %v1248_v57 = vcombine.high %v134_v51, %v138_v52 }
  0x5e   :  { %938 = vmatpush1.bf16.msra.mxu0 %v1181_v61  ;;  %981 = vmatpush1.bf16.msra.mxu1 %v1183_v62  ;;  %v146_v61 = vld [vmem:[%s1774_s1 + $0x3f8] sm:$0xff]  ;;  %v1245_v62 = vcombine.low %v133_v49, %v137_v50 }
  0x5f   :  { %939 = vmatprep.subr.bf16.mxu0 %v1190_v63  ;;  %982 = vmatprep.subr.bf16.mxu1 %v1192_v0  ;;  %v1247_v63 = vcombine.low %v134_v51, %v138_v52  ;;  %v1254_v0 = vcombine.high %v141_v58, %v145_v59  ;;  %v1256_v1 = vcombine.high %v142_v60, %v146_v61 }
  0x60   :  { %v1255_v3 = vcombine.low %v142_v60, %v146_v61 }
  0x62   :  { %940 = vmatpush1.bf16.msra.mxu0 %v1189_v5  ;;  %983 = vmatpush1.bf16.msra.mxu1 %v1191_v6  ;;  %v1703_v5 = vshrl.u32 %v149_v4, 7 }
  0x63   :  { %941 = vmatprep.subr.bf16.mxu0 %v1198_v7  ;;  %984 = vmatprep.subr.bf16.mxu1 %v1200_v8  ;;  %v1709_v7 = vld [vmem:[%s1776_s2] sm:$0xff] }
  0x64   :  { %v151_v6 = vsub.s32 0, %v1703_v5  ;;  %v159_v8 = vsub.s32 2, %v1703_v5  ;;  %v155_v9 = vsub.s32 1, %v1703_v5  ;;  %v163_v11 = vsub.s32 3, %v1703_v5 }
  0x66   :  { %942 = vmatpush1.bf16.msra.mxu0 %v1197_v14  ;;  %985 = vmatpush1.bf16.msra.mxu1 %v1199_v15  ;;  %v152_v12 = vrot.slane %v1709_v7, %v151_v6  ;;  %v160_v14 = vrot.slane %v1709_v7, %v159_v8  ;;  %v156_v15 = vrot.slane %v1709_v7, %v155_v9  ;;  %v1014_v6 = vld [vmem:[%s1777_s3 + $0x18] sm:$0xff] }
  0x67   :  { %943 = vmatprep.subr.bf16.mxu0 %v1206_v16  ;;  %986 = vmatprep.subr.bf16.mxu1 %v1208_v17  ;;  %v1015_v16 = vld [vmem:[%s1777_s3 + $0x20] sm:$0xff]  ;;  %v164_v18 = vrot.slane %v1709_v7, %v163_v11  ;;  %v1017_v11 = vld [vmem:[%s1777_s3 + $0x30] sm:$0xff] }
  0x68   :  { %v1027_v27 = vunpack.c.l.bf16 %v1015_v16 }
  0x6a   :  { %944 = vmatpush1.bf16.msra.mxu0 %v1205_v22  ;;  %987 = vmatpush1.bf16.msra.mxu1 %v1207_v23 }
  0x6b   :  { %945 = vmatprep.subr.bf16.mxu0 %v1214_v24  ;;  %988 = vmatprep.subr.bf16.mxu1 %v1216_v25 }
  0x6e   :  { %946 = vmatpush1.bf16.msra.mxu0 %v1213_v30  ;;  %989 = vmatpush1.bf16.msra.mxu1 %v1215_v31 }
  0x6f   :  { %947 = vmatprep.subr.bf16.mxu0 %v1222_v32  ;;  %990 = vmatprep.subr.bf16.mxu1 %v1224_v33  ;;  %v1029_v32 = vunpack.c.l.bf16 %v1016_v19  ;;  %v1028_v33 = vunpack.c.h.bf16 %v1015_v16 }
  0x72   :  { %948 = vmatpush1.bf16.msra.mxu0 %v1221_v37  ;;  %991 = vmatpush1.bf16.msra.mxu1 %v1223_v38  ;;  %v1030_v38 = vunpack.c.h.bf16 %v1016_v19  ;;  %v1026_v19 = vunpack.c.h.bf16 %v1014_v6 }
  0x73   :  { %949 = vmatprep.subr.bf16.mxu0 %v1230_v39  ;;  %992 = vmatprep.subr.bf16.mxu1 %v1232_v40 }
  0x76   :  { %950 = vmatpush1.bf16.msra.mxu0 %v1229_v45  ;;  %993 = vmatpush1.bf16.msra.mxu1 %v1231_v46 }
  0x77   :  { %951 = vmatprep.subr.bf16.mxu0 %v1238_v47  ;;  %994 = vmatprep.subr.bf16.mxu1 %v1240_v48 }
  0x7a   :  { %952 = vmatpush1.bf16.msra.mxu0 %v1237_v53  ;;  %995 = vmatpush1.bf16.msra.mxu1 %v1239_v54 }
  0x7b   :  { %953 = vmatprep.subr.bf16.mxu0 %v1246_v55  ;;  %996 = vmatprep.subr.bf16.mxu1 %v1248_v57 }
  0x7e   :  { %954 = vmatpush1.bf16.msra.mxu0 %v1245_v62  ;;  %997 = vmatpush1.bf16.msra.mxu1 %v1247_v63  ;;  %v167_v63 = vsub.s32 4, %v1703_v5 }
  0x7f   :  { %955 = vmatprep.subr.bf16.mxu0 %v1254_v0  ;;  %998 = vmatprep.subr.bf16.mxu1 %v1256_v1  ;;  %v175_v0 = vsub.s32 6, %v1703_v5  ;;  %v171_v1 = vsub.s32 5, %v1703_v5 }
  0x80   :  { %v168_v4 = vrot.slane %v1709_v7, %v167_v63 }
  0x81   :  { %v176_v8 = vrot.slane %v1709_v7, %v175_v0  ;;  %v172_v9 = vrot.slane %v1709_v7, %v171_v1 }
  0x82   :  { %956 = vmatpush1.bf16.msra.mxu0 %v1253_v2  ;;  %999 = vmatpush1.bf16.msra.mxu1 %v1255_v3  ;;  %v179_v2 = vsub.s32 7, %v1703_v5  ;;  %v1013_v3 = vld [vmem:[%s1777_s3 + $0x10] sm:$0xff] }
  0x84   :  { %v180_v5 = vrot.slane %v1709_v7, %v179_v2 }
  0x85   :  { %958 = vmatmul.mubr.bf16.vlgmr.msra.gmra.mrb[4].mxu0 %v1521_v10  ;;  %1001 = vmatmul.mubr.bf16.vlgmr.msra.gmra.mrb[4].mxu1 %v1521_v10  ;;  %v1011_v10 = vld [vmem:[%s1777_s3] sm:$0xff] }
  0x86   :  { %v1019_v17 = vunpack.c.l.bf16 %v1011_v10  ;;  %v1020_v22 = vunpack.c.h.bf16 %v1011_v10  ;;  %v1023_v10 = vunpack.c.l.bf16 %v1013_v3 }
 0x118   :  { %v873_v20 = vpop.f32.mrb[0].mxu0  ;;  %v916_v24 = vpop.f32.mrb[0].mxu1 }
 0x119   :  { %v874_v23 = vadd.f32 %v873_v20, %v152_v12  ;;  %v875_v25 = vpop.f32.mrb[1].mxu0  ;;  %v917_v28 = vadd.f32 %v916_v24, %v160_v14  ;;  %v918_v30 = vpop.f32.mrb[1].mxu1  ;;  %v1031_v20 = vunpack.c.l.bf16 %v1017_v11 }
 0x11a   :  { %v876_v29 = vadd.f32 %v875_v25, %v156_v15  ;;  %v877_v31 = vpop.f32.mrb[2].mxu0  ;;  %v919_v56 = vadd.f32 %v918_v30, %v164_v18  ;;  %v920_v36 = vpop.f32.mrb[2].mxu1 }
 0x11b   :  { %v1035_v34 = vadd.f32 %v1019_v17, %v874_v23  ;;  %v878_v35 = vadd.f32 %v877_v31, %v152_v12  ;;  %v879_v37 = vpop.f32.mrb[3].mxu0  ;;  %v1037_v39 = vadd.f32 %v1021_v21, %v917_v28  ;;  %v921_v41 = vadd.f32 %v920_v36, %v160_v14  ;;  %v922_v43 = vpop.f32.mrb[3].mxu1  ;;  %v1018_v12 = vld [vmem:[%s1777_s3 + $0x38] sm:$0xff] }
 0x11c   :  { %v1036_v40 = vadd.f32 %v1020_v22, %v876_v29  ;;  %v880_v42 = vadd.f32 %v879_v37, %v156_v15  ;;  %v1038_v45 = vadd.f32 %v1022_v26, %v919_v56  ;;  %v923_v47 = vadd.f32 %v922_v43, %v164_v18 }
 0x11d   :  { %v1051_v44 = vmax.f32 %v1035_v34, 0.0  ;;  %v1043_v46 = vadd.f32 %v1027_v27, %v878_v35  ;;  %v1053_v48 = vmax.f32 %v1037_v39, 0.0  ;;  %v1045_v50 = vadd.f32 %v1029_v32, %v921_v41 }
 0x11e   :  { %v1052_v49 = vmax.f32 %v1036_v40, 0.0  ;;  %v1044_v51 = vadd.f32 %v1028_v33, %v880_v42  ;;  %v1054_v52 = vmax.f32 %v1038_v45, 0.0  ;;  %v1046_v54 = vadd.f32 %v1030_v38, %v923_v47 }
 0x11f   :  { %v1059_v53 = vmax.f32 %v1043_v46, 0.0  ;;  %v1061_v57 = vmax.f32 %v1045_v50, 0.0  ;;  %v1025_v14 = vunpack.c.l.bf16 %v1014_v6  ;;  %v1024_v15 = vunpack.c.h.bf16 %v1013_v3 }
 0x120   :  { %v1265_v55 = vpack.c.bf16 %v1052_v49, %v1051_v44  ;;  %v1060_v58 = vmax.f32 %v1044_v51, 0.0  ;;  %v1266_v59 = vpack.c.bf16 %v1054_v52, %v1053_v48  ;;  %v1062_v60 = vmax.f32 %v1046_v54, 0.0 }
 0x121   :  { %v1033_v25 = vunpack.c.l.bf16 %v1018_v12  ;;  %v1032_v26 = vunpack.c.h.bf16 %v1017_v11  ;;  %v1034_v31 = vunpack.c.h.bf16 %v1018_v12 }
 0x122   :  { %1115 = vst [vmem:[%s1778_s4] sm:$0xff] %v1265_v55  ;;  %v1269_v61 = vpack.c.bf16 %v1060_v58, %v1059_v53  ;;  %1116 = vst [vmem:[%s1778_s4 + $0x8] sm:$0xff] %v1266_v59  ;;  %v1270_v62 = vpack.c.bf16 %v1062_v60, %v1061_v57 }
 0x124   :  { %1119 = vst [vmem:[%s1778_s4 + $0x20] sm:$0xff] %v1269_v61  ;;  %1120 = vst [vmem:[%s1778_s4 + $0x28] sm:$0xff] %v1270_v62 }
 0x158   :  { %v959_v13 = vpop.f32.mrb[4].mxu0  ;;  %v1002_v17 = vpop.f32.mrb[4].mxu1 }
 0x159   :  { %v960_v16 = vadd.f32 %v959_v13, %v168_v4  ;;  %v961_v18 = vpop.f32.mrb[5].mxu0  ;;  %v1003_v21 = vadd.f32 %v1002_v17, %v176_v8  ;;  %v1004_v23 = vpop.f32.mrb[5].mxu1 }
 0x15a   :  { %v962_v22 = vadd.f32 %v961_v18, %v172_v9  ;;  %v963_v24 = vpop.f32.mrb[6].mxu0  ;;  %v1005_v7 = vadd.f32 %v1004_v23, %v180_v5  ;;  %v1006_v29 = vpop.f32.mrb[6].mxu1 }
 0x15b   :  { %v1039_v27 = vadd.f32 %v1023_v10, %v960_v16  ;;  %v964_v28 = vadd.f32 %v963_v24, %v168_v4  ;;  %v965_v30 = vpop.f32.mrb[7].mxu0  ;;  %v1041_v32 = vadd.f32 %v1025_v14, %v1003_v21  ;;  %v1007_v34 = vadd.f32 %v1006_v29, %v176_v8  ;;  %v1008_v35 = vpop.f32.mrb[7].mxu1 }
 0x15c   :  { %v1040_v33 = vadd.f32 %v1024_v15, %v962_v22  ;;  %v966_v56 = vadd.f32 %v965_v30, %v172_v9  ;;  %v1042_v37 = vadd.f32 %v1026_v19, %v1005_v7  ;;  %v1009_v39 = vadd.f32 %v1008_v35, %v180_v5 }
 0x15d   :  { %v1055_v36 = vmax.f32 %v1039_v27, 0.0  ;;  %v1047_v38 = vadd.f32 %v1031_v20, %v964_v28  ;;  %v1057_v40 = vmax.f32 %v1041_v32, 0.0  ;;  %v1049_v42 = vadd.f32 %v1033_v25, %v1007_v34 }
 0x15e   :  { %v1056_v41 = vmax.f32 %v1040_v33, 0.0  ;;  %v1048_v43 = vadd.f32 %v1032_v26, %v966_v56  ;;  %v1058_v44 = vmax.f32 %v1042_v37, 0.0  ;;  %v1050_v46 = vadd.f32 %v1034_v31, %v1009_v39 }
 0x15f   :  { %v1063_v45 = vmax.f32 %v1047_v38, 0.0  ;;  %v1065_v48 = vmax.f32 %v1049_v42, 0.0 }
 0x160   :  { %v1267_v47 = vpack.c.bf16 %v1056_v41, %v1055_v36  ;;  %v1064_v49 = vmax.f32 %v1048_v43, 0.0  ;;  %v1268_v50 = vpack.c.bf16 %v1058_v44, %v1057_v40  ;;  %v1066_v51 = vmax.f32 %v1050_v46, 0.0 }
 0x162   :  { %1117 = vst [vmem:[%s1778_s4 + $0x10] sm:$0xff] %v1267_v47  ;;  %v1271_v52 = vpack.c.bf16 %v1064_v49, %v1063_v45  ;;  %1118 = vst [vmem:[%s1778_s4 + $0x18] sm:$0xff] %v1268_v50  ;;  %v1272_v53 = vpack.c.bf16 %v1066_v51, %v1065_v48 }
 0x164   :  { %1121 = vst [vmem:[%s1778_s4 + $0x30] sm:$0xff] %v1271_v52  ;;  %1122 = vst [vmem:[%s1778_s4 + $0x38] sm:$0xff] %v1272_v53 }

// kernel: resnet_baseline_forward.26
= control target key start
LH: loop header
LB: loop body
LE: loop exit
PB: predicated region body
PF: predicated region fallthrough
CT: control target
= control target key end

     0   :  { %s6042_s12 = smov 0   ;;  %s7744_s0 = inlined_call_operand.vmem [shape: bf16[2,24,1024], index: 0, kind: input, shape index: {}]   ;;  %s7745_s1 = inlined_call_operand.vmem [shape: bf16[4,1024,256], index: 1, kind: input, shape index: {}]   ;;  %s7746_s2 = inlined_call_operand.vmem [shape: f32[1,256], index: 2, kind: input, shape index: {}]   ;;  %s7747_s3 = inlined_call_operand.vmem [shape: bf16[2,1,1,256], index: 3, kind: output, shape index: {}]  }
   0x1 LB: > { %s4277_s13 = sadd.s32 4294967295, %s6019_s12   ;;  %p4281_p0 = scmp.ge.s32.totalorder %s6019_s12, 1  ;;  %s6019_s12 = sphi %s6042_s12, %s13_s12  }
   0x2   : > { %p137_p1 = scmp.lt.s32.totalorder %s6019_s12, 3 }
   0x4   : > { %p138_p2 = pnand %p4281_p0, %p137_p1 }
   0x5   : > { %v5225_v0 = vld [vmem:[%s7745_s1 + $0x4] ss:$8 sps:$4 sm:$0xff] (!%p138_p2)   ;;  %v5229_v2 = vld [vmem:[%s7745_s1] ss:$8 sps:$4 sm:$0xff] (!%p138_p2)   ;;  %v5231_v4 = vld [vmem:[%s7745_s1 + $0x14] ss:$8 sps:$4 sm:$0xff] (!%p138_p2)  }
   0x6   : > { %141 = sbr.rel (%p138_p2) target bundleno = 749 (0x2ed), region = 32  ;;  %v5227_v1 = vld [vmem:[%s7745_s1 + $0x104] ss:$8 sps:$4 sm:$0xff] (!%p138_p2)   ;;  %973 = vmatprep.subr.bf16.mxu0 (!%p138_p2), %v5225_v0  ;;  %v5230_v3 = vld [vmem:[%s7745_s1 + $0x100] ss:$8 sps:$4 sm:$0xff] (!%p138_p2)   ;;  %p160_p3 = scmp.lt.s32.totalorder (!%p138_p2), %s4277_s13, 1 }
   0x7   : > { %1014 = vmatprep.subr.bf16.mxu1 (!%p138_p2), %v5227_v1  ;;  %974 = vmatpush1.bf16.msra.mxu0 (!%p138_p2), %v5229_v2  ;;  %v5233_v5 = vld [vmem:[%s7745_s1 + $0x114] ss:$8 sps:$4 sm:$0xff] (!%p138_p2)   ;;  %v5235_v6 = vld [vmem:[%s7745_s1 + $0x10] ss:$8 sps:$4 sm:$0xff] (!%p138_p2)   ;;  %v5237_v8 = vld [vmem:[%s7745_s1 + $0x24] ss:$8 sps:$4 sm:$0xff] (!%p138_p2)  }
   0x8   : > { %1015 = vmatpush1.bf16.msra.mxu1 (!%p138_p2), %v5230_v3  ;;  %975 = vmatprep.subr.bf16.mxu0 (!%p138_p2), %v5231_v4  ;;  %v5236_v7 = vld [vmem:[%s7745_s1 + $0x110] ss:$8 sps:$4 sm:$0xff] (!%p138_p2)   ;;  %v5239_v9 = vld [vmem:[%s7745_s1 + $0x124] ss:$8 sps:$4 sm:$0xff] (!%p138_p2)   ;;  %v5241_v10 = vld [vmem:[%s7745_s1 + $0x20] ss:$8 sps:$4 sm:$0xff] (!%p138_p2)  }
   0x9   : > { %1016 = vmatprep.subr.bf16.mxu1 (!%p138_p2), %v5233_v5  ;;  %v5242_v11 = vld [vmem:[%s7745_s1 + $0x120] ss:$8 sps:$4 sm:$0xff] (!%p138_p2)   ;;  %v5243_v12 = vld [vmem:[%s7745_s1 + $0x34] ss:$8 sps:$4 sm:$0xff] (!%p138_p2)   ;;  %v5247_v14 = vld [vmem:[%s7745_s1 + $0x30] ss:$8 sps:$4 sm:$0xff] (!%p138_p2)  }
   0xa   : > { %v5245_v13 = vld [vmem:[%s7745_s1 + $0x134] ss:$8 sps:$4 sm:$0xff] (!%p138_p2)   ;;  %v5248_v15 = vld [vmem:[%s7745_s1 + $0x130] ss:$8 sps:$4 sm:$0xff] (!%p138_p2)   ;;  %v5249_v16 = vld [vmem:[%s7745_s1 + $0x44] ss:$8 sps:$4 sm:$0xff] (!%p138_p2)  }
   0xb   : > { %976 = vmatpush1.bf16.msra.mxu0 (!%p138_p2), %v5235_v6  ;;  %v5251_v17 = vld [vmem:[%s7745_s1 + $0x144] ss:$8 sps:$4 sm:$0xff] (!%p138_p2)   ;;  %v5253_v18 = vld [vmem:[%s7745_s1 + $0x40] ss:$8 sps:$4 sm:$0xff] (!%p138_p2)   ;;  %v5255_v20 = vld [vmem:[%s7745_s1 + $0x54] ss:$8 sps:$4 sm:$0xff] (!%p138_p2)  }
   0xc   : > { %1017 = vmatpush1.bf16.msra.mxu1 (!%p138_p2), %v5236_v7  ;;  %977 = vmatprep.subr.bf16.mxu0 (!%p138_p2), %v5237_v8  ;;  %v5254_v19 = vld [vmem:[%s7745_s1 + $0x140] ss:$8 sps:$4 sm:$0xff] (!%p138_p2)   ;;  %v5257_v21 = vld [vmem:[%s7745_s1 + $0x154] ss:$8 sps:$4 sm:$0xff] (!%p138_p2)   ;;  %v5259_v22 = vld [vmem:[%s7745_s1 + $0x50] ss:$8 sps:$4 sm:$0xff] (!%p138_p2)  }
   0xd   : > { %1018 = vmatprep.subr.bf16.mxu1 %v5239_v9  ;;  %v5260_v23 = vld [vmem:[%s7745_s1 + $0x150] ss:$8 sps:$4 sm:$0xff]   ;;  %v5261_v24 = vld [vmem:[%s7745_s1 + $0x64] ss:$8 sps:$4 sm:$0xff]   ;;  %v5265_v26 = vld [vmem:[%s7745_s1 + $0x60] ss:$8 sps:$4 sm:$0xff]  }
   0xe   : > { %v5263_v25 = vld [vmem:[%s7745_s1 + $0x164] ss:$8 sps:$4 sm:$0xff]   ;;  %v5266_v27 = vld [vmem:[%s7745_s1 + $0x160] ss:$8 sps:$4 sm:$0xff]   ;;  %v5267_v28 = vld [vmem:[%s7745_s1 + $0x74] ss:$8 sps:$4 sm:$0xff]  }
   0xf   : > { %978 = vmatpush1.bf16.msra.mxu0 %v5241_v10  ;;  %v5269_v29 = vld [vmem:[%s7745_s1 + $0x174] ss:$8 sps:$4 sm:$0xff]   ;;  %v5271_v30 = vld [vmem:[%s7745_s1 + $0x70] ss:$8 sps:$4 sm:$0xff]   ;;  %v5273_v32 = vld [vmem:[%s7745_s1 + $0x84] ss:$8 sps:$4 sm:$0xff]  }
  0x10   : > { %1019 = vmatpush1.bf16.msra.mxu1 %v5242_v11  ;;  %979 = vmatprep.subr.bf16.mxu0 %v5243_v12  ;;  %v5272_v31 = vld [vmem:[%s7745_s1 + $0x170] ss:$8 sps:$4 sm:$0xff]   ;;  %v5275_v33 = vld [vmem:[%s7745_s1 + $0x184] ss:$8 sps:$4 sm:$0xff]   ;;  %v5277_v34 = vld [vmem:[%s7745_s1 + $0x80] ss:$8 sps:$4 sm:$0xff]  }
  0x11   : > { %1020 = vmatprep.subr.bf16.mxu1 %v5245_v13  ;;  %v5278_v35 = vld [vmem:[%s7745_s1 + $0x180] ss:$8 sps:$4 sm:$0xff]   ;;  %s7749_s13 = smov (!%p160_p3, %s4277_s13), 1  ;;  %v5279_v36 = vld [vmem:[%s7745_s1 + $0x94] ss:$8 sps:$4 sm:$0xff]   ;;  %vm4214_vm0 = vcmask 1040384  }
  0x12   : > { %v5281_v37 = vld [vmem:[%s7745_s1 + $0x194] ss:$8 sps:$4 sm:$0xff]   ;;  %v5283_v38 = vld [vmem:[%s7745_s1 + $0x90] ss:$8 sps:$4 sm:$0xff]   ;;  %s5215_s17 = smul.u32 96, %s7749_s13  ;;  %s4283_s26 = sshll.u32 %s7749_s13, 1 }
  0x13   : > { %980 = vmatpush1.bf16.msra.mxu0 %v5247_v14  ;;  %v5284_v39 = vld [vmem:[%s7745_s1 + $0x190] ss:$8 sps:$4 sm:$0xff]   ;;  %v5285_v40 = vld [vmem:[%s7745_s1 + $0xa4] ss:$8 sps:$4 sm:$0xff]   ;;  %v5289_v42 = vld [vmem:[%s7745_s1 + $0xa0] ss:$8 sps:$4 sm:$0xff]   ;;  %s168_s29 = scalar_lea.vmem %s7747_s3, %s4283_s26 }
  0x14   : > { %1021 = vmatpush1.bf16.msra.mxu1 %v5248_v15  ;;  %981 = vmatprep.subr.bf16.mxu0 %v5249_v16  ;;  %v5287_v41 = vld [vmem:[%s7745_s1 + $0x1a4] ss:$8 sps:$4 sm:$0xff]   ;;  %v5290_v43 = vld [vmem:[%s7745_s1 + $0x1a0] ss:$8 sps:$4 sm:$0xff]   ;;  %s6192_s30 = scalar_lea.vmem %s7744_s0, %s5215_s17  ;;  %v5291_v44 = vld [vmem:[%s7745_s1 + $0xb4] ss:$8 sps:$4 sm:$0xff]  }
  0x15   : > { %1022 = vmatprep.subr.bf16.mxu1 %v5251_v17  ;;  %v5293_v45 = vld [vmem:[%s7745_s1 + $0x1b4] ss:$8 sps:$4 sm:$0xff]   ;;  %v169_v46 = vld [vmem:[%s6192_s30] sm:$0xff]  ;;  %v170_v48 = vld [vmem:[%s6192_s30 + $0x8] sm:$0xff]  ;;  %vm4215_vm1 = vsmask.f32 256 }
  0x16   : > { %v4285_v47 = vcombine.high %v169_v46, %v169_v46  ;;  %v5295_v49 = vld [vmem:[%s7745_s1 + $0xb0] ss:$8 sps:$4 sm:$0xff]   ;;  %v4287_v51 = vcombine.high %v170_v48, %v170_v48  ;;  %v5297_v52 = vld [vmem:[%s7745_s1 + $0xc4] ss:$8 sps:$4 sm:$0xff]   ;;  %v5301_v54 = vld [vmem:[%s7745_s1 + $0xc0] ss:$8 sps:$4 sm:$0xff]   ;;  %v4284_v6 = vcombine.low %v169_v46, %v169_v46  ;;  %v4286_v7 = vcombine.low %v170_v48, %v170_v48 }
  0x17   : > { %982 = vmatpush1.bf16.msra.mxu0 %v5253_v18  ;;  %v5296_v50 = vld [vmem:[%s7745_s1 + $0x1b0] ss:$8 sps:$4 sm:$0xff]   ;;  %v5299_v53 = vld [vmem:[%s7745_s1 + $0x1c4] ss:$8 sps:$4 sm:$0xff]   ;;  %v5302_v55 = vld [vmem:[%s7745_s1 + $0x1c0] ss:$8 sps:$4 sm:$0xff]  }
  0x18   : > { %1023 = vmatpush1.bf16.msra.mxu1 %v5254_v19  ;;  %983 = vmatprep.subr.bf16.mxu0 %v5255_v20  ;;  %v5303_v56 = vld [vmem:[%s7745_s1 + $0xd4] ss:$8 sps:$4 sm:$0xff]   ;;  %v5307_v58 = vld [vmem:[%s7745_s1 + $0xd0] ss:$8 sps:$4 sm:$0xff]   ;;  %v5309_v60 = vld [vmem:[%s7745_s1 + $0xe4] ss:$8 sps:$4 sm:$0xff]  }
  0x19   : > { %1024 = vmatprep.subr.bf16.mxu1 %v5257_v21  ;;  %1005 = vmatprep.mubr.bf16.mxu0 %v4285_v47  ;;  %v5305_v57 = vld [vmem:[%s7745_s1 + $0x1d4] ss:$8 sps:$4 sm:$0xff]   ;;  %v5308_v59 = vld [vmem:[%s7745_s1 + $0x1d0] ss:$8 sps:$4 sm:$0xff]   ;;  %v5311_v61 = vld [vmem:[%s7745_s1 + $0x1e4] ss:$8 sps:$4 sm:$0xff]  }
  0x1a   : > { %1046 = vmatprep.mubr.bf16.mxu1 %v4287_v51  ;;  %v5313_v62 = vld [vmem:[%s7745_s1 + $0xe0] ss:$8 sps:$4 sm:$0xff]   ;;  %v5315_v0 = vld [vmem:[%s7745_s1 + $0xf4] ss:$8 sps:$4 sm:$0xff]   ;;  %v5319_v2 = vld [vmem:[%s7745_s1 + $0xf0] ss:$8 sps:$4 sm:$0xff]  }
  0x1b   : > { %984 = vmatpush1.bf16.msra.mxu0 %v5259_v22  ;;  %v5314_v63 = vld [vmem:[%s7745_s1 + $0x1e0] ss:$8 sps:$4 sm:$0xff]   ;;  %v5317_v1 = vld [vmem:[%s7745_s1 + $0x1f4] ss:$8 sps:$4 sm:$0xff]   ;;  %v5320_v3 = vld [vmem:[%s7745_s1 + $0x1f0] ss:$8 sps:$4 sm:$0xff]  }
  0x1c   : > { %1025 = vmatpush1.bf16.msra.mxu1 %v5260_v23  ;;  %985 = vmatprep.subr.bf16.mxu0 %v5261_v24  ;;  %v5327_v4 = vld [vmem:[%s7745_s1 + $0x204] ss:$8 sps:$4 sm:$0xff]   ;;  %v5325_v8 = vld [vmem:[%s7745_s1 + $0x200] ss:$8 sps:$4 sm:$0xff]   ;;  %v5333_v10 = vld [vmem:[%s7745_s1 + $0x214] ss:$8 sps:$4 sm:$0xff]  }
  0x1d   : > { %1026 = vmatprep.subr.bf16.mxu1 %v5263_v25  ;;  %v5330_v5 = vld [vmem:[%s7745_s1 + $0x304] ss:$8 sps:$4 sm:$0xff]   ;;  %v5328_v9 = vld [vmem:[%s7745_s1 + $0x300] ss:$8 sps:$4 sm:$0xff]   ;;  %v5336_v11 = vld [vmem:[%s7745_s1 + $0x314] ss:$8 sps:$4 sm:$0xff]  }
  0x1e   : > { %v5331_v12 = vld [vmem:[%s7745_s1 + $0x210] ss:$8 sps:$4 sm:$0xff]   ;;  %v5339_v14 = vld [vmem:[%s7745_s1 + $0x224] ss:$8 sps:$4 sm:$0xff]   ;;  %v5337_v16 = vld [vmem:[%s7745_s1 + $0x220] ss:$8 sps:$4 sm:$0xff]  }
  0x1f   : > { %986 = vmatpush1.bf16.msra.mxu0 %v5265_v26  ;;  %v5334_v13 = vld [vmem:[%s7745_s1 + $0x310] ss:$8 sps:$4 sm:$0xff]   ;;  %v5342_v15 = vld [vmem:[%s7745_s1 + $0x324] ss:$8 sps:$4 sm:$0xff]   ;;  %v5340_v17 = vld [vmem:[%s7745_s1 + $0x320] ss:$8 sps:$4 sm:$0xff]  }
  0x20   : > { %1027 = vmatpush1.bf16.msra.mxu1 %v5266_v27  ;;  %987 = vmatprep.subr.bf16.mxu0 %v5267_v28  ;;  %v5345_v18 = vld [vmem:[%s7745_s1 + $0x234] ss:$8 sps:$4 sm:$0xff]   ;;  %v5343_v20 = vld [vmem:[%s7745_s1 + $0x230] ss:$8 sps:$4 sm:$0xff]   ;;  %v5351_v22 = vld [vmem:[%s7745_s1 + $0x244] ss:$8 sps:$4 sm:$0xff]  }
  0x21   : > { %1028 = vmatprep.subr.bf16.mxu1 %v5269_v29  ;;  %v5348_v19 = vld [vmem:[%s7745_s1 + $0x334] ss:$8 sps:$4 sm:$0xff]   ;;  %v5346_v21 = vld [vmem:[%s7745_s1 + $0x330] ss:$8 sps:$4 sm:$0xff]   ;;  %v5354_v23 = vld [vmem:[%s7745_s1 + $0x344] ss:$8 sps:$4 sm:$0xff]  }
  0x22   : > { %v5349_v24 = vld [vmem:[%s7745_s1 + $0x240] ss:$8 sps:$4 sm:$0xff]   ;;  %v5357_v26 = vld [vmem:[%s7745_s1 + $0x254] ss:$8 sps:$4 sm:$0xff]   ;;  %v5355_v28 = vld [vmem:[%s7745_s1 + $0x250] ss:$8 sps:$4 sm:$0xff]  }
  0x23   : > { %988 = vmatpush1.bf16.msra.mxu0 %v5271_v30  ;;  %v5352_v25 = vld [vmem:[%s7745_s1 + $0x340] ss:$8 sps:$4 sm:$0xff]   ;;  %v5360_v27 = vld [vmem:[%s7745_s1 + $0x354] ss:$8 sps:$4 sm:$0xff]   ;;  %v5358_v29 = vld [vmem:[%s7745_s1 + $0x350] ss:$8 sps:$4 sm:$0xff]  }
  0x24   : > { %1029 = vmatpush1.bf16.msra.mxu1 %v5272_v31  ;;  %989 = vmatprep.subr.bf16.mxu0 %v5273_v32  ;;  %v5363_v30 = vld [vmem:[%s7745_s1 + $0x264] ss:$8 sps:$4 sm:$0xff]   ;;  %v6335_v32 = vld [vmem:[%s6192_s30 + $0x10] sm:$0xff]  ;;  %vm4217_vm2 = vcmask 1041409   ;;  %vm4218_vm3 = vsmask.f32 1280  ;;  %vm4216_vm4 = vmand %vm4214_vm0, %vm4215_vm1 }
  0x25   : > { %1030 = vmatprep.subr.bf16.mxu1 %v5275_v33  ;;  %v5366_v31 = vld [vmem:[%s7745_s1 + $0x364] ss:$8 sps:$4 sm:$0xff]   ;;  %v6338_v33 = vld [vmem:[%s6192_s30 + $0x18] sm:$0xff]  ;;  %vm4219_vm5 = vmand %vm4217_vm2, %vm4218_vm3 }
  0x26   : > { %v5381_v46 = vld [vmem:[%s7745_s1 + $0x294] ss:$8 sps:$4 sm:$0xff]   ;;  %v5379_v48 = vld [vmem:[%s7745_s1 + $0x290] ss:$8 sps:$4 sm:$0xff]   ;;  %v5390_v51 = vld [vmem:[%s7745_s1 + $0x3a4] ss:$8 sps:$4 sm:$0xff]  }
  0x27   : > { %990 = vmatpush1.bf16.msra.mxu0 %v5277_v34  ;;  %v5361_v34 = vld [vmem:[%s7745_s1 + $0x260] ss:$8 sps:$4 sm:$0xff]   ;;  %v5384_v47 = vld [vmem:[%s7745_s1 + $0x394] ss:$8 sps:$4 sm:$0xff]   ;;  %vm4220_vm6 = vmor %vm4219_vm5, %vm4216_vm4 }
  0x28   : > { %1031 = vmatpush1.bf16.msra.mxu1 %v5278_v35  ;;  %991 = vmatprep.subr.bf16.mxu0 %v5279_v36  ;;  %v5364_v35 = vld [vmem:[%s7745_s1 + $0x360] ss:$8 sps:$4 sm:$0xff]   ;;  %v4289_v36 = vcombine.high %v6335_v32, %v6335_v32 }
  0x29   : > { %1032 = vmatprep.subr.bf16.mxu1 %v5281_v37  ;;  %v4291_v37 = vcombine.high %v6338_v33, %v6338_v33 }
  0x2b   : > { %992 = vmatpush1.bf16.msra.mxu0 %v5283_v38  ;;  %v5369_v38 = vld [vmem:[%s7745_s1 + $0x274] ss:$8 sps:$4 sm:$0xff]  }
  0x2c   : > { %1033 = vmatpush1.bf16.msra.mxu1 %v5284_v39  ;;  %993 = vmatprep.subr.bf16.mxu0 %v5285_v40  ;;  %v5372_v39 = vld [vmem:[%s7745_s1 + $0x374] ss:$8 sps:$4 sm:$0xff]   ;;  %v5367_v40 = vld [vmem:[%s7745_s1 + $0x270] ss:$8 sps:$4 sm:$0xff]  }
  0x2d   : > { %1034 = vmatprep.subr.bf16.mxu1 %v5287_v41  ;;  %v5370_v41 = vld [vmem:[%s7745_s1 + $0x370] ss:$8 sps:$4 sm:$0xff]  }
  0x2f   : > { %994 = vmatpush1.bf16.msra.mxu0 %v5289_v42  ;;  %v5375_v42 = vld [vmem:[%s7745_s1 + $0x284] ss:$8 sps:$4 sm:$0xff]  }
  0x30   : > { %1035 = vmatpush1.bf16.msra.mxu1 %v5290_v43  ;;  %995 = vmatprep.subr.bf16.mxu0 %v5291_v44  ;;  %v5378_v43 = vld [vmem:[%s7745_s1 + $0x384] ss:$8 sps:$4 sm:$0xff]   ;;  %v5373_v44 = vld [vmem:[%s7745_s1 + $0x280] ss:$8 sps:$4 sm:$0xff]  }
  0x31   : > { %1036 = vmatprep.subr.bf16.mxu1 %v5293_v45  ;;  %v5376_v45 = vld [vmem:[%s7745_s1 + $0x380] ss:$8 sps:$4 sm:$0xff]  }
  0x33   : > { %996 = vmatpush1.bf16.msra.mxu0 %v5295_v49  ;;  %v5382_v49 = vld [vmem:[%s7745_s1 + $0x390] ss:$8 sps:$4 sm:$0xff]  }
  0x34   : > { %1037 = vmatpush1.bf16.msra.mxu1 %v5296_v50  ;;  %997 = vmatprep.subr.bf16.mxu0 %v5297_v52  ;;  %v5387_v50 = vld [vmem:[%s7745_s1 + $0x2a4] ss:$8 sps:$4 sm:$0xff]   ;;  %v5385_v52 = vld [vmem:[%s7745_s1 + $0x2a0] ss:$8 sps:$4 sm:$0xff]  }
  0x35   : > { %1038 = vmatprep.subr.bf16.mxu1 %v5299_v53  ;;  %v5388_v53 = vld [vmem:[%s7745_s1 + $0x3a0] ss:$8 sps:$4 sm:$0xff]  }
  0x37   : > { %998 = vmatpush1.bf16.msra.mxu0 %v5301_v54  ;;  %v5393_v54 = vld [vmem:[%s7745_s1 + $0x2b4] ss:$8 sps:$4 sm:$0xff]  }
  0x38   : > { %1039 = vmatpush1.bf16.msra.mxu1 %v5302_v55  ;;  %999 = vmatprep.subr.bf16.mxu0 %v5303_v56  ;;  %v5396_v55 = vld [vmem:[%s7745_s1 + $0x3b4] ss:$8 sps:$4 sm:$0xff]   ;;  %v5391_v56 = vld [vmem:[%s7745_s1 + $0x2b0] ss:$8 sps:$4 sm:$0xff]  }
  0x39   : > { %1040 = vmatprep.subr.bf16.mxu1 %v5305_v57  ;;  %v5394_v57 = vld [vmem:[%s7745_s1 + $0x3b0] ss:$8 sps:$4 sm:$0xff]  }
  0x3b   : > { %1000 = vmatpush1.bf16.msra.mxu0 %v5307_v58  ;;  %v5399_v58 = vld [vmem:[%s7745_s1 + $0x2c4] ss:$8 sps:$4 sm:$0xff]  }
  0x3c   : > { %1041 = vmatpush1.bf16.msra.mxu1 %v5308_v59  ;;  %1001 = vmatprep.subr.bf16.mxu0 %v5309_v60  ;;  %v5402_v59 = vld [vmem:[%s7745_s1 + $0x3c4] ss:$8 sps:$4 sm:$0xff]   ;;  %v5397_v60 = vld [vmem:[%s7745_s1 + $0x2c0] ss:$8 sps:$4 sm:$0xff]  }
  0x3d   : > { %1042 = vmatprep.subr.bf16.mxu1 %v5311_v61  ;;  %v5400_v61 = vld [vmem:[%s7745_s1 + $0x3c0] ss:$8 sps:$4 sm:$0xff]  }
  0x3f   : > { %1002 = vmatpush1.bf16.msra.mxu0 %v5313_v62  ;;  %v5405_v62 = vld [vmem:[%s7745_s1 + $0x2d4] ss:$8 sps:$4 sm:$0xff]  }
  0x40   : > { %1043 = vmatpush1.bf16.msra.mxu1 %v5314_v63  ;;  %1003 = vmatprep.subr.bf16.mxu0 %v5315_v0  ;;  %v5408_v63 = vld [vmem:[%s7745_s1 + $0x3d4] ss:$8 sps:$4 sm:$0xff]   ;;  %v5403_v0 = vld [vmem:[%s7745_s1 + $0x2d0] ss:$8 sps:$4 sm:$0xff]  }
  0x41   : > { %1044 = vmatprep.subr.bf16.mxu1 %v5317_v1  ;;  %v5406_v1 = vld [vmem:[%s7745_s1 + $0x3d0] ss:$8 sps:$4 sm:$0xff]  }
  0x43   : > { %1004 = vmatpush1.bf16.msra.mxu0 %v5319_v2  ;;  %v5411_v2 = vld [vmem:[%s7745_s1 + $0x2e4] ss:$8 sps:$4 sm:$0xff]  }
  0x44   : > { %1045 = vmatpush1.bf16.msra.mxu1 %v5320_v3  ;;  %1055 = vmatprep.subr.bf16.mxu0 %v5327_v4  ;;  %v5414_v3 = vld [vmem:[%s7745_s1 + $0x3e4] ss:$8 sps:$4 sm:$0xff]   ;;  %v5409_v4 = vld [vmem:[%s7745_s1 + $0x2e0] ss:$8 sps:$4 sm:$0xff]  }
  0x45   : > { %1096 = vmatprep.subr.bf16.mxu1 %v5330_v5  ;;  %v5412_v5 = vld [vmem:[%s7745_s1 + $0x3e0] ss:$8 sps:$4 sm:$0xff]  }
  0x46   : > { %1006 = vmatmul.mubr.bf16.vlgmr.msra.gmra.mrb[0].mxu0 %v4284_v6  ;;  %v5417_v6 = vld [vmem:[%s7745_s1 + $0x2f4] ss:$8 sps:$4 sm:$0xff]  }
  0x47   : > { %1047 = vmatmul.mubr.bf16.vlgmr.msra.gmra.mrb[0].mxu1 %v4286_v7  ;;  %1056 = vmatpush1.bf16.msra.mxu0 %v5325_v8  ;;  %v5420_v7 = vld [vmem:[%s7745_s1 + $0x3f4] ss:$8 sps:$4 sm:$0xff]   ;;  %v5415_v8 = vld [vmem:[%s7745_s1 + $0x2f0] ss:$8 sps:$4 sm:$0xff]  }
  0x48   : > { %1097 = vmatpush1.bf16.msra.mxu1 %v5328_v9  ;;  %1057 = vmatprep.subr.bf16.mxu0 %v5333_v10  ;;  %v5418_v9 = vld [vmem:[%s7745_s1 + $0x3f0] ss:$8 sps:$4 sm:$0xff]   ;;  %v5427_v10 = vld [vmem:[%s7745_s1 + $0x804] ss:$8 sps:$4 sm:$0xff]  }
  0x49   : > { %1098 = vmatprep.subr.bf16.mxu1 %v5336_v11  ;;  %1087 = vmatprep.mubr.bf16.mxu0 %v4289_v36  ;;  %v5430_v11 = vld [vmem:[%s7745_s1 + $0x904] ss:$8 sps:$4 sm:$0xff]   ;;  %v5457_v36 = vld [vmem:[%s7745_s1 + $0x854] ss:$8 sps:$4 sm:$0xff]  }
  0x4a   : > { %1128 = vmatprep.mubr.bf16.mxu1 %v4291_v37  ;;  %v5460_v37 = vld [vmem:[%s7745_s1 + $0x954] ss:$8 sps:$4 sm:$0xff]  }
  0x4b   : > { %1058 = vmatpush1.bf16.msra.mxu0 %v5331_v12  ;;  %v4288_v12 = vcombine.low %v6335_v32, %v6335_v32  ;;  %v5451_v32 = vld [vmem:[%s7745_s1 + $0x844] ss:$8 sps:$4 sm:$0xff]  }
  0x4c   : > { %1099 = vmatpush1.bf16.msra.mxu1 %v5334_v13  ;;  %1059 = vmatprep.subr.bf16.mxu0 %v5339_v14  ;;  %v4290_v13 = vcombine.low %v6338_v33, %v6338_v33  ;;  %v5425_v14 = vld [vmem:[%s7745_s1 + $0x800] ss:$8 sps:$4 sm:$0xff]   ;;  %v5454_v33 = vld [vmem:[%s7745_s1 + $0x944] ss:$8 sps:$4 sm:$0xff]  }
  0x4d   : > { %1100 = vmatprep.subr.bf16.mxu1 %v5342_v15  ;;  %v5428_v15 = vld [vmem:[%s7745_s1 + $0x900] ss:$8 sps:$4 sm:$0xff]  }
  0x4f   : > { %1060 = vmatpush1.bf16.msra.mxu0 %v5337_v16  ;;  %v5433_v16 = vld [vmem:[%s7745_s1 + $0x814] ss:$8 sps:$4 sm:$0xff]  }
  0x50   : > { %1101 = vmatpush1.bf16.msra.mxu1 %v5340_v17  ;;  %1061 = vmatprep.subr.bf16.mxu0 %v5345_v18  ;;  %v5436_v17 = vld [vmem:[%s7745_s1 + $0x914] ss:$8 sps:$4 sm:$0xff]   ;;  %v6481_v18 = vld [vmem:[%s6192_s30 + $0x20] sm:$0xff] }
  0x51   : > { %1102 = vmatprep.subr.bf16.mxu1 %v5348_v19  ;;  %v6484_v19 = vld [vmem:[%s6192_s30 + $0x28] sm:$0xff] }
  0x53   : > { %1062 = vmatpush1.bf16.msra.mxu0 %v5343_v20  ;;  %v4549_v20 = vcombine.high %v6481_v18, %v6481_v18 }
  0x54   : > { %1103 = vmatpush1.bf16.msra.mxu1 %v5346_v21  ;;  %1063 = vmatprep.subr.bf16.mxu0 %v5351_v22  ;;  %v4551_v21 = vcombine.high %v6484_v19, %v6484_v19  ;;  %v5431_v22 = vld [vmem:[%s7745_s1 + $0x810] ss:$8 sps:$4 sm:$0xff]  }
  0x55   : > { %1104 = vmatprep.subr.bf16.mxu1 %v5354_v23  ;;  %v5434_v23 = vld [vmem:[%s7745_s1 + $0x910] ss:$8 sps:$4 sm:$0xff]  }
  0x57   : > { %1064 = vmatpush1.bf16.msra.mxu0 %v5349_v24  ;;  %v5439_v24 = vld [vmem:[%s7745_s1 + $0x824] ss:$8 sps:$4 sm:$0xff]  }
  0x58   : > { %1105 = vmatpush1.bf16.msra.mxu1 %v5352_v25  ;;  %1065 = vmatprep.subr.bf16.mxu0 %v5357_v26  ;;  %v5442_v25 = vld [vmem:[%s7745_s1 + $0x924] ss:$8 sps:$4 sm:$0xff]   ;;  %v5437_v26 = vld [vmem:[%s7745_s1 + $0x820] ss:$8 sps:$4 sm:$0xff]  }
  0x59   : > { %1106 = vmatprep.subr.bf16.mxu1 %v5360_v27  ;;  %v5440_v27 = vld [vmem:[%s7745_s1 + $0x920] ss:$8 sps:$4 sm:$0xff]  }
  0x5b   : > { %1066 = vmatpush1.bf16.msra.mxu0 %v5355_v28  ;;  %v5445_v28 = vld [vmem:[%s7745_s1 + $0x834] ss:$8 sps:$4 sm:$0xff]  }
  0x5c   : > { %1107 = vmatpush1.bf16.msra.mxu1 %v5358_v29  ;;  %1067 = vmatprep.subr.bf16.mxu0 %v5363_v30  ;;  %v5448_v29 = vld [vmem:[%s7745_s1 + $0x934] ss:$8 sps:$4 sm:$0xff]   ;;  %v5443_v30 = vld [vmem:[%s7745_s1 + $0x830] ss:$8 sps:$4 sm:$0xff]  }
  0x5d   : > { %1108 = vmatprep.subr.bf16.mxu1 %v5366_v31  ;;  %v5446_v31 = vld [vmem:[%s7745_s1 + $0x930] ss:$8 sps:$4 sm:$0xff]  }
  0x5f   : > { %1068 = vmatpush1.bf16.msra.mxu0 %v5361_v34  ;;  %v5449_v34 = vld [vmem:[%s7745_s1 + $0x840] ss:$8 sps:$4 sm:$0xff]  }
  0x60   : > { %1109 = vmatpush1.bf16.msra.mxu1 %v5364_v35  ;;  %1069 = vmatprep.subr.bf16.mxu0 %v5369_v38  ;;  %v5452_v35 = vld [vmem:[%s7745_s1 + $0x940] ss:$8 sps:$4 sm:$0xff]   ;;  %v5455_v38 = vld [vmem:[%s7745_s1 + $0x850] ss:$8 sps:$4 sm:$0xff]  }
  0x61   : > { %1110 = vmatprep.subr.bf16.mxu1 %v5372_v39  ;;  %v5458_v39 = vld [vmem:[%s7745_s1 + $0x950] ss:$8 sps:$4 sm:$0xff]  }
  0x63   : > { %1070 = vmatpush1.bf16.msra.mxu0 %v5367_v40  ;;  %v5463_v40 = vld [vmem:[%s7745_s1 + $0x864] ss:$8 sps:$4 sm:$0xff]  }
  0x64   : > { %1111 = vmatpush1.bf16.msra.mxu1 %v5370_v41  ;;  %1071 = vmatprep.subr.bf16.mxu0 %v5375_v42  ;;  %v5466_v41 = vld [vmem:[%s7745_s1 + $0x964] ss:$8 sps:$4 sm:$0xff]   ;;  %v5461_v42 = vld [vmem:[%s7745_s1 + $0x860] ss:$8 sps:$4 sm:$0xff]  }
  0x65   : > { %1112 = vmatprep.subr.bf16.mxu1 %v5378_v43  ;;  %v5464_v43 = vld [vmem:[%s7745_s1 + $0x960] ss:$8 sps:$4 sm:$0xff]  }
  0x67   : > { %1072 = vmatpush1.bf16.msra.mxu0 %v5373_v44  ;;  %v5469_v44 = vld [vmem:[%s7745_s1 + $0x874] ss:$8 sps:$4 sm:$0xff]  }
  0x68   : > { %1113 = vmatpush1.bf16.msra.mxu1 %v5376_v45  ;;  %1073 = vmatprep.subr.bf16.mxu0 %v5381_v46  ;;  %v5472_v45 = vld [vmem:[%s7745_s1 + $0x974] ss:$8 sps:$4 sm:$0xff]   ;;  %v5467_v46 = vld [vmem:[%s7745_s1 + $0x870] ss:$8 sps:$4 sm:$0xff]  }
  0x69   : > { %1114 = vmatprep.subr.bf16.mxu1 %v5384_v47  ;;  %v5470_v47 = vld [vmem:[%s7745_s1 + $0x970] ss:$8 sps:$4 sm:$0xff]  }
  0x6b   : > { %1074 = vmatpush1.bf16.msra.mxu0 %v5379_v48  ;;  %v5475_v48 = vld [vmem:[%s7745_s1 + $0x884] ss:$8 sps:$4 sm:$0xff]  }
  0x6c   : > { %1115 = vmatpush1.bf16.msra.mxu1 %v5382_v49  ;;  %1075 = vmatprep.subr.bf16.mxu0 %v5387_v50  ;;  %v5478_v49 = vld [vmem:[%s7745_s1 + $0x984] ss:$8 sps:$4 sm:$0xff]   ;;  %v5473_v50 = vld [vmem:[%s7745_s1 + $0x880] ss:$8 sps:$4 sm:$0xff]  }
  0x6d   : > { %1116 = vmatprep.subr.bf16.mxu1 %v5390_v51  ;;  %v5476_v51 = vld [vmem:[%s7745_s1 + $0x980] ss:$8 sps:$4 sm:$0xff]  }
  0x6f   : > { %1076 = vmatpush1.bf16.msra.mxu0 %v5385_v52  ;;  %v5481_v52 = vld [vmem:[%s7745_s1 + $0x894] ss:$8 sps:$4 sm:$0xff]  }
  0x70   : > { %1117 = vmatpush1.bf16.msra.mxu1 %v5388_v53  ;;  %1077 = vmatprep.subr.bf16.mxu0 %v5393_v54  ;;  %v5484_v53 = vld [vmem:[%s7745_s1 + $0x994] ss:$8 sps:$4 sm:$0xff]   ;;  %v5479_v54 = vld [vmem:[%s7745_s1 + $0x890] ss:$8 sps:$4 sm:$0xff]  }
  0x71   : > { %1118 = vmatprep.subr.bf16.mxu1 %v5396_v55  ;;  %v5482_v55 = vld [vmem:[%s7745_s1 + $0x990] ss:$8 sps:$4 sm:$0xff]  }
  0x73   : > { %1078 = vmatpush1.bf16.msra.mxu0 %v5391_v56  ;;  %v5487_v56 = vld [vmem:[%s7745_s1 + $0x8a4] ss:$8 sps:$4 sm:$0xff]  }
  0x74   : > { %1119 = vmatpush1.bf16.msra.mxu1 %v5394_v57  ;;  %1079 = vmatprep.subr.bf16.mxu0 %v5399_v58  ;;  %v5490_v57 = vld [vmem:[%s7745_s1 + $0x9a4] ss:$8 sps:$4 sm:$0xff]   ;;  %v5485_v58 = vld [vmem:[%s7745_s1 + $0x8a0] ss:$8 sps:$4 sm:$0xff]  }
  0x75   : > { %1120 = vmatprep.subr.bf16.mxu1 %v5402_v59  ;;  %v5488_v59 = vld [vmem:[%s7745_s1 + $0x9a0] ss:$8 sps:$4 sm:$0xff]  }
  0x77   : > { %1080 = vmatpush1.bf16.msra.mxu0 %v5397_v60  ;;  %v5493_v60 = vld [vmem:[%s7745_s1 + $0x8b4] ss:$8 sps:$4 sm:$0xff]  }
  0x78   : > { %1121 = vmatpush1.bf16.msra.mxu1 %v5400_v61  ;;  %1081 = vmatprep.subr.bf16.mxu0 %v5405_v62  ;;  %v5496_v61 = vld [vmem:[%s7745_s1 + $0x9b4] ss:$8 sps:$4 sm:$0xff]   ;;  %v5491_v62 = vld [vmem:[%s7745_s1 + $0x8b0] ss:$8 sps:$4 sm:$0xff]  }
  0x79   : > { %1122 = vmatprep.subr.bf16.mxu1 %v5408_v63  ;;  %v5494_v63 = vld [vmem:[%s7745_s1 + $0x9b0] ss:$8 sps:$4 sm:$0xff]  }
  0x7b   : > { %1082 = vmatpush1.bf16.msra.mxu0 %v5403_v0  ;;  %v5499_v0 = vld [vmem:[%s7745_s1 + $0x8c4] ss:$8 sps:$4 sm:$0xff]  }
  0x7c   : > { %1123 = vmatpush1.bf16.msra.mxu1 %v5406_v1  ;;  %1083 = vmatprep.subr.bf16.mxu0 %v5411_v2  ;;  %v5502_v1 = vld [vmem:[%s7745_s1 + $0x9c4] ss:$8 sps:$4 sm:$0xff]   ;;  %v5497_v2 = vld [vmem:[%s7745_s1 + $0x8c0] ss:$8 sps:$4 sm:$0xff]  }
  0x7d   : > { %1124 = vmatprep.subr.bf16.mxu1 %v5414_v3  ;;  %v5500_v3 = vld [vmem:[%s7745_s1 + $0x9c0] ss:$8 sps:$4 sm:$0xff]  }
  0x7f   : > { %1084 = vmatpush1.bf16.msra.mxu0 %v5409_v4  ;;  %v5505_v4 = vld [vmem:[%s7745_s1 + $0x8d4] ss:$8 sps:$4 sm:$0xff]  }
  0x80   : > { %1125 = vmatpush1.bf16.msra.mxu1 %v5412_v5  ;;  %1085 = vmatprep.subr.bf16.mxu0 %v5417_v6  ;;  %v5508_v5 = vld [vmem:[%s7745_s1 + $0x9d4] ss:$8 sps:$4 sm:$0xff]   ;;  %v5503_v6 = vld [vmem:[%s7745_s1 + $0x8d0] ss:$8 sps:$4 sm:$0xff]  }
  0x81   : > { %1126 = vmatprep.subr.bf16.mxu1 %v5420_v7  ;;  %v5506_v7 = vld [vmem:[%s7745_s1 + $0x9d0] ss:$8 sps:$4 sm:$0xff]  }
  0x83   : > { %1086 = vmatpush1.bf16.msra.mxu0 %v5415_v8  ;;  %v5511_v8 = vld [vmem:[%s7745_s1 + $0x8e4] ss:$8 sps:$4 sm:$0xff]  }
  0x84   : > { %1127 = vmatpush1.bf16.msra.mxu1 %v5418_v9  ;;  %1936 = vmatprep.subr.bf16.mxu0 %v5427_v10  ;;  %v5514_v9 = vld [vmem:[%s7745_s1 + $0x9e4] ss:$8 sps:$4 sm:$0xff]   ;;  %v5509_v10 = vld [vmem:[%s7745_s1 + $0x8e0] ss:$8 sps:$4 sm:$0xff]  }
  0x85   : > { %1977 = vmatprep.subr.bf16.mxu1 %v5430_v11  ;;  %v5512_v11 = vld [vmem:[%s7745_s1 + $0x9e0] ss:$8 sps:$4 sm:$0xff]  }
  0x86   : > { %1088 = vmatmul.mubr.bf16.vlgmr.msra.gmra.mrb[4].mxu0 %v4288_v12  ;;  %v5517_v12 = vld [vmem:[%s7745_s1 + $0x8f4] ss:$8 sps:$4 sm:$0xff]  }
  0x87   : > { %1129 = vmatmul.mubr.bf16.vlgmr.msra.gmra.mrb[4].mxu1 %v4290_v13  ;;  %1937 = vmatpush1.bf16.msra.mxu0 %v5425_v14  ;;  %v5520_v13 = vld [vmem:[%s7745_s1 + $0x9f4] ss:$8 sps:$4 sm:$0xff]   ;;  %v5515_v14 = vld [vmem:[%s7745_s1 + $0x8f0] ss:$8 sps:$4 sm:$0xff]  }
  0x88   : > { %1978 = vmatpush1.bf16.msra.mxu1 %v5428_v15  ;;  %1938 = vmatprep.subr.bf16.mxu0 %v5433_v16  ;;  %v5518_v15 = vld [vmem:[%s7745_s1 + $0x9f0] ss:$8 sps:$4 sm:$0xff]   ;;  %v5527_v16 = vld [vmem:[%s7745_s1 + $0xa04] ss:$8 sps:$4 sm:$0xff]  }
  0x89   : > { %1979 = vmatprep.subr.bf16.mxu1 %v5436_v17  ;;  %1968 = vmatprep.mubr.bf16.mxu0 %v4549_v20  ;;  %v5530_v17 = vld [vmem:[%s7745_s1 + $0xb04] ss:$8 sps:$4 sm:$0xff]   ;;  %v5525_v20 = vld [vmem:[%s7745_s1 + $0xa00] ss:$8 sps:$4 sm:$0xff]  }
  0x8a   : > { %2009 = vmatprep.mubr.bf16.mxu1 %v4551_v21  ;;  %v5528_v21 = vld [vmem:[%s7745_s1 + $0xb00] ss:$8 sps:$4 sm:$0xff]  }
  0x8b   : > { %1939 = vmatpush1.bf16.msra.mxu0 %v5431_v22  ;;  %v4548_v22 = vcombine.low %v6481_v18, %v6481_v18 }
  0x8c   : > { %1980 = vmatpush1.bf16.msra.mxu1 %v5434_v23  ;;  %1940 = vmatprep.subr.bf16.mxu0 %v5439_v24  ;;  %v4550_v23 = vcombine.low %v6484_v19, %v6484_v19  ;;  %v6681_v24 = vld [vmem:[%s6192_s30 + $0x30] sm:$0xff] }
  0x8d   : > { %1981 = vmatprep.subr.bf16.mxu1 %v5442_v25  ;;  %v6684_v25 = vld [vmem:[%s6192_s30 + $0x38] sm:$0xff] }
  0x8f   : > { %1941 = vmatpush1.bf16.msra.mxu0 %v5437_v26  ;;  %v5533_v26 = vld [vmem:[%s7745_s1 + $0xa14] ss:$8 sps:$4 sm:$0xff]  }
  0x90   : > { %1982 = vmatpush1.bf16.msra.mxu1 %v5440_v27  ;;  %1942 = vmatprep.subr.bf16.mxu0 %v5445_v28  ;;  %v5536_v27 = vld [vmem:[%s7745_s1 + $0xb14] ss:$8 sps:$4 sm:$0xff]   ;;  %v4553_v28 = vcombine.high %v6681_v24, %v6681_v24 }
  0x91   : > { %1983 = vmatprep.subr.bf16.mxu1 %v5448_v29  ;;  %v4555_v29 = vcombine.high %v6684_v25, %v6684_v25 }
  0x93   : > { %1943 = vmatpush1.bf16.msra.mxu0 %v5443_v30  ;;  %v5531_v30 = vld [vmem:[%s7745_s1 + $0xa10] ss:$8 sps:$4 sm:$0xff]  }
  0x94   : > { %1984 = vmatpush1.bf16.msra.mxu1 %v5446_v31  ;;  %1944 = vmatprep.subr.bf16.mxu0 %v5451_v32  ;;  %v5534_v31 = vld [vmem:[%s7745_s1 + $0xb10] ss:$8 sps:$4 sm:$0xff]   ;;  %v5539_v32 = vld [vmem:[%s7745_s1 + $0xa24] ss:$8 sps:$4 sm:$0xff]  }
  0x95   : > { %1985 = vmatprep.subr.bf16.mxu1 %v5454_v33  ;;  %v5542_v33 = vld [vmem:[%s7745_s1 + $0xb24] ss:$8 sps:$4 sm:$0xff]  }
  0x97   : > { %1945 = vmatpush1.bf16.msra.mxu0 %v5449_v34  ;;  %v5537_v34 = vld [vmem:[%s7745_s1 + $0xa20] ss:$8 sps:$4 sm:$0xff]  }
  0x98   : > { %1986 = vmatpush1.bf16.msra.mxu1 %v5452_v35  ;;  %1946 = vmatprep.subr.bf16.mxu0 %v5457_v36  ;;  %v5540_v35 = vld [vmem:[%s7745_s1 + $0xb20] ss:$8 sps:$4 sm:$0xff]   ;;  %v5545_v36 = vld [vmem:[%s7745_s1 + $0xa34] ss:$8 sps:$4 sm:$0xff]  }
  0x99   : > { %1987 = vmatprep.subr.bf16.mxu1 %v5460_v37  ;;  %v5548_v37 = vld [vmem:[%s7745_s1 + $0xb34] ss:$8 sps:$4 sm:$0xff]  }
  0x9b   : > { %1947 = vmatpush1.bf16.msra.mxu0 %v5455_v38  ;;  %v5543_v38 = vld [vmem:[%s7745_s1 + $0xa30] ss:$8 sps:$4 sm:$0xff]  }
  0x9c   : > { %1988 = vmatpush1.bf16.msra.mxu1 %v5458_v39  ;;  %1948 = vmatprep.subr.bf16.mxu0 %v5463_v40  ;;  %v5546_v39 = vld [vmem:[%s7745_s1 + $0xb30] ss:$8 sps:$4 sm:$0xff]   ;;  %v5551_v40 = vld [vmem:[%s7745_s1 + $0xa44] ss:$8 sps:$4 sm:$0xff]  }
  0x9d   : > { %1989 = vmatprep.subr.bf16.mxu1 %v5466_v41  ;;  %v5554_v41 = vld [vmem:[%s7745_s1 + $0xb44] ss:$8 sps:$4 sm:$0xff]  }
  0x9f   : > { %1949 = vmatpush1.bf16.msra.mxu0 %v5461_v42  ;;  %v5549_v42 = vld [vmem:[%s7745_s1 + $0xa40] ss:$8 sps:$4 sm:$0xff]  }
  0xa0   : > { %1990 = vmatpush1.bf16.msra.mxu1 %v5464_v43  ;;  %1950 = vmatprep.subr.bf16.mxu0 %v5469_v44  ;;  %v5552_v43 = vld [vmem:[%s7745_s1 + $0xb40] ss:$8 sps:$4 sm:$0xff]   ;;  %v5557_v44 = vld [vmem:[%s7745_s1 + $0xa54] ss:$8 sps:$4 sm:$0xff]  }
  0xa1   : > { %1991 = vmatprep.subr.bf16.mxu1 %v5472_v45  ;;  %v5560_v45 = vld [vmem:[%s7745_s1 + $0xb54] ss:$8 sps:$4 sm:$0xff]  }
  0xa3   : > { %1951 = vmatpush1.bf16.msra.mxu0 %v5467_v46  ;;  %v5555_v46 = vld [vmem:[%s7745_s1 + $0xa50] ss:$8 sps:$4 sm:$0xff]  }
  0xa4   : > { %1992 = vmatpush1.bf16.msra.mxu1 %v5470_v47  ;;  %1952 = vmatprep.subr.bf16.mxu0 %v5475_v48  ;;  %v5558_v47 = vld [vmem:[%s7745_s1 + $0xb50] ss:$8 sps:$4 sm:$0xff]   ;;  %v5563_v48 = vld [vmem:[%s7745_s1 + $0xa64] ss:$8 sps:$4 sm:$0xff]  }
  0xa5   : > { %1993 = vmatprep.subr.bf16.mxu1 %v5478_v49  ;;  %v5566_v49 = vld [vmem:[%s7745_s1 + $0xb64] ss:$8 sps:$4 sm:$0xff]  }
  0xa7   : > { %1953 = vmatpush1.bf16.msra.mxu0 %v5473_v50  ;;  %v5561_v50 = vld [vmem:[%s7745_s1 + $0xa60] ss:$8 sps:$4 sm:$0xff]  }
  0xa8   : > { %1994 = vmatpush1.bf16.msra.mxu1 %v5476_v51  ;;  %1954 = vmatprep.subr.bf16.mxu0 %v5481_v52  ;;  %v5564_v51 = vld [vmem:[%s7745_s1 + $0xb60] ss:$8 sps:$4 sm:$0xff]   ;;  %v5569_v52 = vld [vmem:[%s7745_s1 + $0xa74] ss:$8 sps:$4 sm:$0xff]  }
  0xa9   : > { %1995 = vmatprep.subr.bf16.mxu1 %v5484_v53  ;;  %v5572_v53 = vld [vmem:[%s7745_s1 + $0xb74] ss:$8 sps:$4 sm:$0xff]  }
  0xab   : > { %1955 = vmatpush1.bf16.msra.mxu0 %v5479_v54  ;;  %v5567_v54 = vld [vmem:[%s7745_s1 + $0xa70] ss:$8 sps:$4 sm:$0xff]  }
  0xac   : > { %1996 = vmatpush1.bf16.msra.mxu1 %v5482_v55  ;;  %1956 = vmatprep.subr.bf16.mxu0 %v5487_v56  ;;  %v5570_v55 = vld [vmem:[%s7745_s1 + $0xb70] ss:$8 sps:$4 sm:$0xff]   ;;  %v5575_v56 = vld [vmem:[%s7745_s1 + $0xa84] ss:$8 sps:$4 sm:$0xff]  }
  0xad   : > { %1997 = vmatprep.subr.bf16.mxu1 %v5490_v57  ;;  %v5578_v57 = vld [vmem:[%s7745_s1 + $0xb84] ss:$8 sps:$4 sm:$0xff]  }
  0xaf   : > { %1957 = vmatpush1.bf16.msra.mxu0 %v5485_v58  ;;  %v5573_v58 = vld [vmem:[%s7745_s1 + $0xa80] ss:$8 sps:$4 sm:$0xff]  }
  0xb0   : > { %1998 = vmatpush1.bf16.msra.mxu1 %v5488_v59  ;;  %1958 = vmatprep.subr.bf16.mxu0 %v5493_v60  ;;  %v5576_v59 = vld [vmem:[%s7745_s1 + $0xb80] ss:$8 sps:$4 sm:$0xff]   ;;  %v5581_v60 = vld [vmem:[%s7745_s1 + $0xa94] ss:$8 sps:$4 sm:$0xff]  }
  0xb1   : > { %1999 = vmatprep.subr.bf16.mxu1 %v5496_v61  ;;  %v5584_v61 = vld [vmem:[%s7745_s1 + $0xb94] ss:$8 sps:$4 sm:$0xff]  }
  0xb3   : > { %1959 = vmatpush1.bf16.msra.mxu0 %v5491_v62  ;;  %v5579_v62 = vld [vmem:[%s7745_s1 + $0xa90] ss:$8 sps:$4 sm:$0xff]  }
  0xb4   : > { %2000 = vmatpush1.bf16.msra.mxu1 %v5494_v63  ;;  %1960 = vmatprep.subr.bf16.mxu0 %v5499_v0  ;;  %v5582_v63 = vld [vmem:[%s7745_s1 + $0xb90] ss:$8 sps:$4 sm:$0xff]   ;;  %v5587_v0 = vld [vmem:[%s7745_s1 + $0xaa4] ss:$8 sps:$4 sm:$0xff]  }
  0xb5   : > { %2001 = vmatprep.subr.bf16.mxu1 %v5502_v1  ;;  %v5590_v1 = vld [vmem:[%s7745_s1 + $0xba4] ss:$8 sps:$4 sm:$0xff]  }
  0xb7   : > { %1961 = vmatpush1.bf16.msra.mxu0 %v5497_v2  ;;  %v5585_v2 = vld [vmem:[%s7745_s1 + $0xaa0] ss:$8 sps:$4 sm:$0xff]  }
  0xb8   : > { %2002 = vmatpush1.bf16.msra.mxu1 %v5500_v3  ;;  %1962 = vmatprep.subr.bf16.mxu0 %v5505_v4  ;;  %v5588_v3 = vld [vmem:[%s7745_s1 + $0xba0] ss:$8 sps:$4 sm:$0xff]   ;;  %v5593_v4 = vld [vmem:[%s7745_s1 + $0xab4] ss:$8 sps:$4 sm:$0xff]  }
  0xb9   : > { %2003 = vmatprep.subr.bf16.mxu1 %v5508_v5  ;;  %v5596_v5 = vld [vmem:[%s7745_s1 + $0xbb4] ss:$8 sps:$4 sm:$0xff]  }
  0xbb   : > { %1963 = vmatpush1.bf16.msra.mxu0 %v5503_v6  ;;  %v5591_v6 = vld [vmem:[%s7745_s1 + $0xab0] ss:$8 sps:$4 sm:$0xff]  }
  0xbc   : > { %2004 = vmatpush1.bf16.msra.mxu1 %v5506_v7  ;;  %1964 = vmatprep.subr.bf16.mxu0 %v5511_v8  ;;  %v5594_v7 = vld [vmem:[%s7745_s1 + $0xbb0] ss:$8 sps:$4 sm:$0xff]   ;;  %v5599_v8 = vld [vmem:[%s7745_s1 + $0xac4] ss:$8 sps:$4 sm:$0xff]  }
  0xbd   : > { %2005 = vmatprep.subr.bf16.mxu1 %v5514_v9  ;;  %v5602_v9 = vld [vmem:[%s7745_s1 + $0xbc4] ss:$8 sps:$4 sm:$0xff]  }
  0xbf   : > { %1965 = vmatpush1.bf16.msra.mxu0 %v5509_v10  ;;  %v5597_v10 = vld [vmem:[%s7745_s1 + $0xac0] ss:$8 sps:$4 sm:$0xff]  }
  0xc0   : > { %2006 = vmatpush1.bf16.msra.mxu1 %v5512_v11  ;;  %1966 = vmatprep.subr.bf16.mxu0 %v5517_v12  ;;  %v5600_v11 = vld [vmem:[%s7745_s1 + $0xbc0] ss:$8 sps:$4 sm:$0xff]   ;;  %v5605_v12 = vld [vmem:[%s7745_s1 + $0xad4] ss:$8 sps:$4 sm:$0xff]  }
  0xc1   : > { %2007 = vmatprep.subr.bf16.mxu1 %v5520_v13  ;;  %v5608_v13 = vld [vmem:[%s7745_s1 + $0xbd4] ss:$8 sps:$4 sm:$0xff]  }
  0xc3   : > { %1967 = vmatpush1.bf16.msra.mxu0 %v5515_v14  ;;  %v6841_v14 = vld [vmem:[%s6192_s30] sm:$0xff] }
  0xc4   : > { %2008 = vmatpush1.bf16.msra.mxu1 %v5518_v15  ;;  %2018 = vmatprep.subr.bf16.mxu0 %v5527_v16  ;;  %v6844_v15 = vld [vmem:[%s6192_s30 + $0x8] sm:$0xff]  ;;  %v5603_v16 = vld [vmem:[%s7745_s1 + $0xad0] ss:$8 sps:$4 sm:$0xff]  }
  0xc5   : > { %2059 = vmatprep.subr.bf16.mxu1 %v5530_v17  ;;  %v5606_v17 = vld [vmem:[%s7745_s1 + $0xbd0] ss:$8 sps:$4 sm:$0xff]  }
  0xc6   : > { %1969 = vmatmul.mubr.bf16.vlgmr.msra.gmra.mrb[8].mxu0 %v4548_v22  ;;  %v4813_v22 = vcombine.high %v6841_v14, %v6481_v18  ;;  %v5620_v18 = vld [vmem:[%s7745_s1 + $0xbf4] ss:$8 sps:$4 sm:$0xff]  }
  0xc7   : > { %2010 = vmatmul.mubr.bf16.vlgmr.msra.gmra.mrb[8].mxu1 %v4550_v23  ;;  %2019 = vmatpush1.bf16.msra.mxu0 %v5525_v20  ;;  %v5611_v20 = vld [vmem:[%s7745_s1 + $0xae4] ss:$8 sps:$4 sm:$0xff]   ;;  %v4815_v23 = vcombine.high %v6844_v15, %v6484_v19 }
  0xc8   : > { %2060 = vmatpush1.bf16.msra.mxu1 %v5528_v21  ;;  %2020 = vmatprep.subr.bf16.mxu0 %v5533_v26  ;;  %v5614_v21 = vld [vmem:[%s7745_s1 + $0xbe4] ss:$8 sps:$4 sm:$0xff]   ;;  %v5609_v26 = vld [vmem:[%s7745_s1 + $0xae0] ss:$8 sps:$4 sm:$0xff]   ;;  %v2289_v19 = vshll.u32 %v4813_v22, 16 }
  0xc9   : > { %2061 = vmatprep.subr.bf16.mxu1 %v5536_v27  ;;  %2050 = vmatprep.mubr.bf16.mxu0 %v4553_v28  ;;  %v5612_v27 = vld [vmem:[%s7745_s1 + $0xbe0] ss:$8 sps:$4 sm:$0xff]   ;;  %v5617_v28 = vld [vmem:[%s7745_s1 + $0xaf4] ss:$8 sps:$4 sm:$0xff]  }
  0xca   : > { %2091 = vmatprep.mubr.bf16.mxu1 %v4555_v29  ;;  %v2303_v29 = vshll.u32 %v4815_v23, 16 }
  0xcb   : > { %2021 = vmatpush1.bf16.msra.mxu0 %v5531_v30  ;;  %v5615_v30 = vld [vmem:[%s7745_s1 + $0xaf0] ss:$8 sps:$4 sm:$0xff]  }
  0xcc   : > { %2062 = vmatpush1.bf16.msra.mxu1 %v5534_v31  ;;  %2022 = vmatprep.subr.bf16.mxu0 %v5539_v32  ;;  %v5618_v31 = vld [vmem:[%s7745_s1 + $0xbf0] ss:$8 sps:$4 sm:$0xff]   ;;  %v5627_v32 = vld [vmem:[%s7745_s1 + $0x404] ss:$8 sps:$4 sm:$0xff]  }
  0xcd   : > { %2063 = vmatprep.subr.bf16.mxu1 %v5542_v33  ;;  %v5630_v33 = vld [vmem:[%s7745_s1 + $0x504] ss:$8 sps:$4 sm:$0xff]  }
  0xcf   : > { %2023 = vmatpush1.bf16.msra.mxu0 %v5537_v34  ;;  %v2287_v34 = vshrl.u32 %v4813_v22, 16  ;;  %v5675_v22 = vld [vmem:[%s7745_s1 + $0x484] ss:$8 sps:$4 sm:$0xff]  }
  0xd0   : > { %2064 = vmatpush1.bf16.msra.mxu1 %v5540_v35  ;;  %2024 = vmatprep.subr.bf16.mxu0 %v5545_v36  ;;  %v2291_v35 = vrot.slane %v2289_v19, 1  ;;  %v2301_v36 = vshrl.u32 %v4815_v23, 16  ;;  %v5678_v23 = vld [vmem:[%s7745_s1 + $0x584] ss:$8 sps:$4 sm:$0xff]   ;;  %v5679_v19 = vld [vmem:[%s7745_s1 + $0x490] ss:$8 sps:$4 sm:$0xff]  }
  0xd1   : > { %2065 = vmatprep.subr.bf16.mxu1 %v5548_v37  ;;  %v2305_v37 = vrot.slane %v2303_v29, 1  ;;  %v5682_v29 = vld [vmem:[%s7745_s1 + $0x590] ss:$8 sps:$4 sm:$0xff]  }
  0xd3   : > { %2025 = vmatpush1.bf16.msra.mxu0 %v5543_v38  ;;  %v4552_v38 = vcombine.low %v6681_v24, %v6681_v24 }
  0xd4   : > { %2066 = vmatpush1.bf16.msra.mxu1 %v5546_v39  ;;  %2026 = vmatprep.subr.bf16.mxu0 %v5551_v40  ;;  %v4554_v39 = vcombine.low %v6684_v25, %v6684_v25  ;;  %v5625_v40 = vld [vmem:[%s7745_s1 + $0x400] ss:$8 sps:$4 sm:$0xff]  }
  0xd5   : > { %2067 = vmatprep.subr.bf16.mxu1 %v5554_v41  ;;  %v5628_v41 = vld [vmem:[%s7745_s1 + $0x500] ss:$8 sps:$4 sm:$0xff]  }
  0xd7   : > { %2027 = vmatpush1.bf16.msra.mxu0 %v5549_v42  ;;  %v5633_v42 = vld [vmem:[%s7745_s1 + $0x414] ss:$8 sps:$4 sm:$0xff]  }
  0xd8   : > { %2068 = vmatpush1.bf16.msra.mxu1 %v5552_v43  ;;  %2028 = vmatprep.subr.bf16.mxu0 %v5557_v44  ;;  %v5636_v43 = vld [vmem:[%s7745_s1 + $0x514] ss:$8 sps:$4 sm:$0xff]   ;;  %v2292_v44 = vor.u32 %v2291_v35, %v2287_v34 }
  0xd9   : > { %2069 = vmatprep.subr.bf16.mxu1 %v5560_v45  ;;  %v2306_v45 = vor.u32 %v2305_v37, %v2301_v36  ;;  %v5693_v34 = vld [vmem:[%s7745_s1 + $0x4b4] ss:$8 sps:$4 sm:$0xff]   ;;  %v5691_v36 = vld [vmem:[%s7745_s1 + $0x4b0] ss:$8 sps:$4 sm:$0xff]  }
  0xda   : > { %v5696_v35 = vld [vmem:[%s7745_s1 + $0x5b4] ss:$8 sps:$4 sm:$0xff]   ;;  %v5694_v37 = vld [vmem:[%s7745_s1 + $0x5b0] ss:$8 sps:$4 sm:$0xff]  }
  0xdb   : > { %2029 = vmatpush1.bf16.msra.mxu0 %v5555_v46  ;;  %v5631_v46 = vld [vmem:[%s7745_s1 + $0x410] ss:$8 sps:$4 sm:$0xff]  }
  0xdc   : > { %2070 = vmatpush1.bf16.msra.mxu1 %v5558_v47  ;;  %2030 = vmatprep.subr.bf16.mxu0 %v5563_v48  ;;  %v5634_v47 = vld [vmem:[%s7745_s1 + $0x510] ss:$8 sps:$4 sm:$0xff]   ;;  %v5639_v48 = vld [vmem:[%s7745_s1 + $0x424] ss:$8 sps:$4 sm:$0xff]  }
  0xdd   : > { %2071 = vmatprep.subr.bf16.mxu1 %v5566_v49  ;;  %v5642_v49 = vld [vmem:[%s7745_s1 + $0x524] ss:$8 sps:$4 sm:$0xff]  }
  0xdf   : > { %2031 = vmatpush1.bf16.msra.mxu0 %v5561_v50  ;;  %v5637_v50 = vld [vmem:[%s7745_s1 + $0x420] ss:$8 sps:$4 sm:$0xff]  }
  0xe0   : > { %2072 = vmatpush1.bf16.msra.mxu1 %v5564_v51  ;;  %2032 = vmatprep.subr.bf16.mxu0 %v5569_v52  ;;  %v5640_v51 = vld [vmem:[%s7745_s1 + $0x520] ss:$8 sps:$4 sm:$0xff]   ;;  %v5645_v52 = vld [vmem:[%s7745_s1 + $0x434] ss:$8 sps:$4 sm:$0xff]  }
  0xe1   : > { %2073 = vmatprep.subr.bf16.mxu1 %v5572_v53  ;;  %v5648_v53 = vld [vmem:[%s7745_s1 + $0x534] ss:$8 sps:$4 sm:$0xff]  }
  0xe3   : > { %2033 = vmatpush1.bf16.msra.mxu0 %v5567_v54  ;;  %v5643_v54 = vld [vmem:[%s7745_s1 + $0x430] ss:$8 sps:$4 sm:$0xff]  }
  0xe4   : > { %2074 = vmatpush1.bf16.msra.mxu1 %v5570_v55  ;;  %2034 = vmatprep.subr.bf16.mxu0 %v5575_v56  ;;  %v5646_v55 = vld [vmem:[%s7745_s1 + $0x530] ss:$8 sps:$4 sm:$0xff]   ;;  %v5651_v56 = vld [vmem:[%s7745_s1 + $0x444] ss:$8 sps:$4 sm:$0xff]  }
  0xe5   : > { %2075 = vmatprep.subr.bf16.mxu1 %v5578_v57  ;;  %v5654_v57 = vld [vmem:[%s7745_s1 + $0x544] ss:$8 sps:$4 sm:$0xff]  }
  0xe7   : > { %2035 = vmatpush1.bf16.msra.mxu0 %v5573_v58  ;;  %v5649_v58 = vld [vmem:[%s7745_s1 + $0x440] ss:$8 sps:$4 sm:$0xff]  }
  0xe8   : > { %2076 = vmatpush1.bf16.msra.mxu1 %v5576_v59  ;;  %2036 = vmatprep.subr.bf16.mxu0 %v5581_v60  ;;  %v5652_v59 = vld [vmem:[%s7745_s1 + $0x540] ss:$8 sps:$4 sm:$0xff]   ;;  %v5657_v60 = vld [vmem:[%s7745_s1 + $0x454] ss:$8 sps:$4 sm:$0xff]  }
  0xe9   : > { %2077 = vmatprep.subr.bf16.mxu1 %v5584_v61  ;;  %v5660_v61 = vld [vmem:[%s7745_s1 + $0x554] ss:$8 sps:$4 sm:$0xff]  }
  0xeb   : > { %2037 = vmatpush1.bf16.msra.mxu0 %v5579_v62  ;;  %v5655_v62 = vld [vmem:[%s7745_s1 + $0x450] ss:$8 sps:$4 sm:$0xff]  }
  0xec   : > { %2078 = vmatpush1.bf16.msra.mxu1 %v5582_v63  ;;  %2038 = vmatprep.subr.bf16.mxu0 %v5587_v0  ;;  %v5658_v63 = vld [vmem:[%s7745_s1 + $0x550] ss:$8 sps:$4 sm:$0xff]   ;;  %v5663_v0 = vld [vmem:[%s7745_s1 + $0x464] ss:$8 sps:$4 sm:$0xff]  }
  0xed   : > { %2079 = vmatprep.subr.bf16.mxu1 %v5590_v1  ;;  %v5666_v1 = vld [vmem:[%s7745_s1 + $0x564] ss:$8 sps:$4 sm:$0xff]  }
  0xef   : > { %2039 = vmatpush1.bf16.msra.mxu0 %v5585_v2 }
  0xf0   : > { %2080 = vmatpush1.bf16.msra.mxu1 %v5588_v3  ;;  %2040 = vmatprep.subr.bf16.mxu0 %v5593_v4  ;;  %v5661_v4 = vld [vmem:[%s7745_s1 + $0x460] ss:$8 sps:$4 sm:$0xff]  }
  0xf1   : > { %2081 = vmatprep.subr.bf16.mxu1 %v5596_v5  ;;  %v5664_v5 = vld [vmem:[%s7745_s1 + $0x560] ss:$8 sps:$4 sm:$0xff]  }
  0xf3   : > { %2041 = vmatpush1.bf16.msra.mxu0 %v5591_v6 }
  0xf4   : > { %2082 = vmatpush1.bf16.msra.mxu1 %v5594_v7  ;;  %2042 = vmatprep.subr.bf16.mxu0 %v5599_v8 }
  0xf5   : > { %2083 = vmatprep.subr.bf16.mxu1 %v5602_v9 }
  0xf7   : > { %2043 = vmatpush1.bf16.msra.mxu0 %v5597_v10 }
  0xf8   : > { %2084 = vmatpush1.bf16.msra.mxu1 %v5600_v11  ;;  %2044 = vmatprep.subr.bf16.mxu0 %v5605_v12 }
  0xf9   : > { %2085 = vmatprep.subr.bf16.mxu1 %v5608_v13 }
  0xfb   : > { %2045 = vmatpush1.bf16.msra.mxu0 %v5603_v16  ;;  %v5669_v16 = vld [vmem:[%s7745_s1 + $0x474] ss:$8 sps:$4 sm:$0xff]  }
  0xfc   : > { %2086 = vmatpush1.bf16.msra.mxu1 %v5606_v17  ;;  %2046 = vmatprep.subr.bf16.mxu0 %v5611_v20  ;;  %v5672_v17 = vld [vmem:[%s7745_s1 + $0x574] ss:$8 sps:$4 sm:$0xff]   ;;  %v5667_v20 = vld [vmem:[%s7745_s1 + $0x470] ss:$8 sps:$4 sm:$0xff]  }
  0xfd   : > { %2087 = vmatprep.subr.bf16.mxu1 %v5614_v21  ;;  %v5670_v21 = vld [vmem:[%s7745_s1 + $0x570] ss:$8 sps:$4 sm:$0xff]  }
  0xff   : > { %2047 = vmatpush1.bf16.msra.mxu0 %v5609_v26  ;;  %v5673_v26 = vld [vmem:[%s7745_s1 + $0x480] ss:$8 sps:$4 sm:$0xff]  }
 0x100   : > { %2088 = vmatpush1.bf16.msra.mxu1 %v5612_v27  ;;  %2048 = vmatprep.subr.bf16.mxu0 %v5617_v28  ;;  %v5676_v27 = vld [vmem:[%s7745_s1 + $0x580] ss:$8 sps:$4 sm:$0xff]   ;;  %v5681_v28 = vld [vmem:[%s7745_s1 + $0x494] ss:$8 sps:$4 sm:$0xff]  }
 0x101   : > { %2089 = vmatprep.subr.bf16.mxu1 %v5620_v18  ;;  %v5684_v18 = vld [vmem:[%s7745_s1 + $0x594] ss:$8 sps:$4 sm:$0xff]  }
 0x103   : > { %2049 = vmatpush1.bf16.msra.mxu0 %v5615_v30  ;;  %v5687_v30 = vld [vmem:[%s7745_s1 + $0x4a4] ss:$8 sps:$4 sm:$0xff]  }
 0x104   : > { %2090 = vmatpush1.bf16.msra.mxu1 %v5618_v31  ;;  %2983 = vmatprep.subr.bf16.mxu0 %v5627_v32  ;;  %v5690_v31 = vld [vmem:[%s7745_s1 + $0x5a4] ss:$8 sps:$4 sm:$0xff]   ;;  %v5685_v32 = vld [vmem:[%s7745_s1 + $0x4a0] ss:$8 sps:$4 sm:$0xff]  }
 0x105   : > { %3024 = vmatprep.subr.bf16.mxu1 %v5630_v33  ;;  %v5688_v33 = vld [vmem:[%s7745_s1 + $0x5a0] ss:$8 sps:$4 sm:$0xff]  }
 0x106   : > { %2051 = vmatmul.mubr.bf16.vlgmr.msra.gmra.mrb[12].mxu0 %v4552_v38  ;;  %v5699_v38 = vld [vmem:[%s7745_s1 + $0x4c4] ss:$8 sps:$4 sm:$0xff]  }
 0x107   : > { %2092 = vmatmul.mubr.bf16.vlgmr.msra.gmra.mrb[12].mxu1 %v4554_v39  ;;  %2984 = vmatpush1.bf16.msra.mxu0 %v5625_v40  ;;  %v5702_v39 = vld [vmem:[%s7745_s1 + $0x5c4] ss:$8 sps:$4 sm:$0xff]   ;;  %v5697_v40 = vld [vmem:[%s7745_s1 + $0x4c0] ss:$8 sps:$4 sm:$0xff]  }
 0x108   : > { %3025 = vmatpush1.bf16.msra.mxu1 %v5628_v41  ;;  %2985 = vmatprep.subr.bf16.mxu0 %v5633_v42  ;;  %v5700_v41 = vld [vmem:[%s7745_s1 + $0x5c0] ss:$8 sps:$4 sm:$0xff]   ;;  %v5705_v42 = vld [vmem:[%s7745_s1 + $0x4d4] ss:$8 sps:$4 sm:$0xff]  }
 0x109   : > { %3026 = vmatprep.subr.bf16.mxu1 %v5636_v43  ;;  %3015 = vmatprep.mubr.bf16.mxu0 %v2292_v44  ;;  %v5708_v43 = vld [vmem:[%s7745_s1 + $0x5d4] ss:$8 sps:$4 sm:$0xff]  }
 0x10a   : > { %3056 = vmatprep.mubr.bf16.mxu1 %v2306_v45  ;;  %v7051_v44 = vld [vmem:[%s6192_s30 + $0x10] sm:$0xff]  ;;  %v7054_v45 = vld [vmem:[%s6192_s30 + $0x18] sm:$0xff] }
 0x10b   : > { %2986 = vmatpush1.bf16.msra.mxu0 %v5631_v46  ;;  %v7057_v46 = vld [vmem:[%s6192_s30 + $0x20] sm:$0xff] }
 0x10c   : > { %3027 = vmatpush1.bf16.msra.mxu1 %v5634_v47  ;;  %2987 = vmatprep.subr.bf16.mxu0 %v5639_v48  ;;  %v4812_v47 = vcombine.low %v6841_v14, %v7057_v46  ;;  %v7062_v48 = vld [vmem:[%s6192_s30 + $0x28] sm:$0xff] }
 0x10d   : > { %3028 = vmatprep.subr.bf16.mxu1 %v5642_v49  ;;  %v4814_v49 = vcombine.low %v6844_v15, %v7062_v48  ;;  %v5711_v14 = vld [vmem:[%s7745_s1 + $0x4e4] ss:$8 sps:$4 sm:$0xff]  }
 0x10e   : > { %v5714_v15 = vld [vmem:[%s7745_s1 + $0x5e4] ss:$8 sps:$4 sm:$0xff]  }
 0x10f   : > { %2988 = vmatpush1.bf16.msra.mxu0 %v5637_v50  ;;  %v5703_v50 = vld [vmem:[%s7745_s1 + $0x4d0] ss:$8 sps:$4 sm:$0xff]  }
 0x110   : > { %3029 = vmatpush1.bf16.msra.mxu1 %v5640_v51  ;;  %2989 = vmatprep.subr.bf16.mxu0 %v5645_v52  ;;  %v5706_v51 = vld [vmem:[%s7745_s1 + $0x5d0] ss:$8 sps:$4 sm:$0xff]   ;;  %v4817_v52 = vcombine.high %v7051_v44, %v6681_v24  ;;  %v5717_v24 = vld [vmem:[%s7745_s1 + $0x4f4] ss:$8 sps:$4 sm:$0xff]  }
 0x111   : > { %3030 = vmatprep.subr.bf16.mxu1 %v5648_v53  ;;  %v4819_v53 = vcombine.high %v7054_v45, %v6684_v25  ;;  %v5720_v25 = vld [vmem:[%s7745_s1 + $0x5f4] ss:$8 sps:$4 sm:$0xff]  }
 0x113   : > { %2990 = vmatpush1.bf16.msra.mxu0 %v5643_v54  ;;  %v2282_v54 = vshll.u32 %v4812_v47, 16 }
 0x114   : > { %3031 = vmatpush1.bf16.msra.mxu1 %v5646_v55  ;;  %2991 = vmatprep.subr.bf16.mxu0 %v5651_v56  ;;  %v2296_v55 = vshll.u32 %v4814_v49, 16  ;;  %v5709_v56 = vld [vmem:[%s7745_s1 + $0x4e0] ss:$8 sps:$4 sm:$0xff]  }
 0x115   : > { %3032 = vmatprep.subr.bf16.mxu1 %v5654_v57  ;;  %v5712_v57 = vld [vmem:[%s7745_s1 + $0x5e0] ss:$8 sps:$4 sm:$0xff]  }
 0x117   : > { %2992 = vmatpush1.bf16.msra.mxu0 %v5649_v58  ;;  %v2280_v58 = vshrl.u32 %v4812_v47, 16 }
 0x118   : > { %3033 = vmatpush1.bf16.msra.mxu1 %v5652_v59  ;;  %2993 = vmatprep.subr.bf16.mxu0 %v5657_v60  ;;  %v2317_v59 = vshll.u32 %v4817_v52, 16  ;;  %v2331_v60 = vshll.u32 %v4819_v53, 16 }
 0x119   : > { %3034 = vmatprep.subr.bf16.mxu1 %v5660_v61  ;;  %v1007_v2 = vpop.f32.mrb[0].mxu0  ;;  %v2284_v61 = vrot.slane %v2282_v54, 1 }
 0x11a   : > { %v1048_v3 = vpop.f32.mrb[0].mxu1  ;;  %v1009_v7 = vpop.f32.mrb[1].mxu0 }
 0x11b   : > { %v6968_v6 = vadd.f32 %v1048_v3, %v1007_v2  ;;  %v1050_v8 = vpop.f32.mrb[1].mxu1  ;;  %v1011_v10 = vpop.f32.mrb[2].mxu0  ;;  %2994 = vmatpush1.bf16.msra.mxu0 %v5655_v62  ;;  %v2294_v62 = vshrl.u32 %v4814_v49, 16  ;;  %v5723_v2 = vld [vmem:[%s7745_s1 + $0x604] ss:$8 sps:$4 sm:$0xff]  }
 0x11c   : > { %v6970_v9 = vadd.f32 %v1050_v8, %v1009_v7  ;;  %v1052_v11 = vpop.f32.mrb[2].mxu1  ;;  %3035 = vmatpush1.bf16.msra.mxu1 %v5658_v63  ;;  %v1012_v12 = vpop.f32.mrb[3].mxu0  ;;  %2995 = vmatprep.subr.bf16.mxu0 %v5663_v0  ;;  %v2298_v63 = vrot.slane %v2296_v55, 1  ;;  %v5715_v0 = vld [vmem:[%s7745_s1 + $0x4f0] ss:$8 sps:$4 sm:$0xff]   ;;  %v2319_v7 = vrot.slane %v2317_v59, 1 }
 0x11d   : > { %v1053_v13 = vpop.f32.mrb[3].mxu1  ;;  %3036 = vmatprep.subr.bf16.mxu1 %v5666_v1  ;;  %v5718_v1 = vld [vmem:[%s7745_s1 + $0x5f0] ss:$8 sps:$4 sm:$0xff]   ;;  %v5726_v3 = vld [vmem:[%s7745_s1 + $0x704] ss:$8 sps:$4 sm:$0xff]   ;;  %v2329_v8 = vshrl.u32 %v4819_v53, 16  ;;  %v2285_v11 = vor.u32 %v2284_v61, %v2280_v58 }
 0x11e   : > { %v2333_v10 = vrot.slane %v2331_v60, 1  ;;  %v2299_v12 = vor.u32 %v2298_v63, %v2294_v62  ;;  %v5724_v13 = vld [vmem:[%s7745_s1 + $0x700] ss:$8 sps:$4 sm:$0xff]   ;;  %v5771_v58 = vld [vmem:[%s7745_s1 + $0x684] ss:$8 sps:$4 sm:$0xff]  }
 0x11f   : > { %2996 = vmatpush1.bf16.msra.mxu0 %v5661_v4  ;;  %v5721_v4 = vld [vmem:[%s7745_s1 + $0x600] ss:$8 sps:$4 sm:$0xff]   ;;  %v5774_v59 = vld [vmem:[%s7745_s1 + $0x784] ss:$8 sps:$4 sm:$0xff]   ;;  %v5777_v62 = vld [vmem:[%s7745_s1 + $0x694] ss:$8 sps:$4 sm:$0xff]  }
 0x120   : > { %3037 = vmatpush1.bf16.msra.mxu1 %v5664_v5  ;;  %2997 = vmatprep.subr.bf16.mxu0 %v5669_v16  ;;  %v2315_v5 = vshrl.u32 %v4817_v52, 16  ;;  %v5729_v16 = vld [vmem:[%s7745_s1 + $0x614] ss:$8 sps:$4 sm:$0xff]   ;;  %v5757_v52 = vld [vmem:[%s7745_s1 + $0x660] ss:$8 sps:$4 sm:$0xff]  }
 0x121   : > { %3038 = vmatprep.subr.bf16.mxu1 %v5672_v17  ;;  %v5732_v17 = vld [vmem:[%s7745_s1 + $0x714] ss:$8 sps:$4 sm:$0xff]   ;;  %v5760_v53 = vld [vmem:[%s7745_s1 + $0x760] ss:$8 sps:$4 sm:$0xff]  }
 0x122   : > { %v5769_v60 = vld [vmem:[%s7745_s1 + $0x680] ss:$8 sps:$4 sm:$0xff]   ;;  %v5780_v63 = vld [vmem:[%s7745_s1 + $0x794] ss:$8 sps:$4 sm:$0xff]  }
 0x123   : > { %2998 = vmatpush1.bf16.msra.mxu0 %v5667_v20  ;;  %v2320_v20 = vor.u32 %v2319_v7, %v2315_v5  ;;  %v5772_v61 = vld [vmem:[%s7745_s1 + $0x780] ss:$8 sps:$4 sm:$0xff]   ;;  %v5789_v7 = vld [vmem:[%s7745_s1 + $0x6b4] ss:$8 sps:$4 sm:$0xff]  }
 0x124   : > { %3039 = vmatpush1.bf16.msra.mxu1 %v5670_v21  ;;  %2999 = vmatprep.subr.bf16.mxu0 %v5675_v22  ;;  %v2334_v21 = vor.u32 %v2333_v10, %v2329_v8  ;;  %v5727_v22 = vld [vmem:[%s7745_s1 + $0x610] ss:$8 sps:$4 sm:$0xff]   ;;  %v5784_v5 = vld [vmem:[%s7745_s1 + $0x7a0] ss:$8 sps:$4 sm:$0xff]   ;;  %v5792_v8 = vld [vmem:[%s7745_s1 + $0x7b4] ss:$8 sps:$4 sm:$0xff]  }
 0x125   : > { %3040 = vmatprep.subr.bf16.mxu1 %v5678_v23  ;;  %v5730_v23 = vld [vmem:[%s7745_s1 + $0x710] ss:$8 sps:$4 sm:$0xff]  }
 0x126   : > { %v5787_v10 = vld [vmem:[%s7745_s1 + $0x6b0] ss:$8 sps:$4 sm:$0xff]  }
 0x127   : > { %3000 = vmatpush1.bf16.msra.mxu0 %v5673_v26  ;;  %v5735_v26 = vld [vmem:[%s7745_s1 + $0x624] ss:$8 sps:$4 sm:$0xff]  }
 0x128   : > { %3041 = vmatpush1.bf16.msra.mxu1 %v5676_v27  ;;  %3001 = vmatprep.subr.bf16.mxu0 %v5681_v28  ;;  %v5738_v27 = vld [vmem:[%s7745_s1 + $0x724] ss:$8 sps:$4 sm:$0xff]   ;;  %v5733_v28 = vld [vmem:[%s7745_s1 + $0x620] ss:$8 sps:$4 sm:$0xff]  }
 0x129   : > { %3042 = vmatprep.subr.bf16.mxu1 %v5684_v18  ;;  %v5736_v18 = vld [vmem:[%s7745_s1 + $0x720] ss:$8 sps:$4 sm:$0xff]  }
 0x12b   : > { %3002 = vmatpush1.bf16.msra.mxu0 %v5679_v19  ;;  %v5741_v19 = vld [vmem:[%s7745_s1 + $0x634] ss:$8 sps:$4 sm:$0xff]  }
 0x12c   : > { %3043 = vmatpush1.bf16.msra.mxu1 %v5682_v29  ;;  %3003 = vmatprep.subr.bf16.mxu0 %v5687_v30  ;;  %v5744_v29 = vld [vmem:[%s7745_s1 + $0x734] ss:$8 sps:$4 sm:$0xff]   ;;  %v5739_v30 = vld [vmem:[%s7745_s1 + $0x630] ss:$8 sps:$4 sm:$0xff]  }
 0x12d   : > { %3044 = vmatprep.subr.bf16.mxu1 %v5690_v31  ;;  %v5742_v31 = vld [vmem:[%s7745_s1 + $0x730] ss:$8 sps:$4 sm:$0xff]  }
 0x12f   : > { %3004 = vmatpush1.bf16.msra.mxu0 %v5685_v32  ;;  %v5747_v32 = vld [vmem:[%s7745_s1 + $0x644] ss:$8 sps:$4 sm:$0xff]  }
 0x130   : > { %3045 = vmatpush1.bf16.msra.mxu1 %v5688_v33  ;;  %3005 = vmatprep.subr.bf16.mxu0 %v5693_v34  ;;  %v5750_v33 = vld [vmem:[%s7745_s1 + $0x744] ss:$8 sps:$4 sm:$0xff]   ;;  %v5745_v34 = vld [vmem:[%s7745_s1 + $0x640] ss:$8 sps:$4 sm:$0xff]  }
 0x131   : > { %3046 = vmatprep.subr.bf16.mxu1 %v5696_v35  ;;  %v5748_v35 = vld [vmem:[%s7745_s1 + $0x740] ss:$8 sps:$4 sm:$0xff]  }
 0x133   : > { %3006 = vmatpush1.bf16.msra.mxu0 %v5691_v36  ;;  %v5753_v36 = vld [vmem:[%s7745_s1 + $0x654] ss:$8 sps:$4 sm:$0xff]  }
 0x134   : > { %3047 = vmatpush1.bf16.msra.mxu1 %v5694_v37  ;;  %3007 = vmatprep.subr.bf16.mxu0 %v5699_v38  ;;  %v5756_v37 = vld [vmem:[%s7745_s1 + $0x754] ss:$8 sps:$4 sm:$0xff]   ;;  %v5751_v38 = vld [vmem:[%s7745_s1 + $0x650] ss:$8 sps:$4 sm:$0xff]  }
 0x135   : > { %3048 = vmatprep.subr.bf16.mxu1 %v5702_v39  ;;  %v5754_v39 = vld [vmem:[%s7745_s1 + $0x750] ss:$8 sps:$4 sm:$0xff]  }
 0x137   : > { %3008 = vmatpush1.bf16.msra.mxu0 %v5697_v40  ;;  %v5759_v40 = vld [vmem:[%s7745_s1 + $0x664] ss:$8 sps:$4 sm:$0xff]  }
 0x138   : > { %3049 = vmatpush1.bf16.msra.mxu1 %v5700_v41  ;;  %3009 = vmatprep.subr.bf16.mxu0 %v5705_v42  ;;  %v5762_v41 = vld [vmem:[%s7745_s1 + $0x764] ss:$8 sps:$4 sm:$0xff]  }
 0x139   : > { %3050 = vmatprep.subr.bf16.mxu1 %v5708_v43 }
 0x13b   : > { %3010 = vmatpush1.bf16.msra.mxu0 %v5703_v50 }
 0x13c   : > { %3051 = vmatpush1.bf16.msra.mxu1 %v5706_v51  ;;  %3011 = vmatprep.subr.bf16.mxu0 %v5711_v14 }
 0x13d   : > { %3052 = vmatprep.subr.bf16.mxu1 %v5714_v15 }
 0x13f   : > { %3012 = vmatpush1.bf16.msra.mxu0 %v5709_v56  ;;  %v5768_v56 = vld [vmem:[%s7745_s1 + $0x774] ss:$8 sps:$4 sm:$0xff]  }
 0x140   : > { %3053 = vmatpush1.bf16.msra.mxu1 %v5712_v57  ;;  %3013 = vmatprep.subr.bf16.mxu0 %v5717_v24  ;;  %v5763_v24 = vld [vmem:[%s7745_s1 + $0x670] ss:$8 sps:$4 sm:$0xff]  }
 0x141   : > { %3054 = vmatprep.subr.bf16.mxu1 %v5720_v25  ;;  %v5766_v25 = vld [vmem:[%s7745_s1 + $0x770] ss:$8 sps:$4 sm:$0xff]  }
 0x143   : > { %3014 = vmatpush1.bf16.msra.mxu0 %v5715_v0  ;;  %v5775_v0 = vld [vmem:[%s7745_s1 + $0x690] ss:$8 sps:$4 sm:$0xff]  }
 0x144   : > { %3055 = vmatpush1.bf16.msra.mxu1 %v5718_v1  ;;  %3065 = vmatprep.subr.bf16.mxu0 %v5723_v2  ;;  %v5778_v1 = vld [vmem:[%s7745_s1 + $0x790] ss:$8 sps:$4 sm:$0xff]   ;;  %v5783_v2 = vld [vmem:[%s7745_s1 + $0x6a4] ss:$8 sps:$4 sm:$0xff]  }
 0x145   : > { %3106 = vmatprep.subr.bf16.mxu1 %v5726_v3  ;;  %v5786_v3 = vld [vmem:[%s7745_s1 + $0x7a4] ss:$8 sps:$4 sm:$0xff]  }
 0x146   : > { %3016 = vmatmul.mubr.bf16.vlgmr.msra.gmra.mrb[16].mxu0 %v2285_v11  ;;  %v5790_v11 = vld [vmem:[%s7745_s1 + $0x7b0] ss:$8 sps:$4 sm:$0xff]  }
 0x147   : > { %3057 = vmatmul.mubr.bf16.vlgmr.msra.gmra.mrb[16].mxu1 %v2299_v12  ;;  %3066 = vmatpush1.bf16.msra.mxu0 %v5721_v4  ;;  %v5781_v4 = vld [vmem:[%s7745_s1 + $0x6a0] ss:$8 sps:$4 sm:$0xff]   ;;  %v5795_v12 = vld [vmem:[%s7745_s1 + $0x6c4] ss:$8 sps:$4 sm:$0xff]  }
 0x148   : > { %3107 = vmatpush1.bf16.msra.mxu1 %v5724_v13  ;;  %3067 = vmatprep.subr.bf16.mxu0 %v5729_v16  ;;  %v5798_v13 = vld [vmem:[%s7745_s1 + $0x7c4] ss:$8 sps:$4 sm:$0xff]   ;;  %v5793_v16 = vld [vmem:[%s7745_s1 + $0x6c0] ss:$8 sps:$4 sm:$0xff]  }
 0x149   : > { %3108 = vmatprep.subr.bf16.mxu1 %v5732_v17  ;;  %3097 = vmatprep.mubr.bf16.mxu0 %v2320_v20  ;;  %v5796_v17 = vld [vmem:[%s7745_s1 + $0x7c0] ss:$8 sps:$4 sm:$0xff]   ;;  %v5801_v20 = vld [vmem:[%s7745_s1 + $0x6d4] ss:$8 sps:$4 sm:$0xff]  }
 0x14a   : > { %3138 = vmatprep.mubr.bf16.mxu1 %v2334_v21  ;;  %v5804_v21 = vld [vmem:[%s7745_s1 + $0x7d4] ss:$8 sps:$4 sm:$0xff]  }
 0x14b   : > { %3068 = vmatpush1.bf16.msra.mxu0 %v5727_v22  ;;  %v7269_v22 = vld [vmem:[%s6192_s30 + $0x30] sm:$0xff] }
 0x14c   : > { %3109 = vmatpush1.bf16.msra.mxu1 %v5730_v23  ;;  %3069 = vmatprep.subr.bf16.mxu0 %v5735_v26  ;;  %v4816_v23 = vcombine.low %v7051_v44, %v7269_v22  ;;  %v7274_v26 = vld [vmem:[%s6192_s30 + $0x38] sm:$0xff]  ;;  %v5807_v44 = vld [vmem:[%s7745_s1 + $0x6e4] ss:$8 sps:$4 sm:$0xff]  }
 0x14d   : > { %3110 = vmatprep.subr.bf16.mxu1 %v5738_v27  ;;  %v4818_v27 = vcombine.low %v7054_v45, %v7274_v26  ;;  %v5810_v45 = vld [vmem:[%s7745_s1 + $0x7e4] ss:$8 sps:$4 sm:$0xff]  }
 0x14f   : > { %3070 = vmatpush1.bf16.msra.mxu0 %v5733_v28  ;;  %v7279_v28 = vld [vmem:[%s6192_s30 + $0x40] sm:$0x11] }
 0x150   : > { %3111 = vmatpush1.bf16.msra.mxu1 %v5736_v18  ;;  %3071 = vmatprep.subr.bf16.mxu0 %v5741_v19  ;;  %v7282_v18 = vld [vmem:[%s6192_s30 + $0x48] sm:$0x11]  ;;  %v5799_v19 = vld [vmem:[%s7745_s1 + $0x6d0] ss:$8 sps:$4 sm:$0xff]  }
 0x151   : > { %3112 = vmatprep.subr.bf16.mxu1 %v5744_v29  ;;  %v5802_v29 = vld [vmem:[%s7745_s1 + $0x7d0] ss:$8 sps:$4 sm:$0xff]  }
 0x153   : > { %3072 = vmatpush1.bf16.msra.mxu0 %v5739_v30  ;;  %v5077_v30 = vcombine.high %v7057_v46, %v7279_v28 }
 0x154   : > { %3113 = vmatpush1.bf16.msra.mxu1 %v5742_v31  ;;  %3073 = vmatprep.subr.bf16.mxu0 %v5747_v32  ;;  %v5079_v31 = vcombine.high %v7062_v48, %v7282_v18  ;;  %v2310_v32 = vshll.u32 %v4816_v23, 16 }
 0x155   : > { %3114 = vmatprep.subr.bf16.mxu1 %v5750_v33  ;;  %v2324_v33 = vshll.u32 %v4818_v27, 16 }
 0x157   : > { %3074 = vmatpush1.bf16.msra.mxu0 %v5745_v34  ;;  %v5805_v34 = vld [vmem:[%s7745_s1 + $0x6e0] ss:$8 sps:$4 sm:$0xff]  }
 0x158   : > { %3115 = vmatpush1.bf16.msra.mxu1 %v5748_v35  ;;  %3075 = vmatprep.subr.bf16.mxu0 %v5753_v36  ;;  %v5808_v35 = vld [vmem:[%s7745_s1 + $0x7e0] ss:$8 sps:$4 sm:$0xff]   ;;  %v5813_v36 = vld [vmem:[%s7745_s1 + $0x6f4] ss:$8 sps:$4 sm:$0xff]  }
 0x159   : > { %3116 = vmatprep.subr.bf16.mxu1 %v5756_v37  ;;  %v1089_v42 = vpop.f32.mrb[4].mxu0  ;;  %v5816_v37 = vld [vmem:[%s7745_s1 + $0x7f4] ss:$8 sps:$4 sm:$0xff]  }
 0x15a   : > { %v1130_v43 = vpop.f32.mrb[4].mxu1  ;;  %v1090_v47 = vadd.f32 %v1089_v42, %v6968_v6  ;;  %v1091_v49 = vpop.f32.mrb[5].mxu0  ;;  %v2322_v42 = vshrl.u32 %v4818_v27, 16 }
 0x15b   : > { %v1132_v50 = vpop.f32.mrb[5].mxu1  ;;  %v1092_v51 = vadd.f32 %v1091_v49, %v6970_v9  ;;  %v1093_v14 = vpop.f32.mrb[6].mxu0  ;;  %3076 = vmatpush1.bf16.msra.mxu0 %v5751_v38  ;;  %v5765_v9 = vld [vmem:[%s7745_s1 + $0x674] ss:$8 sps:$4 sm:$0xff]   ;;  %v3312_v38 = vshll.u32 %v5077_v30, 16 }
 0x15c   : > { %v1134_v15 = vpop.f32.mrb[6].mxu1  ;;  %3117 = vmatpush1.bf16.msra.mxu1 %v5754_v39  ;;  %v7186_v54 = vadd.f32 %v1130_v43, %v1090_v47  ;;  %v1094_v55 = vpop.f32.mrb[7].mxu0  ;;  %3077 = vmatprep.subr.bf16.mxu0 %v5759_v40  ;;  %v3326_v39 = vshll.u32 %v5079_v31, 16  ;;  %v2308_v40 = vshrl.u32 %v4816_v23, 16  ;;  %v2326_v43 = vrot.slane %v2324_v33, 1 }
 0x15d   : > { %v1135_v6 = vpop.f32.mrb[7].mxu1  ;;  %3118 = vmatprep.subr.bf16.mxu1 %v5762_v41  ;;  %v7194_v57 = vadd.f32 %v1132_v50, %v1092_v51  ;;  %v2312_v41 = vrot.slane %v2310_v32, 1  ;;  %v5811_v47 = vld [vmem:[%s7745_s1 + $0x6f0] ss:$8 sps:$4 sm:$0xff]   ;;  %v5819_v50 = vld [vmem:[%s7745_s1 + $0xc04] ss:$8 sps:$4 sm:$0xff]  }
 0x15e   : > { %v5814_v49 = vld [vmem:[%s7745_s1 + $0x7f0] ss:$8 sps:$4 sm:$0xff]   ;;  %v5822_v51 = vld [vmem:[%s7745_s1 + $0xd04] ss:$8 sps:$4 sm:$0xff]   ;;  %v3310_v14 = vshrl.u32 %v5077_v30, 16  ;;  %v3314_v15 = vrot.slane %v3312_v38, 1  ;;  %v2327_v6 = vor.u32 %v2326_v43, %v2322_v42 }
 0x15f   : > { %3078 = vmatpush1.bf16.msra.mxu0 %v5757_v52  ;;  %v3324_v52 = vshrl.u32 %v5079_v31, 16  ;;  %v2313_v55 = vor.u32 %v2312_v41, %v2308_v40  ;;  %v5853_v32 = vld [vmem:[%s7745_s1 + $0xc60] ss:$8 sps:$4 sm:$0xff]   ;;  %v5859_v38 = vld [vmem:[%s7745_s1 + $0xc70] ss:$8 sps:$4 sm:$0xff]  }
 0x160   : > { %3119 = vmatpush1.bf16.msra.mxu1 %v5760_v53  ;;  %3079 = vmatprep.subr.bf16.mxu0 %v5765_v9  ;;  %v3328_v53 = vrot.slane %v3326_v39, 1  ;;  %v5817_v9 = vld [vmem:[%s7745_s1 + $0xc00] ss:$8 sps:$4 sm:$0xff]   ;;  %v5862_v39 = vld [vmem:[%s7745_s1 + $0xd70] ss:$8 sps:$4 sm:$0xff]  }
 0x161   : > { %3120 = vmatprep.subr.bf16.mxu1 %v5768_v56  ;;  %v5820_v56 = vld [vmem:[%s7745_s1 + $0xd00] ss:$8 sps:$4 sm:$0xff]   ;;  %v5867_v40 = vld [vmem:[%s7745_s1 + $0xc84] ss:$8 sps:$4 sm:$0xff]  }
 0x162   : > { %v5856_v33 = vld [vmem:[%s7745_s1 + $0xd60] ss:$8 sps:$4 sm:$0xff]   ;;  %v5870_v41 = vld [vmem:[%s7745_s1 + $0xd84] ss:$8 sps:$4 sm:$0xff]  }
 0x163   : > { %3080 = vmatpush1.bf16.msra.mxu0 %v5763_v24  ;;  %v5825_v24 = vld [vmem:[%s7745_s1 + $0xc14] ss:$8 sps:$4 sm:$0xff]   ;;  %v5865_v42 = vld [vmem:[%s7745_s1 + $0xc80] ss:$8 sps:$4 sm:$0xff]  }
 0x164   : > { %3121 = vmatpush1.bf16.msra.mxu1 %v5766_v25  ;;  %3081 = vmatprep.subr.bf16.mxu0 %v5771_v58  ;;  %v5828_v25 = vld [vmem:[%s7745_s1 + $0xd14] ss:$8 sps:$4 sm:$0xff]   ;;  %v3315_v58 = vor.u32 %v3314_v15, %v3310_v14  ;;  %v5868_v43 = vld [vmem:[%s7745_s1 + $0xd80] ss:$8 sps:$4 sm:$0xff]   ;;  %v5879_v14 = vld [vmem:[%s7745_s1 + $0xca4] ss:$8 sps:$4 sm:$0xff]  }
 0x165   : > { %3122 = vmatprep.subr.bf16.mxu1 %v5774_v59  ;;  %v3329_v59 = vor.u32 %v3328_v53, %v3324_v52  ;;  %v5882_v15 = vld [vmem:[%s7745_s1 + $0xda4] ss:$8 sps:$4 sm:$0xff]   ;;  %v5877_v52 = vld [vmem:[%s7745_s1 + $0xca0] ss:$8 sps:$4 sm:$0xff]  }
 0x166   : > { %v5880_v53 = vld [vmem:[%s7745_s1 + $0xda0] ss:$8 sps:$4 sm:$0xff]  }
 0x167   : > { %3082 = vmatpush1.bf16.msra.mxu0 %v5769_v60  ;;  %v5823_v60 = vld [vmem:[%s7745_s1 + $0xc10] ss:$8 sps:$4 sm:$0xff]  }
 0x168   : > { %3123 = vmatpush1.bf16.msra.mxu1 %v5772_v61  ;;  %3083 = vmatprep.subr.bf16.mxu0 %v5777_v62  ;;  %v5826_v61 = vld [vmem:[%s7745_s1 + $0xd10] ss:$8 sps:$4 sm:$0xff]   ;;  %v5831_v62 = vld [vmem:[%s7745_s1 + $0xc24] ss:$8 sps:$4 sm:$0xff]  }
 0x169   : > { %3124 = vmatprep.subr.bf16.mxu1 %v5780_v63  ;;  %v5834_v63 = vld [vmem:[%s7745_s1 + $0xd24] ss:$8 sps:$4 sm:$0xff]  }
 0x16b   : > { %3084 = vmatpush1.bf16.msra.mxu0 %v5775_v0  ;;  %v5829_v0 = vld [vmem:[%s7745_s1 + $0xc20] ss:$8 sps:$4 sm:$0xff]  }
 0x16c   : > { %3125 = vmatpush1.bf16.msra.mxu1 %v5778_v1  ;;  %3085 = vmatprep.subr.bf16.mxu0 %v5783_v2  ;;  %v5832_v1 = vld [vmem:[%s7745_s1 + $0xd20] ss:$8 sps:$4 sm:$0xff]   ;;  %v5837_v2 = vld [vmem:[%s7745_s1 + $0xc34] ss:$8 sps:$4 sm:$0xff]  }
 0x16d   : > { %3126 = vmatprep.subr.bf16.mxu1 %v5786_v3  ;;  %v5840_v3 = vld [vmem:[%s7745_s1 + $0xd34] ss:$8 sps:$4 sm:$0xff]  }
 0x16f   : > { %3086 = vmatpush1.bf16.msra.mxu0 %v5781_v4  ;;  %v5835_v4 = vld [vmem:[%s7745_s1 + $0xc30] ss:$8 sps:$4 sm:$0xff]  }
 0x170   : > { %3127 = vmatpush1.bf16.msra.mxu1 %v5784_v5  ;;  %3087 = vmatprep.subr.bf16.mxu0 %v5789_v7  ;;  %v5838_v5 = vld [vmem:[%s7745_s1 + $0xd30] ss:$8 sps:$4 sm:$0xff]   ;;  %v5843_v7 = vld [vmem:[%s7745_s1 + $0xc44] ss:$8 sps:$4 sm:$0xff]  }
 0x171   : > { %3128 = vmatprep.subr.bf16.mxu1 %v5792_v8  ;;  %v5846_v8 = vld [vmem:[%s7745_s1 + $0xd44] ss:$8 sps:$4 sm:$0xff]  }
 0x173   : > { %3088 = vmatpush1.bf16.msra.mxu0 %v5787_v10  ;;  %v5841_v10 = vld [vmem:[%s7745_s1 + $0xc40] ss:$8 sps:$4 sm:$0xff]  }
 0x174   : > { %3129 = vmatpush1.bf16.msra.mxu1 %v5790_v11  ;;  %3089 = vmatprep.subr.bf16.mxu0 %v5795_v12  ;;  %v5844_v11 = vld [vmem:[%s7745_s1 + $0xd40] ss:$8 sps:$4 sm:$0xff]   ;;  %v5849_v12 = vld [vmem:[%s7745_s1 + $0xc54] ss:$8 sps:$4 sm:$0xff]  }
 0x175   : > { %3130 = vmatprep.subr.bf16.mxu1 %v5798_v13  ;;  %v5852_v13 = vld [vmem:[%s7745_s1 + $0xd54] ss:$8 sps:$4 sm:$0xff]  }
 0x177   : > { %3090 = vmatpush1.bf16.msra.mxu0 %v5793_v16  ;;  %v5847_v16 = vld [vmem:[%s7745_s1 + $0xc50] ss:$8 sps:$4 sm:$0xff]  }
 0x178   : > { %3131 = vmatpush1.bf16.msra.mxu1 %v5796_v17  ;;  %3091 = vmatprep.subr.bf16.mxu0 %v5801_v20  ;;  %v5850_v17 = vld [vmem:[%s7745_s1 + $0xd50] ss:$8 sps:$4 sm:$0xff]   ;;  %v5855_v20 = vld [vmem:[%s7745_s1 + $0xc64] ss:$8 sps:$4 sm:$0xff]  }
 0x179   : > { %3132 = vmatprep.subr.bf16.mxu1 %v5804_v21  ;;  %v5858_v21 = vld [vmem:[%s7745_s1 + $0xd64] ss:$8 sps:$4 sm:$0xff]  }
 0x17b   : > { %3092 = vmatpush1.bf16.msra.mxu0 %v5799_v19 }
 0x17c   : > { %3133 = vmatpush1.bf16.msra.mxu1 %v5802_v29  ;;  %3093 = vmatprep.subr.bf16.mxu0 %v5807_v44 }
 0x17d   : > { %3134 = vmatprep.subr.bf16.mxu1 %v5810_v45 }
 0x17f   : > { %3094 = vmatpush1.bf16.msra.mxu0 %v5805_v34 }
 0x180   : > { %3135 = vmatpush1.bf16.msra.mxu1 %v5808_v35  ;;  %3095 = vmatprep.subr.bf16.mxu0 %v5813_v36  ;;  %v5861_v36 = vld [vmem:[%s7745_s1 + $0xc74] ss:$8 sps:$4 sm:$0xff]  }
 0x181   : > { %3136 = vmatprep.subr.bf16.mxu1 %v5816_v37  ;;  %v5864_v37 = vld [vmem:[%s7745_s1 + $0xd74] ss:$8 sps:$4 sm:$0xff]  }
 0x183   : > { %3096 = vmatpush1.bf16.msra.mxu0 %v5811_v47  ;;  %v5873_v47 = vld [vmem:[%s7745_s1 + $0xc94] ss:$8 sps:$4 sm:$0xff]  }
 0x184   : > { %3137 = vmatpush1.bf16.msra.mxu1 %v5814_v49  ;;  %4006 = vmatprep.subr.bf16.mxu0 %v5819_v50  ;;  %v5876_v49 = vld [vmem:[%s7745_s1 + $0xd94] ss:$8 sps:$4 sm:$0xff]   ;;  %v5871_v50 = vld [vmem:[%s7745_s1 + $0xc90] ss:$8 sps:$4 sm:$0xff]  }
 0x185   : > { %4047 = vmatprep.subr.bf16.mxu1 %v5822_v51  ;;  %v5874_v51 = vld [vmem:[%s7745_s1 + $0xd90] ss:$8 sps:$4 sm:$0xff]  }
 0x186   : > { %3098 = vmatmul.mubr.bf16.vlgmr.msra.gmra.mrb[20].mxu0 %v2313_v55  ;;  %v5885_v55 = vld [vmem:[%s7745_s1 + $0xcb4] ss:$8 sps:$4 sm:$0xff]  }
 0x187   : > { %3139 = vmatmul.mubr.bf16.vlgmr.msra.gmra.mrb[20].mxu1 %v2327_v6  ;;  %4007 = vmatpush1.bf16.msra.mxu0 %v5817_v9  ;;  %v5888_v6 = vld [vmem:[%s7745_s1 + $0xdb4] ss:$8 sps:$4 sm:$0xff]   ;;  %v5883_v9 = vld [vmem:[%s7745_s1 + $0xcb0] ss:$8 sps:$4 sm:$0xff]  }
 0x188   : > { %4048 = vmatpush1.bf16.msra.mxu1 %v5820_v56  ;;  %4008 = vmatprep.subr.bf16.mxu0 %v5825_v24  ;;  %v5886_v56 = vld [vmem:[%s7745_s1 + $0xdb0] ss:$8 sps:$4 sm:$0xff]   ;;  %v5891_v24 = vld [vmem:[%s7745_s1 + $0xcc4] ss:$8 sps:$4 sm:$0xff]  }
 0x189   : > { %4049 = vmatprep.subr.bf16.mxu1 %v5828_v25  ;;  %4038 = vmatprep.mubr.bf16.mxu0 %v3315_v58  ;;  %v5894_v25 = vld [vmem:[%s7745_s1 + $0xdc4] ss:$8 sps:$4 sm:$0xff]   ;;  %v5889_v58 = vld [vmem:[%s7745_s1 + $0xcc0] ss:$8 sps:$4 sm:$0xff]  }
 0x18a   : > { %4079 = vmatprep.mubr.bf16.mxu1 %v3329_v59  ;;  %v5892_v59 = vld [vmem:[%s7745_s1 + $0xdc0] ss:$8 sps:$4 sm:$0xff]  }
 0x18b   : > { %4009 = vmatpush1.bf16.msra.mxu0 %v5823_v60  ;;  %v5897_v60 = vld [vmem:[%s7745_s1 + $0xcd4] ss:$8 sps:$4 sm:$0xff]  }
 0x18c   : > { %4050 = vmatpush1.bf16.msra.mxu1 %v5826_v61  ;;  %4010 = vmatprep.subr.bf16.mxu0 %v5831_v62  ;;  %v5900_v61 = vld [vmem:[%s7745_s1 + $0xdd4] ss:$8 sps:$4 sm:$0xff]   ;;  %v5076_v62 = vcombine.low %v7057_v46, %v7279_v28  ;;  %v5903_v46 = vld [vmem:[%s7745_s1 + $0xce4] ss:$8 sps:$4 sm:$0xff]  }
 0x18d   : > { %4051 = vmatprep.subr.bf16.mxu1 %v5834_v63  ;;  %v5078_v63 = vcombine.low %v7062_v48, %v7282_v18  ;;  %v5906_v48 = vld [vmem:[%s7745_s1 + $0xde4] ss:$8 sps:$4 sm:$0xff]  }
 0x18f   : > { %4011 = vmatpush1.bf16.msra.mxu0 %v5829_v0  ;;  %v7489_v0 = vld [vmem:[%s6192_s30 + $0x50] sm:$0x11] }
 0x190   : > { %4052 = vmatpush1.bf16.msra.mxu1 %v5832_v1  ;;  %4012 = vmatprep.subr.bf16.mxu0 %v5837_v2  ;;  %v7492_v1 = vld [vmem:[%s6192_s30 + $0x58] sm:$0x11]  ;;  %v5081_v28 = vcombine.high %v7269_v22, %v7489_v0 }
 0x191   : > { %4053 = vmatprep.subr.bf16.mxu1 %v5840_v3  ;;  %v5895_v2 = vld [vmem:[%s7745_s1 + $0xcd0] ss:$8 sps:$4 sm:$0xff]   ;;  %v5083_v18 = vcombine.high %v7274_v26, %v7492_v1 }
 0x192   : > { %v5898_v3 = vld [vmem:[%s7745_s1 + $0xdd0] ss:$8 sps:$4 sm:$0xff]  }
 0x193   : > { %4013 = vmatpush1.bf16.msra.mxu0 %v5835_v4  ;;  %v3305_v4 = vshll.u32 %v5076_v62, 16 }
 0x194   : > { %4054 = vmatpush1.bf16.msra.mxu1 %v5838_v5  ;;  %4014 = vmatprep.subr.bf16.mxu0 %v5843_v7  ;;  %v3319_v5 = vshll.u32 %v5078_v63, 16  ;;  %v5901_v7 = vld [vmem:[%s7745_s1 + $0xce0] ss:$8 sps:$4 sm:$0xff]  }
 0x195   : > { %4055 = vmatprep.subr.bf16.mxu1 %v5846_v8  ;;  %v5904_v8 = vld [vmem:[%s7745_s1 + $0xde0] ss:$8 sps:$4 sm:$0xff]  }
 0x197   : > { %4015 = vmatpush1.bf16.msra.mxu0 %v5841_v10  ;;  %v5909_v10 = vld [vmem:[%s7745_s1 + $0xcf4] ss:$8 sps:$4 sm:$0xff]  }
 0x198   : > { %4056 = vmatpush1.bf16.msra.mxu1 %v5844_v11  ;;  %4016 = vmatprep.subr.bf16.mxu0 %v5849_v12  ;;  %v5912_v11 = vld [vmem:[%s7745_s1 + $0xdf4] ss:$8 sps:$4 sm:$0xff]   ;;  %v3340_v12 = vshll.u32 %v5081_v28, 16 }
 0x199   : > { %4057 = vmatprep.subr.bf16.mxu1 %v5852_v13  ;;  %v1970_v23 = vpop.f32.mrb[8].mxu0  ;;  %v3354_v13 = vshll.u32 %v5083_v18, 16 }
 0x19a   : > { %v2011_v27 = vpop.f32.mrb[8].mxu1  ;;  %v1972_v29 = vpop.f32.mrb[9].mxu0 }
 0x19b   : > { %v7396_v19 = vadd.f32 %v2011_v27, %v1970_v23  ;;  %v2013_v44 = vpop.f32.mrb[9].mxu1  ;;  %v1974_v30 = vpop.f32.mrb[10].mxu0  ;;  %4017 = vmatpush1.bf16.msra.mxu0 %v5847_v16  ;;  %v3303_v16 = vshrl.u32 %v5076_v62, 16  ;;  %v5907_v23 = vld [vmem:[%s7745_s1 + $0xcf0] ss:$8 sps:$4 sm:$0xff]  }
 0x19c   : > { %v7398_v45 = vadd.f32 %v2013_v44, %v1972_v29  ;;  %v2015_v31 = vpop.f32.mrb[10].mxu1  ;;  %4058 = vmatpush1.bf16.msra.mxu1 %v5850_v17  ;;  %v1975_v34 = vpop.f32.mrb[11].mxu0  ;;  %4018 = vmatprep.subr.bf16.mxu0 %v5855_v20  ;;  %v3307_v17 = vrot.slane %v3305_v4, 1  ;;  %v3317_v20 = vshrl.u32 %v5078_v63, 16  ;;  %v5910_v27 = vld [vmem:[%s7745_s1 + $0xdf0] ss:$8 sps:$4 sm:$0xff]  }
 0x19d   : > { %v2016_v35 = vpop.f32.mrb[11].mxu1  ;;  %4059 = vmatprep.subr.bf16.mxu1 %v5858_v21  ;;  %v3321_v21 = vrot.slane %v3319_v5, 1  ;;  %v5915_v29 = vld [vmem:[%s7745_s1 + $0xe04] ss:$8 sps:$4 sm:$0xff]   ;;  %v3338_v30 = vshrl.u32 %v5081_v28, 16  ;;  %v3342_v31 = vrot.slane %v3340_v12, 1 }
 0x19e   : > { %v5918_v44 = vld [vmem:[%s7745_s1 + $0xf04] ss:$8 sps:$4 sm:$0xff]   ;;  %v3308_v34 = vor.u32 %v3307_v17, %v3303_v16  ;;  %v5949_v4 = vld [vmem:[%s7745_s1 + $0xe60] ss:$8 sps:$4 sm:$0xff]   ;;  %v5955_v16 = vld [vmem:[%s7745_s1 + $0xe70] ss:$8 sps:$4 sm:$0xff]  }
 0x19f   : > { %4019 = vmatpush1.bf16.msra.mxu0 %v5853_v32  ;;  %v3352_v32 = vshrl.u32 %v5083_v18, 16  ;;  %v3322_v35 = vor.u32 %v3321_v21, %v3317_v20  ;;  %v5952_v5 = vld [vmem:[%s7745_s1 + $0xf60] ss:$8 sps:$4 sm:$0xff]   ;;  %v5958_v17 = vld [vmem:[%s7745_s1 + $0xf70] ss:$8 sps:$4 sm:$0xff]  }
 0x1a0   : > { %4060 = vmatpush1.bf16.msra.mxu1 %v5856_v33  ;;  %4020 = vmatprep.subr.bf16.mxu0 %v5861_v36  ;;  %v3356_v33 = vrot.slane %v3354_v13, 1  ;;  %v5913_v36 = vld [vmem:[%s7745_s1 + $0xe00] ss:$8 sps:$4 sm:$0xff]  }
 0x1a1   : > { %4061 = vmatprep.subr.bf16.mxu1 %v5864_v37  ;;  %v5916_v37 = vld [vmem:[%s7745_s1 + $0xf00] ss:$8 sps:$4 sm:$0xff]  }
 0x1a2   : > { %v5961_v20 = vld [vmem:[%s7745_s1 + $0xe80] ss:$8 sps:$4 sm:$0xff]  }
 0x1a3   : > { %4021 = vmatpush1.bf16.msra.mxu0 %v5859_v38  ;;  %v5921_v38 = vld [vmem:[%s7745_s1 + $0xe14] ss:$8 sps:$4 sm:$0xff]   ;;  %v5964_v21 = vld [vmem:[%s7745_s1 + $0xf80] ss:$8 sps:$4 sm:$0xff]  }
 0x1a4   : > { %4062 = vmatpush1.bf16.msra.mxu1 %v5862_v39  ;;  %4022 = vmatprep.subr.bf16.mxu0 %v5867_v40  ;;  %v5924_v39 = vld [vmem:[%s7745_s1 + $0xf14] ss:$8 sps:$4 sm:$0xff]   ;;  %v3343_v40 = vor.u32 %v3342_v31, %v3338_v30  ;;  %v5975_v30 = vld [vmem:[%s7745_s1 + $0xea4] ss:$8 sps:$4 sm:$0xff]  }
 0x1a5   : > { %4063 = vmatprep.subr.bf16.mxu1 %v5870_v41  ;;  %v3357_v41 = vor.u32 %v3356_v33, %v3352_v32  ;;  %v5978_v31 = vld [vmem:[%s7745_s1 + $0xfa4] ss:$8 sps:$4 sm:$0xff]   ;;  %v5973_v32 = vld [vmem:[%s7745_s1 + $0xea0] ss:$8 sps:$4 sm:$0xff]  }
 0x1a6   : > { %v5976_v33 = vld [vmem:[%s7745_s1 + $0xfa0] ss:$8 sps:$4 sm:$0xff]  }
 0x1a7   : > { %4023 = vmatpush1.bf16.msra.mxu0 %v5865_v42  ;;  %v5919_v42 = vld [vmem:[%s7745_s1 + $0xe10] ss:$8 sps:$4 sm:$0xff]  }
 0x1a8   : > { %4064 = vmatpush1.bf16.msra.mxu1 %v5868_v43  ;;  %4024 = vmatprep.subr.bf16.mxu0 %v5873_v47  ;;  %v5922_v43 = vld [vmem:[%s7745_s1 + $0xf10] ss:$8 sps:$4 sm:$0xff]   ;;  %v5927_v47 = vld [vmem:[%s7745_s1 + $0xe24] ss:$8 sps:$4 sm:$0xff]  }
 0x1a9   : > { %4065 = vmatprep.subr.bf16.mxu1 %v5876_v49  ;;  %v5930_v49 = vld [vmem:[%s7745_s1 + $0xf24] ss:$8 sps:$4 sm:$0xff]  }
 0x1ab   : > { %4025 = vmatpush1.bf16.msra.mxu0 %v5871_v50  ;;  %v5925_v50 = vld [vmem:[%s7745_s1 + $0xe20] ss:$8 sps:$4 sm:$0xff]  }
 0x1ac   : > { %4066 = vmatpush1.bf16.msra.mxu1 %v5874_v51  ;;  %4026 = vmatprep.subr.bf16.mxu0 %v5879_v14  ;;  %v5928_v51 = vld [vmem:[%s7745_s1 + $0xf20] ss:$8 sps:$4 sm:$0xff]   ;;  %v5933_v14 = vld [vmem:[%s7745_s1 + $0xe34] ss:$8 sps:$4 sm:$0xff]  }
 0x1ad   : > { %4067 = vmatprep.subr.bf16.mxu1 %v5882_v15  ;;  %v5936_v15 = vld [vmem:[%s7745_s1 + $0xf34] ss:$8 sps:$4 sm:$0xff]  }
 0x1af   : > { %4027 = vmatpush1.bf16.msra.mxu0 %v5877_v52  ;;  %v5931_v52 = vld [vmem:[%s7745_s1 + $0xe30] ss:$8 sps:$4 sm:$0xff]  }
 0x1b0   : > { %4068 = vmatpush1.bf16.msra.mxu1 %v5880_v53  ;;  %4028 = vmatprep.subr.bf16.mxu0 %v5885_v55  ;;  %v5934_v53 = vld [vmem:[%s7745_s1 + $0xf30] ss:$8 sps:$4 sm:$0xff]   ;;  %v5939_v55 = vld [vmem:[%s7745_s1 + $0xe44] ss:$8 sps:$4 sm:$0xff]  }
 0x1b1   : > { %4069 = vmatprep.subr.bf16.mxu1 %v5888_v6  ;;  %v5942_v6 = vld [vmem:[%s7745_s1 + $0xf44] ss:$8 sps:$4 sm:$0xff]  }
 0x1b3   : > { %4029 = vmatpush1.bf16.msra.mxu0 %v5883_v9  ;;  %v5937_v9 = vld [vmem:[%s7745_s1 + $0xe40] ss:$8 sps:$4 sm:$0xff]  }
 0x1b4   : > { %4070 = vmatpush1.bf16.msra.mxu1 %v5886_v56  ;;  %4030 = vmatprep.subr.bf16.mxu0 %v5891_v24  ;;  %v5940_v56 = vld [vmem:[%s7745_s1 + $0xf40] ss:$8 sps:$4 sm:$0xff]   ;;  %v5945_v24 = vld [vmem:[%s7745_s1 + $0xe54] ss:$8 sps:$4 sm:$0xff]  }
 0x1b5   : > { %4071 = vmatprep.subr.bf16.mxu1 %v5894_v25  ;;  %v5948_v25 = vld [vmem:[%s7745_s1 + $0xf54] ss:$8 sps:$4 sm:$0xff]  }
 0x1b7   : > { %4031 = vmatpush1.bf16.msra.mxu0 %v5889_v58  ;;  %v5943_v58 = vld [vmem:[%s7745_s1 + $0xe50] ss:$8 sps:$4 sm:$0xff]  }
 0x1b8   : > { %4072 = vmatpush1.bf16.msra.mxu1 %v5892_v59  ;;  %4032 = vmatprep.subr.bf16.mxu0 %v5897_v60  ;;  %v5946_v59 = vld [vmem:[%s7745_s1 + $0xf50] ss:$8 sps:$4 sm:$0xff]   ;;  %v5951_v60 = vld [vmem:[%s7745_s1 + $0xe64] ss:$8 sps:$4 sm:$0xff]  }
 0x1b9   : > { %4073 = vmatprep.subr.bf16.mxu1 %v5900_v61  ;;  %v5954_v61 = vld [vmem:[%s7745_s1 + $0xf64] ss:$8 sps:$4 sm:$0xff]  }
 0x1bb   : > { %4033 = vmatpush1.bf16.msra.mxu0 %v5895_v2 }
 0x1bc   : > { %4074 = vmatpush1.bf16.msra.mxu1 %v5898_v3  ;;  %4034 = vmatprep.subr.bf16.mxu0 %v5903_v46 }
 0x1bd   : > { %4075 = vmatprep.subr.bf16.mxu1 %v5906_v48 }
 0x1bf   : > { %4035 = vmatpush1.bf16.msra.mxu0 %v5901_v7 }
 0x1c0   : > { %4076 = vmatpush1.bf16.msra.mxu1 %v5904_v8  ;;  %4036 = vmatprep.subr.bf16.mxu0 %v5909_v10 }
 0x1c1   : > { %4077 = vmatprep.subr.bf16.mxu1 %v5912_v11 }
 0x1c3   : > { %4037 = vmatpush1.bf16.msra.mxu0 %v5907_v23  ;;  %v5969_v23 = vld [vmem:[%s7745_s1 + $0xe94] ss:$8 sps:$4 sm:$0xff]  }
 0x1c4   : > { %4078 = vmatpush1.bf16.msra.mxu1 %v5910_v27  ;;  %4088 = vmatprep.subr.bf16.mxu0 %v5915_v29  ;;  %v5972_v27 = vld [vmem:[%s7745_s1 + $0xf94] ss:$8 sps:$4 sm:$0xff]   ;;  %v5967_v29 = vld [vmem:[%s7745_s1 + $0xe90] ss:$8 sps:$4 sm:$0xff]  }
 0x1c5   : > { %4129 = vmatprep.subr.bf16.mxu1 %v5918_v44  ;;  %v5970_v44 = vld [vmem:[%s7745_s1 + $0xf90] ss:$8 sps:$4 sm:$0xff]  }
 0x1c6   : > { %4039 = vmatmul.mubr.bf16.vlgmr.msra.gmra.mrb[24].mxu0 %v3308_v34  ;;  %v5981_v34 = vld [vmem:[%s7745_s1 + $0xeb4] ss:$8 sps:$4 sm:$0xff]  }
 0x1c7   : > { %4080 = vmatmul.mubr.bf16.vlgmr.msra.gmra.mrb[24].mxu1 %v3322_v35  ;;  %4089 = vmatpush1.bf16.msra.mxu0 %v5913_v36  ;;  %v5984_v35 = vld [vmem:[%s7745_s1 + $0xfb4] ss:$8 sps:$4 sm:$0xff]   ;;  %v5979_v36 = vld [vmem:[%s7745_s1 + $0xeb0] ss:$8 sps:$4 sm:$0xff]  }
 0x1c8   : > { %4130 = vmatpush1.bf16.msra.mxu1 %v5916_v37  ;;  %4090 = vmatprep.subr.bf16.mxu0 %v5921_v38  ;;  %v5982_v37 = vld [vmem:[%s7745_s1 + $0xfb0] ss:$8 sps:$4 sm:$0xff]   ;;  %v5987_v38 = vld [vmem:[%s7745_s1 + $0xec4] ss:$8 sps:$4 sm:$0xff]  }
 0x1c9   : > { %4131 = vmatprep.subr.bf16.mxu1 %v5924_v39  ;;  %4120 = vmatprep.mubr.bf16.mxu0 %v3343_v40  ;;  %v5990_v39 = vld [vmem:[%s7745_s1 + $0xfc4] ss:$8 sps:$4 sm:$0xff]   ;;  %v5985_v40 = vld [vmem:[%s7745_s1 + $0xec0] ss:$8 sps:$4 sm:$0xff]  }
 0x1ca   : > { %4161 = vmatprep.mubr.bf16.mxu1 %v3357_v41  ;;  %v5988_v41 = vld [vmem:[%s7745_s1 + $0xfc0] ss:$8 sps:$4 sm:$0xff]  }
 0x1cb   : > { %4091 = vmatpush1.bf16.msra.mxu0 %v5919_v42  ;;  %v5993_v42 = vld [vmem:[%s7745_s1 + $0xed4] ss:$8 sps:$4 sm:$0xff]  }
 0x1cc   : > { %4132 = vmatpush1.bf16.msra.mxu1 %v5922_v43  ;;  %4092 = vmatprep.subr.bf16.mxu0 %v5927_v47  ;;  %v5996_v43 = vld [vmem:[%s7745_s1 + $0xfd4] ss:$8 sps:$4 sm:$0xff]   ;;  %v5080_v47 = vcombine.low %v7269_v22, %v7489_v0  ;;  %v6002_v22 = vld [vmem:[%s7745_s1 + $0xfe4] ss:$8 sps:$4 sm:$0xff]  }
 0x1cd   : > { %4133 = vmatprep.subr.bf16.mxu1 %v5930_v49  ;;  %v5082_v49 = vcombine.low %v7274_v26, %v7492_v1  ;;  %v5997_v1 = vld [vmem:[%s7745_s1 + $0xee0] ss:$8 sps:$4 sm:$0xff]  }
 0x1ce   : > { %v3333_v26 = vshll.u32 %v5080_v47, 16 }
 0x1cf   : > { %4093 = vmatpush1.bf16.msra.mxu0 %v5925_v50  ;;  %v5991_v50 = vld [vmem:[%s7745_s1 + $0xed0] ss:$8 sps:$4 sm:$0xff]   ;;  %v3347_v0 = vshll.u32 %v5082_v49, 16 }
 0x1d0   : > { %4134 = vmatpush1.bf16.msra.mxu1 %v5928_v51  ;;  %4094 = vmatprep.subr.bf16.mxu0 %v5933_v14  ;;  %v5994_v51 = vld [vmem:[%s7745_s1 + $0xfd0] ss:$8 sps:$4 sm:$0xff]   ;;  %v5999_v14 = vld [vmem:[%s7745_s1 + $0xee4] ss:$8 sps:$4 sm:$0xff]  }
 0x1d1   : > { %4135 = vmatprep.subr.bf16.mxu1 %v5936_v15  ;;  %v6000_v15 = vld [vmem:[%s7745_s1 + $0xfe0] ss:$8 sps:$4 sm:$0xff]  }
 0x1d3   : > { %4095 = vmatpush1.bf16.msra.mxu0 %v5931_v52  ;;  %v6005_v52 = vld [vmem:[%s7745_s1 + $0xef4] ss:$8 sps:$4 sm:$0xff]  }
 0x1d4   : > { %4136 = vmatpush1.bf16.msra.mxu1 %v5934_v53  ;;  %4096 = vmatprep.subr.bf16.mxu0 %v5939_v55  ;;  %v6008_v53 = vld [vmem:[%s7745_s1 + $0xff4] ss:$8 sps:$4 sm:$0xff]   ;;  %v3331_v55 = vshrl.u32 %v5080_v47, 16 }
 0x1d5   : > { %4137 = vmatprep.subr.bf16.mxu1 %v5942_v6  ;;  %v3335_v6 = vrot.slane %v3333_v26, 1 }
 0x1d7   : > { %4097 = vmatpush1.bf16.msra.mxu0 %v5937_v9  ;;  %v3345_v9 = vshrl.u32 %v5082_v49, 16  ;;  %v6021_v49 = vmov 1966171168  }
 0x1d8   : > { %4138 = vmatpush1.bf16.msra.mxu1 %v5940_v56  ;;  %4098 = vmatprep.subr.bf16.mxu0 %v5945_v24  ;;  %v3349_v56 = vrot.slane %v3347_v0, 1  ;;  %v6003_v24 = vld [vmem:[%s7745_s1 + $0xef0] ss:$8 sps:$4 sm:$0xff]  }
 0x1d9   : > { %4139 = vmatprep.subr.bf16.mxu1 %v5948_v25  ;;  %v2052_v62 = vpop.f32.mrb[12].mxu0  ;;  %v6006_v25 = vld [vmem:[%s7745_s1 + $0xff0] ss:$8 sps:$4 sm:$0xff]  }
 0x1da   : > { %v2093_v63 = vpop.f32.mrb[12].mxu1  ;;  %v2053_v2 = vadd.f32 %v2052_v62, %v7396_v19  ;;  %v2054_v3 = vpop.f32.mrb[13].mxu0  ;;  %v5957_v19 = vld [vmem:[%s7745_s1 + $0xe74] ss:$8 sps:$4 sm:$0xff]  }
 0x1db   : > { %v2095_v46 = vpop.f32.mrb[13].mxu1  ;;  %v2055_v48 = vadd.f32 %v2054_v3, %v7398_v45  ;;  %v2056_v28 = vpop.f32.mrb[14].mxu0  ;;  %4099 = vmatpush1.bf16.msra.mxu0 %v5943_v58  ;;  %v5960_v45 = vld [vmem:[%s7745_s1 + $0xf74] ss:$8 sps:$4 sm:$0xff]   ;;  %v3336_v58 = vor.u32 %v3335_v6, %v3331_v55 }
 0x1dc   : > { %v2097_v18 = vpop.f32.mrb[14].mxu1  ;;  %4140 = vmatpush1.bf16.msra.mxu1 %v5946_v59  ;;  %v2094_v7 = vadd.f32 %v2093_v63, %v2053_v2  ;;  %v2057_v8 = vpop.f32.mrb[15].mxu0  ;;  %4100 = vmatprep.subr.bf16.mxu0 %v5951_v60  ;;  %v3350_v59 = vor.u32 %v3349_v56, %v3345_v9 }
 0x1dd   : > { %v2098_v10 = vpop.f32.mrb[15].mxu1  ;;  %4141 = vmatprep.subr.bf16.mxu1 %v5954_v61  ;;  %v2096_v11 = vadd.f32 %v2095_v46, %v2055_v48 }
 0x1de   : > { %v7621_v12 = vadd.f32 %v2094_v7, %v7186_v54  ;;  %v5963_v54 = vld [vmem:[%s7745_s1 + $0xe84] ss:$8 sps:$4 sm:$0xff]  }
 0x1df   : > { %v7624_v13 = vadd.f32 %v2096_v11, %v7194_v57  ;;  %4101 = vmatpush1.bf16.msra.mxu0 %v5949_v4  ;;  %v5966_v57 = vld [vmem:[%s7745_s1 + $0xf84] ss:$8 sps:$4 sm:$0xff]  }
 0x1e0   : > { %4142 = vmatpush1.bf16.msra.mxu1 %v5952_v5  ;;  %4102 = vmatprep.subr.bf16.mxu0 %v5957_v19 }
 0x1e1   : > { %4143 = vmatprep.subr.bf16.mxu1 %v5960_v45 }
 0x1e3   : > { %4103 = vmatpush1.bf16.msra.mxu0 %v5955_v16 }
 0x1e4   : > { %4144 = vmatpush1.bf16.msra.mxu1 %v5958_v17  ;;  %4104 = vmatprep.subr.bf16.mxu0 %v5963_v54 }
 0x1e5   : > { %4145 = vmatprep.subr.bf16.mxu1 %v5966_v57 }
 0x1e7   : > { %4105 = vmatpush1.bf16.msra.mxu0 %v5961_v20 }
 0x1e8   : > { %4146 = vmatpush1.bf16.msra.mxu1 %v5964_v21  ;;  %4106 = vmatprep.subr.bf16.mxu0 %v5969_v23 }
 0x1e9   : > { %4147 = vmatprep.subr.bf16.mxu1 %v5972_v27 }
 0x1eb   : > { %4107 = vmatpush1.bf16.msra.mxu0 %v5967_v29 }
 0x1ec   : > { %4148 = vmatpush1.bf16.msra.mxu1 %v5970_v44  ;;  %4108 = vmatprep.subr.bf16.mxu0 %v5975_v30 }
 0x1ed   : > { %4149 = vmatprep.subr.bf16.mxu1 %v5978_v31 }
 0x1ef   : > { %4109 = vmatpush1.bf16.msra.mxu0 %v5973_v32 }
 0x1f0   : > { %4150 = vmatpush1.bf16.msra.mxu1 %v5976_v33  ;;  %4110 = vmatprep.subr.bf16.mxu0 %v5981_v34 }
 0x1f1   : > { %4151 = vmatprep.subr.bf16.mxu1 %v5984_v35 }
 0x1f3   : > { %4111 = vmatpush1.bf16.msra.mxu0 %v5979_v36  ;;  %v4180_v36 = vlaneseq }
 0x1f4   : > { %4152 = vmatpush1.bf16.msra.mxu1 %v5982_v37  ;;  %4112 = vmatprep.subr.bf16.mxu0 %v5987_v38 }
 0x1f5   : > { %4153 = vmatprep.subr.bf16.mxu1 %v5990_v39  ;;  %v4181_v37 = vshrl.u32 %v4180_v36, 7 }
 0x1f7   : > { %4113 = vmatpush1.bf16.msra.mxu0 %v5985_v40  ;;  %v4182_v38 = vsub.s32 0, %v4181_v37 }
 0x1f8   : > { %4154 = vmatpush1.bf16.msra.mxu1 %v5988_v41  ;;  %4114 = vmatprep.subr.bf16.mxu0 %v5993_v42 }
 0x1f9   : > { %4155 = vmatprep.subr.bf16.mxu1 %v5996_v43 }
 0x1fb   : > { %4115 = vmatpush1.bf16.msra.mxu0 %v5991_v50  ;;  %v4200_v50 = vunpack.c.l.s4 %v6021_v49 }
 0x1fc   : > { %4156 = vmatpush1.bf16.msra.mxu1 %v5994_v51  ;;  %4116 = vmatprep.subr.bf16.mxu0 %v5999_v14 }
 0x1fd   : > { %4157 = vmatprep.subr.bf16.mxu1 %v6002_v22  ;;  %v4201_v6 = vunpack.c.0.s8 %v4200_v50 }
 0x1ff   : > { %4117 = vmatpush1.bf16.msra.mxu0 %v5997_v1 }
 0x200   : > { %4158 = vmatpush1.bf16.msra.mxu1 %v6000_v15  ;;  %4118 = vmatprep.subr.bf16.mxu0 %v6005_v52 }
 0x201   : > { %4159 = vmatprep.subr.bf16.mxu1 %v6008_v53 }
 0x203   : > { %4119 = vmatpush1.bf16.msra.mxu0 %v6003_v24 }
 0x204   : > { %4160 = vmatpush1.bf16.msra.mxu1 %v6006_v25 }
 0x206   : > { %4121 = vmatmul.mubr.bf16.vlgmr.msra.gmra.mrb[28].mxu0 %v3336_v58  ;;  %v4204_v58 = vsub.s32 %v4201_v6, %v4181_v37 }
 0x207   : > { %4162 = vmatmul.mubr.bf16.vlgmr.msra.gmra.mrb[28].mxu1 %v3350_v59 }
 0x219   : > { %v3017_v60 = vpop.f32.mrb[16].mxu0 }
 0x21a   : > { %v3058_v61 = vpop.f32.mrb[16].mxu1  ;;  %v3019_v63 = vpop.f32.mrb[17].mxu0 }
 0x21b   : > { %v3059_v62 = vadd.f32 %v3058_v61, %v3017_v60  ;;  %v3060_v2 = vpop.f32.mrb[17].mxu1  ;;  %v3021_v46 = vpop.f32.mrb[18].mxu0  ;;  %v4221_v61 = vld [vmem:[%s168_s29] sm:$0x3] }
 0x21c   : > { %v3061_v3 = vadd.f32 %v3060_v2, %v3019_v63  ;;  %v3062_v48 = vpop.f32.mrb[18].mxu1  ;;  %v3022_v28 = vpop.f32.mrb[19].mxu0 }
 0x21d   : > { %v3063_v18 = vpop.f32.mrb[19].mxu1 }
 0x259   : > { %v3099_v4 = vpop.f32.mrb[20].mxu0 }
 0x25a   : > { %v3140_v5 = vpop.f32.mrb[20].mxu1  ;;  %v3100_v7 = vadd.f32 %v3099_v4, %v3059_v62  ;;  %v3101_v8 = vpop.f32.mrb[21].mxu0 }
 0x25b   : > { %v3142_v10 = vpop.f32.mrb[21].mxu1  ;;  %v3102_v19 = vadd.f32 %v3101_v8, %v3061_v3  ;;  %v3103_v45 = vpop.f32.mrb[22].mxu0 }
 0x25c   : > { %v3144_v11 = vpop.f32.mrb[22].mxu1  ;;  %v3141_v16 = vadd.f32 %v3140_v5, %v3100_v7  ;;  %v3104_v17 = vpop.f32.mrb[23].mxu0 }
 0x25d   : > { %v3145_v54 = vpop.f32.mrb[23].mxu1  ;;  %v3143_v57 = vadd.f32 %v3142_v10, %v3102_v19 }
 0x25e   : > { %v3149_v20 = vadd.f32 %v3141_v16, %v7621_v12  ;;  %v4178_v12 = vld [vmem:[%s7746_s2] sm:$0x3] }
 0x25f   : > { %v3150_v21 = vadd.f32 %v3143_v57, %v7624_v13  ;;  %v4186_v13 = vsub.s32 1, %v4181_v37  ;;  %v4183_v26 = vrot.slane %v4178_v12, %v4182_v38 }
 0x261   : > { %v4187_v52 = vrot.slane %v4178_v12, %v4186_v13 }
 0x299   : > { %v4040_v23 = vpop.f32.mrb[24].mxu0 }
 0x29a   : > { %v4081_v27 = vpop.f32.mrb[24].mxu1  ;;  %v4042_v44 = vpop.f32.mrb[25].mxu0 }
 0x29b   : > { %v4082_v29 = vadd.f32 %v4081_v27, %v4040_v23  ;;  %v4083_v30 = vpop.f32.mrb[25].mxu1  ;;  %v4044_v32 = vpop.f32.mrb[26].mxu0 }
 0x29c   : > { %v4084_v31 = vadd.f32 %v4083_v30, %v4042_v44  ;;  %v4085_v33 = vpop.f32.mrb[26].mxu1  ;;  %v4045_v34 = vpop.f32.mrb[27].mxu0 }
 0x29d   : > { %v4086_v35 = vpop.f32.mrb[27].mxu1 }
 0x2d9   : > { %v4122_v39 = vpop.f32.mrb[28].mxu0 }
 0x2da   : > { %v4163_v40 = vpop.f32.mrb[28].mxu1  ;;  %v4123_v41 = vadd.f32 %v4122_v39, %v4082_v29  ;;  %v4124_v42 = vpop.f32.mrb[29].mxu0 }
 0x2db   : > { %v4165_v43 = vpop.f32.mrb[29].mxu1  ;;  %v4125_v47 = vadd.f32 %v4124_v42, %v4084_v31  ;;  %v4126_v51 = vpop.f32.mrb[30].mxu0 }
 0x2dc   : > { %v4167_v14 = vpop.f32.mrb[30].mxu1  ;;  %v4164_v22 = vadd.f32 %v4163_v40, %v4123_v41  ;;  %v4127_v0 = vpop.f32.mrb[31].mxu0 }
 0x2dd   : > { %v4168_v1 = vpop.f32.mrb[31].mxu1  ;;  %v4166_v15 = vadd.f32 %v4165_v43, %v4125_v47 }
 0x2de   : > { %v4172_v53 = vadd.f32 %v4164_v22, %v3149_v20 }
 0x2df   : > { %v4173_v55 = vadd.f32 %v4166_v15, %v3150_v21 }
 0x2e0   : > { %v4190_v9 = vadd.f32 %v4183_v26, %v4172_v53 }
 0x2e1   : > { %v4191_v56 = vadd.f32 %v4187_v52, %v4173_v55 }
 0x2e2   : > { %v4192_v24 = vmax.f32 %v4190_v9, 0.0 }
 0x2e3   : > { %v4193_v25 = vmax.f32 %v4191_v56, 0.0 }
 0x2e5   : > { %v5212_v59 = vpack.c.bf16 %v4193_v25, %v4192_v24 }
 0x2e7   : > { %v4205_v60 = vrot.slane %v5212_v59, %v4204_v58 }
 0x2e9   : > { %v4212_v62 = vrot.slane %v4205_v60, %v4204_v58 }
 0x2eb   : > { %v4222_v63 = vsel %vm4220_vm6, %v4212_v62, %v4221_v61 }
 0x2ec   : > { %4223 = vst [vmem:[%s168_s29] sm:$0x3] %v4222_v63 }
 0x2ed PF: > { %s13_s12 = sadd.s32 1, %s6019_s12  }
 0x2ee   : > { %p10_p4 = scmp.ge.s32.totalorder %s13_s12, 4  }
 0x2f0   :  { %12 = sbr.rel (!%p10_p4) target bundleno = 1 (0x1), region = 65 }

</bundles_post_ra>
